<compile_context>
chip_gen: v6e
topology: v6e:2x2x1
jax: 0.10.0
libtpu: 0.0.40
codegen_flags: <defaults>
</compile_context>

<pallas_src>
import functools

import numpy as np
import jax
import jax.numpy as jnp
from jax.experimental import pallas as pl
from jax.experimental.pallas import tpu as pltpu

_VMEM_LIMIT = 32 * 1024 * 1024  # safe scoped limit on v5e/v6e (128 MiB) and v7x (64 MiB)


def _num_tensorcores() -> int:
    """2 on megacore-style chips (v7x / v5p / v4); 1 on v5e / v6e."""
    try:
        kind = jax.devices()[0].device_kind.lower()
    except Exception:
        return 1
    return 2 if ("v7" in kind or "v5p" in kind or "v4" in kind) else 1


def _round_up(v, m):
    return (v + m - 1) // m * m


# ----------------------------------------------------------------------------
# Pallas kernel: out = relu?(A @ W + bias)   (A, W bf16; accumulate f32)
# ----------------------------------------------------------------------------
def _matmul_bias_kernel(a_ref, w_ref, b_ref, o_ref, *, relu):
    acc = jnp.dot(a_ref[...], w_ref[...], preferred_element_type=jnp.float32)
    acc = acc + b_ref[...]            # bias (1, N) f32, broadcasts over rows
    if relu:
        acc = jnp.maximum(acc, 0.0)
    o_ref[...] = acc.astype(o_ref.dtype)


def matmul_bias_act(a, w, b2d, *, relu, out_dtype):
    """a: (M, K) bf16, w: (K, N) bf16, b2d: (1, N) f32 -> (M, N) out_dtype."""
    M, K = a.shape
    N = w.shape[1]

    # Split the big conv1 matmul across the grid only when there are 2 TCs to
    # shard it onto (v7x); on single-core chips a split is pure per-step
    # pipeline overhead plus duplicated grid-invariant weight buffers.
    grid_m = 2 if (_num_tensorcores() >= 2 and M >= 512 and (M // 2) % 16 == 0) else 1
    tile_m = M // grid_m

    in_isz = np.dtype(a.dtype).itemsize
    out_isz = np.dtype(out_dtype).itemsize
    cost = pl.CostEstimate(
        flops=2 * M * K * N,
        transcendentals=0,
        bytes_accessed=M * K * in_isz + K * N * in_isz + M * N * out_isz + N * 4,
    )

    return pl.pallas_call(
        functools.partial(_matmul_bias_kernel, relu=relu),
        out_shape=jax.ShapeDtypeStruct((M, N), out_dtype),
        grid=(grid_m,),
        in_specs=[
            pl.BlockSpec((tile_m, K), lambda i: (i, 0)),   # activation row-tile
            pl.BlockSpec((K, N), lambda i: (0, 0)),        # full weight (grid-invariant)
            pl.BlockSpec((1, N), lambda i: (0, 0)),        # bias
        ],
        out_specs=pl.BlockSpec((tile_m, N), lambda i: (i, 0)),
        compiler_params=pltpu.CompilerParams(
            dimension_semantics=("parallel",),
            vmem_limit_bytes=_VMEM_LIMIT),
        cost_estimate=cost,
    )(a, w, b2d)


# ----------------------------------------------------------------------------
# Pallas kernel: fused head  q = relu(x @ W1 + b1) @ W2 + b2
# ----------------------------------------------------------------------------
def _fc_head_kernel(x_ref, w1_ref, b1_ref, w2_ref, b2_ref, o_ref):
    h = jnp.dot(x_ref[...], w1_ref[...], preferred_element_type=jnp.float32)
    h = jnp.maximum(h + b1_ref[...], 0.0).astype(jnp.bfloat16)
    q = jnp.dot(h, w2_ref[...], preferred_element_type=jnp.float32)
    o_ref[...] = (q + b2_ref[...]).astype(o_ref.dtype)


def fc_head(x, w1, b1, w2p, b2p):
    """x: (M, K) bf16, w1: (K, H) bf16, w2p: (H, Np) bf16 -> (M, Np) f32."""
    M, K = x.shape
    H = w1.shape[1]
    Np = w2p.shape[1]
    cost = pl.CostEstimate(
        flops=2 * M * K * H + 2 * M * H * Np,
        transcendentals=0,
        bytes_accessed=(M * K + K * H + H * Np) * 2 + M * Np * 4 + (H + Np) * 4,
    )
    return pl.pallas_call(
        _fc_head_kernel,
        out_shape=jax.ShapeDtypeStruct((M, Np), jnp.float32),
        grid=(1,),
        in_specs=[
            pl.BlockSpec((M, K), lambda i: (0, 0)),
            pl.BlockSpec((K, H), lambda i: (0, 0)),
            pl.BlockSpec((1, H), lambda i: (0, 0)),
            pl.BlockSpec((H, Np), lambda i: (0, 0)),
            pl.BlockSpec((1, Np), lambda i: (0, 0)),
        ],
        out_specs=pl.BlockSpec((M, Np), lambda i: (0, 0)),
        compiler_params=pltpu.CompilerParams(
            dimension_semantics=("arbitrary",),
            vmem_limit_bytes=_VMEM_LIMIT),
        cost_estimate=cost,
    )(x, w1, b1, w2p, b2p)


# ----------------------------------------------------------------------------
# Conv2d (NHWC, valid padding) = lean XLA im2col + Pallas matmul kernel
# ----------------------------------------------------------------------------
def _im2col_nhwc(x, kh, kw, stride, k_pad=0):
    """x: (N, H, W, C) -> patches (N*OH*OW, kh*kw*C [+k_pad]), order (i, j, ci)."""
    n, h, w, c = x.shape
    oh = (h - kh) // stride + 1
    ow = (w - kw) // stride + 1
    cols = []
    for i in range(kh):
        for j in range(kw):
            cols.append(x[:, i:i + stride * (oh - 1) + 1:stride,
                          j:j + stride * (ow - 1) + 1:stride, :])
    patches = jnp.stack(cols, axis=3)                  # (N, OH, OW, kh*kw, C)
    patches = patches.reshape(n * oh * ow, kh * kw * c)
    if k_pad:
        patches = jnp.pad(patches, ((0, 0), (0, k_pad)))   # lane-align K
    return patches, oh, ow


def conv2d_relu(x_nhwc, w_mat, bias2d, *, ksize, stride):
    """w_mat: (Kpadded, C_out) bf16 (pre-packed). Returns NHWC bf16."""
    n, _, _, c_in = x_nhwc.shape
    c_out = w_mat.shape[1]
    k_raw = ksize * ksize * c_in
    k_pad = w_mat.shape[0] - k_raw       # weight rows were zero-padded at pack time
    patches, oh, ow = _im2col_nhwc(x_nhwc, ksize, ksize, stride, k_pad=k_pad)
    out = matmul_bias_act(patches, w_mat, bias2d, relu=True, out_dtype=jnp.bfloat16)
    return out.reshape(n, oh, ow, c_out)


# ----------------------------------------------------------------------------
# Parameters: PyTorch-layout init + one-time packing (outside the jitted fwd)
# ----------------------------------------------------------------------------
def init_dqn_params(key, action_dim, frame_stack=4):
    ks = jax.random.split(key, 10)
    c_in = frame_stack * 3

    def u(k, shape, fan_in):
        bound = 1.0 / jnp.sqrt(fan_in)
        return jax.random.uniform(k, shape, jnp.float32, -bound, bound)

    return {
        "conv1_w": u(ks[0], (32, c_in, 8, 8), c_in * 8 * 8),
        "conv1_b": u(ks[1], (32,), c_in * 8 * 8),
        "conv2_w": u(ks[2], (64, 32, 4, 4), 32 * 4 * 4),
        "conv2_b": u(ks[3], (64,), 32 * 4 * 4),
        "conv3_w": u(ks[4], (64, 64, 3, 3), 64 * 3 * 3),
        "conv3_b": u(ks[5], (64,), 64 * 3 * 3),
        "fc1_w": u(ks[6], (512, 64 * 7 * 7), 64 * 7 * 7),   # PyTorch (out, in)
        "fc1_b": u(ks[7], (512,), 64 * 7 * 7),
        "fc2_w": u(ks[8], (action_dim, 512), 512),
        "fc2_b": u(ks[9], (action_dim,), 512),
    }


def pack_params(p, action_dim, n_pad=128):
    """One-time repack of PyTorch-layout weights into kernel-ready matrices."""
    def conv_mat(w, k_target=None):   # (co,ci,kh,kw) -> (kh*kw*ci [pad], co)
        co, ci, kh, kw = w.shape
        m = w.transpose(2, 3, 1, 0).reshape(kh * kw * ci, co)
        if k_target is not None and k_target > m.shape[0]:
            m = jnp.pad(m, ((0, k_target - m.shape[0]), (0, 0)))
        return m.astype(jnp.bfloat16)

    # conv3 K: 576 -> 640 (5*128) so the activation operand is lane-dense.
    conv3 = conv_mat(p["conv3_w"], k_target=_round_up(3 * 3 * 64, 128))

    # fc1 columns permuted to consume the NHWC (h, w, c) flatten directly;
    # rows padded 3136 -> 3200 (25*128).
    fc1 = (p["fc1_w"].reshape(512, 64, 7, 7)
           .transpose(2, 3, 1, 0).reshape(64 * 7 * 7, 512))
    fc1 = jnp.pad(fc1, ((0, _round_up(64 * 7 * 7, 128) - 64 * 7 * 7), (0, 0)))
    fc1 = fc1.astype(jnp.bfloat16)

    # fc2 as (512, 128): lane-dense padded output; padded q columns stay 0.
    w2 = jnp.zeros((512, n_pad), jnp.bfloat16).at[:, :action_dim].set(
        p["fc2_w"].T.astype(jnp.bfloat16))
    b2 = jnp.zeros((1, n_pad), jnp.float32).at[0, :action_dim].set(p["fc2_b"])

    return {
        "conv1_w": conv_mat(p["conv1_w"]), "conv1_b": p["conv1_b"].reshape(1, -1),
        "conv2_w": conv_mat(p["conv2_w"]), "conv2_b": p["conv2_b"].reshape(1, -1),
        "conv3_w": conv3, "conv3_b": p["conv3_b"].reshape(1, -1),
        "fc1_w": fc1, "fc1_b": p["fc1_b"].reshape(1, -1),
        "fc2_w": w2, "fc2_b": b2,
    }


# ----------------------------------------------------------------------------
# DQN forward (NHWC end-to-end; PyTorch's permute folded into weight packing)
# ----------------------------------------------------------------------------
@functools.partial(jax.jit, static_argnames=("action_dim",))
def dqn_forward(params, x_nhwc, *, action_dim):
    # The f32->bf16 cast is fused by XLA into the conv1 im2col fusion, so the
    # patch matrices (the largest glue buffers) are materialized in bf16.
    x = x_nhwc.astype(jnp.bfloat16)                                              # (N,84,84,C)
    x = conv2d_relu(x, params["conv1_w"], params["conv1_b"], ksize=8, stride=4)  # (N,20,20,32)
    x = conv2d_relu(x, params["conv2_w"], params["conv2_b"], ksize=4, stride=2)  # (N, 9, 9,64)
    x = conv2d_relu(x, params["conv3_w"], params["conv3_b"], ksize=3, stride=1)  # (N, 7, 7,64)

    n = x.shape[0]
    x = x.reshape(n, -1)                       # NHWC flatten (h,w,c): free metadata reshape
    k_fc = params["fc1_w"].shape[0]
    if x.shape[1] < k_fc:                      # zero-pad 3136 -> 3200 lanes
        x = jnp.pad(x, ((0, 0), (0, k_fc - x.shape[1])))

    q = fc_head(x, params["fc1_w"], params["fc1_b"],
                params["fc2_w"], params["fc2_b"])                                # (N, 128) f32
    return q[:, :action_dim]


if __name__ == "__main__":
    # FC layer hard-codes 64*7*7, forcing 84x84 inputs; batch/action_dim small.
    batch = 2
    frame_stack = 4
    action_dim = 5

    key = jax.random.PRNGKey(0)
    k_params, k_x = jax.random.split(key)
    torch_layout_params = init_dqn_params(k_params, action_dim, frame_stack)
    params = pack_params(torch_layout_params, action_dim)   # one-time, outside jit

    # Input exactly as the PyTorch module receives it (before its permute): NHWC.
    x = jax.random.uniform(k_x, (batch, 84, 84, frame_stack * 3), jnp.float32)

    q = dqn_forward(params, x, action_dim=action_dim)
    jax.block_until_ready(q)
    assert q.shape == (batch, action_dim) and q.dtype == jnp.float32
    assert bool(jnp.isfinite(q).all())
    print("KERNEL_OK")
</pallas_src>

<mosaic_0001>
module attributes {stable_mosaic.version = 11 : i64} {
  func.func @_matmul_bias_kernel(%arg0: i32, %arg1: memref<800x768xbf16, #tpu.memory_space<vmem>>, %arg2: memref<768x32xbf16, #tpu.memory_space<vmem>>, %arg3: memref<1x32xf32, #tpu.memory_space<vmem>>, %arg4: memref<800x32xbf16, #tpu.memory_space<vmem>>) attributes {dimension_semantics = [#tpu.dimension_semantics<parallel>], iteration_bounds = array<i64: 1>, scalar_prefetch = 0 : i64, scratch_operands = 0 : i64, tpu.core_type = #tpu.core_type<tc>, window_params = [{transform_indices = @transform_0, window_bounds = array<i64: 800, 768>}, {pipeline_mode = #tpu.pipeline_mode<synchronous>, transform_indices = @transform_1, window_bounds = array<i64: 768, 32>}, {pipeline_mode = #tpu.pipeline_mode<synchronous>, transform_indices = @transform_2, window_bounds = array<i64: 1, 32>}, {transform_indices = @transform_3, window_bounds = array<i64: 800, 32>}]} {
    %c0 = arith.constant 0 : index
    %c0_0 = arith.constant 0 : index
    %0 = vector.load %arg1[%c0, %c0_0] : memref<800x768xbf16, #tpu.memory_space<vmem>>, vector<800x768xbf16>
    %c0_1 = arith.constant 0 : index
    %c0_2 = arith.constant 0 : index
    %1 = vector.load %arg2[%c0_1, %c0_2] : memref<768x32xbf16, #tpu.memory_space<vmem>>, vector<768x32xbf16>
    %cst = arith.constant dense<0.000000e+00> : vector<800x32xf32>
    %2 = tpu.matmul %0, %1, %cst {dimension_numbers = #tpu.dot_dimension_numbers<[1], [0], [0], [1], [0, 0, 1, 1], [], []>} : vector<800x768xbf16>, vector<768x32xbf16>, vector<800x32xf32> -> vector<800x32xf32>
    %c0_3 = arith.constant 0 : index
    %c0_4 = arith.constant 0 : index
    %3 = vector.load %arg3[%c0_3, %c0_4] : memref<1x32xf32, #tpu.memory_space<vmem>>, vector<1x32xf32>
    %4 = vector.broadcast %3 : vector<1x32xf32> to vector<800x32xf32>
    %5 = arith.addf %2, %4 : vector<800x32xf32>
    %cst_5 = arith.constant 0.000000e+00 : f32
    %6 = vector.broadcast %cst_5 : f32 to vector<800x32xf32>
    %7 = arith.maximumf %5, %6 : vector<800x32xf32>
    %8 = arith.truncf %7 : vector<800x32xf32> to vector<800x32xbf16>
    %c0_6 = arith.constant 0 : index
    %c0_7 = arith.constant 0 : index
    %9 = vector.load %arg4[%c0_6, %c0_7] : memref<800x32xbf16, #tpu.memory_space<vmem>>, vector<800x32xbf16>
    tpu.vector_store %arg4[%c0_6, %c0_7], %8 {strides = array<i32>} : memref<800x32xbf16, #tpu.memory_space<vmem>>, vector<800x32xbf16>,
    return
  }
  func.func @transform_0(%arg0: i32) -> (i32, i32) {
    %c0_i32 = arith.constant 0 : i32
    %c0_i32_0 = arith.constant 0 : i32
    return %arg0, %c0_i32 : i32, i32
  }
  func.func @transform_1(%arg0: i32) -> (i32, i32) {
    %c0_i32 = arith.constant 0 : i32
    %c0_i32_0 = arith.constant 0 : i32
    %c0_i32_1 = arith.constant 0 : i32
    return %c0_i32, %c0_i32_0 : i32, i32
  }
  func.func @transform_2(%arg0: i32) -> (i32, i32) {
    %c0_i32 = arith.constant 0 : i32
    %c0_i32_0 = arith.constant 0 : i32
    %c0_i32_1 = arith.constant 0 : i32
    return %c0_i32, %c0_i32_0 : i32, i32
  }
  func.func @transform_3(%arg0: i32) -> (i32, i32) {
    %c0_i32 = arith.constant 0 : i32
    %c0_i32_0 = arith.constant 0 : i32
    return %arg0, %c0_i32 : i32, i32
  }
}

module attributes {stable_mosaic.version = 11 : i64} {
  func.func @_matmul_bias_kernel(%arg0: i32, %arg1: memref<162x512xbf16, #tpu.memory_space<vmem>>, %arg2: memref<512x64xbf16, #tpu.memory_space<vmem>>, %arg3: memref<1x64xf32, #tpu.memory_space<vmem>>, %arg4: memref<162x64xbf16, #tpu.memory_space<vmem>>) attributes {dimension_semantics = [#tpu.dimension_semantics<parallel>], iteration_bounds = array<i64: 1>, scalar_prefetch = 0 : i64, scratch_operands = 0 : i64, tpu.core_type = #tpu.core_type<tc>, window_params = [{transform_indices = @transform_0, window_bounds = array<i64: 162, 512>}, {pipeline_mode = #tpu.pipeline_mode<synchronous>, transform_indices = @transform_1, window_bounds = array<i64: 512, 64>}, {pipeline_mode = #tpu.pipeline_mode<synchronous>, transform_indices = @transform_2, window_bounds = array<i64: 1, 64>}, {transform_indices = @transform_3, window_bounds = array<i64: 162, 64>}]} {
    %c0 = arith.constant 0 : index
    %c0_0 = arith.constant 0 : index
    %0 = vector.load %arg1[%c0, %c0_0] : memref<162x512xbf16, #tpu.memory_space<vmem>>, vector<162x512xbf16>
    %c0_1 = arith.constant 0 : index
    %c0_2 = arith.constant 0 : index
    %1 = vector.load %arg2[%c0_1, %c0_2] : memref<512x64xbf16, #tpu.memory_space<vmem>>, vector<512x64xbf16>
    %cst = arith.constant dense<0.000000e+00> : vector<162x64xf32>
    %2 = tpu.matmul %0, %1, %cst {dimension_numbers = #tpu.dot_dimension_numbers<[1], [0], [0], [1], [0, 0, 1, 1], [], []>} : vector<162x512xbf16>, vector<512x64xbf16>, vector<162x64xf32> -> vector<162x64xf32>
    %c0_3 = arith.constant 0 : index
    %c0_4 = arith.constant 0 : index
    %3 = vector.load %arg3[%c0_3, %c0_4] : memref<1x64xf32, #tpu.memory_space<vmem>>, vector<1x64xf32>
    %4 = vector.broadcast %3 : vector<1x64xf32> to vector<162x64xf32>
    %5 = arith.addf %2, %4 : vector<162x64xf32>
    %cst_5 = arith.constant 0.000000e+00 : f32
    %6 = vector.broadcast %cst_5 : f32 to vector<162x64xf32>
    %7 = arith.maximumf %5, %6 : vector<162x64xf32>
    %8 = arith.truncf %7 : vector<162x64xf32> to vector<162x64xbf16>
    %c0_6 = arith.constant 0 : index
    %c0_7 = arith.constant 0 : index
    %9 = vector.load %arg4[%c0_6, %c0_7] : memref<162x64xbf16, #tpu.memory_space<vmem>>, vector<162x64xbf16>
    tpu.vector_store %arg4[%c0_6, %c0_7], %8 {strides = array<i32>} : memref<162x64xbf16, #tpu.memory_space<vmem>>, vector<162x64xbf16>,
    return
  }
  func.func @transform_0(%arg0: i32) -> (i32, i32) {
    %c0_i32 = arith.constant 0 : i32
    %c0_i32_0 = arith.constant 0 : i32
    return %arg0, %c0_i32 : i32, i32
  }
  func.func @transform_1(%arg0: i32) -> (i32, i32) {
    %c0_i32 = arith.constant 0 : i32
    %c0_i32_0 = arith.constant 0 : i32
    %c0_i32_1 = arith.constant 0 : i32
    return %c0_i32, %c0_i32_0 : i32, i32
  }
  func.func @transform_2(%arg0: i32) -> (i32, i32) {
    %c0_i32 = arith.constant 0 : i32
    %c0_i32_0 = arith.constant 0 : i32
    %c0_i32_1 = arith.constant 0 : i32
    return %c0_i32, %c0_i32_0 : i32, i32
  }
  func.func @transform_3(%arg0: i32) -> (i32, i32) {
    %c0_i32 = arith.constant 0 : i32
    %c0_i32_0 = arith.constant 0 : i32
    return %arg0, %c0_i32 : i32, i32
  }
}

module attributes {stable_mosaic.version = 11 : i64} {
  func.func @_matmul_bias_kernel(%arg0: i32, %arg1: memref<98x640xbf16, #tpu.memory_space<vmem>>, %arg2: memref<640x64xbf16, #tpu.memory_space<vmem>>, %arg3: memref<1x64xf32, #tpu.memory_space<vmem>>, %arg4: memref<98x64xbf16, #tpu.memory_space<vmem>>) attributes {dimension_semantics = [#tpu.dimension_semantics<parallel>], iteration_bounds = array<i64: 1>, scalar_prefetch = 0 : i64, scratch_operands = 0 : i64, tpu.core_type = #tpu.core_type<tc>, window_params = [{transform_indices = @transform_0, window_bounds = array<i64: 98, 640>}, {pipeline_mode = #tpu.pipeline_mode<synchronous>, transform_indices = @transform_1, window_bounds = array<i64: 640, 64>}, {pipeline_mode = #tpu.pipeline_mode<synchronous>, transform_indices = @transform_2, window_bounds = array<i64: 1, 64>}, {transform_indices = @transform_3, window_bounds = array<i64: 98, 64>}]} {
    %c0 = arith.constant 0 : index
    %c0_0 = arith.constant 0 : index
    %0 = vector.load %arg1[%c0, %c0_0] : memref<98x640xbf16, #tpu.memory_space<vmem>>, vector<98x640xbf16>
    %c0_1 = arith.constant 0 : index
    %c0_2 = arith.constant 0 : index
    %1 = vector.load %arg2[%c0_1, %c0_2] : memref<640x64xbf16, #tpu.memory_space<vmem>>, vector<640x64xbf16>
    %cst = arith.constant dense<0.000000e+00> : vector<98x64xf32>
    %2 = tpu.matmul %0, %1, %cst {dimension_numbers = #tpu.dot_dimension_numbers<[1], [0], [0], [1], [0, 0, 1, 1], [], []>} : vector<98x640xbf16>, vector<640x64xbf16>, vector<98x64xf32> -> vector<98x64xf32>
    %c0_3 = arith.constant 0 : index
    %c0_4 = arith.constant 0 : index
    %3 = vector.load %arg3[%c0_3, %c0_4] : memref<1x64xf32, #tpu.memory_space<vmem>>, vector<1x64xf32>
    %4 = vector.broadcast %3 : vector<1x64xf32> to vector<98x64xf32>
    %5 = arith.addf %2, %4 : vector<98x64xf32>
    %cst_5 = arith.constant 0.000000e+00 : f32
    %6 = vector.broadcast %cst_5 : f32 to vector<98x64xf32>
    %7 = arith.maximumf %5, %6 : vector<98x64xf32>
    %8 = arith.truncf %7 : vector<98x64xf32> to vector<98x64xbf16>
    %c0_6 = arith.constant 0 : index
    %c0_7 = arith.constant 0 : index
    %9 = vector.load %arg4[%c0_6, %c0_7] : memref<98x64xbf16, #tpu.memory_space<vmem>>, vector<98x64xbf16>
    tpu.vector_store %arg4[%c0_6, %c0_7], %8 {strides = array<i32>} : memref<98x64xbf16, #tpu.memory_space<vmem>>, vector<98x64xbf16>,
    return
  }
  func.func @transform_0(%arg0: i32) -> (i32, i32) {
    %c0_i32 = arith.constant 0 : i32
    %c0_i32_0 = arith.constant 0 : i32
    return %arg0, %c0_i32 : i32, i32
  }
  func.func @transform_1(%arg0: i32) -> (i32, i32) {
    %c0_i32 = arith.constant 0 : i32
    %c0_i32_0 = arith.constant 0 : i32
    %c0_i32_1 = arith.constant 0 : i32
    return %c0_i32, %c0_i32_0 : i32, i32
  }
  func.func @transform_2(%arg0: i32) -> (i32, i32) {
    %c0_i32 = arith.constant 0 : i32
    %c0_i32_0 = arith.constant 0 : i32
    %c0_i32_1 = arith.constant 0 : i32
    return %c0_i32, %c0_i32_0 : i32, i32
  }
  func.func @transform_3(%arg0: i32) -> (i32, i32) {
    %c0_i32 = arith.constant 0 : i32
    %c0_i32_0 = arith.constant 0 : i32
    return %arg0, %c0_i32 : i32, i32
  }
}

module attributes {stable_mosaic.version = 11 : i64} {
  func.func @_fc_head_kernel(%arg0: i32, %arg1: memref<2x3200xbf16, #tpu.memory_space<vmem>>, %arg2: memref<3200x512xbf16, #tpu.memory_space<vmem>>, %arg3: memref<1x512xf32, #tpu.memory_space<vmem>>, %arg4: memref<512x128xbf16, #tpu.memory_space<vmem>>, %arg5: memref<1x128xf32, #tpu.memory_space<vmem>>, %arg6: memref<2x128xf32, #tpu.memory_space<vmem>>) attributes {dimension_semantics = [#tpu.dimension_semantics<arbitrary>], iteration_bounds = array<i64: 1>, scalar_prefetch = 0 : i64, scratch_operands = 0 : i64, tpu.core_type = #tpu.core_type<tc>, window_params = [{pipeline_mode = #tpu.pipeline_mode<synchronous>, transform_indices = @transform_0, window_bounds = array<i64: 2, 3200>}, {pipeline_mode = #tpu.pipeline_mode<synchronous>, transform_indices = @transform_1, window_bounds = array<i64: 3200, 512>}, {pipeline_mode = #tpu.pipeline_mode<synchronous>, transform_indices = @transform_2, window_bounds = array<i64: 1, 512>}, {pipeline_mode = #tpu.pipeline_mode<synchronous>, transform_indices = @transform_3, window_bounds = array<i64: 512, 128>}, {pipeline_mode = #tpu.pipeline_mode<synchronous>, transform_indices = @transform_4, window_bounds = array<i64: 1, 128>}, {pipeline_mode = #tpu.pipeline_mode<synchronous>, transform_indices = @transform_5, window_bounds = array<i64: 2, 128>}]} {
    %c0 = arith.constant 0 : index
    %c0_0 = arith.constant 0 : index
    %0 = vector.load %arg1[%c0, %c0_0] : memref<2x3200xbf16, #tpu.memory_space<vmem>>, vector<2x3200xbf16>
    %c0_1 = arith.constant 0 : index
    %c0_2 = arith.constant 0 : index
    %1 = vector.load %arg2[%c0_1, %c0_2] : memref<3200x512xbf16, #tpu.memory_space<vmem>>, vector<3200x512xbf16>
    %cst = arith.constant dense<0.000000e+00> : vector<2x512xf32>
    %2 = tpu.matmul %0, %1, %cst {dimension_numbers = #tpu.dot_dimension_numbers<[1], [0], [0], [1], [0, 0, 1, 1], [], []>} : vector<2x3200xbf16>, vector<3200x512xbf16>, vector<2x512xf32> -> vector<2x512xf32>
    %c0_3 = arith.constant 0 : index
    %c0_4 = arith.constant 0 : index
    %3 = vector.load %arg3[%c0_3, %c0_4] : memref<1x512xf32, #tpu.memory_space<vmem>>, vector<1x512xf32>
    %4 = vector.broadcast %3 : vector<1x512xf32> to vector<2x512xf32>
    %5 = arith.addf %2, %4 : vector<2x512xf32>
    %cst_5 = arith.constant 0.000000e+00 : f32
    %6 = vector.broadcast %cst_5 : f32 to vector<2x512xf32>
    %7 = arith.maximumf %5, %6 : vector<2x512xf32>
    %8 = arith.truncf %7 : vector<2x512xf32> to vector<2x512xbf16>
    %c0_6 = arith.constant 0 : index
    %c0_7 = arith.constant 0 : index
    %9 = vector.load %arg4[%c0_6, %c0_7] : memref<512x128xbf16, #tpu.memory_space<vmem>>, vector<512x128xbf16>
    %cst_8 = arith.constant dense<0.000000e+00> : vector<2x128xf32>
    %10 = tpu.matmul %8, %9, %cst_8 {dimension_numbers = #tpu.dot_dimension_numbers<[1], [0], [0], [1], [0, 0, 1, 1], [], []>} : vector<2x512xbf16>, vector<512x128xbf16>, vector<2x128xf32> -> vector<2x128xf32>
    %c0_9 = arith.constant 0 : index
    %c0_10 = arith.constant 0 : index
    %11 = vector.load %arg5[%c0_9, %c0_10] : memref<1x128xf32, #tpu.memory_space<vmem>>, vector<1x128xf32>
    %12 = vector.broadcast %11 : vector<1x128xf32> to vector<2x128xf32>
    %13 = arith.addf %10, %12 : vector<2x128xf32>
    %c0_11 = arith.constant 0 : index
    %c0_12 = arith.constant 0 : index
    %14 = vector.load %arg6[%c0_11, %c0_12] : memref<2x128xf32, #tpu.memory_space<vmem>>, vector<2x128xf32>
    tpu.vector_store %arg6[%c0_11, %c0_12], %13 {strides = array<i32>} : memref<2x128xf32, #tpu.memory_space<vmem>>, vector<2x128xf32>,
    return
  }
  func.func @transform_0(%arg0: i32) -> (i32, i32) {
    %c0_i32 = arith.constant 0 : i32
    %c0_i32_0 = arith.constant 0 : i32
    %c0_i32_1 = arith.constant 0 : i32
    return %c0_i32, %c0_i32_0 : i32, i32
  }
  func.func @transform_1(%arg0: i32) -> (i32, i32) {
    %c0_i32 = arith.constant 0 : i32
    %c0_i32_0 = arith.constant 0 : i32
    %c0_i32_1 = arith.constant 0 : i32
    return %c0_i32, %c0_i32_0 : i32, i32
  }
  func.func @transform_2(%arg0: i32) -> (i32, i32) {
    %c0_i32 = arith.constant 0 : i32
    %c0_i32_0 = arith.constant 0 : i32
    %c0_i32_1 = arith.constant 0 : i32
    return %c0_i32, %c0_i32_0 : i32, i32
  }
  func.func @transform_3(%arg0: i32) -> (i32, i32) {
    %c0_i32 = arith.constant 0 : i32
    %c0_i32_0 = arith.constant 0 : i32
    %c0_i32_1 = arith.constant 0 : i32
    return %c0_i32, %c0_i32_0 : i32, i32
  }
  func.func @transform_4(%arg0: i32) -> (i32, i32) {
    %c0_i32 = arith.constant 0 : i32
    %c0_i32_0 = arith.constant 0 : i32
    %c0_i32_1 = arith.constant 0 : i32
    return %c0_i32, %c0_i32_0 : i32, i32
  }
  func.func @transform_5(%arg0: i32) -> (i32, i32) {
    %c0_i32 = arith.constant 0 : i32
    %c0_i32_0 = arith.constant 0 : i32
    %c0_i32_1 = arith.constant 0 : i32
    return %c0_i32, %c0_i32_0 : i32, i32
  }
}

</mosaic_0001>

<bundles_post_ra>
// kernel: dqn_forward.4
= control target key start
LH: loop header
LB: loop body
LE: loop exit
PB: predicated region body
PF: predicated region fallthrough
CT: control target
= control target key end

     0   :  { %v5192_v0 = vmov 0   ;;  %vm4005_vm0 = vcmask 257024   ;;  %s7136_s1 = inlined_call_operand.vmem [shape: bf16[768,32], index: 1, kind: input, shape index: {}]   ;;  %s7137_s0 = inlined_call_operand.vmem [shape: bf16[800,768], index: 0, kind: input, shape index: {}]   ;;  %s7138_s2 = inlined_call_operand.vmem [shape: f32[1,32], index: 2, kind: input, shape index: {}]   ;;  %s7139_s3 = inlined_call_operand.vmem [shape: bf16[800,32], index: 3, kind: output, shape index: {}]  }
   0x1   :  { %2206 = vmatprep.subr.bf16.mxu0 %v5192_v0  ;;  %4659 = vmatprep.subr.bf16.mxu1 %v5192_v0  ;;  %v4692_v1 = vld [vmem:[%s7136_s1 + $0x38] sm:$0xff]   ;;  %v4693_v2 = vld [vmem:[%s7136_s1 + $0x30] sm:$0xff]   ;;  %v4694_v3 = vld [vmem:[%s7136_s1 + $0x28] sm:$0xff]  }
   0x2   :  { %2207 = vmatpush1.bf16.msra.mxu0 %v4692_v1  ;;  %4675 = vmatpush1.bf16.msra.mxu1 %v4692_v1  ;;  %v4695_v4 = vld [vmem:[%s7136_s1 + $0x20] sm:$0xff]   ;;  %v4696_v5 = vld [vmem:[%s7136_s1 + $0x18] sm:$0xff]   ;;  %v4697_v7 = vld [vmem:[%s7136_s1 + $0x10] sm:$0xff]  }
   0x3   :  { %2208 = vmatprep.subr.bf16.mxu0 %v5192_v0  ;;  %4660 = vmatprep.subr.bf16.mxu1 %v5192_v0  ;;  %v4710_v6 = vld [vmem:[%s7137_s0 + $0x4] ss:$24 sps:$4 sm:$0xff]   ;;  %v4713_v8 = vld [vmem:[%s7137_s0 + $0x4b4] ss:$24 sps:$4 sm:$0xff]   ;;  %v4708_v19 = vld [vmem:[%s7137_s0] ss:$24 sps:$4 sm:$0xff]  }
   0x4   :  { %2238 = vmatprep.mubr.bf16.mxu0 %v4710_v6  ;;  %2438 = vmatprep.mubr.bf16.mxu1 %v4713_v8  ;;  %v4698_v9 = vld [vmem:[%s7136_s1 + $0x8] sm:$0xff]   ;;  %v4699_v10 = vld [vmem:[%s7136_s1] sm:$0xff]   ;;  %v4700_v11 = vld [vmem:[%s7136_s1 + $0x78] sm:$0xff]  }
   0x5   :  { %v4701_v12 = vld [vmem:[%s7136_s1 + $0x70] sm:$0xff]   ;;  %v4702_v13 = vld [vmem:[%s7136_s1 + $0x68] sm:$0xff]   ;;  %v4703_v14 = vld [vmem:[%s7136_s1 + $0x60] sm:$0xff]  }
   0x6   :  { %2209 = vmatpush1.bf16.msra.mxu0 %v4693_v2  ;;  %4676 = vmatpush1.bf16.msra.mxu1 %v4693_v2  ;;  %v4704_v15 = vld [vmem:[%s7136_s1 + $0x58] sm:$0xff]   ;;  %v4705_v16 = vld [vmem:[%s7136_s1 + $0x50] sm:$0xff]   ;;  %v4706_v17 = vld [vmem:[%s7136_s1 + $0x48] sm:$0xff]  }
   0x7   :  { %2210 = vmatprep.subr.bf16.mxu0 %v5192_v0  ;;  %4661 = vmatprep.subr.bf16.mxu1 %v5192_v0  ;;  %v4707_v18 = vld [vmem:[%s7136_s1 + $0x40] sm:$0xff]   ;;  %v4711_v20 = vld [vmem:[%s7137_s0 + $0x4b0] ss:$24 sps:$4 sm:$0xff]   ;;  %v4714_v21 = vld [vmem:[%s7136_s1 + $0xb8] sm:$0xff]  }
   0x8   :  { %v4715_v22 = vld [vmem:[%s7136_s1 + $0x138] sm:$0xff]   ;;  %v4716_v23 = vld [vmem:[%s7137_s0 + $0x34] ss:$24 sps:$4 sm:$0xff]   ;;  %v4720_v27 = vld [vmem:[%s7137_s0 + $0x30] ss:$24 sps:$4 sm:$0xff]  }
   0x9   :  { %v4718_v24 = vld [vmem:[%s7137_s0 + $0x4e4] ss:$24 sps:$4 sm:$0xff]   ;;  %v4722_v25 = vld [vmem:[%s7136_s1 + $0xb0] sm:$0xff]   ;;  %v4721_v28 = vld [vmem:[%s7137_s0 + $0x4e0] ss:$24 sps:$4 sm:$0xff]  }
   0xa   :  { %2211 = vmatpush1.bf16.msra.mxu0 %v4694_v3  ;;  %4677 = vmatpush1.bf16.msra.mxu1 %v4694_v3  ;;  %v4729_v26 = vld [vmem:[%s7136_s1 + $0x130] sm:$0xff]   ;;  %v4723_v29 = vld [vmem:[%s7137_s0 + $0x64] ss:$24 sps:$4 sm:$0xff]   ;;  %v4736_v31 = vld [vmem:[%s7136_s1 + $0xa8] sm:$0xff]  }
   0xb   :  { %2212 = vmatprep.subr.bf16.mxu0 %v5192_v0  ;;  %4662 = vmatprep.subr.bf16.mxu1 %v5192_v0  ;;  %v4725_v30 = vld [vmem:[%s7137_s0 + $0x514] ss:$24 sps:$4 sm:$0xff]   ;;  %v4748_v33 = vld [vmem:[%s7136_s1 + $0xa0] sm:$0xff]   ;;  %v4728_v36 = vld [vmem:[%s7137_s0 + $0x510] ss:$24 sps:$4 sm:$0xff]  }
   0xc   :  { %v4737_v32 = vld [vmem:[%s7136_s1 + $0x128] sm:$0xff]   ;;  %v4727_v34 = vld [vmem:[%s7137_s0 + $0x60] ss:$24 sps:$4 sm:$0xff]   ;;  %v4732_v38 = vld [vmem:[%s7137_s0 + $0x544] ss:$24 sps:$4 sm:$0xff]  }
   0xd   :  { %v4751_v35 = vld [vmem:[%s7136_s1 + $0x120] sm:$0xff]   ;;  %v4730_v37 = vld [vmem:[%s7137_s0 + $0x94] ss:$24 sps:$4 sm:$0xff]   ;;  %v4758_v39 = vld [vmem:[%s7136_s1 + $0x98] sm:$0xff]  }
   0xe   :  { %2213 = vmatpush1.bf16.msra.mxu0 %v4695_v4  ;;  %4678 = vmatpush1.bf16.msra.mxu1 %v4695_v4  ;;  %v4759_v40 = vld [vmem:[%s7136_s1 + $0x118] sm:$0xff]   ;;  %v4772_v41 = vld [vmem:[%s7136_s1 + $0x90] sm:$0xff]   ;;  %v4780_v47 = vld [vmem:[%s7136_s1 + $0x88] sm:$0xff]  }
   0xf   :  { %2214 = vmatprep.subr.bf16.mxu0 %v5192_v0  ;;  %4663 = vmatprep.subr.bf16.mxu1 %v5192_v0  ;;  %v4773_v42 = vld [vmem:[%s7136_s1 + $0x110] sm:$0xff]   ;;  %v4735_v44 = vld [vmem:[%s7137_s0 + $0x540] ss:$24 sps:$4 sm:$0xff]   ;;  %v4738_v45 = vld [vmem:[%s7137_s0 + $0xc4] ss:$24 sps:$4 sm:$0xff]  }
  0x10   :  { %v4734_v43 = vld [vmem:[%s7137_s0 + $0x90] ss:$24 sps:$4 sm:$0xff]   ;;  %v4740_v46 = vld [vmem:[%s7137_s0 + $0x574] ss:$24 sps:$4 sm:$0xff]   ;;  %v4794_v49 = vld [vmem:[%s7136_s1 + $0x80] sm:$0xff]  }
  0x11   :  { %v4781_v48 = vld [vmem:[%s7136_s1 + $0x108] sm:$0xff]   ;;  %v4742_v50 = vld [vmem:[%s7137_s0 + $0xc0] ss:$24 sps:$4 sm:$0xff]   ;;  %v4746_v54 = vld [vmem:[%s7137_s0 + $0x5a4] ss:$24 sps:$4 sm:$0xff]  }
  0x12   :  { %2215 = vmatpush1.bf16.msra.mxu0 %v4696_v5  ;;  %4679 = vmatpush1.bf16.msra.mxu1 %v4696_v5  ;;  %v4795_v51 = vld [vmem:[%s7136_s1 + $0x100] sm:$0xff]   ;;  %v4743_v52 = vld [vmem:[%s7137_s0 + $0x570] ss:$24 sps:$4 sm:$0xff]   ;;  %v4744_v53 = vld [vmem:[%s7137_s0 + $0xf4] ss:$24 sps:$4 sm:$0xff]  }
  0x13   :  { %2216 = vmatprep.subr.bf16.mxu0 %v5192_v0  ;;  %4664 = vmatprep.subr.bf16.mxu1 %v5192_v0  ;;  %v4802_v55 = vld [vmem:[%s7136_s1 + $0xf8] sm:$0xff]   ;;  %v4816_v57 = vld [vmem:[%s7136_s1 + $0xf0] sm:$0xff]   ;;  %v4824_v63 = vld [vmem:[%s7136_s1 + $0xe8] sm:$0xff]  }
  0x14   :  { %v4807_v56 = vld [vmem:[%s7136_s1 + $0x178] sm:$0xff]   ;;  %v4749_v58 = vld [vmem:[%s7137_s0 + $0xf0] ss:$24 sps:$4 sm:$0xff]   ;;  %v4754_v62 = vld [vmem:[%s7137_s0 + $0x5d4] ss:$24 sps:$4 sm:$0xff]  }
  0x15   :  { %v4750_v59 = vld [vmem:[%s7137_s0 + $0x5a0] ss:$24 sps:$4 sm:$0xff]   ;;  %v4817_v60 = vld [vmem:[%s7136_s1 + $0x170] sm:$0xff]   ;;  %v4752_v61 = vld [vmem:[%s7137_s0 + $0x124] ss:$24 sps:$4 sm:$0xff]  }
  0x16   :  { %2217 = vmatpush1.bf16.msra.mxu0 %v4697_v7  ;;  %4680 = vmatpush1.bf16.msra.mxu1 %v4697_v7  ;;  %v4831_v1 = vld [vmem:[%s7136_s1 + $0x168] sm:$0xff]   ;;  %v4838_v2 = vld [vmem:[%s7136_s1 + $0xe0] sm:$0xff]   ;;  %v4850_v8 = vld [vmem:[%s7136_s1 + $0xd8] sm:$0xff]  }
  0x17   :  { %2218 = vmatprep.subr.bf16.mxu0 %v5192_v0  ;;  %4665 = vmatprep.subr.bf16.mxu1 %v5192_v0  ;;  %v4839_v3 = vld [vmem:[%s7136_s1 + $0x160] sm:$0xff]   ;;  %v4757_v5 = vld [vmem:[%s7137_s0 + $0x5d0] ss:$24 sps:$4 sm:$0xff]   ;;  %v4760_v6 = vld [vmem:[%s7137_s0 + $0x154] ss:$24 sps:$4 sm:$0xff]  }
  0x18   :  { %v4756_v4 = vld [vmem:[%s7137_s0 + $0x120] ss:$24 sps:$4 sm:$0xff]   ;;  %v4762_v7 = vld [vmem:[%s7137_s0 + $0x604] ss:$24 sps:$4 sm:$0xff]  }
  0x1a   :  { %2219 = vmatpush1.bf16.msra.mxu0 %v4698_v9  ;;  %4681 = vmatpush1.bf16.msra.mxu1 %v4698_v9  ;;  %v4853_v9 = vld [vmem:[%s7136_s1 + $0x158] sm:$0xff]  }
  0x1b   :  { %2220 = vmatprep.subr.bf16.mxu0 %v5192_v0  ;;  %4666 = vmatprep.subr.bf16.mxu1 %v5192_v0 }
  0x1e   :  { %2221 = vmatpush1.bf16.msra.mxu0 %v4699_v10  ;;  %4682 = vmatpush1.bf16.msra.mxu1 %v4699_v10  ;;  %v4860_v10 = vld [vmem:[%s7136_s1 + $0xd0] sm:$0xff]  }
  0x1f   :  { %2222 = vmatprep.subr.bf16.mxu0 %v5192_v0  ;;  %4667 = vmatprep.subr.bf16.mxu1 %v5192_v0 }
  0x22   :  { %2223 = vmatpush2.bf16.msra.mxu0 %v4700_v11  ;;  %4683 = vmatpush2.bf16.msra.mxu1 %v4700_v11  ;;  %v4861_v11 = vld [vmem:[%s7136_s1 + $0x150] sm:$0xff]  }
  0x23   :  { %2224 = vmatprep.subr.bf16.mxu0 %v5192_v0  ;;  %4668 = vmatprep.subr.bf16.mxu1 %v5192_v0 }
  0x26   :  { %2225 = vmatpush2.bf16.msra.mxu0 %v4701_v12  ;;  %4684 = vmatpush2.bf16.msra.mxu1 %v4701_v12  ;;  %v4764_v12 = vld [vmem:[%s7137_s0 + $0x150] ss:$24 sps:$4 sm:$0xff]  }
  0x27   :  { %2226 = vmatprep.subr.bf16.mxu0 %v5192_v0  ;;  %4669 = vmatprep.subr.bf16.mxu1 %v5192_v0 }
  0x2a   :  { %2227 = vmatpush2.bf16.msra.mxu0 %v4702_v13  ;;  %4685 = vmatpush2.bf16.msra.mxu1 %v4702_v13  ;;  %v4765_v13 = vld [vmem:[%s7137_s0 + $0x600] ss:$24 sps:$4 sm:$0xff]  }
  0x2b   :  { %2228 = vmatprep.subr.bf16.mxu0 %v5192_v0  ;;  %4670 = vmatprep.subr.bf16.mxu1 %v5192_v0 }
  0x2e   :  { %2229 = vmatpush2.bf16.msra.mxu0 %v4703_v14  ;;  %4686 = vmatpush2.bf16.msra.mxu1 %v4703_v14  ;;  %v4766_v14 = vld [vmem:[%s7137_s0 + $0x184] ss:$24 sps:$4 sm:$0xff]  }
  0x2f   :  { %2230 = vmatprep.subr.bf16.mxu0 %v5192_v0  ;;  %4671 = vmatprep.subr.bf16.mxu1 %v5192_v0 }
  0x32   :  { %2231 = vmatpush2.bf16.msra.mxu0 %v4704_v15  ;;  %4687 = vmatpush2.bf16.msra.mxu1 %v4704_v15  ;;  %v4768_v15 = vld [vmem:[%s7137_s0 + $0x634] ss:$24 sps:$4 sm:$0xff]  }
  0x33   :  { %2232 = vmatprep.subr.bf16.mxu0 %v5192_v0  ;;  %4672 = vmatprep.subr.bf16.mxu1 %v5192_v0 }
  0x36   :  { %2233 = vmatpush2.bf16.msra.mxu0 %v4705_v16  ;;  %4688 = vmatpush2.bf16.msra.mxu1 %v4705_v16  ;;  %v4874_v16 = vld [vmem:[%s7136_s1 + $0xc8] sm:$0xff]  }
  0x37   :  { %2234 = vmatprep.subr.bf16.mxu0 %v5192_v0  ;;  %4673 = vmatprep.subr.bf16.mxu1 %v5192_v0 }
  0x3a   :  { %2235 = vmatpush2.bf16.msra.mxu0 %v4706_v17  ;;  %4689 = vmatpush2.bf16.msra.mxu1 %v4706_v17  ;;  %v4875_v17 = vld [vmem:[%s7136_s1 + $0x148] sm:$0xff]  }
  0x3b   :  { %2236 = vmatprep.subr.bf16.mxu0 %v5192_v0  ;;  %4674 = vmatprep.subr.bf16.mxu1 %v5192_v0 }
  0x3e   :  { %2237 = vmatpush2.bf16.msra.mxu0 %v4707_v18  ;;  %4690 = vmatpush2.bf16.msra.mxu1 %v4707_v18  ;;  %v4882_v18 = vld [vmem:[%s7136_s1 + $0xc0] sm:$0xff]  }
  0x3f   :  { %2639 = vmatprep.subr.bf16.mxu1 %v5192_v0  ;;  %3072 = vmatprep.subr.bf16.mxu0 %v5192_v0 }
  0x41   :  { %2239 = vmatmul.mubr.bf16.vlgmr.msra.gmra.mxu0 %v4708_v19  ;;  %2439 = vmatmul.mubr.bf16.vlgmr.msra.gmra.mxu1 %v4711_v20  ;;  %v4770_v19 = vld [vmem:[%s7137_s0 + $0x180] ss:$24 sps:$4 sm:$0xff]   ;;  %v4771_v20 = vld [vmem:[%s7137_s0 + $0x630] ss:$24 sps:$4 sm:$0xff]  }
  0x42   :  { %2640 = vmatpush1.bf16.msra.mxu1 %v4714_v21  ;;  %3073 = vmatpush1.bf16.msra.mxu0 %v4715_v22  ;;  %v4887_v21 = vld [vmem:[%s7136_s1 + $0x140] sm:$0xff]   ;;  %v4774_v22 = vld [vmem:[%s7137_s0 + $0x1b4] ss:$24 sps:$4 sm:$0xff]  }
  0x43   :  { %2246 = vmatprep.mubr.bf16.mxu0 %v4716_v23  ;;  %2446 = vmatprep.mubr.bf16.mxu1 %v4718_v24  ;;  %v4776_v23 = vld [vmem:[%s7137_s0 + $0x664] ss:$24 sps:$4 sm:$0xff]   ;;  %v4778_v24 = vld [vmem:[%s7137_s0 + $0x1b0] ss:$24 sps:$4 sm:$0xff]  }
  0x44   :  { %2641 = vmatprep.subr.bf16.mxu1 %v5192_v0  ;;  %3074 = vmatprep.subr.bf16.mxu0 %v5192_v0 }
  0x46   :  { %2642 = vmatpush1.bf16.msra.mxu1 %v4722_v25  ;;  %3075 = vmatpush1.bf16.msra.mxu0 %v4729_v26  ;;  %v4779_v25 = vld [vmem:[%s7137_s0 + $0x660] ss:$24 sps:$4 sm:$0xff]   ;;  %v4782_v26 = vld [vmem:[%s7137_s0 + $0x1e4] ss:$24 sps:$4 sm:$0xff]  }
  0x47   :  { %2643 = vmatprep.subr.bf16.mxu1 %v5192_v0  ;;  %3076 = vmatprep.subr.bf16.mxu0 %v5192_v0 }
  0x49   :  { %2247 = vmatmul.mubr.bf16.gmra.mxu0 %v4720_v27  ;;  %2447 = vmatmul.mubr.bf16.gmra.mxu1 %v4721_v28  ;;  %v4786_v27 = vld [vmem:[%s7137_s0 + $0x1e0] ss:$24 sps:$4 sm:$0xff]   ;;  %v4787_v28 = vld [vmem:[%s7137_s0 + $0x690] ss:$24 sps:$4 sm:$0xff]  }
  0x4a   :  { %2254 = vmatprep.mubr.bf16.mxu0 %v4723_v29  ;;  %2454 = vmatprep.mubr.bf16.mxu1 %v4725_v30  ;;  %v4788_v29 = vld [vmem:[%s7137_s0 + $0x214] ss:$24 sps:$4 sm:$0xff]   ;;  %v4790_v30 = vld [vmem:[%s7137_s0 + $0x6c4] ss:$24 sps:$4 sm:$0xff]  }
  0x4b   :  { %2644 = vmatpush1.bf16.msra.mxu1 %v4736_v31  ;;  %3077 = vmatpush1.bf16.msra.mxu0 %v4737_v32  ;;  %v4792_v31 = vld [vmem:[%s7137_s0 + $0x210] ss:$24 sps:$4 sm:$0xff]   ;;  %v4793_v32 = vld [vmem:[%s7137_s0 + $0x6c0] ss:$24 sps:$4 sm:$0xff]  }
  0x4c   :  { %2645 = vmatprep.subr.bf16.mxu1 %v5192_v0  ;;  %3078 = vmatprep.subr.bf16.mxu0 %v5192_v0 }
  0x4f   :  { %2646 = vmatpush1.bf16.msra.mxu1 %v4748_v33  ;;  %3079 = vmatpush1.bf16.msra.mxu0 %v4751_v35  ;;  %v4796_v33 = vld [vmem:[%s7137_s0 + $0x244] ss:$24 sps:$4 sm:$0xff]   ;;  %v4800_v35 = vld [vmem:[%s7137_s0 + $0x240] ss:$24 sps:$4 sm:$0xff]  }
  0x50   :  { %2647 = vmatprep.subr.bf16.mxu1 %v5192_v0  ;;  %3080 = vmatprep.subr.bf16.mxu0 %v5192_v0 }
  0x51   :  { %2255 = vmatmul.mubr.bf16.gmra.mxu0 %v4727_v34  ;;  %2455 = vmatmul.mubr.bf16.gmra.mxu1 %v4728_v36  ;;  %v4798_v34 = vld [vmem:[%s7137_s0 + $0x6f4] ss:$24 sps:$4 sm:$0xff]   ;;  %v4801_v36 = vld [vmem:[%s7137_s0 + $0x6f0] ss:$24 sps:$4 sm:$0xff]  }
  0x52   :  { %2262 = vmatprep.mubr.bf16.mxu0 %v4730_v37  ;;  %2462 = vmatprep.mubr.bf16.mxu1 %v4732_v38  ;;  %v4803_v37 = vld [vmem:[%s7137_s0 + $0x274] ss:$24 sps:$4 sm:$0xff]   ;;  %v4805_v38 = vld [vmem:[%s7137_s0 + $0x724] ss:$24 sps:$4 sm:$0xff]  }
  0x53   :  { %2648 = vmatpush1.bf16.msra.mxu1 %v4758_v39  ;;  %3081 = vmatpush1.bf16.msra.mxu0 %v4759_v40  ;;  %v4808_v39 = vld [vmem:[%s7137_s0 + $0x270] ss:$24 sps:$4 sm:$0xff]   ;;  %v4809_v40 = vld [vmem:[%s7137_s0 + $0x720] ss:$24 sps:$4 sm:$0xff]  }
  0x54   :  { %2649 = vmatprep.subr.bf16.mxu1 %v5192_v0  ;;  %3082 = vmatprep.subr.bf16.mxu0 %v5192_v0 }
  0x57   :  { %2650 = vmatpush1.bf16.msra.mxu1 %v4772_v41  ;;  %3083 = vmatpush1.bf16.msra.mxu0 %v4773_v42  ;;  %v4810_v41 = vld [vmem:[%s7137_s0 + $0x2a4] ss:$24 sps:$4 sm:$0xff]   ;;  %v4812_v42 = vld [vmem:[%s7137_s0 + $0x754] ss:$24 sps:$4 sm:$0xff]  }
  0x58   :  { %2651 = vmatprep.subr.bf16.mxu1 %v5192_v0  ;;  %3084 = vmatprep.subr.bf16.mxu0 %v5192_v0 }
  0x59   :  { %2263 = vmatmul.mubr.bf16.gmra.mxu0 %v4734_v43  ;;  %2463 = vmatmul.mubr.bf16.gmra.mxu1 %v4735_v44  ;;  %v4814_v43 = vld [vmem:[%s7137_s0 + $0x2a0] ss:$24 sps:$4 sm:$0xff]   ;;  %v4815_v44 = vld [vmem:[%s7137_s0 + $0x750] ss:$24 sps:$4 sm:$0xff]  }
  0x5a   :  { %2270 = vmatprep.mubr.bf16.mxu0 %v4738_v45  ;;  %2470 = vmatprep.mubr.bf16.mxu1 %v4740_v46  ;;  %v4818_v45 = vld [vmem:[%s7137_s0 + $0x2d4] ss:$24 sps:$4 sm:$0xff]   ;;  %v4820_v46 = vld [vmem:[%s7137_s0 + $0x784] ss:$24 sps:$4 sm:$0xff]  }
  0x5b   :  { %2652 = vmatpush1.bf16.msra.mxu1 %v4780_v47  ;;  %3085 = vmatpush1.bf16.msra.mxu0 %v4781_v48  ;;  %v4822_v47 = vld [vmem:[%s7137_s0 + $0x2d0] ss:$24 sps:$4 sm:$0xff]   ;;  %v4823_v48 = vld [vmem:[%s7137_s0 + $0x780] ss:$24 sps:$4 sm:$0xff]  }
  0x5c   :  { %2653 = vmatprep.subr.bf16.mxu1 %v5192_v0  ;;  %3086 = vmatprep.subr.bf16.mxu0 %v5192_v0 }
  0x5f   :  { %2654 = vmatpush1.bf16.msra.mxu1 %v4794_v49  ;;  %3087 = vmatpush1.bf16.msra.mxu0 %v4795_v51  ;;  %v4825_v49 = vld [vmem:[%s7137_s0 + $0x304] ss:$24 sps:$4 sm:$0xff]   ;;  %v4829_v51 = vld [vmem:[%s7137_s0 + $0x300] ss:$24 sps:$4 sm:$0xff]  }
  0x60   :  { %2655 = vmatprep.subr.bf16.mxu1 %v5192_v0  ;;  %3088 = vmatprep.subr.bf16.mxu0 %v5192_v0 }
  0x61   :  { %2271 = vmatmul.mubr.bf16.gmra.mxu0 %v4742_v50  ;;  %2471 = vmatmul.mubr.bf16.gmra.mxu1 %v4743_v52  ;;  %v4827_v50 = vld [vmem:[%s7137_s0 + $0x7b4] ss:$24 sps:$4 sm:$0xff]   ;;  %v4830_v52 = vld [vmem:[%s7137_s0 + $0x7b0] ss:$24 sps:$4 sm:$0xff]  }
  0x62   :  { %2278 = vmatprep.mubr.bf16.mxu0 %v4744_v53  ;;  %2478 = vmatprep.mubr.bf16.mxu1 %v4746_v54  ;;  %v4832_v53 = vld [vmem:[%s7137_s0 + $0x334] ss:$24 sps:$4 sm:$0xff]   ;;  %v4834_v54 = vld [vmem:[%s7137_s0 + $0x7e4] ss:$24 sps:$4 sm:$0xff]  }
  0x63   :  { %2656 = vmatpush2.bf16.msra.mxu1 %v4802_v55  ;;  %3089 = vmatpush2.bf16.msra.mxu0 %v4807_v56  ;;  %v4836_v55 = vld [vmem:[%s7137_s0 + $0x330] ss:$24 sps:$4 sm:$0xff]   ;;  %v4837_v56 = vld [vmem:[%s7137_s0 + $0x7e0] ss:$24 sps:$4 sm:$0xff]  }
  0x64   :  { %2657 = vmatprep.subr.bf16.mxu1 %v5192_v0  ;;  %3090 = vmatprep.subr.bf16.mxu0 %v5192_v0 }
  0x67   :  { %2658 = vmatpush2.bf16.msra.mxu1 %v4816_v57  ;;  %3091 = vmatpush2.bf16.msra.mxu0 %v4817_v60  ;;  %v4840_v57 = vld [vmem:[%s7137_s0 + $0x364] ss:$24 sps:$4 sm:$0xff]   ;;  %v4845_v60 = vld [vmem:[%s7137_s0 + $0x810] ss:$24 sps:$4 sm:$0xff]  }
  0x68   :  { %2659 = vmatprep.subr.bf16.mxu1 %v5192_v0  ;;  %3092 = vmatprep.subr.bf16.mxu0 %v5192_v0 }
  0x69   :  { %2279 = vmatmul.mubr.bf16.gmra.mxu0 %v4749_v58  ;;  %2479 = vmatmul.mubr.bf16.gmra.mxu1 %v4750_v59  ;;  %v4842_v58 = vld [vmem:[%s7137_s0 + $0x814] ss:$24 sps:$4 sm:$0xff]   ;;  %v4844_v59 = vld [vmem:[%s7137_s0 + $0x360] ss:$24 sps:$4 sm:$0xff]  }
  0x6a   :  { %2286 = vmatprep.mubr.bf16.mxu0 %v4752_v61  ;;  %2486 = vmatprep.mubr.bf16.mxu1 %v4754_v62  ;;  %v4846_v61 = vld [vmem:[%s7137_s0 + $0x394] ss:$24 sps:$4 sm:$0xff]   ;;  %v4848_v62 = vld [vmem:[%s7137_s0 + $0x844] ss:$24 sps:$4 sm:$0xff]  }
  0x6b   :  { %2660 = vmatpush2.bf16.msra.mxu1 %v4824_v63  ;;  %3093 = vmatpush2.bf16.msra.mxu0 %v4831_v1  ;;  %v4851_v63 = vld [vmem:[%s7137_s0 + $0x390] ss:$24 sps:$4 sm:$0xff]   ;;  %v4852_v1 = vld [vmem:[%s7137_s0 + $0x840] ss:$24 sps:$4 sm:$0xff]  }
  0x6c   :  { %2661 = vmatprep.subr.bf16.mxu1 %v5192_v0  ;;  %3094 = vmatprep.subr.bf16.mxu0 %v5192_v0 }
  0x6f   :  { %2662 = vmatpush2.bf16.msra.mxu1 %v4838_v2  ;;  %3095 = vmatpush2.bf16.msra.mxu0 %v4839_v3  ;;  %v4854_v2 = vld [vmem:[%s7137_s0 + $0x3c4] ss:$24 sps:$4 sm:$0xff]   ;;  %v4856_v3 = vld [vmem:[%s7137_s0 + $0x874] ss:$24 sps:$4 sm:$0xff]  }
  0x70   :  { %2663 = vmatprep.subr.bf16.mxu1 %v5192_v0  ;;  %3096 = vmatprep.subr.bf16.mxu0 %v5192_v0 }
  0x71   :  { %2287 = vmatmul.mubr.bf16.gmra.mxu0 %v4756_v4  ;;  %2487 = vmatmul.mubr.bf16.gmra.mxu1 %v4757_v5  ;;  %v4858_v4 = vld [vmem:[%s7137_s0 + $0x3c0] ss:$24 sps:$4 sm:$0xff]   ;;  %v4859_v5 = vld [vmem:[%s7137_s0 + $0x870] ss:$24 sps:$4 sm:$0xff]  }
  0x72   :  { %2294 = vmatprep.mubr.bf16.mxu0 %v4760_v6  ;;  %2494 = vmatprep.mubr.bf16.mxu1 %v4762_v7  ;;  %v4862_v6 = vld [vmem:[%s7137_s0 + $0x3f4] ss:$24 sps:$4 sm:$0xff]   ;;  %v4864_v7 = vld [vmem:[%s7137_s0 + $0x8a4] ss:$24 sps:$4 sm:$0xff]  }
  0x73   :  { %2664 = vmatpush2.bf16.msra.mxu1 %v4850_v8  ;;  %3097 = vmatpush2.bf16.msra.mxu0 %v4853_v9  ;;  %v4866_v8 = vld [vmem:[%s7137_s0 + $0x3f0] ss:$24 sps:$4 sm:$0xff]   ;;  %v4867_v9 = vld [vmem:[%s7137_s0 + $0x8a0] ss:$24 sps:$4 sm:$0xff]  }
  0x74   :  { %2665 = vmatprep.subr.bf16.mxu1 %v5192_v0  ;;  %3098 = vmatprep.subr.bf16.mxu0 %v5192_v0 }
  0x77   :  { %2666 = vmatpush2.bf16.msra.mxu1 %v4860_v10  ;;  %3099 = vmatpush2.bf16.msra.mxu0 %v4861_v11  ;;  %v4868_v10 = vld [vmem:[%s7137_s0 + $0x424] ss:$24 sps:$4 sm:$0xff]   ;;  %v4870_v11 = vld [vmem:[%s7137_s0 + $0x8d4] ss:$24 sps:$4 sm:$0xff]  }
  0x78   :  { %2667 = vmatprep.subr.bf16.mxu1 %v5192_v0  ;;  %3100 = vmatprep.subr.bf16.mxu0 %v5192_v0 }
  0x79   :  { %2295 = vmatmul.mubr.bf16.gmra.mxu0 %v4764_v12  ;;  %2495 = vmatmul.mubr.bf16.gmra.mxu1 %v4765_v13  ;;  %v4872_v12 = vld [vmem:[%s7137_s0 + $0x420] ss:$24 sps:$4 sm:$0xff]   ;;  %v4873_v13 = vld [vmem:[%s7137_s0 + $0x8d0] ss:$24 sps:$4 sm:$0xff]  }
  0x7a   :  { %2302 = vmatprep.mubr.bf16.mxu0 %v4766_v14  ;;  %2502 = vmatprep.mubr.bf16.mxu1 %v4768_v15  ;;  %v4876_v14 = vld [vmem:[%s7137_s0 + $0x454] ss:$24 sps:$4 sm:$0xff]   ;;  %v4878_v15 = vld [vmem:[%s7137_s0 + $0x904] ss:$24 sps:$4 sm:$0xff]  }
  0x7b   :  { %2668 = vmatpush2.bf16.msra.mxu1 %v4874_v16  ;;  %3101 = vmatpush2.bf16.msra.mxu0 %v4875_v17  ;;  %v4880_v16 = vld [vmem:[%s7137_s0 + $0x450] ss:$24 sps:$4 sm:$0xff]   ;;  %v4881_v17 = vld [vmem:[%s7137_s0 + $0x900] ss:$24 sps:$4 sm:$0xff]  }
  0x7c   :  { %2669 = vmatprep.subr.bf16.mxu1 %v5192_v0  ;;  %3102 = vmatprep.subr.bf16.mxu0 %v5192_v0  ;;  %v4784_v0 = vld [vmem:[%s7137_s0 + $0x694] ss:$24 sps:$4 sm:$0xff]  }
  0x7f   :  { %2670 = vmatpush2.bf16.msra.mxu1 %v4882_v18  ;;  %3103 = vmatpush2.bf16.msra.mxu0 %v4887_v21  ;;  %v4883_v18 = vld [vmem:[%s7137_s0 + $0x484] ss:$24 sps:$4 sm:$0xff]   ;;  %v4889_v21 = vld [vmem:[%s7137_s0 + $0x930] ss:$24 sps:$4 sm:$0xff]  }
  0x81   :  { %2303 = vmatmul.mubr.bf16.gmra.mxu0 %v4770_v19  ;;  %2503 = vmatmul.mubr.bf16.gmra.mxu1 %v4771_v20  ;;  %v4885_v19 = vld [vmem:[%s7137_s0 + $0x934] ss:$24 sps:$4 sm:$0xff]   ;;  %v4888_v20 = vld [vmem:[%s7137_s0 + $0x480] ss:$24 sps:$4 sm:$0xff]  }
  0x82   :  { %2310 = vmatprep.mubr.bf16.mxu0 %v4774_v22  ;;  %2510 = vmatprep.mubr.bf16.mxu1 %v4776_v23  ;;  %v4892_v22 = vld [vmem:[%s7137_s0 + $0xc] ss:$24 sps:$4 sm:$0xff]  }
  0x83   :  { %v4895_v23 = vld [vmem:[%s7137_s0 + $0x14] ss:$24 sps:$4 sm:$0xff]  }
  0x89   :  { %2311 = vmatmul.mubr.bf16.gmra.mxu0 %v4778_v24  ;;  %2511 = vmatmul.mubr.bf16.gmra.mxu1 %v4779_v25 }
  0x8a   :  { %2318 = vmatprep.mubr.bf16.mxu0 %v4782_v26  ;;  %2518 = vmatprep.mubr.bf16.mxu1 %v4784_v0 }
  0x91   :  { %2319 = vmatmul.mubr.bf16.gmra.mxu0 %v4786_v27  ;;  %2519 = vmatmul.mubr.bf16.gmra.mxu1 %v4787_v28 }
  0x92   :  { %2326 = vmatprep.mubr.bf16.mxu0 %v4788_v29  ;;  %2526 = vmatprep.mubr.bf16.mxu1 %v4790_v30  ;;  %v4890_v29 = vld [vmem:[%s7137_s0 + $0x8] ss:$24 sps:$4 sm:$0xff]  }
  0x93   :  { %v4893_v30 = vld [vmem:[%s7137_s0 + $0x10] ss:$24 sps:$4 sm:$0xff]  }
  0x99   :  { %2327 = vmatmul.mubr.bf16.gmra.mxu0 %v4792_v31  ;;  %2527 = vmatmul.mubr.bf16.gmra.mxu1 %v4793_v32  ;;  %v4896_v31 = vld [vmem:[%s7137_s0 + $0x3c] ss:$24 sps:$4 sm:$0xff]  }
  0x9a   :  { %2334 = vmatprep.mubr.bf16.mxu0 %v4796_v33  ;;  %2534 = vmatprep.mubr.bf16.mxu1 %v4798_v34  ;;  %v4898_v32 = vld [vmem:[%s7137_s0 + $0x44] ss:$24 sps:$4 sm:$0xff]  }
  0xa1   :  { %2335 = vmatmul.mubr.bf16.gmra.mxu0 %v4800_v35  ;;  %2535 = vmatmul.mubr.bf16.gmra.mxu1 %v4801_v36 }
  0xa2   :  { %2342 = vmatprep.mubr.bf16.mxu0 %v4803_v37  ;;  %2542 = vmatprep.mubr.bf16.mxu1 %v4805_v38 }
  0xa9   :  { %2343 = vmatmul.mubr.bf16.gmra.mxu0 %v4808_v39  ;;  %2543 = vmatmul.mubr.bf16.gmra.mxu1 %v4809_v40 }
  0xaa   :  { %2350 = vmatprep.mubr.bf16.mxu0 %v4810_v41  ;;  %2550 = vmatprep.mubr.bf16.mxu1 %v4812_v42  ;;  %v4900_v41 = vld [vmem:[%s7137_s0 + $0x38] ss:$24 sps:$4 sm:$0xff]  }
  0xab   :  { %v4901_v42 = vld [vmem:[%s7137_s0 + $0x40] ss:$24 sps:$4 sm:$0xff]  }
  0xb1   :  { %2351 = vmatmul.mubr.bf16.gmra.mxu0 %v4814_v43  ;;  %2551 = vmatmul.mubr.bf16.gmra.mxu1 %v4815_v44  ;;  %v4902_v43 = vld [vmem:[%s7137_s0 + $0x6c] ss:$24 sps:$4 sm:$0xff]  }
  0xb2   :  { %2358 = vmatprep.mubr.bf16.mxu0 %v4818_v45  ;;  %2558 = vmatprep.mubr.bf16.mxu1 %v4820_v46  ;;  %v4904_v44 = vld [vmem:[%s7137_s0 + $0x74] ss:$24 sps:$4 sm:$0xff]  }
  0xb9   :  { %2359 = vmatmul.mubr.bf16.gmra.mxu0 %v4822_v47  ;;  %2559 = vmatmul.mubr.bf16.gmra.mxu1 %v4823_v48 }
  0xba   :  { %2366 = vmatprep.mubr.bf16.mxu0 %v4825_v49  ;;  %2566 = vmatprep.mubr.bf16.mxu1 %v4827_v50 }
  0xc1   :  { %2367 = vmatmul.mubr.bf16.gmra.mxu0 %v4829_v51  ;;  %2567 = vmatmul.mubr.bf16.gmra.mxu1 %v4830_v52 }
  0xc2   :  { %2374 = vmatprep.mubr.bf16.mxu0 %v4832_v53  ;;  %2574 = vmatprep.mubr.bf16.mxu1 %v4834_v54  ;;  %v4906_v53 = vld [vmem:[%s7137_s0 + $0x68] ss:$24 sps:$4 sm:$0xff]  }
  0xc3   :  { %v4907_v54 = vld [vmem:[%s7137_s0 + $0x70] ss:$24 sps:$4 sm:$0xff]  }
  0xc9   :  { %2375 = vmatmul.mubr.bf16.gmra.mxu0 %v4836_v55  ;;  %2575 = vmatmul.mubr.bf16.gmra.mxu1 %v4837_v56  ;;  %v4910_v55 = vld [vmem:[%s7137_s0 + $0x9c] ss:$24 sps:$4 sm:$0xff]  }
  0xca   :  { %2382 = vmatprep.mubr.bf16.mxu0 %v4840_v57  ;;  %2582 = vmatprep.mubr.bf16.mxu1 %v4842_v58  ;;  %v4913_v56 = vld [vmem:[%s7137_s0 + $0xa4] ss:$24 sps:$4 sm:$0xff]  }
  0xd1   :  { %2383 = vmatmul.mubr.bf16.gmra.mxu0 %v4844_v59  ;;  %2583 = vmatmul.mubr.bf16.gmra.mxu1 %v4845_v60 }
  0xd2   :  { %2390 = vmatprep.mubr.bf16.mxu0 %v4846_v61  ;;  %2590 = vmatprep.mubr.bf16.mxu1 %v4848_v62 }
  0xd9   :  { %2391 = vmatmul.mubr.bf16.gmra.mxu0 %v4851_v63  ;;  %2591 = vmatmul.mubr.bf16.gmra.mxu1 %v4852_v1 }
  0xda   :  { %2398 = vmatprep.mubr.bf16.mxu0 %v4854_v2  ;;  %2598 = vmatprep.mubr.bf16.mxu1 %v4856_v3  ;;  %v4908_v2 = vld [vmem:[%s7137_s0 + $0x98] ss:$24 sps:$4 sm:$0xff]  }
  0xdb   :  { %v4911_v3 = vld [vmem:[%s7137_s0 + $0xa0] ss:$24 sps:$4 sm:$0xff]  }
  0xe1   :  { %2399 = vmatmul.mubr.bf16.gmra.mxu0 %v4858_v4  ;;  %2599 = vmatmul.mubr.bf16.gmra.mxu1 %v4859_v5  ;;  %v4916_v4 = vld [vmem:[%s7137_s0 + $0xcc] ss:$24 sps:$4 sm:$0xff]  }
  0xe2   :  { %2406 = vmatprep.mubr.bf16.mxu0 %v4862_v6  ;;  %2606 = vmatprep.mubr.bf16.mxu1 %v4864_v7  ;;  %v4919_v5 = vld [vmem:[%s7137_s0 + $0xd4] ss:$24 sps:$4 sm:$0xff]  }
  0xe9   :  { %2407 = vmatmul.mubr.bf16.gmra.mxu0 %v4866_v8  ;;  %2607 = vmatmul.mubr.bf16.gmra.mxu1 %v4867_v9 }
  0xea   :  { %2414 = vmatprep.mubr.bf16.mxu0 %v4868_v10  ;;  %2614 = vmatprep.mubr.bf16.mxu1 %v4870_v11 }
  0xf1   :  { %2415 = vmatmul.mubr.bf16.gmra.mxu0 %v4872_v12  ;;  %2615 = vmatmul.mubr.bf16.gmra.mxu1 %v4873_v13 }
  0xf2   :  { %2422 = vmatprep.mubr.bf16.mxu0 %v4876_v14  ;;  %2622 = vmatprep.mubr.bf16.mxu1 %v4878_v15  ;;  %v4914_v14 = vld [vmem:[%s7137_s0 + $0xc8] ss:$24 sps:$4 sm:$0xff]  }
  0xf3   :  { %v4917_v15 = vld [vmem:[%s7137_s0 + $0xd0] ss:$24 sps:$4 sm:$0xff]  }
  0xf9   :  { %2423 = vmatmul.mubr.bf16.gmra.mxu0 %v4880_v16  ;;  %2623 = vmatmul.mubr.bf16.gmra.mxu1 %v4881_v17  ;;  %v4922_v16 = vld [vmem:[%s7137_s0 + $0xfc] ss:$24 sps:$4 sm:$0xff]  }
  0xfa   :  { %2430 = vmatprep.mubr.bf16.mxu0 %v4883_v18  ;;  %2630 = vmatprep.mubr.bf16.mxu1 %v4885_v19  ;;  %v4925_v17 = vld [vmem:[%s7137_s0 + $0x104] ss:$24 sps:$4 sm:$0xff]  }
 0x101   :  { %v5727_v24 = vpop.f32.mrf.mxu0  ;;  %2431 = vmatmul.mubr.bf16.gmra.mxu0 %v4888_v20  ;;  %v5729_v25 = vpop.f32.mrf.mxu1  ;;  %2631 = vmatmul.mubr.bf16.gmra.mxu1 %v4889_v21 }
 0x102   :  { %7140 = vst [vmem:[#allocation2_spill] sm:$0xff] %v5729_v25  ;;  %2671 = vmatprep.mubr.bf16.mxu1 %v4892_v22  ;;  %3104 = vmatprep.mubr.bf16.mxu0 %v4895_v23 }
 0x103   :  { %v2242_v26 = vpop.f32.mrf.mxu0  ;;  %v2442_v0 = vpop.f32.mrf.mxu1 }
 0x105   :  { %v5731_v27 = vpop.f32.mrf.mxu0  ;;  %v5733_v28 = vpop.f32.mrf.mxu1 }
 0x106   :  { %7141 = vst [vmem:[#allocation3_spill] sm:$0xff] %v5733_v28 }
 0x107   :  { %v2245_v33 = vpop.f32.mrf.mxu0  ;;  %v2445_v34 = vpop.f32.mrf.mxu1 }
 0x109   :  { %v5747_v35 = vpop.f32.mrf.mxu0  ;;  %v5749_v36 = vpop.f32.mrf.mxu1  ;;  %2672 = vmatmul.mubr.bf16.vlgmr.msra.gmra.mxu1 %v4890_v29  ;;  %3105 = vmatmul.mubr.bf16.vlgmr.msra.gmra.mxu0 %v4893_v30  ;;  %v4920_v29 = vld [vmem:[%s7137_s0 + $0xf8] ss:$24 sps:$4 sm:$0xff]  }
 0x10a   :  { %7142 = vst [vmem:[#allocation4_spill] sm:$0xff] %v5749_v36  ;;  %2679 = vmatprep.mubr.bf16.mxu1 %v4896_v31  ;;  %3112 = vmatprep.mubr.bf16.mxu0 %v4898_v32  ;;  %v4923_v30 = vld [vmem:[%s7137_s0 + $0x100] ss:$24 sps:$4 sm:$0xff]   ;;  %v4928_v31 = vld [vmem:[%s7137_s0 + $0x12c] ss:$24 sps:$4 sm:$0xff]  }
 0x10b   :  { %v2250_v37 = vpop.f32.mrf.mxu0  ;;  %v2450_v38 = vpop.f32.mrf.mxu1  ;;  %v4931_v32 = vld [vmem:[%s7137_s0 + $0x134] ss:$24 sps:$4 sm:$0xff]  }
 0x10d   :  { %v5751_v39 = vpop.f32.mrf.mxu0  ;;  %v5753_v40 = vpop.f32.mrf.mxu1 }
 0x10e   :  { %7143 = vst [vmem:[#allocation5_spill] sm:$0xff] %v5753_v40  ;;  %v5034_v40 = vld [vmem:[%s7137_s0 + $0x488] ss:$24 sps:$4 sm:$0xff]  }
 0x10f   :  { %v2253_v45 = vpop.f32.mrf.mxu0  ;;  %v2453_v46 = vpop.f32.mrf.mxu1 }
 0x110   :  { %v4926_v45 = vld [vmem:[%s7137_s0 + $0x128] ss:$24 sps:$4 sm:$0xff]  }
 0x111   :  { %v5767_v47 = vpop.f32.mrf.mxu0  ;;  %v5769_v48 = vpop.f32.mrf.mxu1  ;;  %2680 = vmatmul.mubr.bf16.gmra.mxu1 %v4900_v41  ;;  %3113 = vmatmul.mubr.bf16.gmra.mxu0 %v4901_v42  ;;  %v4929_v46 = vld [vmem:[%s7137_s0 + $0x130] ss:$24 sps:$4 sm:$0xff]  }
 0x112   :  { %7144 = vst [vmem:[#allocation6_spill] sm:$0xff] %v5769_v48  ;;  %2687 = vmatprep.mubr.bf16.mxu1 %v4902_v43  ;;  %3120 = vmatprep.mubr.bf16.mxu0 %v4904_v44 }
 0x113   :  { %v2258_v49 = vpop.f32.mrf.mxu0  ;;  %v2458_v50 = vpop.f32.mrf.mxu1 }
 0x114   :  { %v4934_v49 = vld [vmem:[%s7137_s0 + $0x15c] ss:$24 sps:$4 sm:$0xff]  }
 0x115   :  { %v5771_v51 = vpop.f32.mrf.mxu0  ;;  %v5773_v52 = vpop.f32.mrf.mxu1  ;;  %v4937_v50 = vld [vmem:[%s7137_s0 + $0x164] ss:$24 sps:$4 sm:$0xff]  }
 0x116   :  { %7145 = vst [vmem:[#allocation7_spill] sm:$0xff] %v5773_v52  ;;  %v5028_v52 = vld [vmem:[%s7137_s0 + $0x458] ss:$24 sps:$4 sm:$0xff]  }
 0x117   :  { %v2261_v57 = vpop.f32.mrf.mxu0  ;;  %v2461_v58 = vpop.f32.mrf.mxu1 }
 0x119   :  { %v5787_v59 = vpop.f32.mrf.mxu0  ;;  %v5789_v60 = vpop.f32.mrf.mxu1  ;;  %2688 = vmatmul.mubr.bf16.gmra.mxu1 %v4906_v53  ;;  %3121 = vmatmul.mubr.bf16.gmra.mxu0 %v4907_v54 }
 0x11a   :  { %7146 = vst [vmem:[#allocation8_spill] sm:$0xff] %v5789_v60  ;;  %2695 = vmatprep.mubr.bf16.mxu1 %v4910_v55  ;;  %3128 = vmatprep.mubr.bf16.mxu0 %v4913_v56 }
 0x11b   :  { %v2266_v61 = vpop.f32.mrf.mxu0  ;;  %v2466_v62 = vpop.f32.mrf.mxu1 }
 0x11d   :  { %v5791_v63 = vpop.f32.mrf.mxu0  ;;  %v5793_v1 = vpop.f32.mrf.mxu1 }
 0x11e   :  { %7147 = vst [vmem:[#allocation9_spill] sm:$0xff] %v5793_v1  ;;  %v5022_v1 = vld [vmem:[%s7137_s0 + $0x428] ss:$24 sps:$4 sm:$0xff]  }
 0x11f   :  { %v2269_v6 = vpop.f32.mrf.mxu0  ;;  %v2469_v7 = vpop.f32.mrf.mxu1 }
 0x121   :  { %v5807_v8 = vpop.f32.mrf.mxu0  ;;  %v5809_v9 = vpop.f32.mrf.mxu1  ;;  %2696 = vmatmul.mubr.bf16.gmra.mxu1 %v4908_v2  ;;  %3129 = vmatmul.mubr.bf16.gmra.mxu0 %v4911_v3  ;;  %v4932_v2 = vld [vmem:[%s7137_s0 + $0x158] ss:$24 sps:$4 sm:$0xff]  }
 0x122   :  { %7148 = vst [vmem:[#allocation10_spill] sm:$0xff] %v5809_v9  ;;  %2703 = vmatprep.mubr.bf16.mxu1 %v4916_v4  ;;  %3136 = vmatprep.mubr.bf16.mxu0 %v4919_v5  ;;  %v4935_v3 = vld [vmem:[%s7137_s0 + $0x160] ss:$24 sps:$4 sm:$0xff]   ;;  %v4940_v4 = vld [vmem:[%s7137_s0 + $0x18c] ss:$24 sps:$4 sm:$0xff]  }
 0x123   :  { %v2274_v10 = vpop.f32.mrf.mxu0  ;;  %v2474_v11 = vpop.f32.mrf.mxu1  ;;  %v4943_v5 = vld [vmem:[%s7137_s0 + $0x194] ss:$24 sps:$4 sm:$0xff]  }
 0x125   :  { %v5811_v12 = vpop.f32.mrf.mxu0  ;;  %v5813_v13 = vpop.f32.mrf.mxu1 }
 0x126   :  { %7149 = vst [vmem:[#allocation11_spill] sm:$0xff] %v5813_v13  ;;  %v5016_v13 = vld [vmem:[%s7137_s0 + $0x3f8] ss:$24 sps:$4 sm:$0xff]  }
 0x127   :  { %v2277_v18 = vpop.f32.mrf.mxu0  ;;  %v2477_v19 = vpop.f32.mrf.mxu1 }
 0x128   :  { %v4938_v18 = vld [vmem:[%s7137_s0 + $0x188] ss:$24 sps:$4 sm:$0xff]  }
 0x129   :  { %v5827_v20 = vpop.f32.mrf.mxu0  ;;  %v5829_v21 = vpop.f32.mrf.mxu1  ;;  %2704 = vmatmul.mubr.bf16.gmra.mxu1 %v4914_v14  ;;  %3137 = vmatmul.mubr.bf16.gmra.mxu0 %v4917_v15  ;;  %v4941_v19 = vld [vmem:[%s7137_s0 + $0x190] ss:$24 sps:$4 sm:$0xff]  }
 0x12a   :  { %7150 = vst [vmem:[#allocation12_spill] sm:$0xff] %v5829_v21  ;;  %2711 = vmatprep.mubr.bf16.mxu1 %v4922_v16  ;;  %3144 = vmatprep.mubr.bf16.mxu0 %v4925_v17 }
 0x12b   :  { %v2282_v22 = vpop.f32.mrf.mxu0  ;;  %v2482_v23 = vpop.f32.mrf.mxu1 }
 0x12c   :  { %v4946_v22 = vld [vmem:[%s7137_s0 + $0x1bc] ss:$24 sps:$4 sm:$0xff]  }
 0x12d   :  { %v5831_v26 = vpop.f32.mrf.mxu0  ;;  %v5833_v0 = vpop.f32.mrf.mxu1  ;;  %v4949_v23 = vld [vmem:[%s7137_s0 + $0x1c4] ss:$24 sps:$4 sm:$0xff]  }
 0x12e   :  { %7151 = vst [vmem:[#allocation13_spill] sm:$0xff] %v5833_v0  ;;  %v5010_v0 = vld [vmem:[%s7137_s0 + $0x3c8] ss:$24 sps:$4 sm:$0xff]  }
 0x12f   :  { %v2285_v33 = vpop.f32.mrf.mxu0  ;;  %v2485_v34 = vpop.f32.mrf.mxu1 }
 0x131   :  { %v5847_v37 = vpop.f32.mrf.mxu0  ;;  %v5849_v38 = vpop.f32.mrf.mxu1  ;;  %2712 = vmatmul.mubr.bf16.gmra.mxu1 %v4920_v29  ;;  %3145 = vmatmul.mubr.bf16.gmra.mxu0 %v4923_v30 }
 0x132   :  { %7152 = vst [vmem:[#allocation14_spill] sm:$0xff] %v5849_v38  ;;  %2719 = vmatprep.mubr.bf16.mxu1 %v4928_v31  ;;  %3152 = vmatprep.mubr.bf16.mxu0 %v4931_v32 }
 0x133   :  { %v2290_v41 = vpop.f32.mrf.mxu0  ;;  %v2490_v42 = vpop.f32.mrf.mxu1 }
 0x135   :  { %v5851_v43 = vpop.f32.mrf.mxu0  ;;  %v5853_v44 = vpop.f32.mrf.mxu1 }
 0x136   :  { %7153 = vst [vmem:[#allocation15_spill] sm:$0xff] %v5853_v44  ;;  %v5004_v44 = vld [vmem:[%s7137_s0 + $0x398] ss:$24 sps:$4 sm:$0xff]  }
 0x137   :  { %v2293_v53 = vpop.f32.mrf.mxu0  ;;  %v2493_v54 = vpop.f32.mrf.mxu1 }
 0x139   :  { %v5867_v55 = vpop.f32.mrf.mxu0  ;;  %v5869_v56 = vpop.f32.mrf.mxu1  ;;  %2720 = vmatmul.mubr.bf16.gmra.mxu1 %v4926_v45  ;;  %3153 = vmatmul.mubr.bf16.gmra.mxu0 %v4929_v46  ;;  %v4944_v45 = vld [vmem:[%s7137_s0 + $0x1b8] ss:$24 sps:$4 sm:$0xff]  }
 0x13a   :  { %7154 = vst [vmem:[#allocation16_spill] sm:$0xff] %v5869_v56  ;;  %2727 = vmatprep.mubr.bf16.mxu1 %v4934_v49  ;;  %3160 = vmatprep.mubr.bf16.mxu0 %v4937_v50  ;;  %v4947_v46 = vld [vmem:[%s7137_s0 + $0x1c0] ss:$24 sps:$4 sm:$0xff]   ;;  %v4952_v49 = vld [vmem:[%s7137_s0 + $0x1ec] ss:$24 sps:$4 sm:$0xff]  }
 0x13b   :  { %v2298_v57 = vpop.f32.mrf.mxu0  ;;  %v2498_v58 = vpop.f32.mrf.mxu1  ;;  %v4955_v50 = vld [vmem:[%s7137_s0 + $0x1f4] ss:$24 sps:$4 sm:$0xff]  }
 0x13d   :  { %v5871_v61 = vpop.f32.mrf.mxu0  ;;  %v5873_v62 = vpop.f32.mrf.mxu1 }
 0x13e   :  { %7155 = vst [vmem:[#allocation17_spill] sm:$0xff] %v5873_v62  ;;  %v4998_v62 = vld [vmem:[%s7137_s0 + $0x368] ss:$24 sps:$4 sm:$0xff]  }
 0x13f   :  { %v2301_v6 = vpop.f32.mrf.mxu0  ;;  %v2501_v7 = vpop.f32.mrf.mxu1 }
 0x140   :  { %v4950_v6 = vld [vmem:[%s7137_s0 + $0x1e8] ss:$24 sps:$4 sm:$0xff]  }
 0x141   :  { %v5887_v10 = vpop.f32.mrf.mxu0  ;;  %v5889_v11 = vpop.f32.mrf.mxu1  ;;  %2728 = vmatmul.mubr.bf16.gmra.mxu1 %v4932_v2  ;;  %3161 = vmatmul.mubr.bf16.gmra.mxu0 %v4935_v3  ;;  %v4953_v7 = vld [vmem:[%s7137_s0 + $0x1f0] ss:$24 sps:$4 sm:$0xff]  }
 0x142   :  { %7156 = vst [vmem:[#allocation18_spill] sm:$0xff] %v5889_v11  ;;  %2735 = vmatprep.mubr.bf16.mxu1 %v4940_v4  ;;  %3168 = vmatprep.mubr.bf16.mxu0 %v4943_v5 }
 0x143   :  { %v2306_v14 = vpop.f32.mrf.mxu0  ;;  %v2506_v15 = vpop.f32.mrf.mxu1 }
 0x144   :  { %v4958_v14 = vld [vmem:[%s7137_s0 + $0x21c] ss:$24 sps:$4 sm:$0xff]  }
 0x145   :  { %v5891_v16 = vpop.f32.mrf.mxu0  ;;  %v5893_v17 = vpop.f32.mrf.mxu1  ;;  %v4961_v15 = vld [vmem:[%s7137_s0 + $0x224] ss:$24 sps:$4 sm:$0xff]  }
 0x146   :  { %7157 = vst [vmem:[#allocation19_spill] sm:$0xff] %v5893_v17  ;;  %v4992_v17 = vld [vmem:[%s7137_s0 + $0x338] ss:$24 sps:$4 sm:$0xff]  }
 0x147   :  { %v2309_v29 = vpop.f32.mrf.mxu0  ;;  %v2509_v30 = vpop.f32.mrf.mxu1 }
 0x149   :  { %v5907_v31 = vpop.f32.mrf.mxu0  ;;  %v5909_v32 = vpop.f32.mrf.mxu1  ;;  %2736 = vmatmul.mubr.bf16.gmra.mxu1 %v4938_v18  ;;  %3169 = vmatmul.mubr.bf16.gmra.mxu0 %v4941_v19 }
 0x14a   :  { %7158 = vst [vmem:[#allocation20_spill] sm:$0xff] %v5909_v32  ;;  %2743 = vmatprep.mubr.bf16.mxu1 %v4946_v22  ;;  %3176 = vmatprep.mubr.bf16.mxu0 %v4949_v23 }
 0x14b   :  { %v2314_v33 = vpop.f32.mrf.mxu0  ;;  %v2514_v34 = vpop.f32.mrf.mxu1 }
 0x14d   :  { %v5911_v41 = vpop.f32.mrf.mxu0  ;;  %v5913_v42 = vpop.f32.mrf.mxu1 }
 0x14e   :  { %7159 = vst [vmem:[#allocation21_spill] sm:$0xff] %v5913_v42  ;;  %v4986_v42 = vld [vmem:[%s7137_s0 + $0x308] ss:$24 sps:$4 sm:$0xff]  }
 0x14f   :  { %v2317_v53 = vpop.f32.mrf.mxu0  ;;  %v2517_v54 = vpop.f32.mrf.mxu1 }
 0x151   :  { %v5927_v57 = vpop.f32.mrf.mxu0  ;;  %v5929_v58 = vpop.f32.mrf.mxu1  ;;  %2744 = vmatmul.mubr.bf16.gmra.mxu1 %v4944_v45  ;;  %3177 = vmatmul.mubr.bf16.gmra.mxu0 %v4947_v46  ;;  %v4956_v45 = vld [vmem:[%s7137_s0 + $0x218] ss:$24 sps:$4 sm:$0xff]  }
 0x152   :  { %7160 = vst [vmem:[#allocation22_spill] sm:$0xff] %v5929_v58  ;;  %2751 = vmatprep.mubr.bf16.mxu1 %v4952_v49  ;;  %3184 = vmatprep.mubr.bf16.mxu0 %v4955_v50  ;;  %v4959_v46 = vld [vmem:[%s7137_s0 + $0x220] ss:$24 sps:$4 sm:$0xff]   ;;  %v4964_v49 = vld [vmem:[%s7137_s0 + $0x24c] ss:$24 sps:$4 sm:$0xff]  }
 0x153   :  { %v2322_v2 = vpop.f32.mrf.mxu0  ;;  %v2522_v3 = vpop.f32.mrf.mxu1  ;;  %v4967_v50 = vld [vmem:[%s7137_s0 + $0x254] ss:$24 sps:$4 sm:$0xff]  }
 0x155   :  { %v5931_v4 = vpop.f32.mrf.mxu0  ;;  %v5933_v5 = vpop.f32.mrf.mxu1 }
 0x156   :  { %7161 = vst [vmem:[#allocation23_spill] sm:$0xff] %v5933_v5  ;;  %v4980_v5 = vld [vmem:[%s7137_s0 + $0x2d8] ss:$24 sps:$4 sm:$0xff]  }
 0x157   :  { %v2325_v18 = vpop.f32.mrf.mxu0  ;;  %v2525_v19 = vpop.f32.mrf.mxu1 }
 0x158   :  { %v4962_v18 = vld [vmem:[%s7137_s0 + $0x248] ss:$24 sps:$4 sm:$0xff]  }
 0x159   :  { %v5947_v22 = vpop.f32.mrf.mxu0  ;;  %v5949_v23 = vpop.f32.mrf.mxu1  ;;  %2752 = vmatmul.mubr.bf16.gmra.mxu1 %v4950_v6  ;;  %3185 = vmatmul.mubr.bf16.gmra.mxu0 %v4953_v7  ;;  %v4965_v19 = vld [vmem:[%s7137_s0 + $0x250] ss:$24 sps:$4 sm:$0xff]  }
 0x15a   :  { %7162 = vst [vmem:[#allocation24_spill] sm:$0xff] %v5949_v23  ;;  %2759 = vmatprep.mubr.bf16.mxu1 %v4958_v14  ;;  %3192 = vmatprep.mubr.bf16.mxu0 %v4961_v15 }
 0x15b   :  { %v2330_v29 = vpop.f32.mrf.mxu0  ;;  %v2530_v30 = vpop.f32.mrf.mxu1 }
 0x15c   :  { %v4970_v29 = vld [vmem:[%s7137_s0 + $0x27c] ss:$24 sps:$4 sm:$0xff]  }
 0x15d   :  { %v5951_v33 = vpop.f32.mrf.mxu0  ;;  %v5953_v34 = vpop.f32.mrf.mxu1  ;;  %v4973_v30 = vld [vmem:[%s7137_s0 + $0x284] ss:$24 sps:$4 sm:$0xff]  }
 0x15e   :  { %7163 = vst [vmem:[#allocation25_spill] sm:$0xff] %v5953_v34  ;;  %v4974_v34 = vld [vmem:[%s7137_s0 + $0x2a8] ss:$24 sps:$4 sm:$0xff]  }
 0x15f   :  { %v2333_v53 = vpop.f32.mrf.mxu0  ;;  %v2533_v54 = vpop.f32.mrf.mxu1 }
 0x161   :  { %v5967_v2 = vpop.f32.mrf.mxu0  ;;  %v5969_v3 = vpop.f32.mrf.mxu1  ;;  %2760 = vmatmul.mubr.bf16.gmra.mxu1 %v4956_v45  ;;  %3193 = vmatmul.mubr.bf16.gmra.mxu0 %v4959_v46 }
 0x162   :  { %7164 = vst [vmem:[#allocation26_spill] sm:$0xff] %v5969_v3  ;;  %2767 = vmatprep.mubr.bf16.mxu1 %v4964_v49  ;;  %3200 = vmatprep.mubr.bf16.mxu0 %v4967_v50 }
 0x163   :  { %v2338_v6 = vpop.f32.mrf.mxu0  ;;  %v2538_v7 = vpop.f32.mrf.mxu1 }
 0x165   :  { %v5971_v14 = vpop.f32.mrf.mxu0  ;;  %v5973_v15 = vpop.f32.mrf.mxu1 }
 0x166   :  { %7165 = vst [vmem:[#allocation27_spill] sm:$0xff] %v5973_v15  ;;  %v4968_v15 = vld [vmem:[%s7137_s0 + $0x278] ss:$24 sps:$4 sm:$0xff]  }
 0x167   :  { %v2341_v45 = vpop.f32.mrf.mxu0  ;;  %v2541_v46 = vpop.f32.mrf.mxu1 }
 0x168   :  { %v4971_v45 = vld [vmem:[%s7137_s0 + $0x280] ss:$24 sps:$4 sm:$0xff]  }
 0x169   :  { %v5987_v49 = vpop.f32.mrf.mxu0  ;;  %v5989_v50 = vpop.f32.mrf.mxu1  ;;  %2768 = vmatmul.mubr.bf16.gmra.mxu1 %v4962_v18  ;;  %3201 = vmatmul.mubr.bf16.gmra.mxu0 %v4965_v19  ;;  %v4976_v18 = vld [vmem:[%s7137_s0 + $0x2ac] ss:$24 sps:$4 sm:$0xff]  }
 0x16a   :  { %7166 = vst [vmem:[#allocation28_spill] sm:$0xff] %v5989_v50  ;;  %2775 = vmatprep.mubr.bf16.mxu1 %v4970_v29  ;;  %3208 = vmatprep.mubr.bf16.mxu0 %v4973_v30  ;;  %v4979_v19 = vld [vmem:[%s7137_s0 + $0x2b4] ss:$24 sps:$4 sm:$0xff]  }
 0x16b   :  { %v2346_v53 = vpop.f32.mrf.mxu0  ;;  %v2546_v54 = vpop.f32.mrf.mxu1 }
 0x16d   :  { %v5991_v6 = vpop.f32.mrf.mxu0  ;;  %v5993_v7 = vpop.f32.mrf.mxu1 }
 0x16e   :  { %7167 = vst [vmem:[#allocation29_spill] sm:$0xff] %v5993_v7 }
 0x16f   :  { %v2349_v29 = vpop.f32.mrf.mxu0  ;;  %v2549_v30 = vpop.f32.mrf.mxu1 }
 0x170   :  { %v4977_v29 = vld [vmem:[%s7137_s0 + $0x2b0] ss:$24 sps:$4 sm:$0xff]  }
 0x171   :  { %v6007_v46 = vpop.f32.mrf.mxu0  ;;  %v6009_v53 = vpop.f32.mrf.mxu1  ;;  %2776 = vmatmul.mubr.bf16.gmra.mxu1 %v4968_v15  ;;  %3209 = vmatmul.mubr.bf16.gmra.mxu0 %v4971_v45  ;;  %v4982_v15 = vld [vmem:[%s7137_s0 + $0x2dc] ss:$24 sps:$4 sm:$0xff]  }
 0x172   :  { %7168 = vst [vmem:[#allocation30_spill] sm:$0xff] %v6009_v53  ;;  %2783 = vmatprep.mubr.bf16.mxu1 %v4976_v18  ;;  %3216 = vmatprep.mubr.bf16.mxu0 %v4979_v19 }
 0x173   :  { %v2354_v54 = vpop.f32.mrf.mxu0  ;;  %v2554_v7 = vpop.f32.mrf.mxu1 }
 0x174   :  { %v4985_v7 = vld [vmem:[%s7137_s0 + $0x2e4] ss:$24 sps:$4 sm:$0xff]  }
 0x175   :  { %v6011_v50 = vpop.f32.mrf.mxu0  ;;  %v6013_v3 = vpop.f32.mrf.mxu1 }
 0x176   :  { %7169 = vst [vmem:[#allocation31_spill] sm:$0xff] %v6013_v3 }
 0x177   :  { %v2357_v45 = vpop.f32.mrf.mxu0  ;;  %v2557_v18 = vpop.f32.mrf.mxu1 }
 0x178   :  { %v4983_v45 = vld [vmem:[%s7137_s0 + $0x2e0] ss:$24 sps:$4 sm:$0xff]  }
 0x179   :  { %v6027_v19 = vpop.f32.mrf.mxu0  ;;  %v6029_v30 = vpop.f32.mrf.mxu1  ;;  %2784 = vmatmul.mubr.bf16.gmra.mxu1 %v4974_v34  ;;  %3217 = vmatmul.mubr.bf16.gmra.mxu0 %v4977_v29  ;;  %v4988_v34 = vld [vmem:[%s7137_s0 + $0x30c] ss:$24 sps:$4 sm:$0xff]  }
 0x17a   :  { %7170 = vst [vmem:[#allocation32_spill] sm:$0xff] %v6029_v30  ;;  %2791 = vmatprep.mubr.bf16.mxu1 %v4982_v15  ;;  %3224 = vmatprep.mubr.bf16.mxu0 %v4985_v7 }
 0x17b   :  { %v2362_v54 = vpop.f32.mrf.mxu0  ;;  %v2562_v3 = vpop.f32.mrf.mxu1 }
 0x17c   :  { %v4991_v3 = vld [vmem:[%s7137_s0 + $0x314] ss:$24 sps:$4 sm:$0xff]  }
 0x17d   :  { %v6031_v53 = vpop.f32.mrf.mxu0  ;;  %v6033_v23 = vpop.f32.mrf.mxu1 }
 0x17e   :  { %7171 = vst [vmem:[#allocation33_spill] sm:$0xff] %v6033_v23 }
 0x17f   :  { %v2365_v29 = vpop.f32.mrf.mxu0  ;;  %v2565_v15 = vpop.f32.mrf.mxu1 }
 0x180   :  { %v4989_v29 = vld [vmem:[%s7137_s0 + $0x310] ss:$24 sps:$4 sm:$0xff]  }
 0x181   :  { %v6047_v7 = vpop.f32.mrf.mxu0  ;;  %v6049_v18 = vpop.f32.mrf.mxu1  ;;  %2792 = vmatmul.mubr.bf16.gmra.mxu1 %v4980_v5  ;;  %3225 = vmatmul.mubr.bf16.gmra.mxu0 %v4983_v45  ;;  %v4994_v5 = vld [vmem:[%s7137_s0 + $0x33c] ss:$24 sps:$4 sm:$0xff]  }
 0x182   :  { %7172 = vst [vmem:[#allocation34_spill] sm:$0xff] %v6049_v18  ;;  %2799 = vmatprep.mubr.bf16.mxu1 %v4988_v34  ;;  %3232 = vmatprep.mubr.bf16.mxu0 %v4991_v3 }
 0x183   :  { %v2370_v54 = vpop.f32.mrf.mxu0  ;;  %v2570_v23 = vpop.f32.mrf.mxu1 }
 0x184   :  { %v4997_v23 = vld [vmem:[%s7137_s0 + $0x344] ss:$24 sps:$4 sm:$0xff]  }
 0x185   :  { %v6051_v30 = vpop.f32.mrf.mxu0  ;;  %v6053_v58 = vpop.f32.mrf.mxu1 }
 0x186   :  { %7173 = vst [vmem:[#allocation35_spill] sm:$0xff] %v6053_v58 }
 0x187   :  { %v2373_v45 = vpop.f32.mrf.mxu0  ;;  %v2573_v34 = vpop.f32.mrf.mxu1 }
 0x188   :  { %v4995_v45 = vld [vmem:[%s7137_s0 + $0x340] ss:$24 sps:$4 sm:$0xff]  }
 0x189   :  { %v6067_v3 = vpop.f32.mrf.mxu0  ;;  %v6069_v15 = vpop.f32.mrf.mxu1  ;;  %2800 = vmatmul.mubr.bf16.gmra.mxu1 %v4986_v42  ;;  %3233 = vmatmul.mubr.bf16.gmra.mxu0 %v4989_v29  ;;  %v5000_v42 = vld [vmem:[%s7137_s0 + $0x36c] ss:$24 sps:$4 sm:$0xff]  }
 0x18a   :  { %7174 = vst [vmem:[#allocation36_spill] sm:$0xff] %v6069_v15  ;;  %2807 = vmatprep.mubr.bf16.mxu1 %v4994_v5  ;;  %3240 = vmatprep.mubr.bf16.mxu0 %v4997_v23 }
 0x18b   :  { %v2378_v54 = vpop.f32.mrf.mxu0  ;;  %v2578_v58 = vpop.f32.mrf.mxu1 }
 0x18c   :  { %v5003_v58 = vld [vmem:[%s7137_s0 + $0x374] ss:$24 sps:$4 sm:$0xff]  }
 0x18d   :  { %v6071_v18 = vpop.f32.mrf.mxu0  ;;  %v6073_v32 = vpop.f32.mrf.mxu1 }
 0x18e   :  { %7175 = vst [vmem:[#allocation37_spill] sm:$0xff] %v6073_v32 }
 0x18f   :  { %v2381_v29 = vpop.f32.mrf.mxu0  ;;  %v2581_v5 = vpop.f32.mrf.mxu1 }
 0x190   :  { %v5001_v29 = vld [vmem:[%s7137_s0 + $0x370] ss:$24 sps:$4 sm:$0xff]  }
 0x191   :  { %v6087_v23 = vpop.f32.mrf.mxu0  ;;  %v6089_v34 = vpop.f32.mrf.mxu1  ;;  %2808 = vmatmul.mubr.bf16.gmra.mxu1 %v4992_v17  ;;  %3241 = vmatmul.mubr.bf16.gmra.mxu0 %v4995_v45  ;;  %v5006_v17 = vld [vmem:[%s7137_s0 + $0x39c] ss:$24 sps:$4 sm:$0xff]  }
 0x192   :  { %7176 = vst [vmem:[#allocation38_spill] sm:$0xff] %v6089_v34  ;;  %2815 = vmatprep.mubr.bf16.mxu1 %v5000_v42  ;;  %3248 = vmatprep.mubr.bf16.mxu0 %v5003_v58 }
 0x193   :  { %v2386_v54 = vpop.f32.mrf.mxu0  ;;  %v2586_v32 = vpop.f32.mrf.mxu1 }
 0x194   :  { %v5009_v32 = vld [vmem:[%s7137_s0 + $0x3a4] ss:$24 sps:$4 sm:$0xff]  }
 0x195   :  { %v6091_v15 = vpop.f32.mrf.mxu0  ;;  %v6093_v11 = vpop.f32.mrf.mxu1 }
 0x196   :  { %7177 = vst [vmem:[#allocation39_spill] sm:$0xff] %v6093_v11 }
 0x197   :  { %v2389_v45 = vpop.f32.mrf.mxu0  ;;  %v2589_v42 = vpop.f32.mrf.mxu1 }
 0x198   :  { %v5007_v45 = vld [vmem:[%s7137_s0 + $0x3a0] ss:$24 sps:$4 sm:$0xff]  }
 0x199   :  { %v6107_v58 = vpop.f32.mrf.mxu0  ;;  %v6109_v5 = vpop.f32.mrf.mxu1  ;;  %2816 = vmatmul.mubr.bf16.gmra.mxu1 %v4998_v62  ;;  %3249 = vmatmul.mubr.bf16.gmra.mxu0 %v5001_v29  ;;  %v5012_v62 = vld [vmem:[%s7137_s0 + $0x3cc] ss:$24 sps:$4 sm:$0xff]  }
 0x19a   :  { %7178 = vst [vmem:[#allocation40_spill] sm:$0xff] %v6109_v5  ;;  %2823 = vmatprep.mubr.bf16.mxu1 %v5006_v17  ;;  %3256 = vmatprep.mubr.bf16.mxu0 %v5009_v32 }
 0x19b   :  { %v2394_v54 = vpop.f32.mrf.mxu0  ;;  %v2594_v11 = vpop.f32.mrf.mxu1 }
 0x19c   :  { %v5015_v11 = vld [vmem:[%s7137_s0 + $0x3d4] ss:$24 sps:$4 sm:$0xff]  }
 0x19d   :  { %v6111_v34 = vpop.f32.mrf.mxu0  ;;  %v6113_v56 = vpop.f32.mrf.mxu1 }
 0x19e   :  { %7179 = vst [vmem:[#allocation41_spill] sm:$0xff] %v6113_v56 }
 0x19f   :  { %v2397_v29 = vpop.f32.mrf.mxu0  ;;  %v2597_v17 = vpop.f32.mrf.mxu1 }
 0x1a0   :  { %v5013_v29 = vld [vmem:[%s7137_s0 + $0x3d0] ss:$24 sps:$4 sm:$0xff]  }
 0x1a1   :  { %v6127_v32 = vpop.f32.mrf.mxu0  ;;  %v6129_v42 = vpop.f32.mrf.mxu1  ;;  %2824 = vmatmul.mubr.bf16.gmra.mxu1 %v5004_v44  ;;  %3257 = vmatmul.mubr.bf16.gmra.mxu0 %v5007_v45  ;;  %v5018_v44 = vld [vmem:[%s7137_s0 + $0x3fc] ss:$24 sps:$4 sm:$0xff]  }
 0x1a2   :  { %7180 = vst [vmem:[#allocation42_spill] sm:$0xff] %v6129_v42  ;;  %2831 = vmatprep.mubr.bf16.mxu1 %v5012_v62  ;;  %3264 = vmatprep.mubr.bf16.mxu0 %v5015_v11 }
 0x1a3   :  { %v2402_v54 = vpop.f32.mrf.mxu0  ;;  %v2602_v56 = vpop.f32.mrf.mxu1 }
 0x1a4   :  { %v5021_v56 = vld [vmem:[%s7137_s0 + $0x404] ss:$24 sps:$4 sm:$0xff]  }
 0x1a5   :  { %v6131_v5 = vpop.f32.mrf.mxu0  ;;  %v6133_v38 = vpop.f32.mrf.mxu1 }
 0x1a6   :  { %7181 = vst [vmem:[#allocation43_spill] sm:$0xff] %v6133_v38 }
 0x1a7   :  { %v2405_v45 = vpop.f32.mrf.mxu0  ;;  %v2605_v62 = vpop.f32.mrf.mxu1 }
 0x1a8   :  { %v5019_v45 = vld [vmem:[%s7137_s0 + $0x400] ss:$24 sps:$4 sm:$0xff]  }
 0x1a9   :  { %v6147_v11 = vpop.f32.mrf.mxu0  ;;  %v6149_v17 = vpop.f32.mrf.mxu1  ;;  %2832 = vmatmul.mubr.bf16.gmra.mxu1 %v5010_v0  ;;  %3265 = vmatmul.mubr.bf16.gmra.mxu0 %v5013_v29  ;;  %v5024_v0 = vld [vmem:[%s7137_s0 + $0x42c] ss:$24 sps:$4 sm:$0xff]  }
 0x1aa   :  { %7182 = vst [vmem:[#allocation44_spill] sm:$0xff] %v6149_v17  ;;  %2839 = vmatprep.mubr.bf16.mxu1 %v5018_v44  ;;  %3272 = vmatprep.mubr.bf16.mxu0 %v5021_v56 }
 0x1ab   :  { %v2410_v54 = vpop.f32.mrf.mxu0  ;;  %v2610_v38 = vpop.f32.mrf.mxu1 }
 0x1ac   :  { %v5027_v38 = vld [vmem:[%s7137_s0 + $0x434] ss:$24 sps:$4 sm:$0xff]  }
 0x1ad   :  { %v6151_v42 = vpop.f32.mrf.mxu0  ;;  %v6153_v21 = vpop.f32.mrf.mxu1 }
 0x1ae   :  { %7183 = vst [vmem:[#allocation45_spill] sm:$0xff] %v6153_v21 }
 0x1af   :  { %v2413_v29 = vpop.f32.mrf.mxu0  ;;  %v2613_v44 = vpop.f32.mrf.mxu1 }
 0x1b0   :  { %v5025_v29 = vld [vmem:[%s7137_s0 + $0x430] ss:$24 sps:$4 sm:$0xff]  }
 0x1b1   :  { %v6167_v56 = vpop.f32.mrf.mxu0  ;;  %v6169_v62 = vpop.f32.mrf.mxu1  ;;  %2840 = vmatmul.mubr.bf16.gmra.mxu1 %v5016_v13  ;;  %3273 = vmatmul.mubr.bf16.gmra.mxu0 %v5019_v45  ;;  %v5030_v13 = vld [vmem:[%s7137_s0 + $0x45c] ss:$24 sps:$4 sm:$0xff]  }
 0x1b2   :  { %7184 = vst [vmem:[#allocation46_spill] sm:$0xff] %v6169_v62  ;;  %2847 = vmatprep.mubr.bf16.mxu1 %v5024_v0  ;;  %3280 = vmatprep.mubr.bf16.mxu0 %v5027_v38 }
 0x1b3   :  { %v2418_v54 = vpop.f32.mrf.mxu0  ;;  %v2618_v21 = vpop.f32.mrf.mxu1 }
 0x1b4   :  { %v5033_v21 = vld [vmem:[%s7137_s0 + $0x464] ss:$24 sps:$4 sm:$0xff]  }
 0x1b5   :  { %v6171_v17 = vpop.f32.mrf.mxu0  ;;  %v6173_v9 = vpop.f32.mrf.mxu1 }
 0x1b6   :  { %7185 = vst [vmem:[#allocation47_spill] sm:$0xff] %v6173_v9 }
 0x1b7   :  { %v2421_v45 = vpop.f32.mrf.mxu0  ;;  %v2621_v0 = vpop.f32.mrf.mxu1 }
 0x1b8   :  { %v5031_v45 = vld [vmem:[%s7137_s0 + $0x460] ss:$24 sps:$4 sm:$0xff]  }
 0x1b9   :  { %v6187_v38 = vpop.f32.mrf.mxu0  ;;  %v6189_v44 = vpop.f32.mrf.mxu1  ;;  %2848 = vmatmul.mubr.bf16.gmra.mxu1 %v5022_v1  ;;  %3281 = vmatmul.mubr.bf16.gmra.mxu0 %v5025_v29  ;;  %v5036_v1 = vld [vmem:[%s7137_s0 + $0x48c] ss:$24 sps:$4 sm:$0xff]  }
 0x1ba   :  { %7186 = vst [vmem:[#allocation48_spill] sm:$0xff] %v6189_v44  ;;  %2855 = vmatprep.mubr.bf16.mxu1 %v5030_v13  ;;  %3288 = vmatprep.mubr.bf16.mxu0 %v5033_v21 }
 0x1bb   :  { %v2426_v54 = vpop.f32.mrf.mxu0  ;;  %v2626_v9 = vpop.f32.mrf.mxu1 }
 0x1bc   :  { %v5039_v9 = vld [vmem:[%s7137_s0 + $0x494] ss:$24 sps:$4 sm:$0xff]  }
 0x1bd   :  { %v6191_v62 = vpop.f32.mrf.mxu0  ;;  %v6193_v60 = vpop.f32.mrf.mxu1 }
 0x1be   :  { %7187 = vst [vmem:[#allocation49_spill] sm:$0xff] %v6191_v62  ;;  %7188 = vst [vmem:[#allocation50_spill] sm:$0xff] %v6193_v60 }
 0x1bf   :  { %v2429_v29 = vpop.f32.mrf.mxu0  ;;  %v2629_v13 = vpop.f32.mrf.mxu1 }
 0x1c0   :  { %v5037_v29 = vld [vmem:[%s7137_s0 + $0x490] ss:$24 sps:$4 sm:$0xff]  }
 0x1c1   :  { %v6207_v21 = vpop.f32.mrf.mxu0  ;;  %v6209_v0 = vpop.f32.mrf.mxu1  ;;  %2856 = vmatmul.mubr.bf16.gmra.mxu1 %v5028_v52  ;;  %3289 = vmatmul.mubr.bf16.gmra.mxu0 %v5031_v45  ;;  %v5042_v52 = vld [vmem:[%s7137_s0 + $0x4bc] ss:$24 sps:$4 sm:$0xff]   ;;  %v6230_v45 = vld [vmem:[%s7138_s2] ss:$0 sm:$0xff] }
 0x1c2   :  { %7189 = vst [vmem:[#allocation51_spill] sm:$0xff] %v6207_v21  ;;  %7190 = vst [vmem:[#allocation52_spill] sm:$0xff] %v6209_v0  ;;  %2863 = vmatprep.mubr.bf16.mxu1 %v5036_v1  ;;  %3296 = vmatprep.mubr.bf16.mxu0 %v5039_v9  ;;  %v2241_v13 = vadd.f32 %v6230_v45, %v5727_v24  ;;  %v2244_v25 = vadd.f32 %v6230_v45, %v5731_v27  ;;  %v5043_v24 = vld [vmem:[%s7137_s0 + $0x4c0] ss:$24 sps:$4 sm:$0xff]   ;;  %v5051_v27 = vld [vmem:[%s7137_s0 + $0x4f4] ss:$24 sps:$4 sm:$0xff]  }
 0x1c3   :  { %v2434_v54 = vpop.f32.mrf.mxu0  ;;  %v2634_v60 = vpop.f32.mrf.mxu1 }
 0x1c4   :  { %v5045_v60 = vld [vmem:[%s7137_s0 + $0x4c4] ss:$24 sps:$4 sm:$0xff]  }
 0x1c5   :  { %v6211_v44 = vpop.f32.mrf.mxu0  ;;  %v6213_v48 = vpop.f32.mrf.mxu1 }
 0x1c6   :  { %7191 = vst [vmem:[#allocation53_spill] sm:$0xff] %v6211_v44  ;;  %7192 = vst [vmem:[#allocation54_spill] sm:$0xff] %v6213_v48 }
 0x1c7   :  { %v2437_v1 = vpop.f32.mrf.mxu0  ;;  %v2637_v9 = vpop.f32.mrf.mxu1 }
 0x1c8   :  { %v5040_v1 = vld [vmem:[%s7137_s0 + $0x4b8] ss:$24 sps:$4 sm:$0xff]  }
 0x1c9   :  { %v2673_v54 = vpop.f32.mrf.mxu1  ;;  %2864 = vmatmul.mubr.bf16.gmra.mxu1 %v5034_v40  ;;  %v3106_v48 = vpop.f32.mrf.mxu0  ;;  %3297 = vmatmul.mubr.bf16.gmra.mxu0 %v5037_v29 }
 0x1ca   :  { %v2674_v0 = vadd.f32 %v2673_v54, %v2241_v13  ;;  %2871 = vmatprep.mubr.bf16.mxu1 %v5042_v52  ;;  %3304 = vmatprep.mubr.bf16.mxu0 %v5045_v60 }
 0x1cb   :  { %v2675_v36 = vpop.f32.mrf.mxu1  ;;  %v3108_v28 = vpop.f32.mrf.mxu0 }
 0x1cc   :  { %v3107_v44 = vadd.f32 %v3106_v48, %v2674_v0  ;;  %v5048_v28 = vld [vmem:[%s7137_s0 + $0x4ec] ss:$24 sps:$4 sm:$0xff]   ;;  %v2249_v0 = vadd.f32 %v6230_v45, %v5747_v35  ;;  %v2252_v35 = vadd.f32 %v6230_v45, %v5751_v39  ;;  %v5054_v39 = vld [vmem:[%s7137_s0 + $0x51c] ss:$24 sps:$4 sm:$0xff]  }
 0x1cd   :  { %v2676_v21 = vpop.f32.mrf.mxu1  ;;  %v3109_v62 = vpop.f32.mrf.mxu0 }
 0x1ce   :  { %v3505_v40 = vmax.f32 %v3107_v44, 0.0  ;;  %v2677_v29 = vadd.f32 %v2676_v21, %v2244_v25 }
 0x1cf   :  { %v2678_v36 = vpop.f32.mrf.mxu1  ;;  %v3111_v48 = vpop.f32.mrf.mxu0 }
 0x1d0   :  { %v4559_v52 = vpack.c.bf16 %v3505_v40, %v3505_v40  ;;  %v3110_v60 = vadd.f32 %v3109_v62, %v2677_v29  ;;  %v5049_v36 = vld [vmem:[%s7137_s0 + $0x4f0] ss:$24 sps:$4 sm:$0xff]   ;;  %v5057_v48 = vld [vmem:[%s7137_s0 + $0x524] ss:$24 sps:$4 sm:$0xff]  }
 0x1d1   :  { %v2681_v9 = vpop.f32.mrf.mxu1  ;;  %2872 = vmatmul.mubr.bf16.gmra.mxu1 %v5040_v1  ;;  %v3114_v44 = vpop.f32.mrf.mxu0  ;;  %3305 = vmatmul.mubr.bf16.gmra.mxu0 %v5043_v24  ;;  %v5046_v24 = vld [vmem:[%s7137_s0 + $0x4e8] ss:$24 sps:$4 sm:$0xff]  }
 0x1d2   :  { %4006 = vst.msk [vmem:[%s7139_s3] sm:$0xf] %vm4005_vm0, %v4559_v52  ;;  %v3506_v25 = vmax.f32 %v3110_v60, 0.0  ;;  %v2682_v21 = vadd.f32 %v2681_v9, %v2249_v0  ;;  %2879 = vmatprep.mubr.bf16.mxu1 %v5048_v28  ;;  %3312 = vmatprep.mubr.bf16.mxu0 %v5051_v27  ;;  %v2257_v60 = vadd.f32 %v6230_v45, %v5767_v47 }
 0x1d3   :  { %v2683_v13 = vpop.f32.mrf.mxu1  ;;  %v3116_v54 = vpop.f32.mrf.mxu0  ;;  %v2260_v47 = vadd.f32 %v6230_v45, %v5771_v51  ;;  %v5060_v51 = vld [vmem:[%s7137_s0 + $0x54c] ss:$24 sps:$4 sm:$0xff]  }
 0x1d4   :  { %v4560_v40 = vpack.c.bf16 %v3506_v25, %v3506_v25  ;;  %v3115_v62 = vadd.f32 %v3114_v44, %v2682_v21 }
 0x1d5   :  { %v2684_v29 = vpop.f32.mrf.mxu1  ;;  %v3117_v1 = vpop.f32.mrf.mxu0 }
 0x1d6   :  { %4007 = vst.msk [vmem:[%s7139_s3 + $0x4] sm:$0xf] %vm4005_vm0, %v4560_v40  ;;  %v3507_v28 = vmax.f32 %v3115_v62, 0.0  ;;  %v2685_v27 = vadd.f32 %v2684_v29, %v2252_v35 }
 0x1d7   :  { %v2686_v0 = vpop.f32.mrf.mxu1  ;;  %v3119_v52 = vpop.f32.mrf.mxu0 }
 0x1d8   :  { %v4561_v9 = vpack.c.bf16 %v3507_v28, %v3507_v28  ;;  %v3118_v44 = vadd.f32 %v3117_v1, %v2685_v27  ;;  %v5055_v28 = vld [vmem:[%s7137_s0 + $0x520] ss:$24 sps:$4 sm:$0xff]  }
 0x1d9   :  { %v2689_v25 = vpop.f32.mrf.mxu1  ;;  %2880 = vmatmul.mubr.bf16.gmra.mxu1 %v5046_v24  ;;  %v3122_v21 = vpop.f32.mrf.mxu0  ;;  %3313 = vmatmul.mubr.bf16.gmra.mxu0 %v5049_v36  ;;  %v5052_v36 = vld [vmem:[%s7137_s0 + $0x518] ss:$24 sps:$4 sm:$0xff]  }
 0x1da   :  { %4008 = vst.msk [vmem:[%s7139_s3 + $0x8] sm:$0xf] %vm4005_vm0, %v4561_v9  ;;  %v3508_v13 = vmax.f32 %v3118_v44, 0.0  ;;  %v2690_v54 = vadd.f32 %v2689_v25, %v2257_v60  ;;  %2887 = vmatprep.mubr.bf16.mxu1 %v5054_v39  ;;  %3320 = vmatprep.mubr.bf16.mxu0 %v5057_v48  ;;  %v5063_v48 = vld [vmem:[%s7137_s0 + $0x554] ss:$24 sps:$4 sm:$0xff]   ;;  %v2265_v60 = vadd.f32 %v6230_v45, %v5787_v59 }
 0x1db   :  { %v2691_v35 = vpop.f32.mrf.mxu1  ;;  %v3124_v40 = vpop.f32.mrf.mxu0  ;;  %v2268_v59 = vadd.f32 %v6230_v45, %v5791_v63  ;;  %v5066_v63 = vld [vmem:[%s7137_s0 + $0x57c] ss:$24 sps:$4 sm:$0xff]  }
 0x1dc   :  { %v4562_v62 = vpack.c.bf16 %v3508_v13, %v3508_v13  ;;  %v3123_v29 = vadd.f32 %v3122_v21, %v2690_v54 }
 0x1dd   :  { %v2692_v1 = vpop.f32.mrf.mxu1  ;;  %v3125_v24 = vpop.f32.mrf.mxu0 }
 0x1de   :  { %4009 = vst.msk [vmem:[%s7139_s3 + $0xc] sm:$0xf] %vm4005_vm0, %v4562_v62  ;;  %v3509_v27 = vmax.f32 %v3123_v29, 0.0  ;;  %v2693_v39 = vadd.f32 %v2692_v1, %v2260_v47 }
 0x1df   :  { %v2694_v0 = vpop.f32.mrf.mxu1  ;;  %v3127_v52 = vpop.f32.mrf.mxu0 }
 0x1e0   :  { %v4563_v9 = vpack.c.bf16 %v3509_v27, %v3509_v27  ;;  %v3126_v44 = vadd.f32 %v3125_v24, %v2693_v39  ;;  %v5058_v24 = vld [vmem:[%s7137_s0 + $0x548] ss:$24 sps:$4 sm:$0xff]   ;;  %v5069_v39 = vld [vmem:[%s7137_s0 + $0x584] ss:$24 sps:$4 sm:$0xff]   ;;  %v2273_v0 = vadd.f32 %v6230_v45, %v5807_v8  ;;  %v2276_v8 = vadd.f32 %v6230_v45, %v5811_v12 }
 0x1e1   :  { %v2697_v25 = vpop.f32.mrf.mxu1  ;;  %2888 = vmatmul.mubr.bf16.gmra.mxu1 %v5052_v36  ;;  %v3130_v21 = vpop.f32.mrf.mxu0  ;;  %3321 = vmatmul.mubr.bf16.gmra.mxu0 %v5055_v28  ;;  %v5061_v36 = vld [vmem:[%s7137_s0 + $0x550] ss:$24 sps:$4 sm:$0xff]   ;;  %v5072_v12 = vld [vmem:[%s7137_s0 + $0x5ac] ss:$24 sps:$4 sm:$0xff]  }
 0x1e2   :  { %4010 = vst.msk [vmem:[%s7139_s3 + $0x10] sm:$0xf] %vm4005_vm0, %v4563_v9  ;;  %v3510_v13 = vmax.f32 %v3126_v44, 0.0  ;;  %v2698_v54 = vadd.f32 %v2697_v25, %v2265_v60  ;;  %2895 = vmatprep.mubr.bf16.mxu1 %v5060_v51  ;;  %3328 = vmatprep.mubr.bf16.mxu0 %v5063_v48 }
 0x1e3   :  { %v2699_v35 = vpop.f32.mrf.mxu1  ;;  %v3132_v40 = vpop.f32.mrf.mxu0 }
 0x1e4   :  { %v4564_v47 = vpack.c.bf16 %v3510_v13, %v3510_v13  ;;  %v3131_v62 = vadd.f32 %v3130_v21, %v2698_v54 }
 0x1e5   :  { %v2700_v29 = vpop.f32.mrf.mxu1  ;;  %v3133_v1 = vpop.f32.mrf.mxu0 }
 0x1e6   :  { %4011 = vst.msk [vmem:[%s7139_s3 + $0x14] sm:$0xf] %vm4005_vm0, %v4564_v47  ;;  %v3511_v28 = vmax.f32 %v3131_v62, 0.0  ;;  %v2701_v27 = vadd.f32 %v2700_v29, %v2268_v59  ;;  %v5064_v62 = vld [vmem:[%s7137_s0 + $0x578] ss:$24 sps:$4 sm:$0xff]  }
 0x1e7   :  { %v2702_v51 = vpop.f32.mrf.mxu1  ;;  %v3135_v48 = vpop.f32.mrf.mxu0  ;;  %v5067_v29 = vld [vmem:[%s7137_s0 + $0x580] ss:$24 sps:$4 sm:$0xff]  }
 0x1e8   :  { %v4565_v52 = vpack.c.bf16 %v3511_v28, %v3511_v28  ;;  %v3134_v60 = vadd.f32 %v3133_v1, %v2701_v27 }
 0x1e9   :  { %v2705_v9 = vpop.f32.mrf.mxu1  ;;  %2896 = vmatmul.mubr.bf16.gmra.mxu1 %v5058_v24  ;;  %v3138_v44 = vpop.f32.mrf.mxu0  ;;  %3329 = vmatmul.mubr.bf16.gmra.mxu0 %v5061_v36  ;;  %v5075_v36 = vld [vmem:[%s7137_s0 + $0x5b4] ss:$24 sps:$4 sm:$0xff]  }
 0x1ea   :  { %4012 = vst.msk [vmem:[%s7139_s3 + $0x18] sm:$0xf] %vm4005_vm0, %v4565_v52  ;;  %v3512_v25 = vmax.f32 %v3134_v60, 0.0  ;;  %v2706_v21 = vadd.f32 %v2705_v9, %v2273_v0  ;;  %2903 = vmatprep.mubr.bf16.mxu1 %v5066_v63  ;;  %3336 = vmatprep.mubr.bf16.mxu0 %v5069_v39  ;;  %v2281_v63 = vadd.f32 %v6230_v45, %v5827_v20 }
 0x1eb   :  { %v2707_v13 = vpop.f32.mrf.mxu1  ;;  %v3140_v54 = vpop.f32.mrf.mxu0  ;;  %v2284_v20 = vadd.f32 %v6230_v45, %v5831_v26  ;;  %v5078_v26 = vld [vmem:[%s7137_s0 + $0x5dc] ss:$24 sps:$4 sm:$0xff]  }
 0x1ec   :  { %v4566_v35 = vpack.c.bf16 %v3512_v25, %v3512_v25  ;;  %v3139_v40 = vadd.f32 %v3138_v44, %v2706_v21 }
 0x1ed   :  { %v2708_v59 = vpop.f32.mrf.mxu1  ;;  %v3141_v47 = vpop.f32.mrf.mxu0 }
 0x1ee   :  { %4013 = vst.msk [vmem:[%s7139_s3 + $0x1c] sm:$0xf] %vm4005_vm0, %v4566_v35  ;;  %v3513_v1 = vmax.f32 %v3139_v40, 0.0  ;;  %v2709_v24 = vadd.f32 %v2708_v59, %v2276_v8  ;;  %v5070_v8 = vld [vmem:[%s7137_s0 + $0x5a8] ss:$24 sps:$4 sm:$0xff]  }
 0x1ef   :  { %v2710_v28 = vpop.f32.mrf.mxu1  ;;  %v3143_v27 = vpop.f32.mrf.mxu0  ;;  %v5073_v35 = vld [vmem:[%s7137_s0 + $0x5b0] ss:$24 sps:$4 sm:$0xff]  }
 0x1f0   :  { %v4567_v39 = vpack.c.bf16 %v3513_v1, %v3513_v1  ;;  %v3142_v51 = vadd.f32 %v3141_v47, %v2709_v24  ;;  %v5081_v47 = vld [vmem:[%s7137_s0 + $0x5e4] ss:$24 sps:$4 sm:$0xff]   ;;  %v2289_v1 = vadd.f32 %v6230_v45, %v5847_v37  ;;  %v2292_v37 = vadd.f32 %v6230_v45, %v5851_v43 }
 0x1f1   :  { %v2713_v48 = vpop.f32.mrf.mxu1  ;;  %2904 = vmatmul.mubr.bf16.gmra.mxu1 %v5064_v62  ;;  %v3146_v0 = vpop.f32.mrf.mxu0  ;;  %3337 = vmatmul.mubr.bf16.gmra.mxu0 %v5067_v29  ;;  %v5084_v43 = vld [vmem:[%s7137_s0 + $0x60c] ss:$24 sps:$4 sm:$0xff]  }
 0x1f2   :  { %4014 = vst.msk [vmem:[%s7139_s3 + $0x20] sm:$0xf] %vm4005_vm0, %v4567_v39  ;;  %v3514_v52 = vmax.f32 %v3142_v51, 0.0  ;;  %v2714_v60 = vadd.f32 %v2713_v48, %v2281_v63  ;;  %2911 = vmatprep.mubr.bf16.mxu1 %v5072_v12  ;;  %3344 = vmatprep.mubr.bf16.mxu0 %v5075_v36 }
 0x1f3   :  { %v2715_v9 = vpop.f32.mrf.mxu1  ;;  %v3148_v44 = vpop.f32.mrf.mxu0 }
 0x1f4   :  { %v4568_v25 = vpack.c.bf16 %v3514_v52, %v3514_v52  ;;  %v3147_v21 = vadd.f32 %v3146_v0, %v2714_v60  ;;  %v5076_v9 = vld [vmem:[%s7137_s0 + $0x5d8] ss:$24 sps:$4 sm:$0xff]  }
 0x1f5   :  { %v2716_v13 = vpop.f32.mrf.mxu1  ;;  %v3149_v54 = vpop.f32.mrf.mxu0  ;;  %v5079_v44 = vld [vmem:[%s7137_s0 + $0x5e0] ss:$24 sps:$4 sm:$0xff]  }
 0x1f6   :  { %4015 = vst.msk [vmem:[%s7139_s3 + $0x24] sm:$0xf] %vm4005_vm0, %v4568_v25  ;;  %v3515_v40 = vmax.f32 %v3147_v21, 0.0  ;;  %v2717_v59 = vadd.f32 %v2716_v13, %v2284_v20  ;;  %v5087_v21 = vld [vmem:[%s7137_s0 + $0x614] ss:$24 sps:$4 sm:$0xff]  }
 0x1f7   :  { %v2718_v62 = vpop.f32.mrf.mxu1  ;;  %v3151_v29 = vpop.f32.mrf.mxu0 }
 0x1f8   :  { %v4569_v24 = vpack.c.bf16 %v3515_v40, %v3515_v40  ;;  %v3150_v12 = vadd.f32 %v3149_v54, %v2717_v59 }
 0x1f9   :  { %v2721_v36 = vpop.f32.mrf.mxu1  ;;  %2912 = vmatmul.mubr.bf16.gmra.mxu1 %v5070_v8  ;;  %v3154_v28 = vpop.f32.mrf.mxu0  ;;  %3345 = vmatmul.mubr.bf16.gmra.mxu0 %v5073_v35  ;;  %v2297_v8 = vadd.f32 %v6230_v45, %v5867_v55  ;;  %v2300_v55 = vadd.f32 %v6230_v45, %v5871_v61  ;;  %v5090_v61 = vld [vmem:[%s7137_s0 + $0x63c] ss:$24 sps:$4 sm:$0xff]  }
 0x1fa   :  { %4016 = vst.msk [vmem:[%s7139_s3 + $0x28] sm:$0xf] %vm4005_vm0, %v4569_v24  ;;  %v3516_v27 = vmax.f32 %v3150_v12, 0.0  ;;  %v2722_v63 = vadd.f32 %v2721_v36, %v2289_v1  ;;  %2919 = vmatprep.mubr.bf16.mxu1 %v5078_v26  ;;  %3352 = vmatprep.mubr.bf16.mxu0 %v5081_v47 }
 0x1fb   :  { %v2723_v39 = vpop.f32.mrf.mxu1  ;;  %v3156_v51 = vpop.f32.mrf.mxu0 }
 0x1fc   :  { %v4570_v48 = vpack.c.bf16 %v3516_v27, %v3516_v27  ;;  %v3155_v0 = vadd.f32 %v3154_v28, %v2722_v63  ;;  %v5082_v27 = vld [vmem:[%s7137_s0 + $0x608] ss:$24 sps:$4 sm:$0xff]  }
 0x1fd   :  { %v2724_v52 = vpop.f32.mrf.mxu1  ;;  %v3157_v60 = vpop.f32.mrf.mxu0  ;;  %v5085_v63 = vld [vmem:[%s7137_s0 + $0x610] ss:$24 sps:$4 sm:$0xff]  }
 0x1fe   :  { %4017 = vst.msk [vmem:[%s7139_s3 + $0x2c] sm:$0xf] %vm4005_vm0, %v4570_v48  ;;  %v3517_v20 = vmax.f32 %v3155_v0, 0.0  ;;  %v2725_v25 = vadd.f32 %v2724_v52, %v2292_v37  ;;  %v5093_v37 = vld [vmem:[%s7137_s0 + $0x644] ss:$24 sps:$4 sm:$0xff]   ;;  %v2305_v52 = vadd.f32 %v6230_v45, %v5887_v10  ;;  %v2308_v10 = vadd.f32 %v6230_v45, %v5891_v16 }
 0x1ff   :  { %v2726_v13 = vpop.f32.mrf.mxu1  ;;  %v3159_v54 = vpop.f32.mrf.mxu0  ;;  %v5096_v16 = vld [vmem:[%s7137_s0 + $0x66c] ss:$24 sps:$4 sm:$0xff]  }
 0x200   :  { %v4571_v35 = vpack.c.bf16 %v3517_v20, %v3517_v20  ;;  %v3158_v40 = vadd.f32 %v3157_v60, %v2725_v25 }
 0x201   :  { %v2729_v59 = vpop.f32.mrf.mxu1  ;;  %2920 = vmatmul.mubr.bf16.gmra.mxu1 %v5076_v9  ;;  %v3162_v26 = vpop.f32.mrf.mxu0  ;;  %3353 = vmatmul.mubr.bf16.gmra.mxu0 %v5079_v44 }
 0x202   :  { %4018 = vst.msk [vmem:[%s7139_s3 + $0x30] sm:$0xf] %vm4005_vm0, %v4571_v35  ;;  %v3518_v47 = vmax.f32 %v3158_v40, 0.0  ;;  %v2730_v62 = vadd.f32 %v2729_v59, %v2297_v8  ;;  %2927 = vmatprep.mubr.bf16.mxu1 %v5084_v43  ;;  %3360 = vmatprep.mubr.bf16.mxu0 %v5087_v21  ;;  %v5088_v59 = vld [vmem:[%s7137_s0 + $0x638] ss:$24 sps:$4 sm:$0xff]  }
 0x203   :  { %v2731_v29 = vpop.f32.mrf.mxu1  ;;  %v3164_v1 = vpop.f32.mrf.mxu0 }
 0x204   :  { %v4572_v24 = vpack.c.bf16 %v3518_v47, %v3518_v47  ;;  %v3163_v12 = vadd.f32 %v3162_v26, %v2730_v62  ;;  %v5091_v26 = vld [vmem:[%s7137_s0 + $0x640] ss:$24 sps:$4 sm:$0xff]   ;;  %v5099_v29 = vld [vmem:[%s7137_s0 + $0x674] ss:$24 sps:$4 sm:$0xff]  }
 0x205   :  { %v2732_v36 = vpop.f32.mrf.mxu1  ;;  %v3165_v28 = vpop.f32.mrf.mxu0 }
 0x206   :  { %4019 = vst.msk [vmem:[%s7139_s3 + $0x34] sm:$0xf] %vm4005_vm0, %v4572_v24  ;;  %v3519_v39 = vmax.f32 %v3163_v12, 0.0  ;;  %v2733_v51 = vadd.f32 %v2732_v36, %v2300_v55  ;;  %v2313_v24 = vadd.f32 %v6230_v45, %v5907_v31  ;;  %v2316_v31 = vadd.f32 %v6230_v45, %v5911_v41  ;;  %v5102_v41 = vld [vmem:[%s7137_s0 + $0x69c] ss:$24 sps:$4 sm:$0xff]  }
 0x207   :  { %v2734_v48 = vpop.f32.mrf.mxu1  ;;  %v3167_v0 = vpop.f32.mrf.mxu0 }
 0x208   :  { %v4573_v60 = vpack.c.bf16 %v3519_v39, %v3519_v39  ;;  %v3166_v9 = vadd.f32 %v3165_v28, %v2733_v51 }
 0x209   :  { %v2737_v44 = vpop.f32.mrf.mxu1  ;;  %2928 = vmatmul.mubr.bf16.gmra.mxu1 %v5082_v27  ;;  %v3170_v20 = vpop.f32.mrf.mxu0  ;;  %3361 = vmatmul.mubr.bf16.gmra.mxu0 %v5085_v63 }
 0x20a   :  { %4020 = vst.msk [vmem:[%s7139_s3 + $0x38] sm:$0xf] %vm4005_vm0, %v4573_v60  ;;  %v3520_v25 = vmax.f32 %v3166_v9, 0.0  ;;  %v2738_v43 = vadd.f32 %v2737_v44, %v2305_v52  ;;  %2935 = vmatprep.mubr.bf16.mxu1 %v5090_v61  ;;  %3368 = vmatprep.mubr.bf16.mxu0 %v5093_v37  ;;  %v5094_v60 = vld [vmem:[%s7137_s0 + $0x668] ss:$24 sps:$4 sm:$0xff]  }
 0x20b   :  { %v2739_v21 = vpop.f32.mrf.mxu1  ;;  %v3172_v13 = vpop.f32.mrf.mxu0  ;;  %v5097_v9 = vld [vmem:[%s7137_s0 + $0x670] ss:$24 sps:$4 sm:$0xff]  }
 0x20c   :  { %v4574_v54 = vpack.c.bf16 %v3520_v25, %v3520_v25  ;;  %v3171_v8 = vadd.f32 %v3170_v20, %v2738_v43  ;;  %v5105_v25 = vld [vmem:[%s7137_s0 + $0x6a4] ss:$24 sps:$4 sm:$0xff]   ;;  %v2321_v13 = vadd.f32 %v6230_v45, %v5927_v57  ;;  %v2324_v57 = vadd.f32 %v6230_v45, %v5931_v4 }
 0x20d   :  { %v2740_v35 = vpop.f32.mrf.mxu1  ;;  %v3173_v40 = vpop.f32.mrf.mxu0  ;;  %v5108_v4 = vld [vmem:[%s7137_s0 + $0x6cc] ss:$24 sps:$4 sm:$0xff]  }
 0x20e   :  { %4021 = vst.msk [vmem:[%s7139_s3 + $0x3c] sm:$0xf] %vm4005_vm0, %v4574_v54  ;;  %v3521_v47 = vmax.f32 %v3171_v8, 0.0  ;;  %v2741_v62 = vadd.f32 %v2740_v35, %v2308_v10 }
 0x20f   :  { %v2742_v1 = vpop.f32.mrf.mxu1  ;;  %v3175_v55 = vpop.f32.mrf.mxu0 }
 0x210   :  { %v4575_v12 = vpack.c.bf16 %v3521_v47, %v3521_v47  ;;  %v3174_v36 = vadd.f32 %v3173_v40, %v2741_v62  ;;  %v5100_v55 = vld [vmem:[%s7137_s0 + $0x698] ss:$24 sps:$4 sm:$0xff]  }
 0x211   :  { %v2745_v28 = vpop.f32.mrf.mxu1  ;;  %2936 = vmatmul.mubr.bf16.gmra.mxu1 %v5088_v59  ;;  %v3178_v27 = vpop.f32.mrf.mxu0  ;;  %3369 = vmatmul.mubr.bf16.gmra.mxu0 %v5091_v26 }
 0x212   :  { %4022 = vst.msk [vmem:[%s7139_s3 + $0x40] sm:$0xf] %vm4005_vm0, %v4575_v12  ;;  %v3522_v63 = vmax.f32 %v3174_v36, 0.0  ;;  %v2746_v39 = vadd.f32 %v2745_v28, %v2313_v24  ;;  %2943 = vmatprep.mubr.bf16.mxu1 %v5096_v16  ;;  %3376 = vmatprep.mubr.bf16.mxu0 %v5099_v29  ;;  %v5103_v24 = vld [vmem:[%s7137_s0 + $0x6a0] ss:$24 sps:$4 sm:$0xff]  }
 0x213   :  { %v2747_v51 = vpop.f32.mrf.mxu1  ;;  %v3180_v61 = vpop.f32.mrf.mxu0  ;;  %v5111_v28 = vld [vmem:[%s7137_s0 + $0x6d4] ss:$24 sps:$4 sm:$0xff]  }
 0x214   :  { %v4576_v37 = vpack.c.bf16 %v3522_v63, %v3522_v63  ;;  %v3179_v48 = vadd.f32 %v3178_v27, %v2746_v39  ;;  %v2329_v39 = vadd.f32 %v6230_v45, %v5947_v22  ;;  %v2332_v22 = vadd.f32 %v6230_v45, %v5951_v33  ;;  %v5114_v33 = vld [vmem:[%s7137_s0 + $0x6fc] ss:$24 sps:$4 sm:$0xff]  }
 0x215   :  { %v2748_v0 = vpop.f32.mrf.mxu1  ;;  %v3181_v52 = vpop.f32.mrf.mxu0 }
 0x216   :  { %4023 = vst.msk [vmem:[%s7139_s3 + $0x44] sm:$0xf] %vm4005_vm0, %v4576_v37  ;;  %v3523_v44 = vmax.f32 %v3179_v48, 0.0  ;;  %v2749_v20 = vadd.f32 %v2748_v0, %v2316_v31 }
 0x217   :  { %v2750_v43 = vpop.f32.mrf.mxu1  ;;  %v3183_v21 = vpop.f32.mrf.mxu0 }
 0x218   :  { %v4577_v10 = vpack.c.bf16 %v3523_v44, %v3523_v44  ;;  %v3182_v54 = vadd.f32 %v3181_v52, %v2749_v20  ;;  %v5109_v43 = vld [vmem:[%s7137_s0 + $0x6d0] ss:$24 sps:$4 sm:$0xff]  }
 0x219   :  { %v2753_v8 = vpop.f32.mrf.mxu1  ;;  %2944 = vmatmul.mubr.bf16.gmra.mxu1 %v5094_v60  ;;  %v3186_v35 = vpop.f32.mrf.mxu0  ;;  %3377 = vmatmul.mubr.bf16.gmra.mxu0 %v5097_v9 }
 0x21a   :  { %4024 = vst.msk [vmem:[%s7139_s3 + $0x48] sm:$0xf] %vm4005_vm0, %v4577_v10  ;;  %v3524_v40 = vmax.f32 %v3182_v54, 0.0  ;;  %v2754_v59 = vadd.f32 %v2753_v8, %v2321_v13  ;;  %2951 = vmatprep.mubr.bf16.mxu1 %v5102_v41  ;;  %3384 = vmatprep.mubr.bf16.mxu0 %v5105_v25  ;;  %v5106_v25 = vld [vmem:[%s7137_s0 + $0x6c8] ss:$24 sps:$4 sm:$0xff]  }
 0x21b   :  { %v2755_v26 = vpop.f32.mrf.mxu1  ;;  %v3188_v47 = vpop.f32.mrf.mxu0  ;;  %v5117_v10 = vld [vmem:[%s7137_s0 + $0x704] ss:$24 sps:$4 sm:$0xff]  }
 0x21c   :  { %v4578_v62 = vpack.c.bf16 %v3524_v40, %v3524_v40  ;;  %v3187_v16 = vadd.f32 %v3186_v35, %v2754_v59  ;;  %v2337_v35 = vadd.f32 %v6230_v45, %v5967_v2  ;;  %v2340_v2 = vadd.f32 %v6230_v45, %v5971_v14  ;;  %v5120_v14 = vld [vmem:[%s7137_s0 + $0x72c] ss:$24 sps:$4 sm:$0xff]  }
 0x21d   :  { %v2756_v29 = vpop.f32.mrf.mxu1  ;;  %v3189_v1 = vpop.f32.mrf.mxu0 }
 0x21e   :  { %4025 = vst.msk [vmem:[%s7139_s3 + $0x4c] sm:$0xf] %vm4005_vm0, %v4578_v62  ;;  %v3525_v12 = vmax.f32 %v3187_v16, 0.0  ;;  %v2757_v36 = vadd.f32 %v2756_v29, %v2324_v57 }
 0x21f   :  { %v2758_v27 = vpop.f32.mrf.mxu1  ;;  %v3191_v63 = vpop.f32.mrf.mxu0 }
 0x220   :  { %v4579_v51 = vpack.c.bf16 %v3525_v12, %v3525_v12  ;;  %v3190_v61 = vadd.f32 %v3189_v1, %v2757_v36  ;;  %v5112_v36 = vld [vmem:[%s7137_s0 + $0x6f8] ss:$24 sps:$4 sm:$0xff]   ;;  %v5123_v63 = vld [vmem:[%s7137_s0 + $0x734] ss:$24 sps:$4 sm:$0xff]  }
 0x221   :  { %v2761_v31 = vpop.f32.mrf.mxu1  ;;  %2952 = vmatmul.mubr.bf16.gmra.mxu1 %v5100_v55  ;;  %v3194_v37 = vpop.f32.mrf.mxu0  ;;  %3385 = vmatmul.mubr.bf16.gmra.mxu0 %v5103_v24 }
 0x222   :  { %4026 = vst.msk [vmem:[%s7139_s3 + $0x50] sm:$0xf] %vm4005_vm0, %v4579_v51  ;;  %v3526_v48 = vmax.f32 %v3190_v61, 0.0  ;;  %v2762_v0 = vadd.f32 %v2761_v31, %v2329_v39  ;;  %2959 = vmatprep.mubr.bf16.mxu1 %v5108_v4  ;;  %3392 = vmatprep.mubr.bf16.mxu0 %v5111_v28  ;;  %v5115_v4 = vld [vmem:[%s7137_s0 + $0x700] ss:$24 sps:$4 sm:$0xff]   ;;  %v2345_v61 = vadd.f32 %v6230_v45, %v5987_v49 }
 0x223   :  { %v2763_v52 = vpop.f32.mrf.mxu1  ;;  %v3196_v60 = vpop.f32.mrf.mxu0  ;;  %v2348_v49 = vadd.f32 %v6230_v45, %v5991_v6  ;;  %v5126_v6 = vld [vmem:[%s7137_s0 + $0x75c] ss:$24 sps:$4 sm:$0xff]  }
 0x224   :  { %v4580_v9 = vpack.c.bf16 %v3526_v48, %v3526_v48  ;;  %v3195_v44 = vadd.f32 %v3194_v37, %v2762_v0 }
 0x225   :  { %v2764_v20 = vpop.f32.mrf.mxu1  ;;  %v3197_v41 = vpop.f32.mrf.mxu0 }
 0x226   :  { %4027 = vst.msk [vmem:[%s7139_s3 + $0x54] sm:$0xf] %vm4005_vm0, %v4580_v9  ;;  %v3527_v21 = vmax.f32 %v3195_v44, 0.0  ;;  %v2765_v13 = vadd.f32 %v2764_v20, %v2332_v22 }
 0x227   :  { %v2766_v54 = vpop.f32.mrf.mxu1  ;;  %v3199_v8 = vpop.f32.mrf.mxu0 }
 0x228   :  { %v4581_v40 = vpack.c.bf16 %v3527_v21, %v3527_v21  ;;  %v3198_v59 = vadd.f32 %v3197_v41, %v2765_v13  ;;  %v5121_v21 = vld [vmem:[%s7137_s0 + $0x730] ss:$24 sps:$4 sm:$0xff]  }
 0x229   :  { %v2769_v26 = vpop.f32.mrf.mxu1  ;;  %2960 = vmatmul.mubr.bf16.gmra.mxu1 %v5106_v25  ;;  %v3202_v47 = vpop.f32.mrf.mxu0  ;;  %3393 = vmatmul.mubr.bf16.gmra.mxu0 %v5109_v43  ;;  %v5118_v43 = vld [vmem:[%s7137_s0 + $0x728] ss:$24 sps:$4 sm:$0xff]  }
 0x22a   :  { %4028 = vst.msk [vmem:[%s7139_s3 + $0x58] sm:$0xf] %vm4005_vm0, %v4581_v40  ;;  %v3528_v57 = vmax.f32 %v3198_v59, 0.0  ;;  %v2770_v62 = vadd.f32 %v2769_v26, %v2337_v35  ;;  %2967 = vmatprep.mubr.bf16.mxu1 %v5114_v33  ;;  %3400 = vmatprep.mubr.bf16.mxu0 %v5117_v10  ;;  %v5129_v10 = vld [vmem:[%s7137_s0 + $0x764] ss:$24 sps:$4 sm:$0xff]   ;;  %v2353_v35 = vadd.f32 %v6230_v45, %v6007_v46 }
 0x22b   :  { %v2771_v16 = vpop.f32.mrf.mxu1  ;;  %v3204_v29 = vpop.f32.mrf.mxu0  ;;  %v2356_v46 = vadd.f32 %v6230_v45, %v6011_v50  ;;  %v5132_v50 = vld [vmem:[%s7137_s0 + $0x78c] ss:$24 sps:$4 sm:$0xff]  }
 0x22c   :  { %v4582_v1 = vpack.c.bf16 %v3528_v57, %v3528_v57  ;;  %v3203_v55 = vadd.f32 %v3202_v47, %v2770_v62 }
 0x22d   :  { %v2772_v24 = vpop.f32.mrf.mxu1  ;;  %v3205_v12 = vpop.f32.mrf.mxu0 }
 0x22e   :  { %4029 = vst.msk [vmem:[%s7139_s3 + $0x5c] sm:$0xf] %vm4005_vm0, %v4582_v1  ;;  %v3529_v28 = vmax.f32 %v3203_v55, 0.0  ;;  %v2773_v27 = vadd.f32 %v2772_v24, %v2340_v2 }
 0x22f   :  { %v2774_v39 = vpop.f32.mrf.mxu1  ;;  %v3207_v51 = vpop.f32.mrf.mxu0 }
 0x230   :  { %v4583_v31 = vpack.c.bf16 %v3529_v28, %v3529_v28  ;;  %v3206_v37 = vadd.f32 %v3205_v12, %v2773_v27  ;;  %v5124_v12 = vld [vmem:[%s7137_s0 + $0x758] ss:$24 sps:$4 sm:$0xff]   ;;  %v5135_v27 = vld [vmem:[%s7137_s0 + $0x794] ss:$24 sps:$4 sm:$0xff]   ;;  %v2361_v39 = vadd.f32 %v6230_v45, %v6027_v19  ;;  %v2364_v19 = vadd.f32 %v6230_v45, %v6031_v53 }
 0x231   :  { %v2777_v48 = vpop.f32.mrf.mxu1  ;;  %2968 = vmatmul.mubr.bf16.gmra.mxu1 %v5112_v36  ;;  %v3210_v0 = vpop.f32.mrf.mxu0  ;;  %3401 = vmatmul.mubr.bf16.gmra.mxu0 %v5115_v4  ;;  %v5127_v36 = vld [vmem:[%s7137_s0 + $0x760] ss:$24 sps:$4 sm:$0xff]   ;;  %v5138_v53 = vld [vmem:[%s7137_s0 + $0x7bc] ss:$24 sps:$4 sm:$0xff]  }
 0x232   :  { %4030 = vst.msk [vmem:[%s7139_s3 + $0x60] sm:$0xf] %vm4005_vm0, %v4583_v31  ;;  %v3530_v52 = vmax.f32 %v3206_v37, 0.0  ;;  %v2778_v60 = vadd.f32 %v2777_v48, %v2345_v61  ;;  %2975 = vmatprep.mubr.bf16.mxu1 %v5120_v14  ;;  %3408 = vmatprep.mubr.bf16.mxu0 %v5123_v63 }
 0x233   :  { %v2779_v22 = vpop.f32.mrf.mxu1  ;;  %v3212_v9 = vpop.f32.mrf.mxu0 }
 0x234   :  { %v4584_v44 = vpack.c.bf16 %v3530_v52, %v3530_v52  ;;  %v3211_v20 = vadd.f32 %v3210_v0, %v2778_v60 }
 0x235   :  { %v2780_v41 = vpop.f32.mrf.mxu1  ;;  %v3213_v25 = vpop.f32.mrf.mxu0 }
 0x236   :  { %4031 = vst.msk [vmem:[%s7139_s3 + $0x64] sm:$0xf] %vm4005_vm0, %v4584_v44  ;;  %v3531_v13 = vmax.f32 %v3211_v20, 0.0  ;;  %v2781_v33 = vadd.f32 %v2780_v41, %v2348_v49  ;;  %v5130_v20 = vld [vmem:[%s7137_s0 + $0x788] ss:$24 sps:$4 sm:$0xff]  }
 0x237   :  { %v2782_v54 = vpop.f32.mrf.mxu1  ;;  %v3215_v8 = vpop.f32.mrf.mxu0  ;;  %v5133_v41 = vld [vmem:[%s7137_s0 + $0x790] ss:$24 sps:$4 sm:$0xff]  }
 0x238   :  { %v4585_v40 = vpack.c.bf16 %v3531_v13, %v3531_v13  ;;  %v3214_v59 = vadd.f32 %v3213_v25, %v2781_v33 }
 0x239   :  { %v2785_v26 = vpop.f32.mrf.mxu1  ;;  %2976 = vmatmul.mubr.bf16.gmra.mxu1 %v5118_v43  ;;  %v3218_v47 = vpop.f32.mrf.mxu0  ;;  %3409 = vmatmul.mubr.bf16.gmra.mxu0 %v5121_v21  ;;  %v5141_v21 = vld [vmem:[%s7137_s0 + $0x7c4] ss:$24 sps:$4 sm:$0xff]  }
 0x23a   :  { %4032 = vst.msk [vmem:[%s7139_s3 + $0x68] sm:$0xf] %vm4005_vm0, %v4585_v40  ;;  %v3532_v57 = vmax.f32 %v3214_v59, 0.0  ;;  %v2786_v62 = vadd.f32 %v2785_v26, %v2353_v35  ;;  %2983 = vmatprep.mubr.bf16.mxu1 %v5126_v6  ;;  %3416 = vmatprep.mubr.bf16.mxu0 %v5129_v10  ;;  %v2369_v6 = vadd.f32 %v6230_v45, %v6047_v7 }
 0x23b   :  { %v2787_v16 = vpop.f32.mrf.mxu1  ;;  %v3220_v29 = vpop.f32.mrf.mxu0  ;;  %v2372_v7 = vadd.f32 %v6230_v45, %v6051_v30  ;;  %v5144_v30 = vld [vmem:[%s7137_s0 + $0x7ec] ss:$24 sps:$4 sm:$0xff]  }
 0x23c   :  { %v4586_v2 = vpack.c.bf16 %v3532_v57, %v3532_v57  ;;  %v3219_v1 = vadd.f32 %v3218_v47, %v2786_v62 }
 0x23d   :  { %v2788_v55 = vpop.f32.mrf.mxu1  ;;  %v3221_v24 = vpop.f32.mrf.mxu0 }
 0x23e   :  { %4033 = vst.msk [vmem:[%s7139_s3 + $0x6c] sm:$0xf] %vm4005_vm0, %v4586_v2  ;;  %v3533_v4 = vmax.f32 %v3219_v1, 0.0  ;;  %v2789_v28 = vadd.f32 %v2788_v55, %v2356_v46  ;;  %v5136_v46 = vld [vmem:[%s7137_s0 + $0x7b8] ss:$24 sps:$4 sm:$0xff]  }
 0x23f   :  { %v2790_v14 = vpop.f32.mrf.mxu1  ;;  %v3223_v63 = vpop.f32.mrf.mxu0  ;;  %v5139_v2 = vld [vmem:[%s7137_s0 + $0x7c0] ss:$24 sps:$4 sm:$0xff]  }
 0x240   :  { %v4587_v51 = vpack.c.bf16 %v3533_v4, %v3533_v4  ;;  %v3222_v61 = vadd.f32 %v3221_v24, %v2789_v28  ;;  %v5147_v24 = vld [vmem:[%s7137_s0 + $0x7f4] ss:$24 sps:$4 sm:$0xff]   ;;  %v2377_v4 = vadd.f32 %v6230_v45, %v6067_v3  ;;  %v2380_v3 = vadd.f32 %v6230_v45, %v6071_v18 }
 0x241   :  { %v2793_v31 = vpop.f32.mrf.mxu1  ;;  %2984 = vmatmul.mubr.bf16.gmra.mxu1 %v5124_v12  ;;  %v3226_v37 = vpop.f32.mrf.mxu0  ;;  %3417 = vmatmul.mubr.bf16.gmra.mxu0 %v5127_v36  ;;  %v5150_v18 = vld [vmem:[%s7137_s0 + $0x81c] ss:$24 sps:$4 sm:$0xff]  }
 0x242   :  { %4034 = vst.msk [vmem:[%s7139_s3 + $0x70] sm:$0xf] %vm4005_vm0, %v4587_v51  ;;  %v3534_v48 = vmax.f32 %v3222_v61, 0.0  ;;  %v2794_v0 = vadd.f32 %v2793_v31, %v2361_v39  ;;  %2991 = vmatprep.mubr.bf16.mxu1 %v5132_v50  ;;  %3424 = vmatprep.mubr.bf16.mxu0 %v5135_v27 }
 0x243   :  { %v2795_v52 = vpop.f32.mrf.mxu1  ;;  %v3228_v60 = vpop.f32.mrf.mxu0 }
 0x244   :  { %v4588_v22 = vpack.c.bf16 %v3534_v48, %v3534_v48  ;;  %v3227_v9 = vadd.f32 %v3226_v37, %v2794_v0  ;;  %v5142_v52 = vld [vmem:[%s7137_s0 + $0x7e8] ss:$24 sps:$4 sm:$0xff]  }
 0x245   :  { %v2796_v49 = vpop.f32.mrf.mxu1  ;;  %v3229_v44 = vpop.f32.mrf.mxu0  ;;  %v5145_v60 = vld [vmem:[%s7137_s0 + $0x7f0] ss:$24 sps:$4 sm:$0xff]  }
 0x246   :  { %4035 = vst.msk [vmem:[%s7139_s3 + $0x74] sm:$0xf] %vm4005_vm0, %v4588_v22  ;;  %v3535_v25 = vmax.f32 %v3227_v9, 0.0  ;;  %v2797_v43 = vadd.f32 %v2796_v49, %v2364_v19  ;;  %v5153_v9 = vld [vmem:[%s7137_s0 + $0x824] ss:$24 sps:$4 sm:$0xff]  }
 0x247   :  { %v2798_v13 = vpop.f32.mrf.mxu1  ;;  %v3231_v33 = vpop.f32.mrf.mxu0 }
 0x248   :  { %v4589_v10 = vpack.c.bf16 %v3535_v25, %v3535_v25  ;;  %v3230_v54 = vadd.f32 %v3229_v44, %v2797_v43 }
 0x249   :  { %v2801_v8 = vpop.f32.mrf.mxu1  ;;  %2992 = vmatmul.mubr.bf16.gmra.mxu1 %v5130_v20  ;;  %v3234_v35 = vpop.f32.mrf.mxu0  ;;  %3425 = vmatmul.mubr.bf16.gmra.mxu0 %v5133_v41  ;;  %v2385_v20 = vadd.f32 %v6230_v45, %v6087_v23  ;;  %v6665_v23 = vld [vmem:[%s7138_s2] ss:$0 sm:$0xff] }
 0x24a   :  { %4036 = vst.msk [vmem:[%s7139_s3 + $0x78] sm:$0xf] %vm4005_vm0, %v4589_v10  ;;  %v3536_v40 = vmax.f32 %v3230_v54, 0.0  ;;  %v2802_v59 = vadd.f32 %v2801_v8, %v2369_v6  ;;  %2999 = vmatprep.mubr.bf16.mxu1 %v5138_v53  ;;  %3432 = vmatprep.mubr.bf16.mxu0 %v5141_v21  ;;  %v2388_v45 = vadd.f32 %v6665_v23, %v6091_v15  ;;  %v5156_v15 = vld [vmem:[%s7137_s0 + $0x84c] ss:$24 sps:$4 sm:$0xff]  }
 0x24b   :  { %v2803_v26 = vpop.f32.mrf.mxu1  ;;  %v3236_v47 = vpop.f32.mrf.mxu0 }
 0x24c   :  { %v4590_v57 = vpack.c.bf16 %v3536_v40, %v3536_v40  ;;  %v3235_v62 = vadd.f32 %v3234_v35, %v2802_v59  ;;  %v5148_v40 = vld [vmem:[%s7137_s0 + $0x818] ss:$24 sps:$4 sm:$0xff]  }
 0x24d   :  { %v2804_v16 = vpop.f32.mrf.mxu1  ;;  %v3237_v29 = vpop.f32.mrf.mxu0  ;;  %v5151_v59 = vld [vmem:[%s7137_s0 + $0x820] ss:$24 sps:$4 sm:$0xff]  }
 0x24e   :  { %4037 = vst.msk [vmem:[%s7139_s3 + $0x7c] sm:$0xf] %vm4005_vm0, %v4590_v57  ;;  %v3537_v1 = vmax.f32 %v3235_v62, 0.0  ;;  %v2805_v55 = vadd.f32 %v2804_v16, %v2372_v7  ;;  %v5159_v7 = vld [vmem:[%s7137_s0 + $0x854] ss:$24 sps:$4 sm:$0xff]   ;;  %v2393_v16 = vadd.f32 %v6665_v23, %v6107_v58  ;;  %v2396_v58 = vadd.f32 %v6665_v23, %v6111_v34 }
 0x24f   :  { %v2806_v12 = vpop.f32.mrf.mxu1  ;;  %v3239_v36 = vpop.f32.mrf.mxu0  ;;  %v5162_v34 = vld [vmem:[%s7137_s0 + $0x87c] ss:$24 sps:$4 sm:$0xff]  }
 0x250   :  { %v4591_v28 = vpack.c.bf16 %v3537_v1, %v3537_v1  ;;  %v3238_v50 = vadd.f32 %v3237_v29, %v2805_v55 }
 0x251   :  { %v2809_v27 = vpop.f32.mrf.mxu1  ;;  %3000 = vmatmul.mubr.bf16.gmra.mxu1 %v5136_v46  ;;  %v3242_v14 = vpop.f32.mrf.mxu0  ;;  %3433 = vmatmul.mubr.bf16.gmra.mxu0 %v5139_v2 }
 0x252   :  { %4038 = vst.msk [vmem:[%s7139_s3 + $0x80] sm:$0xf] %vm4005_vm0, %v4591_v28  ;;  %v3538_v63 = vmax.f32 %v3238_v50, 0.0  ;;  %v2810_v39 = vadd.f32 %v2809_v27, %v2377_v4  ;;  %3007 = vmatprep.mubr.bf16.mxu1 %v5144_v30  ;;  %3440 = vmatprep.mubr.bf16.mxu0 %v5147_v24  ;;  %v5154_v27 = vld [vmem:[%s7137_s0 + $0x848] ss:$24 sps:$4 sm:$0xff]  }
 0x253   :  { %v2811_v51 = vpop.f32.mrf.mxu1  ;;  %v3244_v61 = vpop.f32.mrf.mxu0 }
 0x254   :  { %v4592_v31 = vpack.c.bf16 %v3538_v63, %v3538_v63  ;;  %v3243_v37 = vadd.f32 %v3242_v14, %v2810_v39  ;;  %v5157_v14 = vld [vmem:[%s7137_s0 + $0x850] ss:$24 sps:$4 sm:$0xff]   ;;  %v5165_v51 = vld [vmem:[%s7137_s0 + $0x884] ss:$24 sps:$4 sm:$0xff]  }
 0x255   :  { %v2812_v48 = vpop.f32.mrf.mxu1  ;;  %v3245_v0 = vpop.f32.mrf.mxu0 }
 0x256   :  { %4039 = vst.msk [vmem:[%s7139_s3 + $0x84] sm:$0xf] %vm4005_vm0, %v4592_v31  ;;  %v3539_v19 = vmax.f32 %v3243_v37, 0.0  ;;  %v2813_v22 = vadd.f32 %v2812_v48, %v2380_v3  ;;  %v2401_v31 = vadd.f32 %v6665_v23, %v6127_v32  ;;  %v2404_v32 = vadd.f32 %v6665_v23, %v6131_v5  ;;  %v5168_v5 = vld [vmem:[%s7137_s0 + $0x8ac] ss:$24 sps:$4 sm:$0xff]  }
 0x257   :  { %v2814_v49 = vpop.f32.mrf.mxu1  ;;  %v3247_v44 = vpop.f32.mrf.mxu0 }
 0x258   :  { %v4593_v41 = vpack.c.bf16 %v3539_v19, %v3539_v19  ;;  %v3246_v25 = vadd.f32 %v3245_v0, %v2813_v22 }
 0x259   :  { %v2817_v43 = vpop.f32.mrf.mxu1  ;;  %3008 = vmatmul.mubr.bf16.gmra.mxu1 %v5142_v52  ;;  %v3250_v53 = vpop.f32.mrf.mxu0  ;;  %3441 = vmatmul.mubr.bf16.gmra.mxu0 %v5145_v60 }
 0x25a   :  { %4040 = vst.msk [vmem:[%s7139_s3 + $0x88] sm:$0xf] %vm4005_vm0, %v4593_v41  ;;  %v3540_v21 = vmax.f32 %v3246_v25, 0.0  ;;  %v2818_v13 = vadd.f32 %v2817_v43, %v2385_v20  ;;  %3015 = vmatprep.mubr.bf16.mxu1 %v5150_v18  ;;  %3448 = vmatprep.mubr.bf16.mxu0 %v5153_v9  ;;  %v5160_v41 = vld [vmem:[%s7137_s0 + $0x878] ss:$24 sps:$4 sm:$0xff]  }
 0x25b   :  { %v2819_v33 = vpop.f32.mrf.mxu1  ;;  %v3252_v6 = vpop.f32.mrf.mxu0  ;;  %v5163_v25 = vld [vmem:[%s7137_s0 + $0x880] ss:$24 sps:$4 sm:$0xff]  }
 0x25c   :  { %v4594_v10 = vpack.c.bf16 %v3540_v21, %v3540_v21  ;;  %v3251_v54 = vadd.f32 %v3250_v53, %v2818_v13  ;;  %v5171_v21 = vld [vmem:[%s7137_s0 + $0x8b4] ss:$24 sps:$4 sm:$0xff]   ;;  %v2409_v6 = vadd.f32 %v6665_v23, %v6147_v11  ;;  %v2412_v11 = vadd.f32 %v6665_v23, %v6151_v42 }
 0x25d   :  { %v2820_v8 = vpop.f32.mrf.mxu1  ;;  %v3253_v35 = vpop.f32.mrf.mxu0  ;;  %v5174_v42 = vld [vmem:[%s7137_s0 + $0x8dc] ss:$24 sps:$4 sm:$0xff]  }
 0x25e   :  { %4041 = vst.msk [vmem:[%s7139_s3 + $0x8c] sm:$0xf] %vm4005_vm0, %v4594_v10  ;;  %v3541_v26 = vmax.f32 %v3251_v54, 0.0  ;;  %v2821_v47 = vadd.f32 %v2820_v8, %v2388_v45 }
 0x25f   :  { %v2822_v57 = vpop.f32.mrf.mxu1  ;;  %v3255_v62 = vpop.f32.mrf.mxu0 }
 0x260   :  { %v4595_v29 = vpack.c.bf16 %v3541_v26, %v3541_v26  ;;  %v3254_v46 = vadd.f32 %v3253_v35, %v2821_v47  ;;  %v5166_v62 = vld [vmem:[%s7137_s0 + $0x8a8] ss:$24 sps:$4 sm:$0xff]  }
 0x261   :  { %v2825_v2 = vpop.f32.mrf.mxu1  ;;  %3016 = vmatmul.mubr.bf16.gmra.mxu1 %v5148_v40  ;;  %v3258_v1 = vpop.f32.mrf.mxu0  ;;  %3449 = vmatmul.mubr.bf16.gmra.mxu0 %v5151_v59 }
 0x262   :  { %4042 = vst.msk [vmem:[%s7139_s3 + $0x90] sm:$0xf] %vm4005_vm0, %v4595_v29  ;;  %v3542_v55 = vmax.f32 %v3254_v46, 0.0  ;;  %v2826_v30 = vadd.f32 %v2825_v2, %v2393_v16  ;;  %3023 = vmatprep.mubr.bf16.mxu1 %v5156_v15  ;;  %3456 = vmatprep.mubr.bf16.mxu0 %v5159_v7  ;;  %v5169_v16 = vld [vmem:[%s7137_s0 + $0x8b0] ss:$24 sps:$4 sm:$0xff]  }
 0x263   :  { %v2827_v24 = vpop.f32.mrf.mxu1  ;;  %v3260_v12 = vpop.f32.mrf.mxu0  ;;  %v5177_v2 = vld [vmem:[%s7137_s0 + $0x8e4] ss:$24 sps:$4 sm:$0xff]  }
 0x264   :  { %v4596_v36 = vpack.c.bf16 %v3542_v55, %v3542_v55  ;;  %v3259_v4 = vadd.f32 %v3258_v1, %v2826_v30  ;;  %v2417_v30 = vadd.f32 %v6665_v23, %v6167_v56  ;;  %v2420_v56 = vadd.f32 %v6665_v23, %v6171_v17  ;;  %v5180_v17 = vld [vmem:[%s7137_s0 + $0x90c] ss:$24 sps:$4 sm:$0xff]  }
 0x265   :  { %v2828_v28 = vpop.f32.mrf.mxu1  ;;  %v3261_v50 = vpop.f32.mrf.mxu0 }
 0x266   :  { %4043 = vst.msk [vmem:[%s7139_s3 + $0x94] sm:$0xf] %vm4005_vm0, %v4596_v36  ;;  %v3543_v63 = vmax.f32 %v3259_v4, 0.0  ;;  %v2829_v39 = vadd.f32 %v2828_v28, %v2396_v58 }
 0x267   :  { %v2830_v61 = vpop.f32.mrf.mxu1  ;;  %v3263_v3 = vpop.f32.mrf.mxu0 }
 0x268   :  { %v4597_v37 = vpack.c.bf16 %v3543_v63, %v3543_v63  ;;  %v3262_v48 = vadd.f32 %v3261_v50, %v2829_v39  ;;  %v5175_v61 = vld [vmem:[%s7137_s0 + $0x8e0] ss:$24 sps:$4 sm:$0xff]  }
 0x269   :  { %v2833_v0 = vpop.f32.mrf.mxu1  ;;  %3024 = vmatmul.mubr.bf16.gmra.mxu1 %v5154_v27  ;;  %v3266_v52 = vpop.f32.mrf.mxu0  ;;  %3457 = vmatmul.mubr.bf16.gmra.mxu0 %v5157_v14 }
 0x26a   :  { %4044 = vst.msk [vmem:[%s7139_s3 + $0x98] sm:$0xf] %vm4005_vm0, %v4597_v37  ;;  %v3544_v60 = vmax.f32 %v3262_v48, 0.0  ;;  %v2834_v19 = vadd.f32 %v2833_v0, %v2401_v31  ;;  %3031 = vmatprep.mubr.bf16.mxu1 %v5162_v34  ;;  %3464 = vmatprep.mubr.bf16.mxu0 %v5165_v51  ;;  %v5172_v51 = vld [vmem:[%s7137_s0 + $0x8d8] ss:$24 sps:$4 sm:$0xff]  }
 0x26b   :  { %v2835_v22 = vpop.f32.mrf.mxu1  ;;  %v3268_v18 = vpop.f32.mrf.mxu0  ;;  %v5183_v37 = vld [vmem:[%s7137_s0 + $0x914] ss:$24 sps:$4 sm:$0xff]  }
 0x26c   :  { %v4598_v9 = vpack.c.bf16 %v3544_v60, %v3544_v60  ;;  %v3267_v49 = vadd.f32 %v3266_v52, %v2834_v19  ;;  %v2425_v52 = vadd.f32 %v6665_v23, %v6187_v38 }
 0x26d   :  { %v2836_v44 = vpop.f32.mrf.mxu1  ;;  %v3269_v20 = vpop.f32.mrf.mxu0 }
 0x26e   :  { %4045 = vst.msk [vmem:[%s7139_s3 + $0x9c] sm:$0xf] %vm4005_vm0, %v4598_v9  ;;  %v3545_v43 = vmax.f32 %v3267_v49, 0.0  ;;  %v2837_v53 = vadd.f32 %v2836_v44, %v2404_v32 }
 0x26f   :  { %v2838_v13 = vpop.f32.mrf.mxu1  ;;  %v3271_v33 = vpop.f32.mrf.mxu0 }
 0x270   :  { %v4599_v45 = vpack.c.bf16 %v3545_v43, %v3545_v43  ;;  %v3270_v10 = vadd.f32 %v3269_v20, %v2837_v53  ;;  %v7193_v20 = vld [vmem:[#allocation49_spill] sm:$0xff] }
 0x271   :  { %v2841_v54 = vpop.f32.mrf.mxu1  ;;  %3032 = vmatmul.mubr.bf16.gmra.mxu1 %v5160_v41  ;;  %v3274_v8 = vpop.f32.mrf.mxu0  ;;  %3465 = vmatmul.mubr.bf16.gmra.mxu0 %v5163_v25  ;;  %v2428_v38 = vadd.f32 %v6665_v23, %v7193_v20 }
 0x272   :  { %4046 = vst.msk [vmem:[%s7139_s3 + $0xa0] sm:$0xf] %vm4005_vm0, %v4599_v45  ;;  %v3546_v35 = vmax.f32 %v3270_v10, 0.0  ;;  %v2842_v40 = vadd.f32 %v2841_v54, %v2409_v6  ;;  %3039 = vmatprep.mubr.bf16.mxu1 %v5168_v5  ;;  %3472 = vmatprep.mubr.bf16.mxu0 %v5171_v21  ;;  %v5178_v5 = vld [vmem:[%s7137_s0 + $0x908] ss:$24 sps:$4 sm:$0xff]  }
 0x273   :  { %v2843_v59 = vpop.f32.mrf.mxu1  ;;  %v3276_v26 = vpop.f32.mrf.mxu0  ;;  %v5181_v21 = vld [vmem:[%s7137_s0 + $0x910] ss:$24 sps:$4 sm:$0xff]   ;;  %v5186_v6 = vld [vmem:[%s7137_s0 + $0x93c] ss:$24 sps:$4 sm:$0xff]  }
 0x274   :  { %v4600_v47 = vpack.c.bf16 %v3546_v35, %v3546_v35  ;;  %v3275_v15 = vadd.f32 %v3274_v8, %v2842_v40  ;;  %v5189_v45 = vld [vmem:[%s7137_s0 + $0x944] ss:$24 sps:$4 sm:$0xff]   ;;  %v7194_v8 = vld [vmem:[#allocation51_spill] sm:$0xff] }
 0x275   :  { %v2844_v7 = vpop.f32.mrf.mxu1  ;;  %v3277_v57 = vpop.f32.mrf.mxu0  ;;  %v2433_v35 = vadd.f32 %v6665_v23, %v7194_v8 }
 0x276   :  { %4047 = vst.msk [vmem:[%s7139_s3 + $0xa4] sm:$0xf] %vm4005_vm0, %v4600_v47  ;;  %v3547_v29 = vmax.f32 %v3275_v15, 0.0  ;;  %v2845_v46 = vadd.f32 %v2844_v7, %v2412_v11 }
 0x277   :  { %v2846_v1 = vpop.f32.mrf.mxu1  ;;  %v3279_v55 = vpop.f32.mrf.mxu0 }
 0x278   :  { %v4601_v24 = vpack.c.bf16 %v3547_v29, %v3547_v29  ;;  %v3278_v12 = vadd.f32 %v3277_v57, %v2845_v46  ;;  %v5184_v1 = vld [vmem:[%s7137_s0 + $0x938] ss:$24 sps:$4 sm:$0xff]  }
 0x279   :  { %v2849_v58 = vpop.f32.mrf.mxu1  ;;  %3040 = vmatmul.mubr.bf16.gmra.mxu1 %v5166_v62  ;;  %v3282_v36 = vpop.f32.mrf.mxu0  ;;  %3473 = vmatmul.mubr.bf16.gmra.mxu0 %v5169_v16  ;;  %v7195_v62 = vld [vmem:[#allocation53_spill] sm:$0xff] }
 0x27a   :  { %4048 = vst.msk [vmem:[%s7139_s3 + $0xa8] sm:$0xf] %vm4005_vm0, %v4601_v24  ;;  %v3548_v4 = vmax.f32 %v3278_v12, 0.0  ;;  %v2850_v28 = vadd.f32 %v2849_v58, %v2417_v30  ;;  %3047 = vmatprep.mubr.bf16.mxu1 %v5174_v42  ;;  %3480 = vmatprep.mubr.bf16.mxu0 %v5177_v2  ;;  %v2436_v16 = vadd.f32 %v6665_v23, %v7195_v62  ;;  %v5187_v55 = vld [vmem:[%s7137_s0 + $0x940] ss:$24 sps:$4 sm:$0xff]  }
 0x27b   :  { %v2851_v50 = vpop.f32.mrf.mxu1  ;;  %v3284_v27 = vpop.f32.mrf.mxu0 }
 0x27c   :  { %v4602_v14 = vpack.c.bf16 %v3548_v4, %v3548_v4  ;;  %v3283_v63 = vadd.f32 %v3282_v36, %v2850_v28  ;;  %v7196_v36 = vld [vmem:[#allocation2_spill] sm:$0xff] }
 0x27d   :  { %v2852_v39 = vpop.f32.mrf.mxu1  ;;  %v3285_v34 = vpop.f32.mrf.mxu0  ;;  %v2441_v4 = vadd.f32 %v6665_v23, %v7196_v36 }
 0x27e   :  { %4049 = vst.msk [vmem:[%s7139_s3 + $0xac] sm:$0xf] %vm4005_vm0, %v4602_v14  ;;  %v3549_v3 = vmax.f32 %v3283_v63, 0.0  ;;  %v2853_v31 = vadd.f32 %v2852_v39, %v2420_v56 }
 0x27f   :  { %v2854_v48 = vpop.f32.mrf.mxu1  ;;  %v3287_v0 = vpop.f32.mrf.mxu0 }
 0x280   :  { %v4603_v60 = vpack.c.bf16 %v3549_v3, %v3549_v3  ;;  %v3286_v19 = vadd.f32 %v3285_v34, %v2853_v31 }
 0x281   :  { %v2857_v22 = vpop.f32.mrf.mxu1  ;;  %3048 = vmatmul.mubr.bf16.gmra.mxu1 %v5172_v51  ;;  %v3290_v18 = vpop.f32.mrf.mxu0  ;;  %3481 = vmatmul.mubr.bf16.gmra.mxu0 %v5175_v61  ;;  %v7197_v51 = vld [vmem:[#allocation3_spill] sm:$0xff] }
 0x282   :  { %4050 = vst.msk [vmem:[%s7139_s3 + $0xb0] sm:$0xf] %vm4005_vm0, %v4603_v60  ;;  %v3550_v32 = vmax.f32 %v3286_v19, 0.0  ;;  %v2858_v9 = vadd.f32 %v2857_v22, %v2425_v52  ;;  %3055 = vmatprep.mubr.bf16.mxu1 %v5180_v17  ;;  %3488 = vmatprep.mubr.bf16.mxu0 %v5183_v37  ;;  %v2444_v61 = vadd.f32 %v6665_v23, %v7197_v51  ;;  %v7198_v19 = vld [vmem:[#allocation4_spill] sm:$0xff] }
 0x283   :  { %v2859_v49 = vpop.f32.mrf.mxu1  ;;  %v3292_v44 = vpop.f32.mrf.mxu0  ;;  %v2449_v22 = vadd.f32 %v6665_v23, %v7198_v19 }
 0x284   :  { %v4604_v41 = vpack.c.bf16 %v3550_v32, %v3550_v32  ;;  %v3291_v25 = vadd.f32 %v3290_v18, %v2858_v9 }
 0x285   :  { %v2860_v43 = vpop.f32.mrf.mxu1  ;;  %v3293_v53 = vpop.f32.mrf.mxu0 }
 0x286   :  { %4051 = vst.msk [vmem:[%s7139_s3 + $0xb4] sm:$0xf] %vm4005_vm0, %v4604_v41  ;;  %v3551_v13 = vmax.f32 %v3291_v25, 0.0  ;;  %v2861_v33 = vadd.f32 %v2860_v43, %v2428_v38  ;;  %v7199_v25 = vld [vmem:[#allocation5_spill] sm:$0xff] }
 0x287   :  { %v2862_v10 = vpop.f32.mrf.mxu1  ;;  %v3295_v54 = vpop.f32.mrf.mxu0  ;;  %v2452_v43 = vadd.f32 %v6665_v23, %v7199_v25 }
 0x288   :  { %v4605_v40 = vpack.c.bf16 %v3551_v13, %v3551_v13  ;;  %v3294_v59 = vadd.f32 %v3293_v53, %v2861_v33  ;;  %v7200_v54 = vld [vmem:[#allocation6_spill] sm:$0xff] }
 0x289   :  { %v2865_v26 = vpop.f32.mrf.mxu1  ;;  %3056 = vmatmul.mubr.bf16.gmra.mxu1 %v5178_v5  ;;  %v3298_v11 = vpop.f32.mrf.mxu0  ;;  %3489 = vmatmul.mubr.bf16.gmra.mxu0 %v5181_v21  ;;  %v2457_v8 = vadd.f32 %v6665_v23, %v7200_v54 }
 0x28a   :  { %4052 = vst.msk [vmem:[%s7139_s3 + $0xb8] sm:$0xf] %vm4005_vm0, %v4605_v40  ;;  %v3552_v47 = vmax.f32 %v3294_v59, 0.0  ;;  %v2866_v15 = vadd.f32 %v2865_v26, %v2433_v35  ;;  %3063 = vmatprep.mubr.bf16.mxu1 %v5186_v6  ;;  %3496 = vmatprep.mubr.bf16.mxu0 %v5189_v45 }
 0x28b   :  { %v2867_v7 = vpop.f32.mrf.mxu1  ;;  %v3300_v57 = vpop.f32.mrf.mxu0 }
 0x28c   :  { %v4606_v29 = vpack.c.bf16 %v3552_v47, %v3552_v47  ;;  %v3299_v46 = vadd.f32 %v3298_v11, %v2866_v15  ;;  %v7201_v57 = vld [vmem:[#allocation7_spill] sm:$0xff] }
 0x28d   :  { %v2868_v42 = vpop.f32.mrf.mxu1  ;;  %v3301_v2 = vpop.f32.mrf.mxu0  ;;  %v2460_v62 = vadd.f32 %v6665_v23, %v7201_v57 }
 0x28e   :  { %4053 = vst.msk [vmem:[%s7139_s3 + $0xbc] sm:$0xf] %vm4005_vm0, %v4606_v29  ;;  %v3553_v30 = vmax.f32 %v3299_v46, 0.0  ;;  %v2869_v24 = vadd.f32 %v2868_v42, %v2436_v16 }
 0x28f   :  { %v2870_v12 = vpop.f32.mrf.mxu1  ;;  %v3303_v58 = vpop.f32.mrf.mxu0 }
 0x290   :  { %v4607_v28 = vpack.c.bf16 %v3553_v30, %v3553_v30  ;;  %v3302_v50 = vadd.f32 %v3301_v2, %v2869_v24  ;;  %v7202_v24 = vld [vmem:[#allocation8_spill] sm:$0xff] }
 0x291   :  { %v2873_v27 = vpop.f32.mrf.mxu1  ;;  %3064 = vmatmul.mubr.bf16.gmra.mxu1 %v5184_v1  ;;  %v3306_v56 = vpop.f32.mrf.mxu0  ;;  %3497 = vmatmul.mubr.bf16.gmra.mxu0 %v5187_v55  ;;  %v2465_v12 = vadd.f32 %v6665_v23, %v7202_v24 }
 0x292   :  { %4054 = vst.msk [vmem:[%s7139_s3 + $0xc0] sm:$0xf] %vm4005_vm0, %v4607_v28  ;;  %v3554_v14 = vmax.f32 %v3302_v50, 0.0  ;;  %v2874_v63 = vadd.f32 %v2873_v27, %v2441_v4 }
 0x293   :  { %v2875_v39 = vpop.f32.mrf.mxu1  ;;  %v3308_v34 = vpop.f32.mrf.mxu0 }
 0x294   :  { %v4608_v3 = vpack.c.bf16 %v3554_v14, %v3554_v14  ;;  %v3307_v31 = vadd.f32 %v3306_v56, %v2874_v63  ;;  %v7203_v63 = vld [vmem:[#allocation9_spill] sm:$0xff] }
 0x295   :  { %v2876_v17 = vpop.f32.mrf.mxu1  ;;  %v3309_v37 = vpop.f32.mrf.mxu0  ;;  %v2468_v39 = vadd.f32 %v6665_v23, %v7203_v63 }
 0x296   :  { %4055 = vst.msk [vmem:[%s7139_s3 + $0xc4] sm:$0xf] %vm4005_vm0, %v4608_v3  ;;  %v3555_v48 = vmax.f32 %v3307_v31, 0.0  ;;  %v2877_v0 = vadd.f32 %v2876_v17, %v2444_v61 }
 0x297   :  { %v2878_v52 = vpop.f32.mrf.mxu1  ;;  %v3311_v60 = vpop.f32.mrf.mxu0 }
 0x298   :  { %v4609_v18 = vpack.c.bf16 %v3555_v48, %v3555_v48  ;;  %v3310_v32 = vadd.f32 %v3309_v37, %v2877_v0  ;;  %v7204_v0 = vld [vmem:[#allocation10_spill] sm:$0xff] }
 0x299   :  { %v2881_v9 = vpop.f32.mrf.mxu1  ;;  %v3314_v49 = vpop.f32.mrf.mxu0  ;;  %v2473_v52 = vadd.f32 %v6665_v23, %v7204_v0 }
 0x29a   :  { %4056 = vst.msk [vmem:[%s7139_s3 + $0xc8] sm:$0xf] %vm4005_vm0, %v4609_v18  ;;  %v3556_v44 = vmax.f32 %v3310_v32, 0.0  ;;  %v2882_v20 = vadd.f32 %v2881_v9, %v2449_v22 }
 0x29b   :  { %v2883_v38 = vpop.f32.mrf.mxu1  ;;  %v3316_v41 = vpop.f32.mrf.mxu0 }
 0x29c   :  { %v4610_v53 = vpack.c.bf16 %v3556_v44, %v3556_v44  ;;  %v3315_v5 = vadd.f32 %v3314_v49, %v2882_v20  ;;  %v7205_v20 = vld [vmem:[#allocation11_spill] sm:$0xff] }
 0x29d   :  { %v2884_v21 = vpop.f32.mrf.mxu1  ;;  %v3317_v13 = vpop.f32.mrf.mxu0  ;;  %v2476_v38 = vadd.f32 %v6665_v23, %v7205_v20 }
 0x29e   :  { %4057 = vst.msk [vmem:[%s7139_s3 + $0xcc] sm:$0xf] %vm4005_vm0, %v4610_v53  ;;  %v3557_v33 = vmax.f32 %v3315_v5, 0.0  ;;  %v2885_v6 = vadd.f32 %v2884_v21, %v2452_v43 }
 0x29f   :  { %v2886_v45 = vpop.f32.mrf.mxu1  ;;  %v3319_v10 = vpop.f32.mrf.mxu0 }
 0x2a0   :  { %v4611_v35 = vpack.c.bf16 %v3557_v33, %v3557_v33  ;;  %v3318_v40 = vadd.f32 %v3317_v13, %v2885_v6  ;;  %v7206_v6 = vld [vmem:[#allocation12_spill] sm:$0xff] }
 0x2a1   :  { %v2889_v59 = vpop.f32.mrf.mxu1  ;;  %v3322_v26 = vpop.f32.mrf.mxu0  ;;  %v2481_v45 = vadd.f32 %v6665_v23, %v7206_v6 }
 0x2a2   :  { %4058 = vst.msk [vmem:[%s7139_s3 + $0xd0] sm:$0xf] %vm4005_vm0, %v4611_v35  ;;  %v3558_v11 = vmax.f32 %v3318_v40, 0.0  ;;  %v2890_v47 = vadd.f32 %v2889_v59, %v2457_v8 }
 0x2a3   :  { %v2891_v15 = vpop.f32.mrf.mxu1  ;;  %v3324_v7 = vpop.f32.mrf.mxu0 }
 0x2a4   :  { %v4612_v16 = vpack.c.bf16 %v3558_v11, %v3558_v11  ;;  %v3323_v29 = vadd.f32 %v3322_v26, %v2890_v47  ;;  %v7207_v47 = vld [vmem:[#allocation13_spill] sm:$0xff] }
 0x2a5   :  { %v2892_v46 = vpop.f32.mrf.mxu1  ;;  %v3325_v42 = vpop.f32.mrf.mxu0  ;;  %v2484_v15 = vadd.f32 %v6665_v23, %v7207_v47 }
 0x2a6   :  { %4059 = vst.msk [vmem:[%s7139_s3 + $0xd4] sm:$0xf] %vm4005_vm0, %v4612_v16  ;;  %v3559_v2 = vmax.f32 %v3323_v29, 0.0  ;;  %v2893_v1 = vadd.f32 %v2892_v46, %v2460_v62 }
 0x2a7   :  { %v2894_v55 = vpop.f32.mrf.mxu1  ;;  %v3327_v30 = vpop.f32.mrf.mxu0 }
 0x2a8   :  { %v4613_v58 = vpack.c.bf16 %v3559_v2, %v3559_v2  ;;  %v3326_v36 = vadd.f32 %v3325_v42, %v2893_v1  ;;  %v7208_v1 = vld [vmem:[#allocation14_spill] sm:$0xff] }
 0x2a9   :  { %v2897_v4 = vpop.f32.mrf.mxu1  ;;  %v3330_v28 = vpop.f32.mrf.mxu0  ;;  %v2489_v55 = vadd.f32 %v6665_v23, %v7208_v1 }
 0x2aa   :  { %4060 = vst.msk [vmem:[%s7139_s3 + $0xd8] sm:$0xf] %vm4005_vm0, %v4613_v58  ;;  %v3560_v50 = vmax.f32 %v3326_v36, 0.0  ;;  %v2898_v27 = vadd.f32 %v2897_v4, %v2465_v12 }
 0x2ab   :  { %v2899_v56 = vpop.f32.mrf.mxu1  ;;  %v3332_v14 = vpop.f32.mrf.mxu0 }
 0x2ac   :  { %v4614_v34 = vpack.c.bf16 %v3560_v50, %v3560_v50  ;;  %v3331_v51 = vadd.f32 %v3330_v28, %v2898_v27  ;;  %v7209_v27 = vld [vmem:[#allocation15_spill] sm:$0xff] }
 0x2ad   :  { %v2900_v61 = vpop.f32.mrf.mxu1  ;;  %v3333_v3 = vpop.f32.mrf.mxu0  ;;  %v2492_v56 = vadd.f32 %v6665_v23, %v7209_v27 }
 0x2ae   :  { %4061 = vst.msk [vmem:[%s7139_s3 + $0xdc] sm:$0xf] %vm4005_vm0, %v4614_v34  ;;  %v3561_v31 = vmax.f32 %v3331_v51, 0.0  ;;  %v2901_v17 = vadd.f32 %v2900_v61, %v2468_v39 }
 0x2af   :  { %v2902_v37 = vpop.f32.mrf.mxu1  ;;  %v3335_v48 = vpop.f32.mrf.mxu0 }
 0x2b0   :  { %v4615_v60 = vpack.c.bf16 %v3561_v31, %v3561_v31  ;;  %v3334_v19 = vadd.f32 %v3333_v3, %v2901_v17  ;;  %v7210_v17 = vld [vmem:[#allocation16_spill] sm:$0xff] }
 0x2b1   :  { %v2905_v22 = vpop.f32.mrf.mxu1  ;;  %v3338_v18 = vpop.f32.mrf.mxu0  ;;  %v2497_v37 = vadd.f32 %v6665_v23, %v7210_v17 }
 0x2b2   :  { %4062 = vst.msk [vmem:[%s7139_s3 + $0xe0] sm:$0xf] %vm4005_vm0, %v4615_v60  ;;  %v3562_v32 = vmax.f32 %v3334_v19, 0.0  ;;  %v2906_v9 = vadd.f32 %v2905_v22, %v2473_v52 }
 0x2b3   :  { %v2907_v49 = vpop.f32.mrf.mxu1  ;;  %v3340_v44 = vpop.f32.mrf.mxu0 }
 0x2b4   :  { %v4616_v41 = vpack.c.bf16 %v3562_v32, %v3562_v32  ;;  %v3339_v25 = vadd.f32 %v3338_v18, %v2906_v9  ;;  %v7211_v9 = vld [vmem:[#allocation17_spill] sm:$0xff] }
 0x2b5   :  { %v2908_v43 = vpop.f32.mrf.mxu1  ;;  %v3341_v53 = vpop.f32.mrf.mxu0  ;;  %v2500_v49 = vadd.f32 %v6665_v23, %v7211_v9 }
 0x2b6   :  { %4063 = vst.msk [vmem:[%s7139_s3 + $0xe4] sm:$0xf] %vm4005_vm0, %v4616_v41  ;;  %v3563_v5 = vmax.f32 %v3339_v25, 0.0  ;;  %v2909_v21 = vadd.f32 %v2908_v43, %v2476_v38 }
 0x2b7   :  { %v2910_v13 = vpop.f32.mrf.mxu1  ;;  %v3343_v33 = vpop.f32.mrf.mxu0 }
 0x2b8   :  { %v4617_v10 = vpack.c.bf16 %v3563_v5, %v3563_v5  ;;  %v3342_v54 = vadd.f32 %v3341_v53, %v2909_v21  ;;  %v7212_v21 = vld [vmem:[#allocation18_spill] sm:$0xff] }
 0x2b9   :  { %v2913_v8 = vpop.f32.mrf.mxu1  ;;  %v3346_v35 = vpop.f32.mrf.mxu0  ;;  %v2505_v13 = vadd.f32 %v6665_v23, %v7212_v21 }
 0x2ba   :  { %4064 = vst.msk [vmem:[%s7139_s3 + $0xe8] sm:$0xf] %vm4005_vm0, %v4617_v10  ;;  %v3564_v40 = vmax.f32 %v3342_v54, 0.0  ;;  %v2914_v59 = vadd.f32 %v2913_v8, %v2481_v45 }
 0x2bb   :  { %v2915_v26 = vpop.f32.mrf.mxu1  ;;  %v3348_v11 = vpop.f32.mrf.mxu0 }
 0x2bc   :  { %v4618_v7 = vpack.c.bf16 %v3564_v40, %v3564_v40  ;;  %v3347_v57 = vadd.f32 %v3346_v35, %v2914_v59  ;;  %v7213_v59 = vld [vmem:[#allocation19_spill] sm:$0xff] }
 0x2bd   :  { %v2916_v62 = vpop.f32.mrf.mxu1  ;;  %v3349_v16 = vpop.f32.mrf.mxu0  ;;  %v2508_v26 = vadd.f32 %v6665_v23, %v7213_v59 }
 0x2be   :  { %4065 = vst.msk [vmem:[%s7139_s3 + $0xec] sm:$0xf] %vm4005_vm0, %v4618_v7  ;;  %v3565_v29 = vmax.f32 %v3347_v57, 0.0  ;;  %v2917_v46 = vadd.f32 %v2916_v62, %v2484_v15 }
 0x2bf   :  { %v2918_v42 = vpop.f32.mrf.mxu1  ;;  %v3351_v2 = vpop.f32.mrf.mxu0 }
 0x2c0   :  { %v4619_v30 = vpack.c.bf16 %v3565_v29, %v3565_v29  ;;  %v3350_v24 = vadd.f32 %v3349_v16, %v2917_v46  ;;  %v7214_v46 = vld [vmem:[#allocation20_spill] sm:$0xff] }
 0x2c1   :  { %v2921_v12 = vpop.f32.mrf.mxu1  ;;  %v3354_v58 = vpop.f32.mrf.mxu0  ;;  %v2513_v42 = vadd.f32 %v6665_v23, %v7214_v46 }
 0x2c2   :  { %4066 = vst.msk [vmem:[%s7139_s3 + $0xf0] sm:$0xf] %vm4005_vm0, %v4619_v30  ;;  %v3566_v36 = vmax.f32 %v3350_v24, 0.0  ;;  %v2922_v4 = vadd.f32 %v2921_v12, %v2489_v55 }
 0x2c3   :  { %v2923_v28 = vpop.f32.mrf.mxu1  ;;  %v3356_v50 = vpop.f32.mrf.mxu0 }
 0x2c4   :  { %v4620_v14 = vpack.c.bf16 %v3566_v36, %v3566_v36  ;;  %v3355_v63 = vadd.f32 %v3354_v58, %v2922_v4  ;;  %v7215_v4 = vld [vmem:[#allocation21_spill] sm:$0xff] }
 0x2c5   :  { %v2924_v39 = vpop.f32.mrf.mxu1  ;;  %v3357_v34 = vpop.f32.mrf.mxu0  ;;  %v2516_v28 = vadd.f32 %v6665_v23, %v7215_v4 }
 0x2c6   :  { %4067 = vst.msk [vmem:[%s7139_s3 + $0xf4] sm:$0xf] %vm4005_vm0, %v4620_v14  ;;  %v3567_v51 = vmax.f32 %v3355_v63, 0.0  ;;  %v2925_v61 = vadd.f32 %v2924_v39, %v2492_v56 }
 0x2c7   :  { %v2926_v3 = vpop.f32.mrf.mxu1  ;;  %v3359_v31 = vpop.f32.mrf.mxu0 }
 0x2c8   :  { %v4621_v48 = vpack.c.bf16 %v3567_v51, %v3567_v51  ;;  %v3358_v0 = vadd.f32 %v3357_v34, %v2925_v61  ;;  %v7216_v61 = vld [vmem:[#allocation22_spill] sm:$0xff] }
 0x2c9   :  { %v2929_v52 = vpop.f32.mrf.mxu1  ;;  %v3362_v60 = vpop.f32.mrf.mxu0  ;;  %v2521_v3 = vadd.f32 %v6665_v23, %v7216_v61 }
 0x2ca   :  { %4068 = vst.msk [vmem:[%s7139_s3 + $0xf8] sm:$0xf] %vm4005_vm0, %v4621_v48  ;;  %v3568_v19 = vmax.f32 %v3358_v0, 0.0  ;;  %v2930_v22 = vadd.f32 %v2929_v52, %v2497_v37 }
 0x2cb   :  { %v2931_v18 = vpop.f32.mrf.mxu1  ;;  %v3364_v32 = vpop.f32.mrf.mxu0 }
 0x2cc   :  { %v4622_v44 = vpack.c.bf16 %v3568_v19, %v3568_v19  ;;  %v3363_v20 = vadd.f32 %v3362_v60, %v2930_v22  ;;  %v7217_v22 = vld [vmem:[#allocation23_spill] sm:$0xff] }
 0x2cd   :  { %v2932_v38 = vpop.f32.mrf.mxu1  ;;  %v3365_v41 = vpop.f32.mrf.mxu0  ;;  %v2524_v18 = vadd.f32 %v6665_v23, %v7217_v22 }
 0x2ce   :  { %4069 = vst.msk [vmem:[%s7139_s3 + $0xfc] sm:$0xf] %vm4005_vm0, %v4622_v44  ;;  %v3569_v25 = vmax.f32 %v3363_v20, 0.0  ;;  %v2933_v43 = vadd.f32 %v2932_v38, %v2500_v49 }
 0x2cf   :  { %v2934_v53 = vpop.f32.mrf.mxu1  ;;  %v3367_v5 = vpop.f32.mrf.mxu0 }
 0x2d0   :  { %v4623_v33 = vpack.c.bf16 %v3569_v25, %v3569_v25  ;;  %v3366_v6 = vadd.f32 %v3365_v41, %v2933_v43  ;;  %v7218_v43 = vld [vmem:[#allocation24_spill] sm:$0xff] }
 0x2d1   :  { %v2937_v45 = vpop.f32.mrf.mxu1  ;;  %v3370_v10 = vpop.f32.mrf.mxu0  ;;  %v2529_v53 = vadd.f32 %v6665_v23, %v7218_v43 }
 0x2d2   :  { %4070 = vst.msk [vmem:[%s7139_s3 + $0x100] sm:$0xf] %vm4005_vm0, %v4623_v33  ;;  %v3570_v54 = vmax.f32 %v3366_v6, 0.0  ;;  %v2938_v8 = vadd.f32 %v2937_v45, %v2505_v13 }
 0x2d3   :  { %v2939_v35 = vpop.f32.mrf.mxu1  ;;  %v3372_v40 = vpop.f32.mrf.mxu0 }
 0x2d4   :  { %v4624_v11 = vpack.c.bf16 %v3570_v54, %v3570_v54  ;;  %v3371_v47 = vadd.f32 %v3370_v10, %v2938_v8  ;;  %v7219_v8 = vld [vmem:[#allocation25_spill] sm:$0xff] }
 0x2d5   :  { %v2940_v15 = vpop.f32.mrf.mxu1  ;;  %v3373_v7 = vpop.f32.mrf.mxu0  ;;  %v2532_v35 = vadd.f32 %v6665_v23, %v7219_v8 }
 0x2d6   :  { %4071 = vst.msk [vmem:[%s7139_s3 + $0x104] sm:$0xf] %vm4005_vm0, %v4624_v11  ;;  %v3571_v57 = vmax.f32 %v3371_v47, 0.0  ;;  %v2941_v62 = vadd.f32 %v2940_v15, %v2508_v26 }
 0x2d7   :  { %v2942_v16 = vpop.f32.mrf.mxu1  ;;  %v3375_v29 = vpop.f32.mrf.mxu0 }
 0x2d8   :  { %v4625_v2 = vpack.c.bf16 %v3571_v57, %v3571_v57  ;;  %v3374_v1 = vadd.f32 %v3373_v7, %v2941_v62  ;;  %v7220_v62 = vld [vmem:[#allocation26_spill] sm:$0xff] }
 0x2d9   :  { %v2945_v55 = vpop.f32.mrf.mxu1  ;;  %v3378_v30 = vpop.f32.mrf.mxu0  ;;  %v2537_v16 = vadd.f32 %v6665_v23, %v7220_v62 }
 0x2da   :  { %4072 = vst.msk [vmem:[%s7139_s3 + $0x108] sm:$0xf] %vm4005_vm0, %v4625_v2  ;;  %v3572_v24 = vmax.f32 %v3374_v1, 0.0  ;;  %v2946_v12 = vadd.f32 %v2945_v55, %v2513_v42 }
 0x2db   :  { %v2947_v58 = vpop.f32.mrf.mxu1  ;;  %v3380_v36 = vpop.f32.mrf.mxu0 }
 0x2dc   :  { %v4626_v50 = vpack.c.bf16 %v3572_v24, %v3572_v24  ;;  %v3379_v27 = vadd.f32 %v3378_v30, %v2946_v12  ;;  %v7221_v12 = vld [vmem:[#allocation27_spill] sm:$0xff] }
 0x2dd   :  { %v2948_v56 = vpop.f32.mrf.mxu1  ;;  %v3381_v14 = vpop.f32.mrf.mxu0  ;;  %v2540_v58 = vadd.f32 %v6665_v23, %v7221_v12 }
 0x2de   :  { %4073 = vst.msk [vmem:[%s7139_s3 + $0x10c] sm:$0xf] %vm4005_vm0, %v4626_v50  ;;  %v3573_v63 = vmax.f32 %v3379_v27, 0.0  ;;  %v2949_v39 = vadd.f32 %v2948_v56, %v2516_v28 }
 0x2df   :  { %v2950_v34 = vpop.f32.mrf.mxu1  ;;  %v3383_v51 = vpop.f32.mrf.mxu0 }
 0x2e0   :  { %v4627_v31 = vpack.c.bf16 %v3573_v63, %v3573_v63  ;;  %v3382_v17 = vadd.f32 %v3381_v14, %v2949_v39  ;;  %v7222_v39 = vld [vmem:[#allocation28_spill] sm:$0xff] }
 0x2e1   :  { %v2953_v37 = vpop.f32.mrf.mxu1  ;;  %v3386_v48 = vpop.f32.mrf.mxu0  ;;  %v2545_v34 = vadd.f32 %v6665_v23, %v7222_v39 }
 0x2e2   :  { %4074 = vst.msk [vmem:[%s7139_s3 + $0x110] sm:$0xf] %vm4005_vm0, %v4627_v31  ;;  %v3574_v0 = vmax.f32 %v3382_v17, 0.0  ;;  %v2954_v52 = vadd.f32 %v2953_v37, %v2521_v3 }
 0x2e3   :  { %v2955_v60 = vpop.f32.mrf.mxu1  ;;  %v3388_v19 = vpop.f32.mrf.mxu0 }
 0x2e4   :  { %v4628_v32 = vpack.c.bf16 %v3574_v0, %v3574_v0  ;;  %v3387_v9 = vadd.f32 %v3386_v48, %v2954_v52  ;;  %v7223_v52 = vld [vmem:[#allocation29_spill] sm:$0xff] }
 0x2e5   :  { %v2956_v49 = vpop.f32.mrf.mxu1  ;;  %v3389_v44 = vpop.f32.mrf.mxu0  ;;  %v2548_v60 = vadd.f32 %v6665_v23, %v7223_v52 }
 0x2e6   :  { %4075 = vst.msk [vmem:[%s7139_s3 + $0x114] sm:$0xf] %vm4005_vm0, %v4628_v32  ;;  %v3575_v20 = vmax.f32 %v3387_v9, 0.0  ;;  %v2957_v38 = vadd.f32 %v2956_v49, %v2524_v18 }
 0x2e7   :  { %v2958_v41 = vpop.f32.mrf.mxu1  ;;  %v3391_v25 = vpop.f32.mrf.mxu0 }
 0x2e8   :  { %v4629_v5 = vpack.c.bf16 %v3575_v20, %v3575_v20  ;;  %v3390_v21 = vadd.f32 %v3389_v44, %v2957_v38  ;;  %v7224_v38 = vld [vmem:[#allocation30_spill] sm:$0xff] }
 0x2e9   :  { %v2961_v13 = vpop.f32.mrf.mxu1  ;;  %v3394_v33 = vpop.f32.mrf.mxu0  ;;  %v2553_v41 = vadd.f32 %v6665_v23, %v7224_v38 }
 0x2ea   :  { %4076 = vst.msk [vmem:[%s7139_s3 + $0x118] sm:$0xf] %vm4005_vm0, %v4629_v5  ;;  %v3576_v6 = vmax.f32 %v3390_v21, 0.0  ;;  %v2962_v45 = vadd.f32 %v2961_v13, %v2529_v53 }
 0x2eb   :  { %v2963_v10 = vpop.f32.mrf.mxu1  ;;  %v3396_v54 = vpop.f32.mrf.mxu0 }
 0x2ec   :  { %v4630_v40 = vpack.c.bf16 %v3576_v6, %v3576_v6  ;;  %v3395_v59 = vadd.f32 %v3394_v33, %v2962_v45  ;;  %v7225_v45 = vld [vmem:[#allocation31_spill] sm:$0xff] }
 0x2ed   :  { %v2964_v26 = vpop.f32.mrf.mxu1  ;;  %v3397_v11 = vpop.f32.mrf.mxu0  ;;  %v2556_v10 = vadd.f32 %v6665_v23, %v7225_v45 }
 0x2ee   :  { %4077 = vst.msk [vmem:[%s7139_s3 + $0x11c] sm:$0xf] %vm4005_vm0, %v4630_v40  ;;  %v3577_v47 = vmax.f32 %v3395_v59, 0.0  ;;  %v2965_v15 = vadd.f32 %v2964_v26, %v2532_v35 }
 0x2ef   :  { %v2966_v7 = vpop.f32.mrf.mxu1  ;;  %v3399_v57 = vpop.f32.mrf.mxu0 }
 0x2f0   :  { %v4631_v29 = vpack.c.bf16 %v3577_v47, %v3577_v47  ;;  %v3398_v46 = vadd.f32 %v3397_v11, %v2965_v15  ;;  %v7226_v15 = vld [vmem:[#allocation32_spill] sm:$0xff] }
 0x2f1   :  { %v2969_v42 = vpop.f32.mrf.mxu1  ;;  %v3402_v2 = vpop.f32.mrf.mxu0  ;;  %v2561_v7 = vadd.f32 %v6665_v23, %v7226_v15 }
 0x2f2   :  { %4078 = vst.msk [vmem:[%s7139_s3 + $0x120] sm:$0xf] %vm4005_vm0, %v4631_v29  ;;  %v3578_v1 = vmax.f32 %v3398_v46, 0.0  ;;  %v2970_v55 = vadd.f32 %v2969_v42, %v2537_v16 }
 0x2f3   :  { %v2971_v30 = vpop.f32.mrf.mxu1  ;;  %v3404_v24 = vpop.f32.mrf.mxu0 }
 0x2f4   :  { %v4632_v36 = vpack.c.bf16 %v3578_v1, %v3578_v1  ;;  %v3403_v4 = vadd.f32 %v3402_v2, %v2970_v55  ;;  %v7227_v55 = vld [vmem:[#allocation33_spill] sm:$0xff] }
 0x2f5   :  { %v2972_v28 = vpop.f32.mrf.mxu1  ;;  %v3405_v50 = vpop.f32.mrf.mxu0  ;;  %v2564_v30 = vadd.f32 %v6665_v23, %v7227_v55 }
 0x2f6   :  { %4079 = vst.msk [vmem:[%s7139_s3 + $0x124] sm:$0xf] %vm4005_vm0, %v4632_v36  ;;  %v3579_v27 = vmax.f32 %v3403_v4, 0.0  ;;  %v2973_v56 = vadd.f32 %v2972_v28, %v2540_v58 }
 0x2f7   :  { %v2974_v14 = vpop.f32.mrf.mxu1  ;;  %v3407_v63 = vpop.f32.mrf.mxu0 }
 0x2f8   :  { %v4633_v51 = vpack.c.bf16 %v3579_v27, %v3579_v27  ;;  %v3406_v61 = vadd.f32 %v3405_v50, %v2973_v56  ;;  %v7228_v56 = vld [vmem:[#allocation34_spill] sm:$0xff] }
 0x2f9   :  { %v2977_v3 = vpop.f32.mrf.mxu1  ;;  %v3410_v31 = vpop.f32.mrf.mxu0  ;;  %v2569_v14 = vadd.f32 %v6665_v23, %v7228_v56 }
 0x2fa   :  { %4080 = vst.msk [vmem:[%s7139_s3 + $0x128] sm:$0xf] %vm4005_vm0, %v4633_v51  ;;  %v3580_v17 = vmax.f32 %v3406_v61, 0.0  ;;  %v2978_v37 = vadd.f32 %v2977_v3, %v2545_v34 }
 0x2fb   :  { %v2979_v48 = vpop.f32.mrf.mxu1  ;;  %v3412_v0 = vpop.f32.mrf.mxu0 }
 0x2fc   :  { %v4634_v19 = vpack.c.bf16 %v3580_v17, %v3580_v17  ;;  %v3411_v22 = vadd.f32 %v3410_v31, %v2978_v37  ;;  %v7024_v37 = vld [vmem:[%s7138_s2] ss:$0 sm:$0xff]  ;;  %v7229_v48 = vld [vmem:[#allocation35_spill] sm:$0xff] }
 0x2fd   :  { %v2980_v18 = vpop.f32.mrf.mxu1  ;;  %v3413_v32 = vpop.f32.mrf.mxu0  ;;  %v2572_v23 = vadd.f32 %v7024_v37, %v7229_v48 }
 0x2fe   :  { %4081 = vst.msk [vmem:[%s7139_s3 + $0x12c] sm:$0xf] %vm4005_vm0, %v4634_v19  ;;  %v3581_v9 = vmax.f32 %v3411_v22, 0.0  ;;  %v2981_v49 = vadd.f32 %v2980_v18, %v2548_v60 }
 0x2ff   :  { %v2982_v44 = vpop.f32.mrf.mxu1  ;;  %v3415_v20 = vpop.f32.mrf.mxu0 }
 0x300   :  { %v4635_v25 = vpack.c.bf16 %v3581_v9, %v3581_v9  ;;  %v3414_v43 = vadd.f32 %v3413_v32, %v2981_v49  ;;  %v7230_v49 = vld [vmem:[#allocation36_spill] sm:$0xff] }
 0x301   :  { %v2985_v53 = vpop.f32.mrf.mxu1  ;;  %v3418_v5 = vpop.f32.mrf.mxu0  ;;  %v2577_v44 = vadd.f32 %v7024_v37, %v7230_v49 }
 0x302   :  { %4082 = vst.msk [vmem:[%s7139_s3 + $0x130] sm:$0xf] %vm4005_vm0, %v4635_v25  ;;  %v3582_v21 = vmax.f32 %v3414_v43, 0.0  ;;  %v2986_v13 = vadd.f32 %v2985_v53, %v2553_v41 }
 0x303   :  { %v2987_v33 = vpop.f32.mrf.mxu1  ;;  %v3420_v6 = vpop.f32.mrf.mxu0 }
 0x304   :  { %v4636_v54 = vpack.c.bf16 %v3582_v21, %v3582_v21  ;;  %v3419_v8 = vadd.f32 %v3418_v5, %v2986_v13  ;;  %v7231_v13 = vld [vmem:[#allocation37_spill] sm:$0xff] }
 0x305   :  { %v2988_v35 = vpop.f32.mrf.mxu1  ;;  %v3421_v40 = vpop.f32.mrf.mxu0  ;;  %v2580_v33 = vadd.f32 %v7024_v37, %v7231_v13 }
 0x306   :  { %4083 = vst.msk [vmem:[%s7139_s3 + $0x134] sm:$0xf] %vm4005_vm0, %v4636_v54  ;;  %v3583_v59 = vmax.f32 %v3419_v8, 0.0  ;;  %v2989_v26 = vadd.f32 %v2988_v35, %v2556_v10 }
 0x307   :  { %v2990_v11 = vpop.f32.mrf.mxu1  ;;  %v3423_v47 = vpop.f32.mrf.mxu0 }
 0x308   :  { %v4637_v57 = vpack.c.bf16 %v3583_v59, %v3583_v59  ;;  %v3422_v62 = vadd.f32 %v3421_v40, %v2989_v26  ;;  %v7232_v26 = vld [vmem:[#allocation38_spill] sm:$0xff] }
 0x309   :  { %v2993_v16 = vpop.f32.mrf.mxu1  ;;  %v3426_v29 = vpop.f32.mrf.mxu0  ;;  %v2585_v11 = vadd.f32 %v7024_v37, %v7232_v26 }
 0x30a   :  { %4084 = vst.msk [vmem:[%s7139_s3 + $0x138] sm:$0xf] %vm4005_vm0, %v4637_v57  ;;  %v3584_v46 = vmax.f32 %v3422_v62, 0.0  ;;  %v2994_v42 = vadd.f32 %v2993_v16, %v2561_v7 }
 0x30b   :  { %v2995_v2 = vpop.f32.mrf.mxu1  ;;  %v3428_v1 = vpop.f32.mrf.mxu0 }
 0x30c   :  { %v4638_v24 = vpack.c.bf16 %v3584_v46, %v3584_v46  ;;  %v3427_v12 = vadd.f32 %v3426_v29, %v2994_v42  ;;  %v7233_v42 = vld [vmem:[#allocation39_spill] sm:$0xff] }
 0x30d   :  { %v2996_v58 = vpop.f32.mrf.mxu1  ;;  %v3429_v36 = vpop.f32.mrf.mxu0  ;;  %v2588_v2 = vadd.f32 %v7024_v37, %v7233_v42 }
 0x30e   :  { %4085 = vst.msk [vmem:[%s7139_s3 + $0x13c] sm:$0xf] %vm4005_vm0, %v4638_v24  ;;  %v3585_v4 = vmax.f32 %v3427_v12, 0.0  ;;  %v2997_v28 = vadd.f32 %v2996_v58, %v2564_v30 }
 0x30f   :  { %v2998_v50 = vpop.f32.mrf.mxu1  ;;  %v3431_v27 = vpop.f32.mrf.mxu0 }
 0x310   :  { %v4639_v63 = vpack.c.bf16 %v3585_v4, %v3585_v4  ;;  %v3430_v39 = vadd.f32 %v3429_v36, %v2997_v28  ;;  %v7234_v28 = vld [vmem:[#allocation40_spill] sm:$0xff] }
 0x311   :  { %v3001_v34 = vpop.f32.mrf.mxu1  ;;  %v3434_v51 = vpop.f32.mrf.mxu0  ;;  %v2593_v50 = vadd.f32 %v7024_v37, %v7234_v28 }
 0x312   :  { %4086 = vst.msk [vmem:[%s7139_s3 + $0x140] sm:$0xf] %vm4005_vm0, %v4639_v63  ;;  %v3586_v61 = vmax.f32 %v3430_v39, 0.0  ;;  %v3002_v3 = vadd.f32 %v3001_v34, %v2569_v14 }
 0x313   :  { %v3003_v31 = vpop.f32.mrf.mxu1  ;;  %v3436_v17 = vpop.f32.mrf.mxu0 }
 0x314   :  { %v4640_v0 = vpack.c.bf16 %v3586_v61, %v3586_v61  ;;  %v3435_v52 = vadd.f32 %v3434_v51, %v3002_v3  ;;  %v7235_v3 = vld [vmem:[#allocation41_spill] sm:$0xff] }
 0x315   :  { %v3004_v60 = vpop.f32.mrf.mxu1  ;;  %v3437_v19 = vpop.f32.mrf.mxu0  ;;  %v2596_v31 = vadd.f32 %v7024_v37, %v7235_v3 }
 0x316   :  { %4087 = vst.msk [vmem:[%s7139_s3 + $0x144] sm:$0xf] %vm4005_vm0, %v4640_v0  ;;  %v3587_v22 = vmax.f32 %v3435_v52, 0.0  ;;  %v3005_v18 = vadd.f32 %v3004_v60, %v2572_v23 }
 0x317   :  { %v3006_v32 = vpop.f32.mrf.mxu1  ;;  %v3439_v9 = vpop.f32.mrf.mxu0 }
 0x318   :  { %v4641_v20 = vpack.c.bf16 %v3587_v22, %v3587_v22  ;;  %v3438_v38 = vadd.f32 %v3437_v19, %v3005_v18  ;;  %v7236_v18 = vld [vmem:[#allocation42_spill] sm:$0xff] }
 0x319   :  { %v3009_v41 = vpop.f32.mrf.mxu1  ;;  %v3442_v25 = vpop.f32.mrf.mxu0  ;;  %v2601_v32 = vadd.f32 %v7024_v37, %v7236_v18 }
 0x31a   :  { %4088 = vst.msk [vmem:[%s7139_s3 + $0x148] sm:$0xf] %vm4005_vm0, %v4641_v20  ;;  %v3588_v43 = vmax.f32 %v3438_v38, 0.0  ;;  %v3010_v53 = vadd.f32 %v3009_v41, %v2577_v44 }
 0x31b   :  { %v3011_v5 = vpop.f32.mrf.mxu1  ;;  %v3444_v21 = vpop.f32.mrf.mxu0 }
 0x31c   :  { %v4642_v6 = vpack.c.bf16 %v3588_v43, %v3588_v43  ;;  %v3443_v45 = vadd.f32 %v3442_v25, %v3010_v53  ;;  %v7237_v53 = vld [vmem:[#allocation43_spill] sm:$0xff] }
 0x31d   :  { %v3012_v10 = vpop.f32.mrf.mxu1  ;;  %v3445_v54 = vpop.f32.mrf.mxu0  ;;  %v2604_v5 = vadd.f32 %v7024_v37, %v7237_v53 }
 0x31e   :  { %4089 = vst.msk [vmem:[%s7139_s3 + $0x14c] sm:$0xf] %vm4005_vm0, %v4642_v6  ;;  %v3589_v8 = vmax.f32 %v3443_v45, 0.0  ;;  %v3013_v35 = vadd.f32 %v3012_v10, %v2580_v33 }
 0x31f   :  { %v3014_v40 = vpop.f32.mrf.mxu1  ;;  %v3447_v59 = vpop.f32.mrf.mxu0 }
 0x320   :  { %v4643_v47 = vpack.c.bf16 %v3589_v8, %v3589_v8  ;;  %v3446_v15 = vadd.f32 %v3445_v54, %v3013_v35  ;;  %v7238_v35 = vld [vmem:[#allocation44_spill] sm:$0xff] }
 0x321   :  { %v3017_v7 = vpop.f32.mrf.mxu1  ;;  %v3450_v57 = vpop.f32.mrf.mxu0  ;;  %v2609_v40 = vadd.f32 %v7024_v37, %v7238_v35 }
 0x322   :  { %4090 = vst.msk [vmem:[%s7139_s3 + $0x150] sm:$0xf] %vm4005_vm0, %v4643_v47  ;;  %v3590_v62 = vmax.f32 %v3446_v15, 0.0  ;;  %v3018_v16 = vadd.f32 %v3017_v7, %v2585_v11 }
 0x323   :  { %v3019_v29 = vpop.f32.mrf.mxu1  ;;  %v3452_v46 = vpop.f32.mrf.mxu0 }
 0x324   :  { %v4644_v1 = vpack.c.bf16 %v3590_v62, %v3590_v62  ;;  %v3451_v55 = vadd.f32 %v3450_v57, %v3018_v16  ;;  %v7239_v16 = vld [vmem:[#allocation45_spill] sm:$0xff] }
 0x325   :  { %v3020_v30 = vpop.f32.mrf.mxu1  ;;  %v3453_v24 = vpop.f32.mrf.mxu0  ;;  %v2612_v29 = vadd.f32 %v7024_v37, %v7239_v16 }
 0x326   :  { %4091 = vst.msk [vmem:[%s7139_s3 + $0x154] sm:$0xf] %vm4005_vm0, %v4644_v1  ;;  %v3591_v12 = vmax.f32 %v3451_v55, 0.0  ;;  %v3021_v58 = vadd.f32 %v3020_v30, %v2588_v2 }
 0x327   :  { %v3022_v36 = vpop.f32.mrf.mxu1  ;;  %v3455_v4 = vpop.f32.mrf.mxu0 }
 0x328   :  { %v4645_v27 = vpack.c.bf16 %v3591_v12, %v3591_v12  ;;  %v3454_v56 = vadd.f32 %v3453_v24, %v3021_v58  ;;  %v7240_v58 = vld [vmem:[#allocation46_spill] sm:$0xff] }
 0x329   :  { %v3025_v14 = vpop.f32.mrf.mxu1  ;;  %v3458_v63 = vpop.f32.mrf.mxu0  ;;  %v2617_v36 = vadd.f32 %v7024_v37, %v7240_v58 }
 0x32a   :  { %4092 = vst.msk [vmem:[%s7139_s3 + $0x158] sm:$0xf] %vm4005_vm0, %v4645_v27  ;;  %v3592_v39 = vmax.f32 %v3454_v56, 0.0  ;;  %v3026_v34 = vadd.f32 %v3025_v14, %v2593_v50 }
 0x32b   :  { %v3027_v51 = vpop.f32.mrf.mxu1  ;;  %v3460_v61 = vpop.f32.mrf.mxu0 }
 0x32c   :  { %v4646_v17 = vpack.c.bf16 %v3592_v39, %v3592_v39  ;;  %v3459_v48 = vadd.f32 %v3458_v63, %v3026_v34  ;;  %v7241_v34 = vld [vmem:[#allocation47_spill] sm:$0xff] }
 0x32d   :  { %v3028_v23 = vpop.f32.mrf.mxu1  ;;  %v3461_v0 = vpop.f32.mrf.mxu0  ;;  %v2620_v51 = vadd.f32 %v7024_v37, %v7241_v34 }
 0x32e   :  { %4093 = vst.msk [vmem:[%s7139_s3 + $0x15c] sm:$0xf] %vm4005_vm0, %v4646_v17  ;;  %v3593_v52 = vmax.f32 %v3459_v48, 0.0  ;;  %v3029_v60 = vadd.f32 %v3028_v23, %v2596_v31 }
 0x32f   :  { %v3030_v19 = vpop.f32.mrf.mxu1  ;;  %v3463_v22 = vpop.f32.mrf.mxu0 }
 0x330   :  { %v4647_v9 = vpack.c.bf16 %v3593_v52, %v3593_v52  ;;  %v3462_v49 = vadd.f32 %v3461_v0, %v3029_v60  ;;  %v7242_v60 = vld [vmem:[#allocation48_spill] sm:$0xff] }
 0x331   :  { %v3033_v44 = vpop.f32.mrf.mxu1  ;;  %v3466_v20 = vpop.f32.mrf.mxu0  ;;  %v2625_v19 = vadd.f32 %v7024_v37, %v7242_v60 }
 0x332   :  { %4094 = vst.msk [vmem:[%s7139_s3 + $0x160] sm:$0xf] %vm4005_vm0, %v4647_v9  ;;  %v3594_v38 = vmax.f32 %v3462_v49, 0.0  ;;  %v3034_v41 = vadd.f32 %v3033_v44, %v2601_v32 }
 0x333   :  { %v3035_v25 = vpop.f32.mrf.mxu1  ;;  %v3468_v43 = vpop.f32.mrf.mxu0 }
 0x334   :  { %v4648_v21 = vpack.c.bf16 %v3594_v38, %v3594_v38  ;;  %v3467_v13 = vadd.f32 %v3466_v20, %v3034_v41  ;;  %v7243_v41 = vld [vmem:[#allocation50_spill] sm:$0xff] }
 0x335   :  { %v3036_v33 = vpop.f32.mrf.mxu1  ;;  %v3469_v6 = vpop.f32.mrf.mxu0  ;;  %v2628_v25 = vadd.f32 %v7024_v37, %v7243_v41 }
 0x336   :  { %4095 = vst.msk [vmem:[%s7139_s3 + $0x164] sm:$0xf] %vm4005_vm0, %v4648_v21  ;;  %v3595_v45 = vmax.f32 %v3467_v13, 0.0  ;;  %v3037_v10 = vadd.f32 %v3036_v33, %v2604_v5 }
 0x337   :  { %v3038_v54 = vpop.f32.mrf.mxu1  ;;  %v3471_v8 = vpop.f32.mrf.mxu0 }
 0x338   :  { %v4649_v59 = vpack.c.bf16 %v3595_v45, %v3595_v45  ;;  %v3470_v26 = vadd.f32 %v3469_v6, %v3037_v10  ;;  %v7244_v10 = vld [vmem:[#allocation52_spill] sm:$0xff] }
 0x339   :  { %v3041_v11 = vpop.f32.mrf.mxu1  ;;  %v3474_v47 = vpop.f32.mrf.mxu0  ;;  %v2633_v54 = vadd.f32 %v7024_v37, %v7244_v10 }
 0x33a   :  { %4096 = vst.msk [vmem:[%s7139_s3 + $0x168] sm:$0xf] %vm4005_vm0, %v4649_v59  ;;  %v3596_v15 = vmax.f32 %v3470_v26, 0.0  ;;  %v3042_v7 = vadd.f32 %v3041_v11, %v2609_v40 }
 0x33b   :  { %v3043_v57 = vpop.f32.mrf.mxu1  ;;  %v3476_v62 = vpop.f32.mrf.mxu0 }
 0x33c   :  { %v4650_v46 = vpack.c.bf16 %v3596_v15, %v3596_v15  ;;  %v3475_v42 = vadd.f32 %v3474_v47, %v3042_v7  ;;  %v7245_v7 = vld [vmem:[#allocation54_spill] sm:$0xff] }
 0x33d   :  { %v3044_v2 = vpop.f32.mrf.mxu1  ;;  %v3477_v1 = vpop.f32.mrf.mxu0  ;;  %v2636_v57 = vadd.f32 %v7024_v37, %v7245_v7 }
 0x33e   :  { %4097 = vst.msk [vmem:[%s7139_s3 + $0x16c] sm:$0xf] %vm4005_vm0, %v4650_v46  ;;  %v3597_v55 = vmax.f32 %v3475_v42, 0.0  ;;  %v3045_v30 = vadd.f32 %v3044_v2, %v2612_v29 }
 0x33f   :  { %v3046_v24 = vpop.f32.mrf.mxu1  ;;  %v3479_v12 = vpop.f32.mrf.mxu0 }
 0x340   :  { %v4651_v4 = vpack.c.bf16 %v3597_v55, %v3597_v55  ;;  %v3478_v28 = vadd.f32 %v3477_v1, %v3045_v30 }
 0x341   :  { %v3049_v50 = vpop.f32.mrf.mxu1  ;;  %v3482_v27 = vpop.f32.mrf.mxu0 }
 0x342   :  { %4098 = vst.msk [vmem:[%s7139_s3 + $0x170] sm:$0xf] %vm4005_vm0, %v4651_v4  ;;  %v3598_v56 = vmax.f32 %v3478_v28, 0.0  ;;  %v3050_v14 = vadd.f32 %v3049_v50, %v2617_v36 }
 0x343   :  { %v3051_v63 = vpop.f32.mrf.mxu1  ;;  %v3484_v39 = vpop.f32.mrf.mxu0 }
 0x344   :  { %v4652_v61 = vpack.c.bf16 %v3598_v56, %v3598_v56  ;;  %v3483_v3 = vadd.f32 %v3482_v27, %v3050_v14 }
 0x345   :  { %v3052_v31 = vpop.f32.mrf.mxu1  ;;  %v3485_v17 = vpop.f32.mrf.mxu0 }
 0x346   :  { %4099 = vst.msk [vmem:[%s7139_s3 + $0x174] sm:$0xf] %vm4005_vm0, %v4652_v61  ;;  %v3599_v48 = vmax.f32 %v3483_v3, 0.0  ;;  %v3053_v23 = vadd.f32 %v3052_v31, %v2620_v51 }
 0x347   :  { %v3054_v0 = vpop.f32.mrf.mxu1  ;;  %v3487_v52 = vpop.f32.mrf.mxu0 }
 0x348   :  { %v4653_v22 = vpack.c.bf16 %v3599_v48, %v3599_v48  ;;  %v3486_v18 = vadd.f32 %v3485_v17, %v3053_v23 }
 0x349   :  { %v3057_v32 = vpop.f32.mrf.mxu1  ;;  %v3490_v9 = vpop.f32.mrf.mxu0 }
 0x34a   :  { %4100 = vst.msk [vmem:[%s7139_s3 + $0x178] sm:$0xf] %vm4005_vm0, %v4653_v22  ;;  %v3600_v49 = vmax.f32 %v3486_v18, 0.0  ;;  %v3058_v44 = vadd.f32 %v3057_v32, %v2625_v19 }
 0x34b   :  { %v3059_v20 = vpop.f32.mrf.mxu1  ;;  %v3492_v38 = vpop.f32.mrf.mxu0 }
 0x34c   :  { %v4654_v43 = vpack.c.bf16 %v3600_v49, %v3600_v49  ;;  %v3491_v53 = vadd.f32 %v3490_v9, %v3058_v44 }
 0x34d   :  { %v3060_v5 = vpop.f32.mrf.mxu1  ;;  %v3493_v21 = vpop.f32.mrf.mxu0 }
 0x34e   :  { %4101 = vst.msk [vmem:[%s7139_s3 + $0x17c] sm:$0xf] %vm4005_vm0, %v4654_v43  ;;  %v3601_v13 = vmax.f32 %v3491_v53, 0.0  ;;  %v3061_v33 = vadd.f32 %v3060_v5, %v2628_v25 }
 0x34f   :  { %v3062_v6 = vpop.f32.mrf.mxu1  ;;  %v3495_v45 = vpop.f32.mrf.mxu0 }
 0x350   :  { %v4655_v8 = vpack.c.bf16 %v3601_v13, %v3601_v13  ;;  %v3494_v35 = vadd.f32 %v3493_v21, %v3061_v33 }
 0x351   :  { %v3065_v40 = vpop.f32.mrf.mxu1  ;;  %v3498_v59 = vpop.f32.mrf.mxu0 }
 0x352   :  { %4102 = vst.msk [vmem:[%s7139_s3 + $0x180] sm:$0xf] %vm4005_vm0, %v4655_v8  ;;  %v3602_v26 = vmax.f32 %v3494_v35, 0.0  ;;  %v3066_v11 = vadd.f32 %v3065_v40, %v2633_v54 }
 0x353   :  { %v3067_v47 = vpop.f32.mrf.mxu1  ;;  %v3500_v15 = vpop.f32.mrf.mxu0 }
 0x354   :  { %v4656_v62 = vpack.c.bf16 %v3602_v26, %v3602_v26  ;;  %v3499_v16 = vadd.f32 %v3498_v59, %v3066_v11 }
 0x355   :  { %v3068_v29 = vpop.f32.mrf.mxu1  ;;  %v3501_v46 = vpop.f32.mrf.mxu0 }
 0x356   :  { %4103 = vst.msk [vmem:[%s7139_s3 + $0x184] sm:$0xf] %vm4005_vm0, %v4656_v62  ;;  %v3603_v42 = vmax.f32 %v3499_v16, 0.0  ;;  %v3069_v2 = vadd.f32 %v3068_v29, %v2636_v57 }
 0x357   :  { %v3070_v1 = vpop.f32.mrf.mxu1  ;;  %v3503_v55 = vpop.f32.mrf.mxu0 }
 0x358   :  { %v4657_v30 = vpack.c.bf16 %v3603_v42, %v3603_v42  ;;  %v3502_v24 = vadd.f32 %v3501_v46, %v3069_v2 }
 0x35a   :  { %4104 = vst.msk [vmem:[%s7139_s3 + $0x188] sm:$0xf] %vm4005_vm0, %v4657_v30  ;;  %v3604_v37 = vmax.f32 %v3502_v24, 0.0 }
 0x35c   :  { %v4658_v12 = vpack.c.bf16 %v3604_v37, %v3604_v37 }
 0x35e   :  { %4105 = vst.msk [vmem:[%s7139_s3 + $0x18c] sm:$0xf] %vm4005_vm0, %v4658_v12 }

// kernel: dqn_forward.5
= control target key start
LH: loop header
LB: loop body
LE: loop exit
PB: predicated region body
PF: predicated region fallthrough
CT: control target
= control target key end

     0   :  { %vm880_vm0 = vcmask 519168   ;;  %vm901_vm1 = vcmask 516096   ;;  %s1637_s1 = inlined_call_operand.vmem [shape: bf16[512,64], index: 1, kind: input, shape index: {}]   ;;  %s1638_s0 = inlined_call_operand.vmem [shape: bf16[162,512], index: 0, kind: input, shape index: {}]   ;;  %s1639_s2 = inlined_call_operand.vmem [shape: f32[1,64], index: 2, kind: input, shape index: {}]   ;;  %s1640_s3 = inlined_call_operand.vmem [shape: bf16[162,64], index: 3, kind: output, shape index: {}]  }
   0x1   :  { %v1190_v0 = vld [vmem:[%s1637_s1 + $0x78] sm:$0xff]   ;;  %v1194_v4 = vld [vmem:[%s1637_s1 + $0x70] sm:$0xff]   ;;  %v1198_v8 = vld [vmem:[%s1637_s1 + $0x68] sm:$0xff]  }
   0x2   :  { %v1191_v1 = vld [vmem:[%s1637_s1 + $0xf8] sm:$0xff]   ;;  %1026 = vmatprep.subr.bf16.mxu0 %v1190_v0  ;;  %v1195_v5 = vld [vmem:[%s1637_s1 + $0xf0] sm:$0xff]   ;;  %v1199_v9 = vld [vmem:[%s1637_s1 + $0xe8] sm:$0xff]  }
   0x3   :  { %v1192_v2 = vld [vmem:[%s1637_s1 + $0x38] sm:$0xff]   ;;  %1108 = vmatprep.subr.bf16.mxu1 %v1191_v1  ;;  %v1196_v6 = vld [vmem:[%s1637_s1 + $0x30] sm:$0xff]   ;;  %v1200_v10 = vld [vmem:[%s1637_s1 + $0x28] sm:$0xff]  }
   0x4   :  { %v1193_v3 = vld [vmem:[%s1637_s1 + $0xb8] sm:$0xff]   ;;  %1027 = vmatpush3.bf16.msra.mxu0 %v1192_v2  ;;  %v1197_v7 = vld [vmem:[%s1637_s1 + $0xb0] sm:$0xff]   ;;  %v1201_v11 = vld [vmem:[%s1637_s1 + $0xa8] sm:$0xff]  }
   0x5   :  { %1109 = vmatpush3.bf16.msra.mxu1 %v1193_v3  ;;  %1028 = vmatprep.subr.bf16.mxu0 %v1194_v4  ;;  %v1202_v12 = vld [vmem:[%s1637_s1 + $0x60] sm:$0xff]   ;;  %v1206_v16 = vld [vmem:[%s1637_s1 + $0x58] sm:$0xff]   ;;  %v1210_v20 = vld [vmem:[%s1637_s1 + $0x50] sm:$0xff]  }
   0x6   :  { %1110 = vmatprep.subr.bf16.mxu1 %v1195_v5  ;;  %v1203_v13 = vld [vmem:[%s1637_s1 + $0xe0] sm:$0xff]   ;;  %v1207_v17 = vld [vmem:[%s1637_s1 + $0xd8] sm:$0xff]   ;;  %v1211_v21 = vld [vmem:[%s1637_s1 + $0xd0] sm:$0xff]  }
   0x7   :  { %v1204_v14 = vld [vmem:[%s1637_s1 + $0x20] sm:$0xff]   ;;  %v1208_v18 = vld [vmem:[%s1637_s1 + $0x18] sm:$0xff]   ;;  %v1212_v22 = vld [vmem:[%s1637_s1 + $0x10] sm:$0xff]  }
   0x8   :  { %1029 = vmatpush3.bf16.msra.mxu0 %v1196_v6  ;;  %v1205_v15 = vld [vmem:[%s1637_s1 + $0xa0] sm:$0xff]   ;;  %v1209_v19 = vld [vmem:[%s1637_s1 + $0x98] sm:$0xff]   ;;  %v1213_v23 = vld [vmem:[%s1637_s1 + $0x90] sm:$0xff]  }
   0x9   :  { %1111 = vmatpush3.bf16.msra.mxu1 %v1197_v7  ;;  %1030 = vmatprep.subr.bf16.mxu0 %v1198_v8  ;;  %v1214_v24 = vld [vmem:[%s1637_s1 + $0x48] sm:$0xff]   ;;  %v1218_v28 = vld [vmem:[%s1637_s1 + $0x40] sm:$0xff]  }
   0xa   :  { %1112 = vmatprep.subr.bf16.mxu1 %v1199_v9  ;;  %v1215_v25 = vld [vmem:[%s1637_s1 + $0xc8] sm:$0xff]   ;;  %v1219_v29 = vld [vmem:[%s1637_s1 + $0xc0] sm:$0xff]  }
   0xb   :  { %v1216_v26 = vld [vmem:[%s1637_s1 + $0x8] sm:$0xff]   ;;  %v1220_v30 = vld [vmem:[%s1637_s1] sm:$0xff]  }
   0xc   :  { %1031 = vmatpush3.bf16.msra.mxu0 %v1200_v10  ;;  %v1217_v27 = vld [vmem:[%s1637_s1 + $0x88] sm:$0xff]   ;;  %v1221_v31 = vld [vmem:[%s1637_s1 + $0x80] sm:$0xff]  }
   0xd   :  { %1113 = vmatpush3.bf16.msra.mxu1 %v1201_v11  ;;  %1032 = vmatprep.subr.bf16.mxu0 %v1202_v12  ;;  %v1222_v32 = vld [vmem:[%s1638_s0] ss:$16 sps:$4 sm:$0xff]   ;;  %v1224_v33 = vld [vmem:[%s1638_s0 + $0x4] ss:$16 sps:$4 sm:$0xff]   ;;  %v1225_v34 = vld [vmem:[%s1638_s0 + $0x8] ss:$16 sps:$4 sm:$0xff]  }
   0xe   :  { %1114 = vmatprep.subr.bf16.mxu1 %v1203_v13  ;;  %v1227_v35 = vld [vmem:[%s1638_s0 + $0xc] ss:$16 sps:$4 sm:$0xff]   ;;  %566 = vmatprep.mubr.bf16.mxu0 %v1224_v33  ;;  %v1228_v36 = vld [vmem:[%s1638_s0 + $0x24] ss:$16 sps:$4 sm:$0xff]   ;;  %v1232_v38 = vld [vmem:[%s1638_s0 + $0x20] ss:$16 sps:$4 sm:$0xff]  }
   0xf   :  { %686 = vmatprep.mubr.bf16.mxu1 %v1227_v35  ;;  %v1230_v37 = vld [vmem:[%s1638_s0 + $0x2c] ss:$16 sps:$4 sm:$0xff]   ;;  %v1233_v39 = vld [vmem:[%s1638_s0 + $0x28] ss:$16 sps:$4 sm:$0xff]   ;;  %v1234_v40 = vld [vmem:[%s1638_s0 + $0x44] ss:$16 sps:$4 sm:$0xff]  }
  0x10   :  { %1033 = vmatpush3.bf16.msra.mxu0 %v1204_v14  ;;  %v1236_v41 = vld [vmem:[%s1638_s0 + $0x4c] ss:$16 sps:$4 sm:$0xff]   ;;  %v1238_v42 = vld [vmem:[%s1638_s0 + $0x40] ss:$16 sps:$4 sm:$0xff]   ;;  %v1239_v43 = vld [vmem:[%s1638_s0 + $0x48] ss:$16 sps:$4 sm:$0xff]  }
  0x11   :  { %1115 = vmatpush3.bf16.msra.mxu1 %v1205_v15  ;;  %1034 = vmatprep.subr.bf16.mxu0 %v1206_v16  ;;  %v1240_v44 = vld [vmem:[%s1638_s0 + $0x64] ss:$16 sps:$4 sm:$0xff]   ;;  %v1242_v45 = vld [vmem:[%s1638_s0 + $0x6c] ss:$16 sps:$4 sm:$0xff]   ;;  %v1244_v46 = vld [vmem:[%s1638_s0 + $0x60] ss:$16 sps:$4 sm:$0xff]  }
  0x12   :  { %1116 = vmatprep.subr.bf16.mxu1 %v1207_v17  ;;  %v1245_v47 = vld [vmem:[%s1638_s0 + $0x68] ss:$16 sps:$4 sm:$0xff]   ;;  %v1246_v48 = vld [vmem:[%s1638_s0 + $0x84] ss:$16 sps:$4 sm:$0xff]   ;;  %v1248_v49 = vld [vmem:[%s1638_s0 + $0x8c] ss:$16 sps:$4 sm:$0xff]  }
  0x13   :  { %v1250_v50 = vld [vmem:[%s1638_s0 + $0x80] ss:$16 sps:$4 sm:$0xff]   ;;  %v1251_v51 = vld [vmem:[%s1638_s0 + $0x88] ss:$16 sps:$4 sm:$0xff]   ;;  %v1252_v52 = vld [vmem:[%s1638_s0 + $0xa4] ss:$16 sps:$4 sm:$0xff]  }
  0x14   :  { %1035 = vmatpush3.bf16.msra.mxu0 %v1208_v18  ;;  %v1254_v53 = vld [vmem:[%s1638_s0 + $0xac] ss:$16 sps:$4 sm:$0xff]   ;;  %v1256_v54 = vld [vmem:[%s1638_s0 + $0xa0] ss:$16 sps:$4 sm:$0xff]   ;;  %v1257_v55 = vld [vmem:[%s1638_s0 + $0xa8] ss:$16 sps:$4 sm:$0xff]  }
  0x15   :  { %1117 = vmatpush3.bf16.msra.mxu1 %v1209_v19  ;;  %1036 = vmatprep.subr.bf16.mxu0 %v1210_v20  ;;  %v1258_v56 = vld [vmem:[%s1638_s0 + $0xc4] ss:$16 sps:$4 sm:$0xff]   ;;  %v1260_v57 = vld [vmem:[%s1638_s0 + $0xcc] ss:$16 sps:$4 sm:$0xff]   ;;  %v1262_v58 = vld [vmem:[%s1638_s0 + $0xc0] ss:$16 sps:$4 sm:$0xff]  }
  0x16   :  { %1118 = vmatprep.subr.bf16.mxu1 %v1211_v21  ;;  %v1263_v59 = vld [vmem:[%s1638_s0 + $0xc8] ss:$16 sps:$4 sm:$0xff]   ;;  %v1264_v60 = vld [vmem:[%s1638_s0 + $0xe4] ss:$16 sps:$4 sm:$0xff]   ;;  %v1266_v61 = vld [vmem:[%s1638_s0 + $0xec] ss:$16 sps:$4 sm:$0xff]  }
  0x17   :  { %v1268_v62 = vld [vmem:[%s1638_s0 + $0xe0] ss:$16 sps:$4 sm:$0xff]   ;;  %v1269_v63 = vld [vmem:[%s1638_s0 + $0xe8] ss:$16 sps:$4 sm:$0xff]   ;;  %v1270_v0 = vld [vmem:[%s1638_s0 + $0x104] ss:$16 sps:$4 sm:$0xff]  }
  0x18   :  { %1037 = vmatpush3.bf16.msra.mxu0 %v1212_v22  ;;  %v1272_v1 = vld [vmem:[%s1638_s0 + $0x10c] ss:$16 sps:$4 sm:$0xff]   ;;  %v1274_v2 = vld [vmem:[%s1638_s0 + $0x100] ss:$16 sps:$4 sm:$0xff]   ;;  %v1275_v3 = vld [vmem:[%s1638_s0 + $0x108] ss:$16 sps:$4 sm:$0xff]  }
  0x19   :  { %1119 = vmatpush3.bf16.msra.mxu1 %v1213_v23  ;;  %1038 = vmatprep.subr.bf16.mxu0 %v1214_v24  ;;  %v1276_v4 = vld [vmem:[%s1638_s0 + $0x124] ss:$16 sps:$4 sm:$0xff]   ;;  %v1278_v5 = vld [vmem:[%s1638_s0 + $0x12c] ss:$16 sps:$4 sm:$0xff]   ;;  %v1280_v8 = vld [vmem:[%s1638_s0 + $0x120] ss:$16 sps:$4 sm:$0xff]  }
  0x1a   :  { %1120 = vmatprep.subr.bf16.mxu1 %v1215_v25  ;;  %v55_v6 = vld [vmem:[%s1638_s0 + $0x140] sm:$0x11]  ;;  %v56_v7 = vld [vmem:[%s1638_s0 + $0x148] sm:$0x11] }
  0x1b   :  { %v1281_v9 = vld [vmem:[%s1638_s0 + $0x128] ss:$16 sps:$4 sm:$0xff]   ;;  %v949_v10 = vcombine.high %v55_v6, %v55_v6  ;;  %v951_v11 = vcombine.high %v56_v7, %v56_v7  ;;  %v948_v12 = vcombine.low %v55_v6, %v55_v6  ;;  %v950_v13 = vcombine.low %v56_v7, %v56_v7  ;;  %v1531_v16 = vld [vmem:[%s1639_s2] ss:$0 sm:$0xff] }
  0x1c   :  { %1039 = vmatpush3.bf16.msra.mxu0 %v1216_v26 }
  0x1d   :  { %1121 = vmatpush3.bf16.msra.mxu1 %v1217_v27  ;;  %1040 = vmatprep.subr.bf16.mxu0 %v1218_v28 }
  0x1e   :  { %1122 = vmatprep.subr.bf16.mxu1 %v1219_v29 }
  0x20   :  { %1041 = vmatpush3.bf16.msra.mxu0 %v1220_v30 }
  0x21   :  { %1123 = vmatpush3.bf16.msra.mxu1 %v1221_v31 }
  0x23   :  { %567 = vmatmul.mubr.bf16.vlgmr.msra.gmra.mxu0 %v1222_v32 }
  0x24   :  { %687 = vmatmul.mubr.bf16.vlgmr.msra.gmra.mxu1 %v1225_v34  ;;  %574 = vmatprep.mubr.bf16.mxu0 %v1228_v36 }
  0x25   :  { %694 = vmatprep.mubr.bf16.mxu1 %v1230_v37 }
  0x2b   :  { %575 = vmatmul.mubr.bf16.gmra.mxu0 %v1232_v38 }
  0x2c   :  { %695 = vmatmul.mubr.bf16.gmra.mxu1 %v1233_v39  ;;  %582 = vmatprep.mubr.bf16.mxu0 %v1234_v40 }
  0x2d   :  { %702 = vmatprep.mubr.bf16.mxu1 %v1236_v41 }
  0x33   :  { %583 = vmatmul.mubr.bf16.gmra.mxu0 %v1238_v42 }
  0x34   :  { %703 = vmatmul.mubr.bf16.gmra.mxu1 %v1239_v43  ;;  %590 = vmatprep.mubr.bf16.mxu0 %v1240_v44 }
  0x35   :  { %710 = vmatprep.mubr.bf16.mxu1 %v1242_v45 }
  0x3b   :  { %591 = vmatmul.mubr.bf16.gmra.mxu0 %v1244_v46 }
  0x3c   :  { %711 = vmatmul.mubr.bf16.gmra.mxu1 %v1245_v47  ;;  %598 = vmatprep.mubr.bf16.mxu0 %v1246_v48 }
  0x3d   :  { %718 = vmatprep.mubr.bf16.mxu1 %v1248_v49 }
  0x43   :  { %599 = vmatmul.mubr.bf16.gmra.mxu0 %v1250_v50 }
  0x44   :  { %719 = vmatmul.mubr.bf16.gmra.mxu1 %v1251_v51  ;;  %606 = vmatprep.mubr.bf16.mxu0 %v1252_v52 }
  0x45   :  { %726 = vmatprep.mubr.bf16.mxu1 %v1254_v53 }
  0x4b   :  { %607 = vmatmul.mubr.bf16.gmra.mxu0 %v1256_v54 }
  0x4c   :  { %727 = vmatmul.mubr.bf16.gmra.mxu1 %v1257_v55  ;;  %614 = vmatprep.mubr.bf16.mxu0 %v1258_v56 }
  0x4d   :  { %734 = vmatprep.mubr.bf16.mxu1 %v1260_v57 }
  0x53   :  { %615 = vmatmul.mubr.bf16.gmra.mxu0 %v1262_v58 }
  0x54   :  { %735 = vmatmul.mubr.bf16.gmra.mxu1 %v1263_v59  ;;  %622 = vmatprep.mubr.bf16.mxu0 %v1264_v60 }
  0x55   :  { %742 = vmatprep.mubr.bf16.mxu1 %v1266_v61 }
  0x5b   :  { %623 = vmatmul.mubr.bf16.gmra.mxu0 %v1268_v62 }
  0x5c   :  { %743 = vmatmul.mubr.bf16.gmra.mxu1 %v1269_v63  ;;  %630 = vmatprep.mubr.bf16.mxu0 %v1270_v0 }
  0x5d   :  { %750 = vmatprep.mubr.bf16.mxu1 %v1272_v1 }
  0x63   :  { %631 = vmatmul.mubr.bf16.gmra.mxu0 %v1274_v2 }
  0x64   :  { %751 = vmatmul.mubr.bf16.gmra.mxu1 %v1275_v3  ;;  %638 = vmatprep.mubr.bf16.mxu0 %v1276_v4 }
  0x65   :  { %758 = vmatprep.mubr.bf16.mxu1 %v1278_v5 }
  0x6b   :  { %639 = vmatmul.mubr.bf16.gmra.mxu0 %v1280_v8 }
  0x6c   :  { %759 = vmatmul.mubr.bf16.gmra.mxu1 %v1281_v9  ;;  %646 = vmatprep.mubr.bf16.mxu0 %v949_v10 }
  0x6d   :  { %766 = vmatprep.mubr.bf16.mxu1 %v951_v11 }
  0x73   :  { %647 = vmatmul.mubr.bf16.gmra.mxu0 %v948_v12 }
  0x74   :  { %767 = vmatmul.mubr.bf16.gmra.mxu1 %v950_v13 }
  0xe3   :  { %v1042_v14 = vpop.f32.mrf.mxu0 }
  0xe4   :  { %v1124_v15 = vpop.f32.mrf.mxu1 }
  0xe5   :  { %v1043_v17 = vpop.f32.mrf.mxu0 }
  0xe6   :  { %v1044_v18 = vadd.f32 %v1043_v17, %v1042_v14  ;;  %v1125_v19 = vpop.f32.mrf.mxu1 }
  0xe7   :  { %v1045_v20 = vpop.f32.mrf.mxu0  ;;  %v1126_v22 = vadd.f32 %v1125_v19, %v1124_v15 }
  0xe8   :  { %v569_v21 = vadd.f32 %v1044_v18, %v1531_v16  ;;  %v1127_v23 = vpop.f32.mrf.mxu1 }
  0xe9   :  { %v1046_v24 = vpop.f32.mrf.mxu0 }
  0xea   :  { %v689_v25 = vadd.f32 %v1126_v22, %v569_v21  ;;  %v1047_v26 = vadd.f32 %v1046_v24, %v1045_v20  ;;  %v1128_v27 = vpop.f32.mrf.mxu1 }
  0xeb   :  { %v1048_v28 = vpop.f32.mrf.mxu0  ;;  %v1129_v31 = vadd.f32 %v1128_v27, %v1127_v23 }
  0xec   :  { %v774_v29 = vmax.f32 %v689_v25, 0.0  ;;  %v572_v30 = vadd.f32 %v1047_v26, %v1531_v16  ;;  %v1130_v32 = vpop.f32.mrf.mxu1 }
  0xed   :  { %v1049_v33 = vpop.f32.mrf.mxu0 }
  0xee   :  { %v1005_v34 = vpack.c.bf16 %v774_v29, %v774_v29  ;;  %v692_v35 = vadd.f32 %v1129_v31, %v572_v30  ;;  %v1050_v36 = vadd.f32 %v1049_v33, %v1048_v28  ;;  %v1131_v37 = vpop.f32.mrf.mxu1 }
  0xef   :  { %v1051_v38 = vpop.f32.mrf.mxu0  ;;  %v1132_v41 = vadd.f32 %v1131_v37, %v1130_v32 }
  0xf0   :  { %881 = vst.msk [vmem:[%s1640_s3] sm:$0xf] %vm880_vm0, %v1005_v34  ;;  %v775_v39 = vmax.f32 %v692_v35, 0.0  ;;  %v577_v40 = vadd.f32 %v1050_v36, %v1531_v16  ;;  %v1133_v42 = vpop.f32.mrf.mxu1 }
  0xf1   :  { %v1052_v43 = vpop.f32.mrf.mxu0 }
  0xf2   :  { %v1006_v44 = vpack.c.bf16 %v775_v39, %v775_v39  ;;  %v697_v45 = vadd.f32 %v1132_v41, %v577_v40  ;;  %v1053_v46 = vadd.f32 %v1052_v43, %v1051_v38  ;;  %v1134_v47 = vpop.f32.mrf.mxu1 }
  0xf3   :  { %v1054_v48 = vpop.f32.mrf.mxu0  ;;  %v1135_v51 = vadd.f32 %v1134_v47, %v1133_v42 }
  0xf4   :  { %882 = vst.msk [vmem:[%s1640_s3 + $0x4] sm:$0xf] %vm880_vm0, %v1006_v44  ;;  %v776_v49 = vmax.f32 %v697_v45, 0.0  ;;  %v580_v50 = vadd.f32 %v1053_v46, %v1531_v16  ;;  %v1136_v52 = vpop.f32.mrf.mxu1 }
  0xf5   :  { %v1055_v53 = vpop.f32.mrf.mxu0 }
  0xf6   :  { %v1007_v54 = vpack.c.bf16 %v776_v49, %v776_v49  ;;  %v700_v55 = vadd.f32 %v1135_v51, %v580_v50  ;;  %v1056_v56 = vadd.f32 %v1055_v53, %v1054_v48  ;;  %v1137_v57 = vpop.f32.mrf.mxu1 }
  0xf7   :  { %v1057_v58 = vpop.f32.mrf.mxu0  ;;  %v1138_v61 = vadd.f32 %v1137_v57, %v1136_v52 }
  0xf8   :  { %883 = vst.msk [vmem:[%s1640_s3 + $0x8] sm:$0xf] %vm880_vm0, %v1007_v54  ;;  %v777_v59 = vmax.f32 %v700_v55, 0.0  ;;  %v585_v60 = vadd.f32 %v1056_v56, %v1531_v16  ;;  %v1139_v62 = vpop.f32.mrf.mxu1 }
  0xf9   :  { %v1058_v63 = vpop.f32.mrf.mxu0 }
  0xfa   :  { %v1008_v0 = vpack.c.bf16 %v777_v59, %v777_v59  ;;  %v705_v1 = vadd.f32 %v1138_v61, %v585_v60  ;;  %v1059_v2 = vadd.f32 %v1058_v63, %v1057_v58  ;;  %v1140_v3 = vpop.f32.mrf.mxu1 }
  0xfb   :  { %v1060_v4 = vpop.f32.mrf.mxu0  ;;  %v1141_v7 = vadd.f32 %v1140_v3, %v1139_v62 }
  0xfc   :  { %884 = vst.msk [vmem:[%s1640_s3 + $0xc] sm:$0xf] %vm880_vm0, %v1008_v0  ;;  %v778_v5 = vmax.f32 %v705_v1, 0.0  ;;  %v588_v6 = vadd.f32 %v1059_v2, %v1531_v16  ;;  %v1142_v8 = vpop.f32.mrf.mxu1 }
  0xfd   :  { %v1061_v9 = vpop.f32.mrf.mxu0 }
  0xfe   :  { %v1009_v10 = vpack.c.bf16 %v778_v5, %v778_v5  ;;  %v708_v11 = vadd.f32 %v1141_v7, %v588_v6  ;;  %v1062_v12 = vadd.f32 %v1061_v9, %v1060_v4  ;;  %v1143_v13 = vpop.f32.mrf.mxu1 }
  0xff   :  { %v1063_v14 = vpop.f32.mrf.mxu0  ;;  %v1144_v18 = vadd.f32 %v1143_v13, %v1142_v8 }
 0x100   :  { %885 = vst.msk [vmem:[%s1640_s3 + $0x10] sm:$0xf] %vm880_vm0, %v1009_v10  ;;  %v779_v15 = vmax.f32 %v708_v11, 0.0  ;;  %v593_v17 = vadd.f32 %v1062_v12, %v1531_v16  ;;  %v1145_v19 = vpop.f32.mrf.mxu1 }
 0x101   :  { %v1064_v20 = vpop.f32.mrf.mxu0 }
 0x102   :  { %v1010_v21 = vpack.c.bf16 %v779_v15, %v779_v15  ;;  %v713_v22 = vadd.f32 %v1144_v18, %v593_v17  ;;  %v1065_v23 = vadd.f32 %v1064_v20, %v1063_v14  ;;  %v1146_v24 = vpop.f32.mrf.mxu1 }
 0x103   :  { %v1066_v25 = vpop.f32.mrf.mxu0  ;;  %v1147_v28 = vadd.f32 %v1146_v24, %v1145_v19 }
 0x104   :  { %886 = vst.msk [vmem:[%s1640_s3 + $0x14] sm:$0xf] %vm880_vm0, %v1010_v21  ;;  %v780_v26 = vmax.f32 %v713_v22, 0.0  ;;  %v596_v27 = vadd.f32 %v1065_v23, %v1531_v16  ;;  %v1148_v29 = vpop.f32.mrf.mxu1 }
 0x105   :  { %v1067_v30 = vpop.f32.mrf.mxu0 }
 0x106   :  { %v1011_v31 = vpack.c.bf16 %v780_v26, %v780_v26  ;;  %v716_v32 = vadd.f32 %v1147_v28, %v596_v27  ;;  %v1068_v33 = vadd.f32 %v1067_v30, %v1066_v25  ;;  %v1149_v34 = vpop.f32.mrf.mxu1 }
 0x107   :  { %v1069_v35 = vpop.f32.mrf.mxu0  ;;  %v1150_v38 = vadd.f32 %v1149_v34, %v1148_v29 }
 0x108   :  { %887 = vst.msk [vmem:[%s1640_s3 + $0x18] sm:$0xf] %vm880_vm0, %v1011_v31  ;;  %v781_v36 = vmax.f32 %v716_v32, 0.0  ;;  %v601_v37 = vadd.f32 %v1068_v33, %v1531_v16  ;;  %v1151_v39 = vpop.f32.mrf.mxu1 }
 0x109   :  { %v1070_v40 = vpop.f32.mrf.mxu0 }
 0x10a   :  { %v1012_v41 = vpack.c.bf16 %v781_v36, %v781_v36  ;;  %v721_v42 = vadd.f32 %v1150_v38, %v601_v37  ;;  %v1071_v43 = vadd.f32 %v1070_v40, %v1069_v35  ;;  %v1152_v44 = vpop.f32.mrf.mxu1 }
 0x10b   :  { %v1072_v45 = vpop.f32.mrf.mxu0  ;;  %v1153_v48 = vadd.f32 %v1152_v44, %v1151_v39 }
 0x10c   :  { %888 = vst.msk [vmem:[%s1640_s3 + $0x1c] sm:$0xf] %vm880_vm0, %v1012_v41  ;;  %v782_v46 = vmax.f32 %v721_v42, 0.0  ;;  %v604_v47 = vadd.f32 %v1071_v43, %v1531_v16  ;;  %v1154_v49 = vpop.f32.mrf.mxu1 }
 0x10d   :  { %v1073_v50 = vpop.f32.mrf.mxu0 }
 0x10e   :  { %v1013_v51 = vpack.c.bf16 %v782_v46, %v782_v46  ;;  %v724_v52 = vadd.f32 %v1153_v48, %v604_v47  ;;  %v1074_v53 = vadd.f32 %v1073_v50, %v1072_v45  ;;  %v1155_v54 = vpop.f32.mrf.mxu1 }
 0x10f   :  { %v1075_v55 = vpop.f32.mrf.mxu0  ;;  %v1156_v58 = vadd.f32 %v1155_v54, %v1154_v49 }
 0x110   :  { %889 = vst.msk [vmem:[%s1640_s3 + $0x20] sm:$0xf] %vm880_vm0, %v1013_v51  ;;  %v783_v56 = vmax.f32 %v724_v52, 0.0  ;;  %v609_v57 = vadd.f32 %v1074_v53, %v1531_v16  ;;  %v1157_v59 = vpop.f32.mrf.mxu1 }
 0x111   :  { %v1076_v60 = vpop.f32.mrf.mxu0 }
 0x112   :  { %v1014_v61 = vpack.c.bf16 %v783_v56, %v783_v56  ;;  %v729_v62 = vadd.f32 %v1156_v58, %v609_v57  ;;  %v1077_v63 = vadd.f32 %v1076_v60, %v1075_v55  ;;  %v1158_v0 = vpop.f32.mrf.mxu1 }
 0x113   :  { %v1078_v1 = vpop.f32.mrf.mxu0  ;;  %v1159_v4 = vadd.f32 %v1158_v0, %v1157_v59 }
 0x114   :  { %890 = vst.msk [vmem:[%s1640_s3 + $0x24] sm:$0xf] %vm880_vm0, %v1014_v61  ;;  %v784_v2 = vmax.f32 %v729_v62, 0.0  ;;  %v612_v3 = vadd.f32 %v1077_v63, %v1531_v16  ;;  %v1160_v5 = vpop.f32.mrf.mxu1 }
 0x115   :  { %v1079_v6 = vpop.f32.mrf.mxu0 }
 0x116   :  { %v1015_v7 = vpack.c.bf16 %v784_v2, %v784_v2  ;;  %v732_v8 = vadd.f32 %v1159_v4, %v612_v3  ;;  %v1080_v9 = vadd.f32 %v1079_v6, %v1078_v1  ;;  %v1161_v10 = vpop.f32.mrf.mxu1 }
 0x117   :  { %v1081_v11 = vpop.f32.mrf.mxu0  ;;  %v1162_v14 = vadd.f32 %v1161_v10, %v1160_v5 }
 0x118   :  { %891 = vst.msk [vmem:[%s1640_s3 + $0x28] sm:$0xf] %vm880_vm0, %v1015_v7  ;;  %v785_v12 = vmax.f32 %v732_v8, 0.0  ;;  %v617_v13 = vadd.f32 %v1080_v9, %v1531_v16  ;;  %v1163_v15 = vpop.f32.mrf.mxu1 }
 0x119   :  { %v1082_v17 = vpop.f32.mrf.mxu0 }
 0x11a   :  { %v1016_v18 = vpack.c.bf16 %v785_v12, %v785_v12  ;;  %v737_v19 = vadd.f32 %v1162_v14, %v617_v13  ;;  %v1083_v20 = vadd.f32 %v1082_v17, %v1081_v11  ;;  %v1164_v21 = vpop.f32.mrf.mxu1 }
 0x11b   :  { %v1084_v22 = vpop.f32.mrf.mxu0  ;;  %v1165_v25 = vadd.f32 %v1164_v21, %v1163_v15 }
 0x11c   :  { %892 = vst.msk [vmem:[%s1640_s3 + $0x2c] sm:$0xf] %vm880_vm0, %v1016_v18  ;;  %v786_v23 = vmax.f32 %v737_v19, 0.0  ;;  %v620_v24 = vadd.f32 %v1083_v20, %v1531_v16  ;;  %v1166_v26 = vpop.f32.mrf.mxu1 }
 0x11d   :  { %v1085_v27 = vpop.f32.mrf.mxu0 }
 0x11e   :  { %v1017_v28 = vpack.c.bf16 %v786_v23, %v786_v23  ;;  %v740_v29 = vadd.f32 %v1165_v25, %v620_v24  ;;  %v1086_v30 = vadd.f32 %v1085_v27, %v1084_v22  ;;  %v1167_v31 = vpop.f32.mrf.mxu1 }
 0x11f   :  { %v1087_v32 = vpop.f32.mrf.mxu0  ;;  %v1168_v35 = vadd.f32 %v1167_v31, %v1166_v26 }
 0x120   :  { %893 = vst.msk [vmem:[%s1640_s3 + $0x30] sm:$0xf] %vm880_vm0, %v1017_v28  ;;  %v787_v33 = vmax.f32 %v740_v29, 0.0  ;;  %v625_v34 = vadd.f32 %v1086_v30, %v1531_v16  ;;  %v1169_v36 = vpop.f32.mrf.mxu1 }
 0x121   :  { %v1088_v37 = vpop.f32.mrf.mxu0 }
 0x122   :  { %v1018_v38 = vpack.c.bf16 %v787_v33, %v787_v33  ;;  %v745_v39 = vadd.f32 %v1168_v35, %v625_v34  ;;  %v1089_v40 = vadd.f32 %v1088_v37, %v1087_v32  ;;  %v1170_v41 = vpop.f32.mrf.mxu1 }
 0x123   :  { %v1090_v42 = vpop.f32.mrf.mxu0  ;;  %v1171_v45 = vadd.f32 %v1170_v41, %v1169_v36 }
 0x124   :  { %894 = vst.msk [vmem:[%s1640_s3 + $0x34] sm:$0xf] %vm880_vm0, %v1018_v38  ;;  %v788_v43 = vmax.f32 %v745_v39, 0.0  ;;  %v628_v44 = vadd.f32 %v1089_v40, %v1531_v16  ;;  %v1172_v46 = vpop.f32.mrf.mxu1 }
 0x125   :  { %v1091_v47 = vpop.f32.mrf.mxu0 }
 0x126   :  { %v1019_v48 = vpack.c.bf16 %v788_v43, %v788_v43  ;;  %v748_v49 = vadd.f32 %v1171_v45, %v628_v44  ;;  %v1092_v50 = vadd.f32 %v1091_v47, %v1090_v42  ;;  %v1173_v51 = vpop.f32.mrf.mxu1 }
 0x127   :  { %v1093_v52 = vpop.f32.mrf.mxu0  ;;  %v1174_v55 = vadd.f32 %v1173_v51, %v1172_v46 }
 0x128   :  { %895 = vst.msk [vmem:[%s1640_s3 + $0x38] sm:$0xf] %vm880_vm0, %v1019_v48  ;;  %v789_v53 = vmax.f32 %v748_v49, 0.0  ;;  %v633_v54 = vadd.f32 %v1092_v50, %v1531_v16  ;;  %v1175_v56 = vpop.f32.mrf.mxu1 }
 0x129   :  { %v1094_v57 = vpop.f32.mrf.mxu0 }
 0x12a   :  { %v1020_v58 = vpack.c.bf16 %v789_v53, %v789_v53  ;;  %v753_v59 = vadd.f32 %v1174_v55, %v633_v54  ;;  %v1095_v60 = vadd.f32 %v1094_v57, %v1093_v52  ;;  %v1176_v61 = vpop.f32.mrf.mxu1 }
 0x12b   :  { %v1096_v62 = vpop.f32.mrf.mxu0  ;;  %v1177_v1 = vadd.f32 %v1176_v61, %v1175_v56 }
 0x12c   :  { %896 = vst.msk [vmem:[%s1640_s3 + $0x3c] sm:$0xf] %vm880_vm0, %v1020_v58  ;;  %v790_v63 = vmax.f32 %v753_v59, 0.0  ;;  %v636_v0 = vadd.f32 %v1095_v60, %v1531_v16  ;;  %v1178_v2 = vpop.f32.mrf.mxu1 }
 0x12d   :  { %v1097_v3 = vpop.f32.mrf.mxu0 }
 0x12e   :  { %v1021_v4 = vpack.c.bf16 %v790_v63, %v790_v63  ;;  %v756_v5 = vadd.f32 %v1177_v1, %v636_v0  ;;  %v1098_v6 = vadd.f32 %v1097_v3, %v1096_v62  ;;  %v1179_v7 = vpop.f32.mrf.mxu1 }
 0x12f   :  { %v1099_v8 = vpop.f32.mrf.mxu0  ;;  %v1180_v11 = vadd.f32 %v1179_v7, %v1178_v2 }
 0x130   :  { %897 = vst.msk [vmem:[%s1640_s3 + $0x40] sm:$0xf] %vm880_vm0, %v1021_v4  ;;  %v791_v9 = vmax.f32 %v756_v5, 0.0  ;;  %v641_v10 = vadd.f32 %v1098_v6, %v1531_v16  ;;  %v1181_v12 = vpop.f32.mrf.mxu1 }
 0x131   :  { %v1100_v13 = vpop.f32.mrf.mxu0 }
 0x132   :  { %v1022_v14 = vpack.c.bf16 %v791_v9, %v791_v9  ;;  %v761_v15 = vadd.f32 %v1180_v11, %v641_v10  ;;  %v1101_v17 = vadd.f32 %v1100_v13, %v1099_v8  ;;  %v1182_v18 = vpop.f32.mrf.mxu1 }
 0x133   :  { %v1102_v19 = vpop.f32.mrf.mxu0  ;;  %v1183_v22 = vadd.f32 %v1182_v18, %v1181_v12 }
 0x134   :  { %898 = vst.msk [vmem:[%s1640_s3 + $0x44] sm:$0xf] %vm880_vm0, %v1022_v14  ;;  %v792_v20 = vmax.f32 %v761_v15, 0.0  ;;  %v644_v21 = vadd.f32 %v1101_v17, %v1531_v16  ;;  %v1184_v23 = vpop.f32.mrf.mxu1 }
 0x135   :  { %v1103_v24 = vpop.f32.mrf.mxu0 }
 0x136   :  { %v1023_v25 = vpack.c.bf16 %v792_v20, %v792_v20  ;;  %v764_v26 = vadd.f32 %v1183_v22, %v644_v21  ;;  %v1104_v27 = vadd.f32 %v1103_v24, %v1102_v19  ;;  %v1185_v28 = vpop.f32.mrf.mxu1 }
 0x137   :  { %v1105_v29 = vpop.f32.mrf.mxu0  ;;  %v1186_v32 = vadd.f32 %v1185_v28, %v1184_v23 }
 0x138   :  { %899 = vst.msk [vmem:[%s1640_s3 + $0x48] sm:$0xf] %vm880_vm0, %v1023_v25  ;;  %v793_v30 = vmax.f32 %v764_v26, 0.0  ;;  %v649_v31 = vadd.f32 %v1104_v27, %v1531_v16  ;;  %v1187_v33 = vpop.f32.mrf.mxu1 }
 0x139   :  { %v1106_v34 = vpop.f32.mrf.mxu0 }
 0x13a   :  { %v1024_v35 = vpack.c.bf16 %v793_v30, %v793_v30  ;;  %v769_v36 = vadd.f32 %v1186_v32, %v649_v31  ;;  %v1188_v37 = vpop.f32.mrf.mxu1 }
 0x13c   :  { %900 = vst.msk [vmem:[%s1640_s3 + $0x4c] sm:$0xf] %vm880_vm0, %v1024_v35  ;;  %v794_v38 = vmax.f32 %v769_v36, 0.0 }
 0x13e   :  { %v1025_v39 = vpack.c.bf16 %v794_v38, %v794_v38 }
 0x140   :  { %902 = vst.msk [vmem:[%s1640_s3 + $0x50] sm:$0x1] %vm901_vm1, %v1025_v39 }

// kernel: dqn_forward.6
= control target key start
LH: loop header
LB: loop body
LE: loop exit
PB: predicated region body
PF: predicated region fallthrough
CT: control target
= control target key end

     0   :  { %v1286_v24 = vmov 0.0   ;;  %vm1287_vm0 = vmmov 0   ;;  %vm885_vm1 = vcmask 519168   ;;  %vm898_vm2 = vcmask 516096   ;;  %s1660_s1 = inlined_call_operand.vmem [shape: bf16[640,64], index: 1, kind: input, shape index: {}]   ;;  %s1661_s0 = inlined_call_operand.vmem [shape: bf16[98,640], index: 0, kind: input, shape index: {}]   ;;  %s1662_s2 = inlined_call_operand.vmem [shape: f32[1,64], index: 2, kind: input, shape index: {}]   ;;  %s1663_s3 = inlined_call_operand.vmem [shape: bf16[98,64], index: 3, kind: output, shape index: {}]  }
   0x1   :  { %v1199_v0 = vld [vmem:[%s1660_s1 + $0x78] sm:$0xff]   ;;  %v1201_v2 = vld [vmem:[%s1660_s1 + $0x70] sm:$0xff]   ;;  %v1203_v4 = vld [vmem:[%s1660_s1 + $0x68] sm:$0xff]  }
   0x2   :  { %v1200_v1 = vld [vmem:[%s1660_s1 + $0x38] sm:$0xff]   ;;  %1006 = vmatprep.subr.bf16.mxu0 %v1199_v0  ;;  %1181 = vmatprep.subr.bf16.mxu1 %v1199_v0  ;;  %v1202_v3 = vld [vmem:[%s1660_s1 + $0x30] sm:$0xff]   ;;  %v1204_v5 = vld [vmem:[%s1660_s1 + $0x28] sm:$0xff]  }
   0x3   :  { %1007 = vmatpush3.bf16.msra.mxu0 %v1200_v1  ;;  %1189 = vmatpush3.bf16.msra.mxu1 %v1200_v1  ;;  %v1205_v6 = vld [vmem:[%s1660_s1 + $0x60] sm:$0xff]   ;;  %v1207_v8 = vld [vmem:[%s1660_s1 + $0x58] sm:$0xff]   ;;  %v1209_v10 = vld [vmem:[%s1660_s1 + $0x50] sm:$0xff]  }
   0x4   :  { %1008 = vmatprep.subr.bf16.mxu0 %v1201_v2  ;;  %1182 = vmatprep.subr.bf16.mxu1 %v1201_v2  ;;  %v1206_v7 = vld [vmem:[%s1660_s1 + $0x20] sm:$0xff]   ;;  %v1208_v9 = vld [vmem:[%s1660_s1 + $0x18] sm:$0xff]   ;;  %v1210_v13 = vld [vmem:[%s1660_s1 + $0x10] sm:$0xff]  }
   0x5   :  { %v1217_v11 = vld [vmem:[%s1661_s0 + $0x4] ss:$20 sps:$4 sm:$0xff]   ;;  %v1211_v14 = vld [vmem:[%s1660_s1 + $0x48] sm:$0xff]   ;;  %v1215_v18 = vld [vmem:[%s1661_s0] ss:$20 sps:$4 sm:$0xff]  }
   0x6   :  { %v1220_v12 = vld [vmem:[%s1661_s0 + $0xa4] ss:$20 sps:$4 sm:$0xff]   ;;  %587 = vmatprep.mubr.bf16.mxu0 %v1217_v11  ;;  %v1212_v15 = vld [vmem:[%s1660_s1 + $0x8] sm:$0xff]   ;;  %v1218_v19 = vld [vmem:[%s1661_s0 + $0xa0] ss:$20 sps:$4 sm:$0xff]  }
   0x7   :  { %1009 = vmatpush3.bf16.msra.mxu0 %v1202_v3  ;;  %1190 = vmatpush3.bf16.msra.mxu1 %v1202_v3  ;;  %v1213_v16 = vld [vmem:[%s1660_s1 + $0x40] sm:$0xff]   ;;  %v1221_v20 = vld [vmem:[%s1660_s1 + $0xf8] sm:$0xff]   ;;  %v1224_v23 = vld [vmem:[%s1660_s1 + $0xf0] sm:$0xff]  }
   0x8   :  { %1010 = vmatprep.subr.bf16.mxu0 %v1203_v4  ;;  %1183 = vmatprep.subr.bf16.mxu1 %v1203_v4  ;;  %v1214_v17 = vld [vmem:[%s1660_s1] sm:$0xff]   ;;  %v1222_v21 = vld [vmem:[%s1660_s1 + $0xb8] sm:$0xff]   ;;  %v1225_v27 = vld [vmem:[%s1660_s1 + $0xb0] sm:$0xff]  }
   0x9   :  { %619 = vmatprep.mubr.bf16.mxu1 %v1220_v12  ;;  %v1223_v22 = vld [vmem:[%s1660_s1 + $0x138] sm:$0xff]   ;;  %v1227_v25 = vld [vmem:[%s1661_s0 + $0x2c] ss:$20 sps:$4 sm:$0xff]   ;;  %v1226_v28 = vld [vmem:[%s1660_s1 + $0x130] sm:$0xff]  }
   0xa   :  { %v1231_v26 = vld [vmem:[%s1661_s0 + $0xcc] ss:$20 sps:$4 sm:$0xff]   ;;  %v1229_v29 = vld [vmem:[%s1661_s0 + $0x28] ss:$20 sps:$4 sm:$0xff]   ;;  %v51_v33 = vld [vmem:[%s1661_s0 + $0xf0] sm:$0x11] }
   0xb   :  { %1011 = vmatpush3.bf16.msra.mxu0 %v1204_v5  ;;  %1191 = vmatpush3.bf16.msra.mxu1 %v1204_v5  ;;  %v1230_v30 = vld [vmem:[%s1660_s1 + $0xe8] sm:$0xff]   ;;  %v1236_v35 = vld [vmem:[%s1660_s1 + $0xe0] sm:$0xff]   ;;  %v936_v37 = vcombine.high %v51_v33, %v51_v33  ;;  %v1242_v40 = vld [vmem:[%s1660_s1 + $0xd8] sm:$0xff]   ;;  %v935_v43 = vcombine.low %v51_v33, %v51_v33 }
   0xc   :  { %1012 = vmatprep.subr.bf16.mxu0 %v1205_v6  ;;  %1184 = vmatprep.subr.bf16.mxu1 %v1205_v6  ;;  %v1233_v31 = vld [vmem:[%s1660_s1 + $0xa8] sm:$0xff]   ;;  %v1237_v38 = vld [vmem:[%s1660_s1 + $0xa0] sm:$0xff]   ;;  %v1244_v42 = vld [vmem:[%s1660_s1 + $0x98] sm:$0xff]  }
   0xd   :  { %v1235_v32 = vld [vmem:[%s1661_s0 + $0xc8] ss:$20 sps:$4 sm:$0xff]   ;;  %v1238_v39 = vld [vmem:[%s1660_s1 + $0x120] sm:$0xff]   ;;  %v1247_v45 = vld [vmem:[%s1660_s1 + $0xd0] sm:$0xff]  }
   0xe   :  { %v1234_v34 = vld [vmem:[%s1660_s1 + $0x128] sm:$0xff]   ;;  %v1241_v41 = vld [vmem:[%s1661_s0 + $0x50] ss:$20 sps:$4 sm:$0xff]   ;;  %v1245_v44 = vld [vmem:[%s1660_s1 + $0x118] sm:$0xff]  }
   0xf   :  { %1013 = vmatpush3.bf16.msra.mxu0 %v1206_v7  ;;  %1192 = vmatpush3.bf16.msra.mxu1 %v1206_v7  ;;  %v1239_v36 = vld [vmem:[%s1661_s0 + $0x54] ss:$20 sps:$4 sm:$0xff]   ;;  %v1250_v46 = vld [vmem:[%s1661_s0 + $0x7c] ss:$20 sps:$4 sm:$0xff]   ;;  %v1261_v47 = vld [vmem:[%s1661_s0 + $0xc] ss:$20 sps:$4 sm:$0xff]  }
  0x10   :  { %1014 = vmatprep.subr.bf16.mxu0 %v1207_v8  ;;  %1185 = vmatprep.subr.bf16.mxu1 %v1207_v8  ;;  %v1248_v48 = vld [vmem:[%s1660_s1 + $0x90] sm:$0xff]   ;;  %v1253_v50 = vld [vmem:[%s1660_s1 + $0xc8] sm:$0xff]   ;;  %v1256_v54 = vld [vmem:[%s1660_s1 + $0xc0] sm:$0xff]  }
  0x11   :  { %v1249_v49 = vld [vmem:[%s1660_s1 + $0x110] sm:$0xff]   ;;  %v1252_v51 = vld [vmem:[%s1661_s0 + $0x78] ss:$20 sps:$4 sm:$0xff]   ;;  %v1257_v55 = vld [vmem:[%s1660_s1 + $0x80] sm:$0xff]  }
  0x12   :  { %v1254_v52 = vld [vmem:[%s1660_s1 + $0x88] sm:$0xff]   ;;  %v1258_v56 = vld [vmem:[%s1660_s1 + $0x100] sm:$0xff]   ;;  %v1267_v62 = vld [vmem:[%s1661_s0 + $0x5c] ss:$20 sps:$4 sm:$0xff]  }
  0x13   :  { %1015 = vmatpush3.bf16.msra.mxu0 %v1208_v9  ;;  %1193 = vmatpush3.bf16.msra.mxu1 %v1208_v9  ;;  %v1255_v53 = vld [vmem:[%s1660_s1 + $0x108] sm:$0xff]   ;;  %v1262_v58 = vld [vmem:[%s1661_s0 + $0x10] ss:$20 sps:$4 sm:$0xff]   ;;  %v1270_v0 = vld [vmem:[%s1661_s0 + $0x60] ss:$20 sps:$4 sm:$0xff]  }
  0x14   :  { %1016 = vmatprep.subr.bf16.mxu0 %v1209_v10  ;;  %1186 = vmatprep.subr.bf16.mxu1 %v1209_v10  ;;  %v1259_v57 = vld [vmem:[%s1661_s0 + $0x8] ss:$20 sps:$4 sm:$0xff]   ;;  %v1265_v60 = vld [vmem:[%s1661_s0 + $0x30] ss:$20 sps:$4 sm:$0xff]   ;;  %v1266_v61 = vld [vmem:[%s1661_s0 + $0x38] ss:$20 sps:$4 sm:$0xff]  }
  0x15   :  { %v1263_v59 = vld [vmem:[%s1661_s0 + $0x34] ss:$20 sps:$4 sm:$0xff]   ;;  %v1269_v63 = vld [vmem:[%s1661_s0 + $0x58] ss:$20 sps:$4 sm:$0xff]   ;;  %v1278_v6 = vld [vmem:[%s1661_s0 + $0xb0] ss:$20 sps:$4 sm:$0xff]  }
  0x16   :  { %v1271_v1 = vld [vmem:[%s1661_s0 + $0x84] ss:$20 sps:$4 sm:$0xff]   ;;  %v1273_v2 = vld [vmem:[%s1661_s0 + $0x80] ss:$20 sps:$4 sm:$0xff]   ;;  %v1274_v3 = vld [vmem:[%s1661_s0 + $0x88] ss:$20 sps:$4 sm:$0xff]  }
  0x17   :  { %1017 = vmatpush3.bf16.msra.mxu0 %v1210_v13  ;;  %1194 = vmatpush3.bf16.msra.mxu1 %v1210_v13  ;;  %v1275_v4 = vld [vmem:[%s1661_s0 + $0xac] ss:$20 sps:$4 sm:$0xff]   ;;  %v1277_v5 = vld [vmem:[%s1661_s0 + $0xa8] ss:$20 sps:$4 sm:$0xff]   ;;  %v1281_v9 = vld [vmem:[%s1661_s0 + $0xd0] ss:$20 sps:$4 sm:$0xff]  }
  0x18   :  { %1018 = vmatprep.subr.bf16.mxu0 %v1211_v14  ;;  %1187 = vmatprep.subr.bf16.mxu1 %v1211_v14  ;;  %v1279_v7 = vld [vmem:[%s1661_s0 + $0xd4] ss:$20 sps:$4 sm:$0xff]   ;;  %v52_v8 = vld [vmem:[%s1661_s0 + $0xf8] sm:$0x11] }
  0x19   :  { %v1282_v10 = vld [vmem:[%s1661_s0 + $0xd8] ss:$20 sps:$4 sm:$0xff]   ;;  %v938_v11 = vcombine.high %v52_v8, %v52_v8  ;;  %v937_v12 = vcombine.low %v52_v8, %v52_v8  ;;  %v1285_v13 = vld [vmem:[%s1661_s0 + $0x100] ss:$0 sps:$4 sm:$0x11]  }
  0x1b   :  { %1019 = vmatpush3.bf16.msra.mxu0 %v1212_v15  ;;  %1195 = vmatpush3.bf16.msra.mxu1 %v1212_v15 }
  0x1c   :  { %1020 = vmatprep.subr.bf16.mxu0 %v1213_v16  ;;  %1188 = vmatprep.subr.bf16.mxu1 %v1213_v16 }
  0x1f   :  { %1021 = vmatpush3.bf16.msra.mxu0 %v1214_v17  ;;  %1196 = vmatpush3.bf16.msra.mxu1 %v1214_v17 }
  0x20   :  { %1064 = vmatprep.subr.bf16.mxu1 %v1221_v20  ;;  %1137 = vmatprep.subr.bf16.mxu0 %v1286_v24 }
  0x22   :  { %588 = vmatmul.mubr.bf16.vlgmr.msra.gmra.mxu0 %v1215_v18  ;;  %620 = vmatmul.mubr.bf16.vlgmr.msra.gmra.mxu1 %v1218_v19 }
  0x23   :  { %1065 = vmatpush3.bf16.msra.mxu1 %v1222_v21  ;;  %1138 = vmatpush3.bf16.msra.mxu0 %v1223_v22 }
  0x24   :  { %1066 = vmatprep.subr.bf16.mxu1 %v1224_v23  ;;  %1139 = vmatprep.subr.bf16.mxu0 %v1286_v24 }
  0x25   :  { %595 = vmatprep.mubr.bf16.mxu0 %v1227_v25  ;;  %627 = vmatprep.mubr.bf16.mxu1 %v1231_v26 }
  0x27   :  { %1067 = vmatpush3.bf16.msra.mxu1 %v1225_v27  ;;  %1140 = vmatpush3.bf16.msra.mxu0 %v1226_v28 }
  0x28   :  { %1068 = vmatprep.subr.bf16.mxu1 %v1230_v30  ;;  %1141 = vmatprep.subr.bf16.mxu0 %v1286_v24 }
  0x2a   :  { %596 = vmatmul.mubr.bf16.gmra.mxu0 %v1229_v29  ;;  %628 = vmatmul.mubr.bf16.gmra.mxu1 %v1235_v32 }
  0x2b   :  { %1069 = vmatpush3.bf16.msra.mxu1 %v1233_v31  ;;  %1142 = vmatpush3.bf16.msra.mxu0 %v1234_v34 }
  0x2c   :  { %1070 = vmatprep.subr.bf16.mxu1 %v1236_v35  ;;  %1143 = vmatprep.subr.bf16.mxu0 %v1286_v24 }
  0x2d   :  { %603 = vmatprep.mubr.bf16.mxu0 %v1239_v36  ;;  %635 = vmatprep.mubr.bf16.mxu1 %v936_v37 }
  0x2f   :  { %1071 = vmatpush3.bf16.msra.mxu1 %v1237_v38  ;;  %1144 = vmatpush3.bf16.msra.mxu0 %v1238_v39 }
  0x30   :  { %1072 = vmatprep.subr.bf16.mxu1 %v1242_v40  ;;  %1145 = vmatprep.subr.bf16.mxu0 %v1286_v24 }
  0x32   :  { %604 = vmatmul.mubr.bf16.gmra.mxu0 %v1241_v41  ;;  %636 = vmatmul.mubr.bf16.gmra.mxu1 %v935_v43 }
  0x33   :  { %1073 = vmatpush3.bf16.msra.mxu1 %v1244_v42  ;;  %1146 = vmatpush3.bf16.msra.mxu0 %v1245_v44 }
  0x34   :  { %1074 = vmatprep.subr.bf16.mxu1 %v1247_v45  ;;  %1147 = vmatprep.subr.bf16.mxu0 %v1286_v24  ;;  %v1580_v45 = vld [vmem:[%s1662_s2] ss:$0 sm:$0xff] }
  0x35   :  { %611 = vmatprep.mubr.bf16.mxu0 %v1250_v46  ;;  %675 = vmatprep.mubr.bf16.mxu1 %v1261_v47 }
  0x37   :  { %1075 = vmatpush3.bf16.msra.mxu1 %v1248_v48  ;;  %1148 = vmatpush3.bf16.msra.mxu0 %v1249_v49 }
  0x38   :  { %1076 = vmatprep.subr.bf16.mxu1 %v1253_v50  ;;  %1149 = vmatprep.subr.bf16.mxu0 %v1286_v24 }
  0x3a   :  { %612 = vmatmul.mubr.bf16.gmra.mxu0 %v1252_v51 }
  0x3b   :  { %1077 = vmatpush3.bf16.msra.mxu1 %v1254_v52  ;;  %1150 = vmatpush3.bf16.msra.mxu0 %v1255_v53 }
  0x3c   :  { %1078 = vmatprep.subr.bf16.mxu1 %v1256_v54  ;;  %1151 = vmatprep.subr.bf16.mxu0 %v1286_v24 }
  0x3d   :  { %1153 = vmatprep.mubr.msk.bf16.mxu0 %vm1287_vm0, %v1286_v24 }
  0x3f   :  { %1079 = vmatpush3.bf16.msra.mxu1 %v1257_v55  ;;  %1152 = vmatpush3.bf16.msra.mxu0 %v1258_v56 }
  0x42   :  { %676 = vmatmul.mubr.bf16.vlgmr.msra.gmra.mxu1 %v1259_v57  ;;  %1154 = vmatmul.mubr.bf16.vlgmr.msra.gmra.mxu0 %v1262_v58 }
  0x43   :  { %683 = vmatprep.mubr.bf16.mxu1 %v1263_v59  ;;  %1157 = vmatprep.mubr.msk.bf16.mxu0 %vm1287_vm0, %v1286_v24 }
  0x4a   :  { %684 = vmatmul.mubr.bf16.gmra.mxu1 %v1265_v60  ;;  %1158 = vmatmul.mubr.bf16.gmra.mxu0 %v1266_v61 }
  0x4b   :  { %691 = vmatprep.mubr.bf16.mxu1 %v1267_v62  ;;  %1161 = vmatprep.mubr.msk.bf16.mxu0 %vm1287_vm0, %v1286_v24 }
  0x52   :  { %692 = vmatmul.mubr.bf16.gmra.mxu1 %v1269_v63  ;;  %1162 = vmatmul.mubr.bf16.gmra.mxu0 %v1270_v0 }
  0x53   :  { %699 = vmatprep.mubr.bf16.mxu1 %v1271_v1  ;;  %1165 = vmatprep.mubr.msk.bf16.mxu0 %vm1287_vm0, %v1286_v24 }
  0x5a   :  { %700 = vmatmul.mubr.bf16.gmra.mxu1 %v1273_v2  ;;  %1166 = vmatmul.mubr.bf16.gmra.mxu0 %v1274_v3 }
  0x5b   :  { %707 = vmatprep.mubr.bf16.mxu1 %v1275_v4  ;;  %1169 = vmatprep.mubr.msk.bf16.mxu0 %vm1287_vm0, %v1286_v24 }
  0x62   :  { %708 = vmatmul.mubr.bf16.gmra.mxu1 %v1277_v5  ;;  %1170 = vmatmul.mubr.bf16.gmra.mxu0 %v1278_v6 }
  0x63   :  { %715 = vmatprep.mubr.bf16.mxu1 %v1279_v7  ;;  %1173 = vmatprep.mubr.msk.bf16.mxu0 %vm1287_vm0, %v1286_v24 }
  0x6a   :  { %716 = vmatmul.mubr.bf16.gmra.mxu1 %v1281_v9  ;;  %1174 = vmatmul.mubr.bf16.gmra.mxu0 %v1282_v10 }
  0x6b   :  { %723 = vmatprep.mubr.bf16.mxu1 %v938_v11  ;;  %1177 = vmatprep.mubr.msk.bf16.mxu0 %vm1287_vm0, %v1286_v24 }
  0x72   :  { %724 = vmatmul.mubr.bf16.gmra.mxu1 %v937_v12  ;;  %1178 = vmatmul.mubr.bf16.gmra.mxu0 %v1285_v13 }
  0xe2   :  { %v1022_v14 = vpop.f32.mrf.mxu0  ;;  %v1549_v15 = vpop.f32.mrf.mxu1 }
  0xe4   :  { %v1023_v16 = vpop.f32.mrf.mxu0  ;;  %v1551_v17 = vpop.f32.mrf.mxu1 }
  0xe5   :  { %v1024_v42 = vadd.f32 %v1023_v16, %v1022_v14 }
  0xe6   :  { %v1025_v18 = vpop.f32.mrf.mxu0  ;;  %v1553_v19 = vpop.f32.mrf.mxu1 }
  0xe7   :  { %v590_v48 = vadd.f32 %v1024_v42, %v1580_v45 }
  0xe8   :  { %v1026_v20 = vpop.f32.mrf.mxu0  ;;  %v1555_v21 = vpop.f32.mrf.mxu1 }
  0xe9   :  { %v1027_v49 = vadd.f32 %v1026_v20, %v1025_v18 }
  0xea   :  { %v1028_v22 = vpop.f32.mrf.mxu0  ;;  %v1557_v23 = vpop.f32.mrf.mxu1 }
  0xeb   :  { %v593_v57 = vadd.f32 %v1027_v49, %v1580_v45 }
  0xec   :  { %v1029_v24 = vpop.f32.mrf.mxu0  ;;  %v1559_v25 = vpop.f32.mrf.mxu1 }
  0xed   :  { %v1030_v54 = vadd.f32 %v1029_v24, %v1028_v22 }
  0xee   :  { %v1031_v26 = vpop.f32.mrf.mxu0  ;;  %v1561_v27 = vpop.f32.mrf.mxu1 }
  0xef   :  { %v598_v0 = vadd.f32 %v1030_v54, %v1580_v45 }
  0xf0   :  { %v1032_v28 = vpop.f32.mrf.mxu0  ;;  %v1563_v29 = vpop.f32.mrf.mxu1 }
  0xf1   :  { %v1033_v3 = vadd.f32 %v1032_v28, %v1031_v26 }
  0xf2   :  { %v1034_v30 = vpop.f32.mrf.mxu0  ;;  %v1565_v31 = vpop.f32.mrf.mxu1 }
  0xf3   :  { %v601_v14 = vadd.f32 %v1033_v3, %v1580_v45 }
  0xf4   :  { %v1035_v32 = vpop.f32.mrf.mxu0  ;;  %v1567_v33 = vpop.f32.mrf.mxu1 }
  0xf5   :  { %v1036_v11 = vadd.f32 %v1035_v32, %v1034_v30 }
  0xf6   :  { %v1037_v34 = vpop.f32.mrf.mxu0  ;;  %v1061_v35 = vpop.f32.mrf.mxu1 }
  0xf7   :  { %v606_v35 = vadd.f32 %v1036_v11, %v1580_v45 }
  0xf8   :  { %v1038_v36 = vpop.f32.mrf.mxu0  ;;  %v1062_v37 = vpop.f32.mrf.mxu1 }
  0xf9   :  { %v1039_v32 = vadd.f32 %v1038_v36, %v1037_v34 }
  0xfa   :  { %v1569_v38 = vpop.f32.mrf.mxu0 }
  0xfc   :  { %v1571_v39 = vpop.f32.mrf.mxu0 }
  0xfe   :  { %v1573_v40 = vpop.f32.mrf.mxu0 }
 0x100   :  { %v1575_v41 = vpop.f32.mrf.mxu0 }
 0x102   :  { %v1080_v43 = vpop.f32.mrf.mxu1  ;;  %v765_v44 = vpop.f32.mrf.mxu0 }
 0x104   :  { %v1081_v46 = vpop.f32.mrf.mxu1  ;;  %v1155_v47 = vpop.f32.mrf.mxu0 }
 0x105   :  { %v1082_v50 = vadd.f32 %v1081_v46, %v1080_v43 }
 0x106   :  { %v1083_v51 = vpop.f32.mrf.mxu1  ;;  %v768_v52 = vpop.f32.mrf.mxu0 }
 0x107   :  { %v678_v53 = vadd.f32 %v1082_v50, %v590_v48  ;;  %v1042_v50 = vadd.f32 %v1571_v39, %v1569_v38  ;;  %v1045_v39 = vadd.f32 %v1575_v41, %v1573_v40 }
 0x108   :  { %v1084_v55 = vpop.f32.mrf.mxu1  ;;  %v1156_v56 = vpop.f32.mrf.mxu0 }
 0x109   :  { %v766_v58 = vadd.f32 %v765_v44, %v678_v53  ;;  %v1085_v59 = vadd.f32 %v1084_v55, %v1083_v51  ;;  %v609_v53 = vadd.f32 %v1039_v32, %v1580_v45 }
 0x10a   :  { %v1086_v60 = vpop.f32.mrf.mxu1  ;;  %v773_v61 = vpop.f32.mrf.mxu0 }
 0x10b   :  { %v819_v62 = vmax.f32 %v766_v58, 0.0  ;;  %v681_v63 = vadd.f32 %v1085_v59, %v593_v57  ;;  %v614_v59 = vadd.f32 %v1042_v50, %v1580_v45 }
 0x10c   :  { %v1087_v1 = vpop.f32.mrf.mxu1  ;;  %v1159_v2 = vpop.f32.mrf.mxu0 }
 0x10d   :  { %v993_v4 = vpack.c.bf16 %v819_v62, %v819_v62  ;;  %v769_v5 = vadd.f32 %v768_v52, %v681_v63  ;;  %v1088_v6 = vadd.f32 %v1087_v1, %v1086_v60 }
 0x10e   :  { %v1089_v7 = vpop.f32.mrf.mxu1  ;;  %v776_v8 = vpop.f32.mrf.mxu0 }
 0x10f   :  { %886 = vst.msk [vmem:[%s1663_s3] sm:$0xf] %vm885_vm1, %v993_v4  ;;  %v820_v9 = vmax.f32 %v769_v5, 0.0  ;;  %v686_v10 = vadd.f32 %v1088_v6, %v598_v0  ;;  %v1048_v4 = vadd.f32 %v1551_v17, %v1549_v15 }
 0x110   :  { %v1090_v12 = vpop.f32.mrf.mxu1  ;;  %v1160_v13 = vpop.f32.mrf.mxu0 }
 0x111   :  { %v994_v16 = vpack.c.bf16 %v820_v9, %v820_v9  ;;  %v774_v18 = vadd.f32 %v773_v61, %v686_v10  ;;  %v1091_v20 = vadd.f32 %v1090_v12, %v1089_v7  ;;  %v617_v7 = vadd.f32 %v1045_v39, %v1580_v45 }
 0x112   :  { %v1092_v22 = vpop.f32.mrf.mxu1  ;;  %v781_v24 = vpop.f32.mrf.mxu0  ;;  %v1051_v13 = vadd.f32 %v1555_v21, %v1553_v19  ;;  %v1054_v21 = vadd.f32 %v1559_v25, %v1557_v23 }
 0x113   :  { %887 = vst.msk [vmem:[%s1663_s3 + $0x4] sm:$0xf] %vm885_vm1, %v994_v16  ;;  %v821_v26 = vmax.f32 %v774_v18, 0.0  ;;  %v689_v28 = vadd.f32 %v1091_v20, %v601_v14  ;;  %v622_v14 = vadd.f32 %v1048_v4, %v1580_v45 }
 0x114   :  { %v1093_v37 = vpop.f32.mrf.mxu1  ;;  %v1163_v30 = vpop.f32.mrf.mxu0 }
 0x115   :  { %v995_v42 = vpack.c.bf16 %v821_v26, %v821_v26  ;;  %v777_v43 = vadd.f32 %v776_v8, %v689_v28  ;;  %v1094_v44 = vadd.f32 %v1093_v37, %v1092_v22 }
 0x116   :  { %v1095_v46 = vpop.f32.mrf.mxu1  ;;  %v784_v47 = vpop.f32.mrf.mxu0 }
 0x117   :  { %888 = vst.msk [vmem:[%s1663_s3 + $0x8] sm:$0xf] %vm885_vm1, %v995_v42  ;;  %v822_v48 = vmax.f32 %v777_v43, 0.0  ;;  %v694_v49 = vadd.f32 %v1094_v44, %v606_v35  ;;  %v625_v35 = vadd.f32 %v1051_v13, %v1580_v45 }
 0x118   :  { %v1096_v51 = vpop.f32.mrf.mxu1  ;;  %v1164_v52 = vpop.f32.mrf.mxu0 }
 0x119   :  { %v996_v34 = vpack.c.bf16 %v822_v48, %v822_v48  ;;  %v782_v36 = vadd.f32 %v781_v24, %v694_v49  ;;  %v1097_v54 = vadd.f32 %v1096_v51, %v1095_v46  ;;  %v1057_v48 = vadd.f32 %v1563_v29, %v1561_v27 }
 0x11a   :  { %v1098_v55 = vpop.f32.mrf.mxu1  ;;  %v789_v56 = vpop.f32.mrf.mxu0  ;;  %v630_v51 = vadd.f32 %v1054_v21, %v1580_v45  ;;  %v1060_v29 = vadd.f32 %v1567_v33, %v1565_v31 }
 0x11b   :  { %889 = vst.msk [vmem:[%s1663_s3 + $0xc] sm:$0xf] %vm885_vm1, %v996_v34  ;;  %v823_v57 = vmax.f32 %v782_v36, 0.0  ;;  %v697_v58 = vadd.f32 %v1097_v54, %v609_v53 }
 0x11c   :  { %v1099_v60 = vpop.f32.mrf.mxu1  ;;  %v1167_v38 = vpop.f32.mrf.mxu0 }
 0x11d   :  { %v997_v61 = vpack.c.bf16 %v823_v57, %v823_v57  ;;  %v785_v62 = vadd.f32 %v784_v47, %v697_v58  ;;  %v1100_v63 = vadd.f32 %v1099_v60, %v1098_v55  ;;  %v633_v55 = vadd.f32 %v1057_v48, %v1580_v45 }
 0x11e   :  { %v1101_v0 = vpop.f32.mrf.mxu1  ;;  %v792_v1 = vpop.f32.mrf.mxu0 }
 0x11f   :  { %890 = vst.msk [vmem:[%s1663_s3 + $0x10] sm:$0xf] %vm885_vm1, %v997_v61  ;;  %v824_v2 = vmax.f32 %v785_v62, 0.0  ;;  %v702_v3 = vadd.f32 %v1100_v63, %v614_v59 }
 0x120   :  { %v1102_v5 = vpop.f32.mrf.mxu1  ;;  %v1168_v6 = vpop.f32.mrf.mxu0 }
 0x121   :  { %v998_v40 = vpack.c.bf16 %v824_v2, %v824_v2  ;;  %v790_v41 = vadd.f32 %v789_v56, %v702_v3  ;;  %v1103_v8 = vadd.f32 %v1102_v5, %v1101_v0  ;;  %v638_v0 = vadd.f32 %v1060_v29, %v1580_v45 }
 0x122   :  { %v1104_v9 = vpop.f32.mrf.mxu1  ;;  %v797_v10 = vpop.f32.mrf.mxu0 }
 0x123   :  { %891 = vst.msk [vmem:[%s1663_s3 + $0x14] sm:$0xf] %vm885_vm1, %v998_v40  ;;  %v825_v11 = vmax.f32 %v790_v41, 0.0  ;;  %v705_v12 = vadd.f32 %v1103_v8, %v617_v7 }
 0x124   :  { %v1105_v15 = vpop.f32.mrf.mxu1  ;;  %v1171_v17 = vpop.f32.mrf.mxu0 }
 0x125   :  { %v999_v16 = vpack.c.bf16 %v825_v11, %v825_v11  ;;  %v793_v18 = vadd.f32 %v792_v1, %v705_v12  ;;  %v1106_v20 = vadd.f32 %v1105_v15, %v1104_v9 }
 0x126   :  { %v1107_v22 = vpop.f32.mrf.mxu1  ;;  %v800_v24 = vpop.f32.mrf.mxu0 }
 0x127   :  { %892 = vst.msk [vmem:[%s1663_s3 + $0x18] sm:$0xf] %vm885_vm1, %v999_v16  ;;  %v826_v26 = vmax.f32 %v793_v18, 0.0  ;;  %v710_v28 = vadd.f32 %v1106_v20, %v622_v14 }
 0x128   :  { %v1108_v37 = vpop.f32.mrf.mxu1  ;;  %v1172_v19 = vpop.f32.mrf.mxu0 }
 0x129   :  { %v1000_v30 = vpack.c.bf16 %v826_v26, %v826_v26  ;;  %v798_v32 = vadd.f32 %v797_v10, %v710_v28  ;;  %v1109_v42 = vadd.f32 %v1108_v37, %v1107_v22 }
 0x12a   :  { %v1110_v43 = vpop.f32.mrf.mxu1  ;;  %v805_v44 = vpop.f32.mrf.mxu0 }
 0x12b   :  { %893 = vst.msk [vmem:[%s1663_s3 + $0x1c] sm:$0xf] %vm885_vm1, %v1000_v30  ;;  %v827_v46 = vmax.f32 %v798_v32, 0.0  ;;  %v713_v47 = vadd.f32 %v1109_v42, %v625_v35 }
 0x12c   :  { %v1111_v49 = vpop.f32.mrf.mxu1  ;;  %v1175_v50 = vpop.f32.mrf.mxu0 }
 0x12d   :  { %v1001_v23 = vpack.c.bf16 %v827_v46, %v827_v46  ;;  %v801_v25 = vadd.f32 %v800_v24, %v713_v47  ;;  %v1112_v52 = vadd.f32 %v1111_v49, %v1110_v43 }
 0x12e   :  { %v1113_v53 = vpop.f32.mrf.mxu1  ;;  %v808_v34 = vpop.f32.mrf.mxu0 }
 0x12f   :  { %894 = vst.msk [vmem:[%s1663_s3 + $0x20] sm:$0xf] %vm885_vm1, %v1001_v23  ;;  %v828_v36 = vmax.f32 %v801_v25, 0.0  ;;  %v718_v54 = vadd.f32 %v1112_v52, %v630_v51 }
 0x130   :  { %v1114_v56 = vpop.f32.mrf.mxu1  ;;  %v1176_v27 = vpop.f32.mrf.mxu0 }
 0x131   :  { %v1002_v57 = vpack.c.bf16 %v828_v36, %v828_v36  ;;  %v806_v58 = vadd.f32 %v805_v44, %v718_v54  ;;  %v1115_v59 = vadd.f32 %v1114_v56, %v1113_v53 }
 0x132   :  { %v1116_v60 = vpop.f32.mrf.mxu1  ;;  %v813_v38 = vpop.f32.mrf.mxu0 }
 0x133   :  { %895 = vst.msk [vmem:[%s1663_s3 + $0x24] sm:$0xf] %vm885_vm1, %v1002_v57  ;;  %v829_v39 = vmax.f32 %v806_v58, 0.0  ;;  %v721_v61 = vadd.f32 %v1115_v59, %v633_v55 }
 0x134   :  { %v1117_v62 = vpop.f32.mrf.mxu1  ;;  %v1179_v63 = vpop.f32.mrf.mxu0 }
 0x135   :  { %v1003_v1 = vpack.c.bf16 %v829_v39, %v829_v39  ;;  %v809_v2 = vadd.f32 %v808_v34, %v721_v61  ;;  %v1118_v3 = vadd.f32 %v1117_v62, %v1116_v60 }
 0x136   :  { %v1119_v31 = vpop.f32.mrf.mxu1  ;;  %v816_v33 = vpop.f32.mrf.mxu0 }
 0x137   :  { %896 = vst.msk [vmem:[%s1663_s3 + $0x28] sm:$0xf] %vm885_vm1, %v1003_v1  ;;  %v830_v4 = vmax.f32 %v809_v2, 0.0  ;;  %v726_v5 = vadd.f32 %v1118_v3, %v638_v0 }
 0x138   :  { %v1120_v6 = vpop.f32.mrf.mxu1  ;;  %v1180_v7 = vpop.f32.mrf.mxu0 }
 0x139   :  { %v1004_v40 = vpack.c.bf16 %v830_v4, %v830_v4  ;;  %v814_v41 = vadd.f32 %v813_v38, %v726_v5 }
 0x13b   :  { %897 = vst.msk [vmem:[%s1663_s3 + $0x2c] sm:$0xf] %vm885_vm1, %v1004_v40  ;;  %v831_v45 = vmax.f32 %v814_v41, 0.0 }
 0x13d   :  { %v1005_v8 = vpack.c.bf16 %v831_v45, %v831_v45 }
 0x13f   :  { %899 = vst.msk [vmem:[%s1663_s3 + $0x30] sm:$0x1] %vm898_vm2, %v1005_v8 }

// kernel: dqn_forward.7
= control target key start
LH: loop header
LB: loop body
LE: loop exit
PB: predicated region body
PF: predicated region fallthrough
CT: control target
= control target key end

     0   :  { %v828_v36 = vlaneseq  ;;  %v8609_v37 = vmov 1966171168   ;;  %s11423_s0 = inlined_call_operand.vmem [shape: bf16[2,3200], index: 0, kind: input, shape index: {}]   ;;  %s11424_s1 = inlined_call_operand.vmem [shape: bf16[3200,512], index: 1, kind: input, shape index: {}]   ;;  %s11425_s2 = inlined_call_operand.vmem [shape: f32[1,512], index: 2, kind: input, shape index: {}]   ;;  %s11426_s3 = inlined_call_operand.vmem [shape: bf16[512,128], index: 3, kind: input, shape index: {}]   ;;  %s11427_s4 = inlined_call_operand.vmem [shape: f32[1,128], index: 4, kind: input, shape index: {}]   ;;  %s11428_s5 = inlined_call_operand.hbm [shape: f32[2,128], index: 5, kind: output, shape index: {}]  }
   0x1   :  { %v7351_v0 = vld [vmem:[%s11424_s1 + $0xe4] ss:$16 sps:$4 sm:$0xff]   ;;  %v7355_v2 = vld [vmem:[%s11424_s1 + $0xe0] ss:$16 sps:$4 sm:$0xff]   ;;  %v854_v38 = vunpack.c.l.s4 %v8609_v37 }
   0x2   :  { %v7353_v1 = vld [vmem:[%s11424_s1 + $0x2e4] ss:$16 sps:$4 sm:$0xff]   ;;  %5038 = vmatprep.subr.bf16.mxu0 %v7351_v0  ;;  %v7356_v3 = vld [vmem:[%s11424_s1 + $0x2e0] ss:$16 sps:$4 sm:$0xff]   ;;  %v8759_v42 = vshrl.u32 %v828_v36, 7 }
   0x3   :  { %5079 = vmatprep.subr.bf16.mxu1 %v7353_v1  ;;  %v7357_v4 = vld [vmem:[%s11424_s1 + $0xc4] ss:$16 sps:$4 sm:$0xff]   ;;  %5039 = vmatpush1.bf16.msra.mxu0 %v7355_v2  ;;  %v7361_v6 = vld [vmem:[%s11424_s1 + $0xc0] ss:$16 sps:$4 sm:$0xff]   ;;  %v855_v43 = vunpack.c.0.s8 %v854_v38 }
   0x4   :  { %5080 = vmatpush1.bf16.msra.mxu1 %v7356_v3  ;;  %v7359_v5 = vld [vmem:[%s11424_s1 + $0x2c4] ss:$16 sps:$4 sm:$0xff]   ;;  %5040 = vmatprep.subr.bf16.mxu0 %v7357_v4  ;;  %v7362_v7 = vld [vmem:[%s11424_s1 + $0x2c0] ss:$16 sps:$4 sm:$0xff]  }
   0x5   :  { %5081 = vmatprep.subr.bf16.mxu1 %v7359_v5  ;;  %v7363_v8 = vld [vmem:[%s11424_s1 + $0xa4] ss:$16 sps:$4 sm:$0xff]   ;;  %v7367_v10 = vld [vmem:[%s11424_s1 + $0xa0] ss:$16 sps:$4 sm:$0xff]   ;;  %v8777_v49 = vsub.s32 %v855_v43, %v8759_v42 }
   0x6   :  { %v7365_v9 = vld [vmem:[%s11424_s1 + $0x2a4] ss:$16 sps:$4 sm:$0xff]   ;;  %v7368_v11 = vld [vmem:[%s11424_s1 + $0x2a0] ss:$16 sps:$4 sm:$0xff]  }
   0x7   :  { %5041 = vmatpush1.bf16.msra.mxu0 %v7361_v6  ;;  %v7369_v12 = vld [vmem:[%s11424_s1 + $0x84] ss:$16 sps:$4 sm:$0xff]   ;;  %v7373_v14 = vld [vmem:[%s11424_s1 + $0x80] ss:$16 sps:$4 sm:$0xff]  }
   0x8   :  { %5082 = vmatpush1.bf16.msra.mxu1 %v7362_v7  ;;  %5042 = vmatprep.subr.bf16.mxu0 %v7363_v8  ;;  %v7371_v13 = vld [vmem:[%s11424_s1 + $0x284] ss:$16 sps:$4 sm:$0xff]   ;;  %v7374_v15 = vld [vmem:[%s11424_s1 + $0x280] ss:$16 sps:$4 sm:$0xff]  }
   0x9   :  { %5083 = vmatprep.subr.bf16.mxu1 %v7365_v9  ;;  %v7375_v16 = vld [vmem:[%s11424_s1 + $0x64] ss:$16 sps:$4 sm:$0xff]   ;;  %v7379_v18 = vld [vmem:[%s11424_s1 + $0x60] ss:$16 sps:$4 sm:$0xff]  }
   0xa   :  { %v7377_v17 = vld [vmem:[%s11424_s1 + $0x264] ss:$16 sps:$4 sm:$0xff]   ;;  %v7380_v19 = vld [vmem:[%s11424_s1 + $0x260] ss:$16 sps:$4 sm:$0xff]  }
   0xb   :  { %5043 = vmatpush1.bf16.msra.mxu0 %v7367_v10  ;;  %v7381_v20 = vld [vmem:[%s11424_s1 + $0x44] ss:$16 sps:$4 sm:$0xff]   ;;  %v7385_v22 = vld [vmem:[%s11424_s1 + $0x40] ss:$16 sps:$4 sm:$0xff]  }
   0xc   :  { %5084 = vmatpush1.bf16.msra.mxu1 %v7368_v11  ;;  %5044 = vmatprep.subr.bf16.mxu0 %v7369_v12  ;;  %v7383_v21 = vld [vmem:[%s11424_s1 + $0x244] ss:$16 sps:$4 sm:$0xff]   ;;  %v7386_v23 = vld [vmem:[%s11424_s1 + $0x240] ss:$16 sps:$4 sm:$0xff]  }
   0xd   :  { %5085 = vmatprep.subr.bf16.mxu1 %v7371_v13  ;;  %v7387_v24 = vld [vmem:[%s11424_s1 + $0x24] ss:$16 sps:$4 sm:$0xff]   ;;  %v7391_v26 = vld [vmem:[%s11424_s1 + $0x20] ss:$16 sps:$4 sm:$0xff]  }
   0xe   :  { %v7389_v25 = vld [vmem:[%s11424_s1 + $0x224] ss:$16 sps:$4 sm:$0xff]   ;;  %v7392_v27 = vld [vmem:[%s11424_s1 + $0x220] ss:$16 sps:$4 sm:$0xff]  }
   0xf   :  { %5045 = vmatpush1.bf16.msra.mxu0 %v7373_v14  ;;  %v7393_v28 = vld [vmem:[%s11424_s1 + $0x4] ss:$16 sps:$4 sm:$0xff]   ;;  %v7397_v30 = vld [vmem:[%s11424_s1] ss:$16 sps:$4 sm:$0xff]  }
  0x10   :  { %5086 = vmatpush1.bf16.msra.mxu1 %v7374_v15  ;;  %5046 = vmatprep.subr.bf16.mxu0 %v7375_v16  ;;  %v7395_v29 = vld [vmem:[%s11424_s1 + $0x204] ss:$16 sps:$4 sm:$0xff]   ;;  %v7398_v31 = vld [vmem:[%s11424_s1 + $0x200] ss:$16 sps:$4 sm:$0xff]  }
  0x11   :  { %5087 = vmatprep.subr.bf16.mxu1 %v7377_v17  ;;  %v7399_v32 = vld [vmem:[%s11424_s1 + $0x1e4] ss:$16 sps:$4 sm:$0xff]   ;;  %v7403_v34 = vld [vmem:[%s11424_s1 + $0x1e0] ss:$16 sps:$4 sm:$0xff]  }
  0x12   :  { %v7401_v33 = vld [vmem:[%s11424_s1 + $0x3e4] ss:$16 sps:$4 sm:$0xff]   ;;  %v7404_v35 = vld [vmem:[%s11424_s1 + $0x3e0] ss:$16 sps:$4 sm:$0xff]  }
  0x13   :  { %5047 = vmatpush1.bf16.msra.mxu0 %v7379_v18  ;;  %v7405_v39 = vld [vmem:[%s11424_s1 + $0x1c4] ss:$16 sps:$4 sm:$0xff]   ;;  %v7409_v41 = vld [vmem:[%s11424_s1 + $0x1c0] ss:$16 sps:$4 sm:$0xff]  }
  0x14   :  { %5088 = vmatpush1.bf16.msra.mxu1 %v7380_v19  ;;  %5048 = vmatprep.subr.bf16.mxu0 %v7381_v20  ;;  %v7407_v40 = vld [vmem:[%s11424_s1 + $0x3c4] ss:$16 sps:$4 sm:$0xff]   ;;  %v7410_v44 = vld [vmem:[%s11424_s1 + $0x3c0] ss:$16 sps:$4 sm:$0xff]  }
  0x15   :  { %5089 = vmatprep.subr.bf16.mxu1 %v7383_v21  ;;  %v7411_v45 = vld [vmem:[%s11424_s1 + $0x1a4] ss:$16 sps:$4 sm:$0xff]   ;;  %v7415_v47 = vld [vmem:[%s11424_s1 + $0x1a0] ss:$16 sps:$4 sm:$0xff]  }
  0x16   :  { %v7413_v46 = vld [vmem:[%s11424_s1 + $0x3a4] ss:$16 sps:$4 sm:$0xff]   ;;  %v7416_v48 = vld [vmem:[%s11424_s1 + $0x3a0] ss:$16 sps:$4 sm:$0xff]  }
  0x17   :  { %5049 = vmatpush1.bf16.msra.mxu0 %v7385_v22  ;;  %v7417_v50 = vld [vmem:[%s11424_s1 + $0x184] ss:$16 sps:$4 sm:$0xff]   ;;  %v7421_v53 = vld [vmem:[%s11424_s1 + $0x180] ss:$16 sps:$4 sm:$0xff]  }
  0x18   :  { %5090 = vmatpush1.bf16.msra.mxu1 %v7386_v23  ;;  %5050 = vmatprep.subr.bf16.mxu0 %v7387_v24  ;;  %v7419_v51 = vld [vmem:[%s11424_s1 + $0x384] ss:$16 sps:$4 sm:$0xff]   ;;  %v7422_v55 = vld [vmem:[%s11424_s1 + $0x380] ss:$16 sps:$4 sm:$0xff]  }
  0x19   :  { %5091 = vmatprep.subr.bf16.mxu1 %v7389_v25  ;;  %v22_v52 = vld [vmem:[%s11423_s0] sm:$0xff] }
  0x1a   :  { %v859_v54 = vrot.slane %v22_v52, %v8777_v49  ;;  %v7423_v56 = vld [vmem:[%s11424_s1 + $0x164] ss:$16 sps:$4 sm:$0xff]   ;;  %v7427_v59 = vld [vmem:[%s11424_s1 + $0x160] ss:$16 sps:$4 sm:$0xff]   ;;  %v852_v1 = vcombine.high %v22_v52, %v22_v52 }
  0x1b   :  { %5051 = vmatpush1.bf16.msra.mxu0 %v7391_v26  ;;  %v7425_v57 = vld [vmem:[%s11424_s1 + $0x364] ss:$16 sps:$4 sm:$0xff]   ;;  %v7428_v61 = vld [vmem:[%s11424_s1 + $0x360] ss:$16 sps:$4 sm:$0xff]  }
  0x1c   :  { %5092 = vmatpush1.bf16.msra.mxu1 %v7392_v27  ;;  %5052 = vmatprep.subr.bf16.mxu0 %v7393_v28  ;;  %v867_v58 = vcombine.high %v859_v54, %v859_v54  ;;  %v7429_v62 = vld [vmem:[%s11424_s1 + $0x144] ss:$16 sps:$4 sm:$0xff]   ;;  %v7433_v2 = vld [vmem:[%s11424_s1 + $0x140] ss:$16 sps:$4 sm:$0xff]   ;;  %v8835_v6 = vrot.slane %v852_v1, %v8777_v49  ;;  %v8855_v13 = vrot.slane %v859_v54, %v8777_v49 }
  0x1d   :  { %5093 = vmatprep.subr.bf16.mxu1 %v7395_v29  ;;  %v7431_v63 = vld [vmem:[%s11424_s1 + $0x344] ss:$16 sps:$4 sm:$0xff]   ;;  %v7434_v3 = vld [vmem:[%s11424_s1 + $0x340] ss:$16 sps:$4 sm:$0xff]  }
  0x1e   :  { %v8805_v60 = vrot.slane %v867_v58, %v8777_v49  ;;  %v7435_v4 = vld [vmem:[%s11424_s1 + $0x124] ss:$16 sps:$4 sm:$0xff]   ;;  %v7439_v7 = vld [vmem:[%s11424_s1 + $0x120] ss:$16 sps:$4 sm:$0xff]   ;;  %v868_v11 = vcombine.high %v8835_v6, %v8835_v6  ;;  %v8871_v18 = vcombine.high %v8855_v13, %v8855_v13 }
  0x1f   :  { %5053 = vmatpush1.bf16.msra.mxu0 %v7397_v30  ;;  %v7437_v5 = vld [vmem:[%s11424_s1 + $0x324] ss:$16 sps:$4 sm:$0xff]   ;;  %v7440_v8 = vld [vmem:[%s11424_s1 + $0x320] ss:$16 sps:$4 sm:$0xff]  }
  0x20   :  { %5094 = vmatpush1.bf16.msra.mxu1 %v7398_v31  ;;  %5054 = vmatprep.subr.bf16.mxu0 %v7399_v32  ;;  %v8818_v0 = vcombine.high %v8805_v60, %v8805_v60  ;;  %v7441_v9 = vld [vmem:[%s11424_s1 + $0x104] ss:$16 sps:$4 sm:$0xff]   ;;  %v7445_v12 = vld [vmem:[%s11424_s1 + $0x100] ss:$16 sps:$4 sm:$0xff]   ;;  %v8867_v17 = vrot.slane %v868_v11, %v8777_v49 }
  0x21   :  { %5095 = vmatprep.subr.bf16.mxu1 %v7401_v33  ;;  %5070 = vmatprep.mubr.bf16.mxu0 %v8805_v60  ;;  %v7443_v10 = vld [vmem:[%s11424_s1 + $0x304] ss:$16 sps:$4 sm:$0xff]   ;;  %v7446_v14 = vld [vmem:[%s11424_s1 + $0x300] ss:$16 sps:$4 sm:$0xff]  }
  0x22   :  { %5111 = vmatprep.mubr.bf16.mxu1 %v8818_v0  ;;  %v7449_v15 = vld [vmem:[%s11424_s1 + $0x4e4] ss:$16 sps:$4 sm:$0xff]   ;;  %v7447_v19 = vld [vmem:[%s11424_s1 + $0x4e0] ss:$16 sps:$4 sm:$0xff]   ;;  %v8887_v23 = vcombine.high %v8867_v17, %v8867_v17 }
  0x23   :  { %5055 = vmatpush2.bf16.msra.mxu0 %v7403_v34  ;;  %v7452_v16 = vld [vmem:[%s11424_s1 + $0x6e4] ss:$16 sps:$4 sm:$0xff]   ;;  %v7450_v20 = vld [vmem:[%s11424_s1 + $0x6e0] ss:$16 sps:$4 sm:$0xff]  }
  0x24   :  { %5096 = vmatpush2.bf16.msra.mxu1 %v7404_v35  ;;  %5056 = vmatprep.subr.bf16.mxu0 %v7405_v39  ;;  %v7455_v21 = vld [vmem:[%s11424_s1 + $0x4c4] ss:$16 sps:$4 sm:$0xff]   ;;  %v7453_v24 = vld [vmem:[%s11424_s1 + $0x4c0] ss:$16 sps:$4 sm:$0xff]  }
  0x25   :  { %5097 = vmatprep.subr.bf16.mxu1 %v7407_v40  ;;  %v7458_v22 = vld [vmem:[%s11424_s1 + $0x6c4] ss:$16 sps:$4 sm:$0xff]   ;;  %v7456_v25 = vld [vmem:[%s11424_s1 + $0x6c0] ss:$16 sps:$4 sm:$0xff]  }
  0x26   :  { %v7461_v26 = vld [vmem:[%s11424_s1 + $0x4a4] ss:$16 sps:$4 sm:$0xff]   ;;  %v7459_v28 = vld [vmem:[%s11424_s1 + $0x4a0] ss:$16 sps:$4 sm:$0xff]  }
  0x27   :  { %5057 = vmatpush2.bf16.msra.mxu0 %v7409_v41  ;;  %v7464_v27 = vld [vmem:[%s11424_s1 + $0x6a4] ss:$16 sps:$4 sm:$0xff]   ;;  %v7462_v29 = vld [vmem:[%s11424_s1 + $0x6a0] ss:$16 sps:$4 sm:$0xff]  }
  0x28   :  { %5098 = vmatpush2.bf16.msra.mxu1 %v7410_v44  ;;  %5058 = vmatprep.subr.bf16.mxu0 %v7411_v45  ;;  %v7467_v30 = vld [vmem:[%s11424_s1 + $0x484] ss:$16 sps:$4 sm:$0xff]   ;;  %v7465_v32 = vld [vmem:[%s11424_s1 + $0x480] ss:$16 sps:$4 sm:$0xff]  }
  0x29   :  { %5099 = vmatprep.subr.bf16.mxu1 %v7413_v46  ;;  %v7470_v31 = vld [vmem:[%s11424_s1 + $0x684] ss:$16 sps:$4 sm:$0xff]   ;;  %v7468_v33 = vld [vmem:[%s11424_s1 + $0x680] ss:$16 sps:$4 sm:$0xff]  }
  0x2a   :  { %v7473_v34 = vld [vmem:[%s11424_s1 + $0x464] ss:$16 sps:$4 sm:$0xff]   ;;  %v7471_v36 = vld [vmem:[%s11424_s1 + $0x460] ss:$16 sps:$4 sm:$0xff]  }
  0x2b   :  { %5059 = vmatpush2.bf16.msra.mxu0 %v7415_v47  ;;  %v7476_v35 = vld [vmem:[%s11424_s1 + $0x664] ss:$16 sps:$4 sm:$0xff]   ;;  %v7474_v37 = vld [vmem:[%s11424_s1 + $0x660] ss:$16 sps:$4 sm:$0xff]  }
  0x2c   :  { %5100 = vmatpush2.bf16.msra.mxu1 %v7416_v48  ;;  %5060 = vmatprep.subr.bf16.mxu0 %v7417_v50  ;;  %v7479_v38 = vld [vmem:[%s11424_s1 + $0x444] ss:$16 sps:$4 sm:$0xff]   ;;  %v7477_v40 = vld [vmem:[%s11424_s1 + $0x440] ss:$16 sps:$4 sm:$0xff]  }
  0x2d   :  { %5101 = vmatprep.subr.bf16.mxu1 %v7419_v51  ;;  %v7482_v39 = vld [vmem:[%s11424_s1 + $0x644] ss:$16 sps:$4 sm:$0xff]   ;;  %v7480_v41 = vld [vmem:[%s11424_s1 + $0x640] ss:$16 sps:$4 sm:$0xff]  }
  0x2e   :  { %v7485_v43 = vld [vmem:[%s11424_s1 + $0x424] ss:$16 sps:$4 sm:$0xff]   ;;  %v7483_v45 = vld [vmem:[%s11424_s1 + $0x420] ss:$16 sps:$4 sm:$0xff]  }
  0x2f   :  { %5061 = vmatpush2.bf16.msra.mxu0 %v7421_v53  ;;  %v7488_v44 = vld [vmem:[%s11424_s1 + $0x624] ss:$16 sps:$4 sm:$0xff]   ;;  %v7486_v46 = vld [vmem:[%s11424_s1 + $0x620] ss:$16 sps:$4 sm:$0xff]  }
  0x30   :  { %5102 = vmatpush2.bf16.msra.mxu1 %v7422_v55  ;;  %5062 = vmatprep.subr.bf16.mxu0 %v7423_v56  ;;  %v7491_v47 = vld [vmem:[%s11424_s1 + $0x404] ss:$16 sps:$4 sm:$0xff]   ;;  %v7489_v50 = vld [vmem:[%s11424_s1 + $0x400] ss:$16 sps:$4 sm:$0xff]  }
  0x31   :  { %5103 = vmatprep.subr.bf16.mxu1 %v7425_v57  ;;  %v7494_v48 = vld [vmem:[%s11424_s1 + $0x604] ss:$16 sps:$4 sm:$0xff]   ;;  %v7492_v51 = vld [vmem:[%s11424_s1 + $0x600] ss:$16 sps:$4 sm:$0xff]  }
  0x32   :  { %v7497_v52 = vld [vmem:[%s11424_s1 + $0x5e4] ss:$16 sps:$4 sm:$0xff]   ;;  %v7495_v54 = vld [vmem:[%s11424_s1 + $0x5e0] ss:$16 sps:$4 sm:$0xff]  }
  0x33   :  { %5063 = vmatpush2.bf16.msra.mxu0 %v7427_v59  ;;  %v7500_v53 = vld [vmem:[%s11424_s1 + $0x7e4] ss:$16 sps:$4 sm:$0xff]   ;;  %v7498_v55 = vld [vmem:[%s11424_s1 + $0x7e0] ss:$16 sps:$4 sm:$0xff]  }
  0x34   :  { %5104 = vmatpush2.bf16.msra.mxu1 %v7428_v61  ;;  %5064 = vmatprep.subr.bf16.mxu0 %v7429_v62  ;;  %v7503_v56 = vld [vmem:[%s11424_s1 + $0x5c4] ss:$16 sps:$4 sm:$0xff]   ;;  %v7501_v58 = vld [vmem:[%s11424_s1 + $0x5c0] ss:$16 sps:$4 sm:$0xff]  }
  0x35   :  { %5105 = vmatprep.subr.bf16.mxu1 %v7431_v63  ;;  %v7506_v57 = vld [vmem:[%s11424_s1 + $0x7c4] ss:$16 sps:$4 sm:$0xff]   ;;  %v7504_v59 = vld [vmem:[%s11424_s1 + $0x7c0] ss:$16 sps:$4 sm:$0xff]  }
  0x36   :  { %v7509_v61 = vld [vmem:[%s11424_s1 + $0x5a4] ss:$16 sps:$4 sm:$0xff]   ;;  %v7507_v63 = vld [vmem:[%s11424_s1 + $0x5a0] ss:$16 sps:$4 sm:$0xff]  }
  0x37   :  { %5065 = vmatpush2.bf16.msra.mxu0 %v7433_v2  ;;  %v7512_v62 = vld [vmem:[%s11424_s1 + $0x7a4] ss:$16 sps:$4 sm:$0xff]   ;;  %v7510_v1 = vld [vmem:[%s11424_s1 + $0x7a0] ss:$16 sps:$4 sm:$0xff]  }
  0x38   :  { %5106 = vmatpush2.bf16.msra.mxu1 %v7434_v3  ;;  %5066 = vmatprep.subr.bf16.mxu0 %v7435_v4  ;;  %v7515_v2 = vld [vmem:[%s11424_s1 + $0x584] ss:$16 sps:$4 sm:$0xff]   ;;  %v7513_v4 = vld [vmem:[%s11424_s1 + $0x580] ss:$16 sps:$4 sm:$0xff]  }
  0x39   :  { %5107 = vmatprep.subr.bf16.mxu1 %v7437_v5  ;;  %v7518_v3 = vld [vmem:[%s11424_s1 + $0x784] ss:$16 sps:$4 sm:$0xff]   ;;  %v7516_v5 = vld [vmem:[%s11424_s1 + $0x780] ss:$16 sps:$4 sm:$0xff]  }
  0x3a   :  { %v7527_v11 = vld [vmem:[%s11424_s1 + $0x544] ss:$16 sps:$4 sm:$0xff]  }
  0x3b   :  { %5067 = vmatpush2.bf16.msra.mxu0 %v7439_v7  ;;  %v7521_v7 = vld [vmem:[%s11424_s1 + $0x564] ss:$16 sps:$4 sm:$0xff]  }
  0x3c   :  { %5108 = vmatpush2.bf16.msra.mxu1 %v7440_v8  ;;  %5068 = vmatprep.subr.bf16.mxu0 %v7441_v9  ;;  %v7524_v8 = vld [vmem:[%s11424_s1 + $0x764] ss:$16 sps:$4 sm:$0xff]   ;;  %v7519_v9 = vld [vmem:[%s11424_s1 + $0x560] ss:$16 sps:$4 sm:$0xff]  }
  0x3d   :  { %5109 = vmatprep.subr.bf16.mxu1 %v7443_v10  ;;  %v7522_v10 = vld [vmem:[%s11424_s1 + $0x760] ss:$16 sps:$4 sm:$0xff]  }
  0x3f   :  { %5069 = vmatpush2.bf16.msra.mxu0 %v7445_v12  ;;  %v7530_v12 = vld [vmem:[%s11424_s1 + $0x744] ss:$16 sps:$4 sm:$0xff]  }
  0x40   :  { %5110 = vmatpush2.bf16.msra.mxu1 %v7446_v14  ;;  %5120 = vmatprep.subr.bf16.mxu0 %v7449_v15  ;;  %v7525_v14 = vld [vmem:[%s11424_s1 + $0x540] ss:$16 sps:$4 sm:$0xff]  }
  0x41   :  { %5161 = vmatprep.subr.bf16.mxu1 %v7452_v16  ;;  %v7528_v15 = vld [vmem:[%s11424_s1 + $0x740] ss:$16 sps:$4 sm:$0xff]   ;;  %v7533_v16 = vld [vmem:[%s11424_s1 + $0x524] ss:$16 sps:$4 sm:$0xff]  }
  0x42   :  { %5071 = vmatmul.mubr.bf16.vlgmr.msra.gmra.mxu0 %v8855_v13 }
  0x43   :  { %5112 = vmatmul.mubr.bf16.vlgmr.msra.gmra.mxu1 %v8871_v18  ;;  %5121 = vmatpush1.bf16.msra.mxu0 %v7447_v19  ;;  %v7536_v19 = vld [vmem:[%s11424_s1 + $0x724] ss:$16 sps:$4 sm:$0xff]  }
  0x44   :  { %5162 = vmatpush1.bf16.msra.mxu1 %v7450_v20  ;;  %5122 = vmatprep.subr.bf16.mxu0 %v7455_v21  ;;  %v7531_v20 = vld [vmem:[%s11424_s1 + $0x520] ss:$16 sps:$4 sm:$0xff]  }
  0x45   :  { %5163 = vmatprep.subr.bf16.mxu1 %v7458_v22  ;;  %5152 = vmatprep.mubr.bf16.mxu0 %v8867_v17  ;;  %v7534_v21 = vld [vmem:[%s11424_s1 + $0x720] ss:$16 sps:$4 sm:$0xff]   ;;  %v7539_v22 = vld [vmem:[%s11424_s1 + $0x504] ss:$16 sps:$4 sm:$0xff]  }
  0x46   :  { %5193 = vmatprep.mubr.bf16.mxu1 %v8887_v23 }
  0x47   :  { %5123 = vmatpush1.bf16.msra.mxu0 %v7453_v24  ;;  %v7542_v24 = vld [vmem:[%s11424_s1 + $0x704] ss:$16 sps:$4 sm:$0xff]  }
  0x48   :  { %5164 = vmatpush1.bf16.msra.mxu1 %v7456_v25  ;;  %5124 = vmatprep.subr.bf16.mxu0 %v7461_v26  ;;  %v7537_v25 = vld [vmem:[%s11424_s1 + $0x500] ss:$16 sps:$4 sm:$0xff]   ;;  %v9066_v26 = vrot.slane %v8835_v6, %v8777_v49 }
  0x49   :  { %5165 = vmatprep.subr.bf16.mxu1 %v7464_v27  ;;  %v7540_v27 = vld [vmem:[%s11424_s1 + $0x700] ss:$16 sps:$4 sm:$0xff]  }
  0x4a   :  { %v9079_v6 = vcombine.high %v9066_v26, %v9066_v26 }
  0x4b   :  { %5125 = vmatpush1.bf16.msra.mxu0 %v7459_v28  ;;  %v7546_v28 = vld [vmem:[%s11424_s1 + $0x8e4] ss:$16 sps:$4 sm:$0xff]  }
  0x4c   :  { %5166 = vmatpush1.bf16.msra.mxu1 %v7462_v29  ;;  %5126 = vmatprep.subr.bf16.mxu0 %v7467_v30  ;;  %v7549_v29 = vld [vmem:[%s11424_s1 + $0xae4] ss:$16 sps:$4 sm:$0xff]   ;;  %v7544_v30 = vld [vmem:[%s11424_s1 + $0x8e0] ss:$16 sps:$4 sm:$0xff]  }
  0x4d   :  { %5167 = vmatprep.subr.bf16.mxu1 %v7470_v31  ;;  %v7547_v31 = vld [vmem:[%s11424_s1 + $0xae0] ss:$16 sps:$4 sm:$0xff]  }
  0x4f   :  { %5127 = vmatpush1.bf16.msra.mxu0 %v7465_v32  ;;  %v9090_v32 = vld [vmem:[%s11423_s0 + $0x8] sm:$0xff] }
  0x50   :  { %5168 = vmatpush1.bf16.msra.mxu1 %v7468_v33  ;;  %5128 = vmatprep.subr.bf16.mxu0 %v7473_v34  ;;  %v7552_v33 = vld [vmem:[%s11424_s1 + $0x8c4] ss:$16 sps:$4 sm:$0xff]  }
  0x51   :  { %5169 = vmatprep.subr.bf16.mxu1 %v7476_v35  ;;  %v7555_v34 = vld [vmem:[%s11424_s1 + $0xac4] ss:$16 sps:$4 sm:$0xff]   ;;  %v9100_v35 = vrot.slane %v9090_v32, %v8777_v49 }
  0x53   :  { %5129 = vmatpush1.bf16.msra.mxu0 %v7471_v36  ;;  %v916_v36 = vcombine.high %v9100_v35, %v9100_v35 }
  0x54   :  { %5170 = vmatpush1.bf16.msra.mxu1 %v7474_v37  ;;  %5130 = vmatprep.subr.bf16.mxu0 %v7479_v38  ;;  %v7550_v37 = vld [vmem:[%s11424_s1 + $0x8c0] ss:$16 sps:$4 sm:$0xff]  }
  0x55   :  { %5171 = vmatprep.subr.bf16.mxu1 %v7482_v39  ;;  %v7553_v38 = vld [vmem:[%s11424_s1 + $0xac0] ss:$16 sps:$4 sm:$0xff]   ;;  %v7558_v39 = vld [vmem:[%s11424_s1 + $0x8a4] ss:$16 sps:$4 sm:$0xff]  }
  0x57   :  { %5131 = vmatpush1.bf16.msra.mxu0 %v7477_v40  ;;  %v7561_v40 = vld [vmem:[%s11424_s1 + $0xaa4] ss:$16 sps:$4 sm:$0xff]  }
  0x58   :  { %5172 = vmatpush1.bf16.msra.mxu1 %v7480_v41  ;;  %5132 = vmatprep.subr.bf16.mxu0 %v7485_v43  ;;  %v9119_v41 = vrot.slane %v916_v36, %v8777_v49  ;;  %v7622_v36 = vld [vmem:[%s11424_s1 + $0x940] ss:$16 sps:$4 sm:$0xff]  }
  0x59   :  { %5173 = vmatprep.subr.bf16.mxu1 %v7488_v44  ;;  %v7556_v44 = vld [vmem:[%s11424_s1 + $0x8a0] ss:$16 sps:$4 sm:$0xff]  }
  0x5a   :  { %v9124_v43 = vcombine.high %v9119_v41, %v9119_v41 }
  0x5b   :  { %5133 = vmatpush1.bf16.msra.mxu0 %v7483_v45  ;;  %v7559_v45 = vld [vmem:[%s11424_s1 + $0xaa0] ss:$16 sps:$4 sm:$0xff]  }
  0x5c   :  { %5174 = vmatpush1.bf16.msra.mxu1 %v7486_v46  ;;  %5134 = vmatprep.subr.bf16.mxu0 %v7491_v47  ;;  %v7564_v46 = vld [vmem:[%s11424_s1 + $0x884] ss:$16 sps:$4 sm:$0xff]  }
  0x5d   :  { %5175 = vmatprep.subr.bf16.mxu1 %v7494_v48  ;;  %v7567_v47 = vld [vmem:[%s11424_s1 + $0xa84] ss:$16 sps:$4 sm:$0xff]   ;;  %v7562_v48 = vld [vmem:[%s11424_s1 + $0x880] ss:$16 sps:$4 sm:$0xff]  }
  0x5f   :  { %5135 = vmatpush1.bf16.msra.mxu0 %v7489_v50  ;;  %v7565_v50 = vld [vmem:[%s11424_s1 + $0xa80] ss:$16 sps:$4 sm:$0xff]  }
  0x60   :  { %5176 = vmatpush1.bf16.msra.mxu1 %v7492_v51  ;;  %5136 = vmatprep.subr.bf16.mxu0 %v7497_v52  ;;  %v7570_v51 = vld [vmem:[%s11424_s1 + $0x864] ss:$16 sps:$4 sm:$0xff]  }
  0x61   :  { %5177 = vmatprep.subr.bf16.mxu1 %v7500_v53  ;;  %v7573_v52 = vld [vmem:[%s11424_s1 + $0xa64] ss:$16 sps:$4 sm:$0xff]   ;;  %v7568_v53 = vld [vmem:[%s11424_s1 + $0x860] ss:$16 sps:$4 sm:$0xff]  }
  0x63   :  { %5137 = vmatpush2.bf16.msra.mxu0 %v7495_v54  ;;  %v7571_v54 = vld [vmem:[%s11424_s1 + $0xa60] ss:$16 sps:$4 sm:$0xff]  }
  0x64   :  { %5178 = vmatpush2.bf16.msra.mxu1 %v7498_v55  ;;  %5138 = vmatprep.subr.bf16.mxu0 %v7503_v56  ;;  %v7576_v55 = vld [vmem:[%s11424_s1 + $0x844] ss:$16 sps:$4 sm:$0xff]  }
  0x65   :  { %5179 = vmatprep.subr.bf16.mxu1 %v7506_v57  ;;  %v7579_v56 = vld [vmem:[%s11424_s1 + $0xa44] ss:$16 sps:$4 sm:$0xff]   ;;  %v7574_v57 = vld [vmem:[%s11424_s1 + $0x840] ss:$16 sps:$4 sm:$0xff]  }
  0x67   :  { %5139 = vmatpush2.bf16.msra.mxu0 %v7501_v58  ;;  %v7577_v58 = vld [vmem:[%s11424_s1 + $0xa40] ss:$16 sps:$4 sm:$0xff]  }
  0x68   :  { %5180 = vmatpush2.bf16.msra.mxu1 %v7504_v59  ;;  %5140 = vmatprep.subr.bf16.mxu0 %v7509_v61  ;;  %v7582_v59 = vld [vmem:[%s11424_s1 + $0x824] ss:$16 sps:$4 sm:$0xff]  }
  0x69   :  { %5181 = vmatprep.subr.bf16.mxu1 %v7512_v62  ;;  %v7585_v61 = vld [vmem:[%s11424_s1 + $0xa24] ss:$16 sps:$4 sm:$0xff]   ;;  %v7580_v62 = vld [vmem:[%s11424_s1 + $0x820] ss:$16 sps:$4 sm:$0xff]  }
  0x6b   :  { %5141 = vmatpush2.bf16.msra.mxu0 %v7507_v63  ;;  %v7583_v63 = vld [vmem:[%s11424_s1 + $0xa20] ss:$16 sps:$4 sm:$0xff]  }
  0x6c   :  { %5182 = vmatpush2.bf16.msra.mxu1 %v7510_v1  ;;  %5142 = vmatprep.subr.bf16.mxu0 %v7515_v2  ;;  %v7588_v1 = vld [vmem:[%s11424_s1 + $0x804] ss:$16 sps:$4 sm:$0xff]  }
  0x6d   :  { %5183 = vmatprep.subr.bf16.mxu1 %v7518_v3  ;;  %v7591_v2 = vld [vmem:[%s11424_s1 + $0xa04] ss:$16 sps:$4 sm:$0xff]   ;;  %v7586_v3 = vld [vmem:[%s11424_s1 + $0x800] ss:$16 sps:$4 sm:$0xff]  }
  0x6f   :  { %5143 = vmatpush2.bf16.msra.mxu0 %v7513_v4  ;;  %v7589_v4 = vld [vmem:[%s11424_s1 + $0xa00] ss:$16 sps:$4 sm:$0xff]  }
  0x70   :  { %5184 = vmatpush2.bf16.msra.mxu1 %v7516_v5  ;;  %5144 = vmatprep.subr.bf16.mxu0 %v7521_v7  ;;  %v7594_v5 = vld [vmem:[%s11424_s1 + $0x9e4] ss:$16 sps:$4 sm:$0xff]  }
  0x71   :  { %5185 = vmatprep.subr.bf16.mxu1 %v7524_v8  ;;  %v7597_v7 = vld [vmem:[%s11424_s1 + $0xbe4] ss:$16 sps:$4 sm:$0xff]   ;;  %v7592_v8 = vld [vmem:[%s11424_s1 + $0x9e0] ss:$16 sps:$4 sm:$0xff]  }
  0x73   :  { %5145 = vmatpush2.bf16.msra.mxu0 %v7519_v9  ;;  %v7595_v9 = vld [vmem:[%s11424_s1 + $0xbe0] ss:$16 sps:$4 sm:$0xff]  }
  0x74   :  { %5186 = vmatpush2.bf16.msra.mxu1 %v7522_v10  ;;  %5146 = vmatprep.subr.bf16.mxu0 %v7527_v11  ;;  %v7600_v10 = vld [vmem:[%s11424_s1 + $0x9c4] ss:$16 sps:$4 sm:$0xff]  }
  0x75   :  { %5187 = vmatprep.subr.bf16.mxu1 %v7530_v12  ;;  %v7603_v11 = vld [vmem:[%s11424_s1 + $0xbc4] ss:$16 sps:$4 sm:$0xff]   ;;  %v7598_v12 = vld [vmem:[%s11424_s1 + $0x9c0] ss:$16 sps:$4 sm:$0xff]  }
  0x77   :  { %5147 = vmatpush2.bf16.msra.mxu0 %v7525_v14  ;;  %v7601_v14 = vld [vmem:[%s11424_s1 + $0xbc0] ss:$16 sps:$4 sm:$0xff]  }
  0x78   :  { %5188 = vmatpush2.bf16.msra.mxu1 %v7528_v15  ;;  %5148 = vmatprep.subr.bf16.mxu0 %v7533_v16  ;;  %v7606_v15 = vld [vmem:[%s11424_s1 + $0x9a4] ss:$16 sps:$4 sm:$0xff]  }
  0x79   :  { %5189 = vmatprep.subr.bf16.mxu1 %v7536_v19  ;;  %v7609_v16 = vld [vmem:[%s11424_s1 + $0xba4] ss:$16 sps:$4 sm:$0xff]   ;;  %v7604_v19 = vld [vmem:[%s11424_s1 + $0x9a0] ss:$16 sps:$4 sm:$0xff]  }
  0x7b   :  { %5149 = vmatpush2.bf16.msra.mxu0 %v7531_v20  ;;  %v7607_v20 = vld [vmem:[%s11424_s1 + $0xba0] ss:$16 sps:$4 sm:$0xff]  }
  0x7c   :  { %5190 = vmatpush2.bf16.msra.mxu1 %v7534_v21  ;;  %5150 = vmatprep.subr.bf16.mxu0 %v7539_v22  ;;  %v7612_v21 = vld [vmem:[%s11424_s1 + $0x984] ss:$16 sps:$4 sm:$0xff]  }
  0x7d   :  { %5191 = vmatprep.subr.bf16.mxu1 %v7542_v24  ;;  %v7615_v22 = vld [vmem:[%s11424_s1 + $0xb84] ss:$16 sps:$4 sm:$0xff]   ;;  %v7610_v24 = vld [vmem:[%s11424_s1 + $0x980] ss:$16 sps:$4 sm:$0xff]  }
  0x7f   :  { %5151 = vmatpush2.bf16.msra.mxu0 %v7537_v25  ;;  %v7613_v25 = vld [vmem:[%s11424_s1 + $0xb80] ss:$16 sps:$4 sm:$0xff]  }
  0x80   :  { %5192 = vmatpush2.bf16.msra.mxu1 %v7540_v27  ;;  %5202 = vmatprep.subr.bf16.mxu0 %v7546_v28  ;;  %v7618_v27 = vld [vmem:[%s11424_s1 + $0x964] ss:$16 sps:$4 sm:$0xff]  }
  0x81   :  { %5243 = vmatprep.subr.bf16.mxu1 %v7549_v29  ;;  %v7621_v28 = vld [vmem:[%s11424_s1 + $0xb64] ss:$16 sps:$4 sm:$0xff]   ;;  %v7616_v29 = vld [vmem:[%s11424_s1 + $0x960] ss:$16 sps:$4 sm:$0xff]  }
  0x82   :  { %5153 = vmatmul.mubr.bf16.vlgmr.msra.gmra.mxu0 %v9066_v26 }
  0x83   :  { %5194 = vmatmul.mubr.bf16.vlgmr.msra.gmra.mxu1 %v9079_v6  ;;  %5203 = vmatpush1.bf16.msra.mxu0 %v7544_v30  ;;  %v7619_v30 = vld [vmem:[%s11424_s1 + $0xb60] ss:$16 sps:$4 sm:$0xff]  }
  0x84   :  { %5244 = vmatpush1.bf16.msra.mxu1 %v7547_v31  ;;  %5204 = vmatprep.subr.bf16.mxu0 %v7552_v33  ;;  %v7624_v31 = vld [vmem:[%s11424_s1 + $0x944] ss:$16 sps:$4 sm:$0xff]  }
  0x85   :  { %5245 = vmatprep.subr.bf16.mxu1 %v7555_v34  ;;  %5234 = vmatprep.mubr.bf16.mxu0 %v9119_v41  ;;  %v7627_v33 = vld [vmem:[%s11424_s1 + $0xb44] ss:$16 sps:$4 sm:$0xff]   ;;  %v901_v34 = vcombine.high %v9090_v32, %v9090_v32 }
  0x86   :  { %5275 = vmatprep.mubr.bf16.mxu1 %v9124_v43  ;;  %v7633_v32 = vld [vmem:[%s11424_s1 + $0xb24] ss:$16 sps:$4 sm:$0xff]  }
  0x87   :  { %5205 = vmatpush1.bf16.msra.mxu0 %v7550_v37  ;;  %v7625_v37 = vld [vmem:[%s11424_s1 + $0xb40] ss:$16 sps:$4 sm:$0xff]  }
  0x88   :  { %5246 = vmatpush1.bf16.msra.mxu1 %v7553_v38  ;;  %5206 = vmatprep.subr.bf16.mxu0 %v7558_v39  ;;  %v7630_v38 = vld [vmem:[%s11424_s1 + $0x924] ss:$16 sps:$4 sm:$0xff]   ;;  %v9274_v39 = vrot.slane %v901_v34, %v8777_v49  ;;  %v7691_v34 = vld [vmem:[%s11424_s1 + $0xfe0] ss:$16 sps:$4 sm:$0xff]  }
  0x89   :  { %5247 = vmatprep.subr.bf16.mxu1 %v7561_v40  ;;  %v7628_v40 = vld [vmem:[%s11424_s1 + $0x920] ss:$16 sps:$4 sm:$0xff]  }
  0x8b   :  { %5207 = vmatpush1.bf16.msra.mxu0 %v7556_v44  ;;  %v7631_v44 = vld [vmem:[%s11424_s1 + $0xb20] ss:$16 sps:$4 sm:$0xff]  }
  0x8c   :  { %5248 = vmatpush1.bf16.msra.mxu1 %v7559_v45  ;;  %5208 = vmatprep.subr.bf16.mxu0 %v7564_v46  ;;  %v7636_v45 = vld [vmem:[%s11424_s1 + $0x904] ss:$16 sps:$4 sm:$0xff]  }
  0x8d   :  { %5249 = vmatprep.subr.bf16.mxu1 %v7567_v47  ;;  %v7639_v46 = vld [vmem:[%s11424_s1 + $0xb04] ss:$16 sps:$4 sm:$0xff]   ;;  %v917_v47 = vcombine.high %v9274_v39, %v9274_v39 }
  0x8f   :  { %5209 = vmatpush1.bf16.msra.mxu0 %v7562_v48  ;;  %v7634_v48 = vld [vmem:[%s11424_s1 + $0x900] ss:$16 sps:$4 sm:$0xff]  }
  0x90   :  { %5250 = vmatpush1.bf16.msra.mxu1 %v7565_v50  ;;  %5210 = vmatprep.subr.bf16.mxu0 %v7570_v51  ;;  %v9295_v50 = vrot.slane %v9100_v35, %v8777_v49  ;;  %v7637_v51 = vld [vmem:[%s11424_s1 + $0xb00] ss:$16 sps:$4 sm:$0xff]  }
  0x91   :  { %5251 = vmatprep.subr.bf16.mxu1 %v7573_v52  ;;  %v7642_v52 = vld [vmem:[%s11424_s1 + $0xce4] ss:$16 sps:$4 sm:$0xff]  }
  0x92   :  { %v9311_v35 = vcombine.high %v9295_v50, %v9295_v50 }
  0x93   :  { %5211 = vmatpush1.bf16.msra.mxu0 %v7568_v53  ;;  %v7645_v53 = vld [vmem:[%s11424_s1 + $0xee4] ss:$16 sps:$4 sm:$0xff]  }
  0x94   :  { %5252 = vmatpush1.bf16.msra.mxu1 %v7571_v54  ;;  %5212 = vmatprep.subr.bf16.mxu0 %v7576_v55  ;;  %v9307_v54 = vrot.slane %v917_v47, %v8777_v49  ;;  %v7640_v55 = vld [vmem:[%s11424_s1 + $0xce0] ss:$16 sps:$4 sm:$0xff]   ;;  %v7708_v47 = vld [vmem:[%s11424_s1 + $0xd84] ss:$16 sps:$4 sm:$0xff]  }
  0x95   :  { %5253 = vmatprep.subr.bf16.mxu1 %v7579_v56  ;;  %v7643_v56 = vld [vmem:[%s11424_s1 + $0xee0] ss:$16 sps:$4 sm:$0xff]  }
  0x97   :  { %5213 = vmatpush1.bf16.msra.mxu0 %v7574_v57  ;;  %v7648_v57 = vld [vmem:[%s11424_s1 + $0xcc4] ss:$16 sps:$4 sm:$0xff]  }
  0x98   :  { %5254 = vmatpush1.bf16.msra.mxu1 %v7577_v58  ;;  %5214 = vmatprep.subr.bf16.mxu0 %v7582_v59  ;;  %v7651_v58 = vld [vmem:[%s11424_s1 + $0xec4] ss:$16 sps:$4 sm:$0xff]   ;;  %v9327_v59 = vcombine.high %v9307_v54, %v9307_v54 }
  0x99   :  { %5255 = vmatprep.subr.bf16.mxu1 %v7585_v61  ;;  %v7646_v61 = vld [vmem:[%s11424_s1 + $0xcc0] ss:$16 sps:$4 sm:$0xff]  }
  0x9b   :  { %5215 = vmatpush1.bf16.msra.mxu0 %v7580_v62  ;;  %v7649_v62 = vld [vmem:[%s11424_s1 + $0xec0] ss:$16 sps:$4 sm:$0xff]  }
  0x9c   :  { %5256 = vmatpush1.bf16.msra.mxu1 %v7583_v63  ;;  %5216 = vmatprep.subr.bf16.mxu0 %v7588_v1  ;;  %v7654_v63 = vld [vmem:[%s11424_s1 + $0xca4] ss:$16 sps:$4 sm:$0xff]  }
  0x9d   :  { %5257 = vmatprep.subr.bf16.mxu1 %v7591_v2  ;;  %v7657_v1 = vld [vmem:[%s11424_s1 + $0xea4] ss:$16 sps:$4 sm:$0xff]   ;;  %v7652_v2 = vld [vmem:[%s11424_s1 + $0xca0] ss:$16 sps:$4 sm:$0xff]  }
  0x9f   :  { %5217 = vmatpush1.bf16.msra.mxu0 %v7586_v3  ;;  %v7655_v3 = vld [vmem:[%s11424_s1 + $0xea0] ss:$16 sps:$4 sm:$0xff]  }
  0xa0   :  { %5258 = vmatpush1.bf16.msra.mxu1 %v7589_v4  ;;  %5218 = vmatprep.subr.bf16.mxu0 %v7594_v5  ;;  %v7660_v4 = vld [vmem:[%s11424_s1 + $0xc84] ss:$16 sps:$4 sm:$0xff]  }
  0xa1   :  { %5259 = vmatprep.subr.bf16.mxu1 %v7597_v7  ;;  %v7663_v5 = vld [vmem:[%s11424_s1 + $0xe84] ss:$16 sps:$4 sm:$0xff]   ;;  %v7658_v7 = vld [vmem:[%s11424_s1 + $0xc80] ss:$16 sps:$4 sm:$0xff]  }
  0xa3   :  { %5219 = vmatpush2.bf16.msra.mxu0 %v7592_v8  ;;  %v7661_v8 = vld [vmem:[%s11424_s1 + $0xe80] ss:$16 sps:$4 sm:$0xff]  }
  0xa4   :  { %5260 = vmatpush2.bf16.msra.mxu1 %v7595_v9  ;;  %5220 = vmatprep.subr.bf16.mxu0 %v7600_v10  ;;  %v7666_v9 = vld [vmem:[%s11424_s1 + $0xc64] ss:$16 sps:$4 sm:$0xff]  }
  0xa5   :  { %5261 = vmatprep.subr.bf16.mxu1 %v7603_v11  ;;  %v7669_v10 = vld [vmem:[%s11424_s1 + $0xe64] ss:$16 sps:$4 sm:$0xff]   ;;  %v7664_v11 = vld [vmem:[%s11424_s1 + $0xc60] ss:$16 sps:$4 sm:$0xff]  }
  0xa7   :  { %5221 = vmatpush2.bf16.msra.mxu0 %v7598_v12  ;;  %v7667_v12 = vld [vmem:[%s11424_s1 + $0xe60] ss:$16 sps:$4 sm:$0xff]  }
  0xa8   :  { %5262 = vmatpush2.bf16.msra.mxu1 %v7601_v14  ;;  %5222 = vmatprep.subr.bf16.mxu0 %v7606_v15  ;;  %v7672_v14 = vld [vmem:[%s11424_s1 + $0xc44] ss:$16 sps:$4 sm:$0xff]  }
  0xa9   :  { %5263 = vmatprep.subr.bf16.mxu1 %v7609_v16  ;;  %v7675_v15 = vld [vmem:[%s11424_s1 + $0xe44] ss:$16 sps:$4 sm:$0xff]   ;;  %v7670_v16 = vld [vmem:[%s11424_s1 + $0xc40] ss:$16 sps:$4 sm:$0xff]  }
  0xab   :  { %5223 = vmatpush2.bf16.msra.mxu0 %v7604_v19  ;;  %v7673_v19 = vld [vmem:[%s11424_s1 + $0xe40] ss:$16 sps:$4 sm:$0xff]  }
  0xac   :  { %5264 = vmatpush2.bf16.msra.mxu1 %v7607_v20  ;;  %5224 = vmatprep.subr.bf16.mxu0 %v7612_v21  ;;  %v7678_v20 = vld [vmem:[%s11424_s1 + $0xc24] ss:$16 sps:$4 sm:$0xff]  }
  0xad   :  { %5265 = vmatprep.subr.bf16.mxu1 %v7615_v22  ;;  %v7681_v21 = vld [vmem:[%s11424_s1 + $0xe24] ss:$16 sps:$4 sm:$0xff]   ;;  %v7676_v22 = vld [vmem:[%s11424_s1 + $0xc20] ss:$16 sps:$4 sm:$0xff]  }
  0xaf   :  { %5225 = vmatpush2.bf16.msra.mxu0 %v7610_v24  ;;  %v7679_v24 = vld [vmem:[%s11424_s1 + $0xe20] ss:$16 sps:$4 sm:$0xff]  }
  0xb0   :  { %5266 = vmatpush2.bf16.msra.mxu1 %v7613_v25  ;;  %5226 = vmatprep.subr.bf16.mxu0 %v7618_v27  ;;  %v7684_v25 = vld [vmem:[%s11424_s1 + $0xc04] ss:$16 sps:$4 sm:$0xff]  }
  0xb1   :  { %5267 = vmatprep.subr.bf16.mxu1 %v7621_v28  ;;  %v7687_v27 = vld [vmem:[%s11424_s1 + $0xe04] ss:$16 sps:$4 sm:$0xff]   ;;  %v7682_v28 = vld [vmem:[%s11424_s1 + $0xc00] ss:$16 sps:$4 sm:$0xff]  }
  0xb3   :  { %5227 = vmatpush2.bf16.msra.mxu0 %v7616_v29  ;;  %v7685_v29 = vld [vmem:[%s11424_s1 + $0xe00] ss:$16 sps:$4 sm:$0xff]  }
  0xb4   :  { %5268 = vmatpush2.bf16.msra.mxu1 %v7619_v30  ;;  %5228 = vmatprep.subr.bf16.mxu0 %v7624_v31  ;;  %v7690_v30 = vld [vmem:[%s11424_s1 + $0xde4] ss:$16 sps:$4 sm:$0xff]  }
  0xb5   :  { %5269 = vmatprep.subr.bf16.mxu1 %v7627_v33  ;;  %v7693_v31 = vld [vmem:[%s11424_s1 + $0xfe4] ss:$16 sps:$4 sm:$0xff]   ;;  %v7688_v33 = vld [vmem:[%s11424_s1 + $0xde0] ss:$16 sps:$4 sm:$0xff]  }
  0xb7   :  { %5229 = vmatpush2.bf16.msra.mxu0 %v7622_v36  ;;  %v7696_v36 = vld [vmem:[%s11424_s1 + $0xdc4] ss:$16 sps:$4 sm:$0xff]  }
  0xb8   :  { %5270 = vmatpush2.bf16.msra.mxu1 %v7625_v37  ;;  %5230 = vmatprep.subr.bf16.mxu0 %v7630_v38  ;;  %v7699_v37 = vld [vmem:[%s11424_s1 + $0xfc4] ss:$16 sps:$4 sm:$0xff]   ;;  %v7694_v38 = vld [vmem:[%s11424_s1 + $0xdc0] ss:$16 sps:$4 sm:$0xff]  }
  0xb9   :  { %5271 = vmatprep.subr.bf16.mxu1 %v7633_v32  ;;  %v7697_v32 = vld [vmem:[%s11424_s1 + $0xfc0] ss:$16 sps:$4 sm:$0xff]  }
  0xbb   :  { %5231 = vmatpush2.bf16.msra.mxu0 %v7628_v40  ;;  %v7702_v40 = vld [vmem:[%s11424_s1 + $0xda4] ss:$16 sps:$4 sm:$0xff]  }
  0xbc   :  { %5272 = vmatpush2.bf16.msra.mxu1 %v7631_v44  ;;  %5232 = vmatprep.subr.bf16.mxu0 %v7636_v45  ;;  %v7705_v44 = vld [vmem:[%s11424_s1 + $0xfa4] ss:$16 sps:$4 sm:$0xff]   ;;  %v7700_v45 = vld [vmem:[%s11424_s1 + $0xda0] ss:$16 sps:$4 sm:$0xff]  }
  0xbd   :  { %5273 = vmatprep.subr.bf16.mxu1 %v7639_v46  ;;  %v7703_v46 = vld [vmem:[%s11424_s1 + $0xfa0] ss:$16 sps:$4 sm:$0xff]  }
  0xbf   :  { %5233 = vmatpush2.bf16.msra.mxu0 %v7634_v48  ;;  %v7711_v48 = vld [vmem:[%s11424_s1 + $0xf84] ss:$16 sps:$4 sm:$0xff]  }
  0xc0   :  { %5274 = vmatpush2.bf16.msra.mxu1 %v7637_v51  ;;  %5284 = vmatprep.subr.bf16.mxu0 %v7642_v52  ;;  %v7706_v51 = vld [vmem:[%s11424_s1 + $0xd80] ss:$16 sps:$4 sm:$0xff]  }
  0xc1   :  { %5325 = vmatprep.subr.bf16.mxu1 %v7645_v53  ;;  %v7709_v52 = vld [vmem:[%s11424_s1 + $0xf80] ss:$16 sps:$4 sm:$0xff]   ;;  %v7714_v53 = vld [vmem:[%s11424_s1 + $0xd64] ss:$16 sps:$4 sm:$0xff]  }
  0xc2   :  { %5235 = vmatmul.mubr.bf16.vlgmr.msra.gmra.mxu0 %v9295_v50 }
  0xc3   :  { %5276 = vmatmul.mubr.bf16.vlgmr.msra.gmra.mxu1 %v9311_v35  ;;  %5285 = vmatpush1.bf16.msra.mxu0 %v7640_v55  ;;  %v7717_v55 = vld [vmem:[%s11424_s1 + $0xf64] ss:$16 sps:$4 sm:$0xff]  }
  0xc4   :  { %5326 = vmatpush1.bf16.msra.mxu1 %v7643_v56  ;;  %5286 = vmatprep.subr.bf16.mxu0 %v7648_v57  ;;  %v7712_v56 = vld [vmem:[%s11424_s1 + $0xd60] ss:$16 sps:$4 sm:$0xff]  }
  0xc5   :  { %5327 = vmatprep.subr.bf16.mxu1 %v7651_v58  ;;  %5316 = vmatprep.mubr.bf16.mxu0 %v9307_v54  ;;  %v7715_v57 = vld [vmem:[%s11424_s1 + $0xf60] ss:$16 sps:$4 sm:$0xff]   ;;  %v7720_v58 = vld [vmem:[%s11424_s1 + $0xd44] ss:$16 sps:$4 sm:$0xff]  }
  0xc6   :  { %5357 = vmatprep.mubr.bf16.mxu1 %v9327_v59 }
  0xc7   :  { %5287 = vmatpush1.bf16.msra.mxu0 %v7646_v61  ;;  %v7723_v61 = vld [vmem:[%s11424_s1 + $0xf44] ss:$16 sps:$4 sm:$0xff]  }
  0xc8   :  { %5328 = vmatpush1.bf16.msra.mxu1 %v7649_v62  ;;  %5288 = vmatprep.subr.bf16.mxu0 %v7654_v63  ;;  %v7718_v62 = vld [vmem:[%s11424_s1 + $0xd40] ss:$16 sps:$4 sm:$0xff]  }
  0xc9   :  { %5329 = vmatprep.subr.bf16.mxu1 %v7657_v1  ;;  %v7721_v63 = vld [vmem:[%s11424_s1 + $0xf40] ss:$16 sps:$4 sm:$0xff]  }
  0xca   :  { %v9486_v1 = vld [vmem:[%s11423_s0 + $0x10] sm:$0xff] }
  0xcb   :  { %5289 = vmatpush1.bf16.msra.mxu0 %v7652_v2  ;;  %v7726_v2 = vld [vmem:[%s11424_s1 + $0xd24] ss:$16 sps:$4 sm:$0xff]  }
  0xcc   :  { %5330 = vmatpush1.bf16.msra.mxu1 %v7655_v3  ;;  %5290 = vmatprep.subr.bf16.mxu0 %v7660_v4  ;;  %v7729_v3 = vld [vmem:[%s11424_s1 + $0xf24] ss:$16 sps:$4 sm:$0xff]   ;;  %v9496_v4 = vrot.slane %v9486_v1, %v8777_v49 }
  0xcd   :  { %5331 = vmatprep.subr.bf16.mxu1 %v7663_v5  ;;  %v7724_v5 = vld [vmem:[%s11424_s1 + $0xd20] ss:$16 sps:$4 sm:$0xff]  }
  0xcf   :  { %5291 = vmatpush1.bf16.msra.mxu0 %v7658_v7  ;;  %v7727_v7 = vld [vmem:[%s11424_s1 + $0xf20] ss:$16 sps:$4 sm:$0xff]  }
  0xd0   :  { %5332 = vmatpush1.bf16.msra.mxu1 %v7661_v8  ;;  %5292 = vmatprep.subr.bf16.mxu0 %v7666_v9  ;;  %v7732_v8 = vld [vmem:[%s11424_s1 + $0xd04] ss:$16 sps:$4 sm:$0xff]  }
  0xd1   :  { %5333 = vmatprep.subr.bf16.mxu1 %v7669_v10  ;;  %v7735_v9 = vld [vmem:[%s11424_s1 + $0xf04] ss:$16 sps:$4 sm:$0xff]   ;;  %v7730_v10 = vld [vmem:[%s11424_s1 + $0xd00] ss:$16 sps:$4 sm:$0xff]  }
  0xd3   :  { %5293 = vmatpush1.bf16.msra.mxu0 %v7664_v11  ;;  %v965_v11 = vcombine.high %v9496_v4, %v9496_v4 }
  0xd4   :  { %5334 = vmatpush1.bf16.msra.mxu1 %v7667_v12  ;;  %5294 = vmatprep.subr.bf16.mxu0 %v7672_v14  ;;  %v7733_v12 = vld [vmem:[%s11424_s1 + $0xf00] ss:$16 sps:$4 sm:$0xff]  }
  0xd5   :  { %5335 = vmatprep.subr.bf16.mxu1 %v7675_v15  ;;  %v826_v14 = vld [vmem:[%s11425_s2] sm:$0xf]  ;;  %v9523_v15 = vrot.slane %v9274_v39, %v8777_v49 }
  0xd7   :  { %5295 = vmatpush1.bf16.msra.mxu0 %v7670_v16  ;;  %v830_v16 = vsub.s32 0, %v8759_v42  ;;  %v9538_v39 = vcombine.high %v9523_v15, %v9523_v15 }
  0xd8   :  { %5336 = vmatpush1.bf16.msra.mxu1 %v7673_v19  ;;  %5296 = vmatprep.subr.bf16.mxu0 %v7678_v20  ;;  %v7739_v19 = vld [vmem:[%s11424_s1 + $0x10e4] ss:$16 sps:$4 sm:$0xff]  }
  0xd9   :  { %5337 = vmatprep.subr.bf16.mxu1 %v7681_v21  ;;  %v7742_v20 = vld [vmem:[%s11424_s1 + $0x12e4] ss:$16 sps:$4 sm:$0xff]   ;;  %v834_v21 = vsub.s32 1, %v8759_v42 }
  0xdb   :  { %5297 = vmatpush1.bf16.msra.mxu0 %v7676_v22  ;;  %v9534_v22 = vrot.slane %v965_v11, %v8777_v49  ;;  %v7770_v11 = vld [vmem:[%s11424_s1 + $0x1240] ss:$16 sps:$4 sm:$0xff]  }
  0xdc   :  { %5338 = vmatpush1.bf16.msra.mxu1 %v7679_v24  ;;  %5298 = vmatprep.subr.bf16.mxu0 %v7684_v25  ;;  %v7737_v24 = vld [vmem:[%s11424_s1 + $0x10e0] ss:$16 sps:$4 sm:$0xff]  }
  0xdd   :  { %5339 = vmatprep.subr.bf16.mxu1 %v7687_v27  ;;  %v7740_v25 = vld [vmem:[%s11424_s1 + $0x12e0] ss:$16 sps:$4 sm:$0xff]   ;;  %v831_v27 = vrot.slane %v826_v14, %v830_v16 }
  0xde   :  { %v7773_v16 = vld [vmem:[%s11424_s1 + $0x1020] ss:$16 sps:$4 sm:$0xff]  }
  0xdf   :  { %5299 = vmatpush1.bf16.msra.mxu0 %v7682_v28  ;;  %v7745_v28 = vld [vmem:[%s11424_s1 + $0x10c4] ss:$16 sps:$4 sm:$0xff]  }
  0xe0   :  { %5340 = vmatpush1.bf16.msra.mxu1 %v7685_v29  ;;  %5300 = vmatprep.subr.bf16.mxu0 %v7690_v30  ;;  %v7748_v29 = vld [vmem:[%s11424_s1 + $0x12c4] ss:$16 sps:$4 sm:$0xff]   ;;  %v835_v30 = vrot.slane %v826_v14, %v834_v21 }
  0xe1   :  { %5341 = vmatprep.subr.bf16.mxu1 %v7693_v31  ;;  %v9554_v31 = vcombine.high %v9534_v22, %v9534_v22  ;;  %v7778_v14 = vld [vmem:[%s11424_s1 + $0x1224] ss:$16 sps:$4 sm:$0xff]  }
  0xe2   :  { %v7784_v21 = vld [vmem:[%s11424_s1 + $0x1204] ss:$16 sps:$4 sm:$0xff]  }
  0xe3   :  { %5301 = vmatpush2.bf16.msra.mxu0 %v7688_v33 }
  0xe4   :  { %5342 = vmatpush2.bf16.msra.mxu1 %v7691_v34  ;;  %5302 = vmatprep.subr.bf16.mxu0 %v7696_v36  ;;  %v7743_v36 = vld [vmem:[%s11424_s1 + $0x10c0] ss:$16 sps:$4 sm:$0xff]  }
  0xe5   :  { %5343 = vmatprep.subr.bf16.mxu1 %v7699_v37  ;;  %v7746_v37 = vld [vmem:[%s11424_s1 + $0x12c0] ss:$16 sps:$4 sm:$0xff]  }
  0xe7   :  { %5303 = vmatpush2.bf16.msra.mxu0 %v7694_v38 }
  0xe8   :  { %5344 = vmatpush2.bf16.msra.mxu1 %v7697_v32  ;;  %5304 = vmatprep.subr.bf16.mxu0 %v7702_v40 }
  0xe9   :  { %5345 = vmatprep.subr.bf16.mxu1 %v7705_v44  ;;  %v7751_v44 = vld [vmem:[%s11424_s1 + $0x10a4] ss:$16 sps:$4 sm:$0xff]  }
  0xeb   :  { %5305 = vmatpush2.bf16.msra.mxu0 %v7700_v45  ;;  %v7754_v45 = vld [vmem:[%s11424_s1 + $0x12a4] ss:$16 sps:$4 sm:$0xff]  }
  0xec   :  { %5346 = vmatpush2.bf16.msra.mxu1 %v7703_v46  ;;  %5306 = vmatprep.subr.bf16.mxu0 %v7708_v47 }
  0xed   :  { %5347 = vmatprep.subr.bf16.mxu1 %v7711_v48  ;;  %v7749_v48 = vld [vmem:[%s11424_s1 + $0x10a0] ss:$16 sps:$4 sm:$0xff]  }
  0xef   :  { %5307 = vmatpush2.bf16.msra.mxu0 %v7706_v51  ;;  %v7752_v51 = vld [vmem:[%s11424_s1 + $0x12a0] ss:$16 sps:$4 sm:$0xff]  }
  0xf0   :  { %5348 = vmatpush2.bf16.msra.mxu1 %v7709_v52  ;;  %5308 = vmatprep.subr.bf16.mxu0 %v7714_v53 }
  0xf1   :  { %5349 = vmatprep.subr.bf16.mxu1 %v7717_v55 }
  0xf3   :  { %5309 = vmatpush2.bf16.msra.mxu0 %v7712_v56 }
  0xf4   :  { %5350 = vmatpush2.bf16.msra.mxu1 %v7715_v57  ;;  %5310 = vmatprep.subr.bf16.mxu0 %v7720_v58  ;;  %v7757_v58 = vld [vmem:[%s11424_s1 + $0x1084] ss:$16 sps:$4 sm:$0xff]  }
  0xf5   :  { %5351 = vmatprep.subr.bf16.mxu1 %v7723_v61  ;;  %v7760_v61 = vld [vmem:[%s11424_s1 + $0x1284] ss:$16 sps:$4 sm:$0xff]  }
  0xf7   :  { %5311 = vmatpush2.bf16.msra.mxu0 %v7718_v62  ;;  %v7755_v62 = vld [vmem:[%s11424_s1 + $0x1080] ss:$16 sps:$4 sm:$0xff]  }
  0xf8   :  { %5352 = vmatpush2.bf16.msra.mxu1 %v7721_v63  ;;  %5312 = vmatprep.subr.bf16.mxu0 %v7726_v2  ;;  %v7758_v63 = vld [vmem:[%s11424_s1 + $0x1280] ss:$16 sps:$4 sm:$0xff]   ;;  %v7763_v2 = vld [vmem:[%s11424_s1 + $0x1064] ss:$16 sps:$4 sm:$0xff]  }
  0xf9   :  { %5353 = vmatprep.subr.bf16.mxu1 %v7729_v3  ;;  %v7766_v3 = vld [vmem:[%s11424_s1 + $0x1264] ss:$16 sps:$4 sm:$0xff]  }
  0xfb   :  { %5313 = vmatpush2.bf16.msra.mxu0 %v7724_v5  ;;  %v7761_v5 = vld [vmem:[%s11424_s1 + $0x1060] ss:$16 sps:$4 sm:$0xff]  }
  0xfc   :  { %5354 = vmatpush2.bf16.msra.mxu1 %v7727_v7  ;;  %5314 = vmatprep.subr.bf16.mxu0 %v7732_v8  ;;  %v7764_v7 = vld [vmem:[%s11424_s1 + $0x1260] ss:$16 sps:$4 sm:$0xff]   ;;  %v7769_v8 = vld [vmem:[%s11424_s1 + $0x1044] ss:$16 sps:$4 sm:$0xff]  }
  0xfd   :  { %5355 = vmatprep.subr.bf16.mxu1 %v7735_v9  ;;  %v7772_v9 = vld [vmem:[%s11424_s1 + $0x1244] ss:$16 sps:$4 sm:$0xff]  }
  0xff   :  { %5315 = vmatpush2.bf16.msra.mxu0 %v7730_v10  ;;  %v7767_v10 = vld [vmem:[%s11424_s1 + $0x1040] ss:$16 sps:$4 sm:$0xff]  }
 0x100   :  { %5356 = vmatpush2.bf16.msra.mxu1 %v7733_v12  ;;  %5366 = vmatprep.subr.bf16.mxu0 %v7739_v19  ;;  %v7775_v12 = vld [vmem:[%s11424_s1 + $0x1024] ss:$16 sps:$4 sm:$0xff]   ;;  %v7776_v19 = vld [vmem:[%s11424_s1 + $0x1220] ss:$16 sps:$4 sm:$0xff]  }
 0x101   :  { %5407 = vmatprep.subr.bf16.mxu1 %v7742_v20  ;;  %v7781_v20 = vld [vmem:[%s11424_s1 + $0x1004] ss:$16 sps:$4 sm:$0xff]  }
 0x102   :  { %v5072_v33 = vpop.f32.mrf.mxu0  ;;  %5317 = vmatmul.mubr.bf16.vlgmr.msra.gmra.mxu0 %v9523_v15 }
 0x103   :  { %v5113_v34 = vpop.f32.mrf.mxu1  ;;  %5358 = vmatmul.mubr.bf16.vlgmr.msra.gmra.mxu1 %v9538_v39  ;;  %v5073_v38 = vadd.f32 %v5072_v33, %v831_v27  ;;  %5367 = vmatpush1.bf16.msra.mxu0 %v7737_v24  ;;  %v7779_v24 = vld [vmem:[%s11424_s1 + $0x1000] ss:$16 sps:$4 sm:$0xff]   ;;  %v7787_v27 = vld [vmem:[%s11424_s1 + $0x11e4] ss:$16 sps:$4 sm:$0xff]  }
 0x104   :  { %5408 = vmatpush1.bf16.msra.mxu1 %v7740_v25  ;;  %v5074_v32 = vpop.f32.mrf.mxu0  ;;  %5368 = vmatprep.subr.bf16.mxu0 %v7745_v28  ;;  %v7782_v25 = vld [vmem:[%s11424_s1 + $0x1200] ss:$16 sps:$4 sm:$0xff]   ;;  %v7790_v28 = vld [vmem:[%s11424_s1 + $0x13e4] ss:$16 sps:$4 sm:$0xff]  }
 0x105   :  { %v5115_v40 = vpop.f32.mrf.mxu1  ;;  %5409 = vmatprep.subr.bf16.mxu1 %v7748_v29  ;;  %v9570_v46 = vadd.f32 %v5113_v34, %v5073_v38  ;;  %v5075_v47 = vadd.f32 %v5074_v32, %v835_v30  ;;  %5398 = vmatprep.mubr.bf16.mxu0 %v9534_v22  ;;  %v7785_v29 = vld [vmem:[%s11424_s1 + $0x11e0] ss:$16 sps:$4 sm:$0xff]   ;;  %v7793_v33 = vld [vmem:[%s11424_s1 + $0x11c4] ss:$16 sps:$4 sm:$0xff]  }
 0x106   :  { %5439 = vmatprep.mubr.bf16.mxu1 %v9554_v31  ;;  %v5076_v52 = vpop.f32.mrf.mxu0  ;;  %v7788_v30 = vld [vmem:[%s11424_s1 + $0x13e0] ss:$16 sps:$4 sm:$0xff]   ;;  %v7796_v34 = vld [vmem:[%s11424_s1 + $0x13c4] ss:$16 sps:$4 sm:$0xff]  }
 0x107   :  { %v5117_v53 = vpop.f32.mrf.mxu1  ;;  %v9580_v55 = vadd.f32 %v5115_v40, %v5075_v47  ;;  %5369 = vmatpush1.bf16.msra.mxu0 %v7743_v36  ;;  %v7791_v36 = vld [vmem:[%s11424_s1 + $0x11c0] ss:$16 sps:$4 sm:$0xff]   ;;  %v7799_v38 = vld [vmem:[%s11424_s1 + $0x11a4] ss:$16 sps:$4 sm:$0xff]  }
 0x108   :  { %5410 = vmatpush1.bf16.msra.mxu1 %v7746_v37  ;;  %v5077_v56 = vpop.f32.mrf.mxu0  ;;  %5370 = vmatprep.subr.bf16.mxu0 %v7751_v44  ;;  %v7794_v37 = vld [vmem:[%s11424_s1 + $0x13c0] ss:$16 sps:$4 sm:$0xff]   ;;  %v7802_v32 = vld [vmem:[%s11424_s1 + $0x13a4] ss:$16 sps:$4 sm:$0xff]  }
 0x109   :  { %v5118_v57 = vpop.f32.mrf.mxu1  ;;  %5411 = vmatprep.subr.bf16.mxu1 %v7754_v45  ;;  %v7797_v40 = vld [vmem:[%s11424_s1 + $0x11a0] ss:$16 sps:$4 sm:$0xff]   ;;  %v7805_v45 = vld [vmem:[%s11424_s1 + $0x1184] ss:$16 sps:$4 sm:$0xff]  }
 0x10a   :  { %v7800_v44 = vld [vmem:[%s11424_s1 + $0x13a0] ss:$16 sps:$4 sm:$0xff]   ;;  %v7808_v47 = vld [vmem:[%s11424_s1 + $0x1384] ss:$16 sps:$4 sm:$0xff]  }
 0x10b   :  { %5371 = vmatpush1.bf16.msra.mxu0 %v7749_v48  ;;  %v7803_v48 = vld [vmem:[%s11424_s1 + $0x1180] ss:$16 sps:$4 sm:$0xff]   ;;  %v7811_v52 = vld [vmem:[%s11424_s1 + $0x1164] ss:$16 sps:$4 sm:$0xff]  }
 0x10c   :  { %5412 = vmatpush1.bf16.msra.mxu1 %v7752_v51  ;;  %5372 = vmatprep.subr.bf16.mxu0 %v7757_v58  ;;  %v7806_v51 = vld [vmem:[%s11424_s1 + $0x1380] ss:$16 sps:$4 sm:$0xff]   ;;  %v7814_v53 = vld [vmem:[%s11424_s1 + $0x1364] ss:$16 sps:$4 sm:$0xff]  }
 0x10d   :  { %5413 = vmatprep.subr.bf16.mxu1 %v7760_v61  ;;  %v7809_v56 = vld [vmem:[%s11424_s1 + $0x1160] ss:$16 sps:$4 sm:$0xff]   ;;  %v7817_v58 = vld [vmem:[%s11424_s1 + $0x1144] ss:$16 sps:$4 sm:$0xff]  }
 0x10e   :  { %v7812_v57 = vld [vmem:[%s11424_s1 + $0x1360] ss:$16 sps:$4 sm:$0xff]   ;;  %v7820_v61 = vld [vmem:[%s11424_s1 + $0x1344] ss:$16 sps:$4 sm:$0xff]  }
 0x10f   :  { %5373 = vmatpush1.bf16.msra.mxu0 %v7755_v62  ;;  %v950_v62 = vcombine.high %v9486_v1, %v9486_v1  ;;  %v7826_v1 = vld [vmem:[%s11424_s1 + $0x1324] ss:$16 sps:$4 sm:$0xff]  }
 0x110   :  { %5414 = vmatpush1.bf16.msra.mxu1 %v7758_v63  ;;  %5374 = vmatprep.subr.bf16.mxu0 %v7763_v2  ;;  %v7815_v63 = vld [vmem:[%s11424_s1 + $0x1140] ss:$16 sps:$4 sm:$0xff]  }
 0x111   :  { %5415 = vmatprep.subr.bf16.mxu1 %v7766_v3  ;;  %v7818_v2 = vld [vmem:[%s11424_s1 + $0x1340] ss:$16 sps:$4 sm:$0xff]   ;;  %v7823_v3 = vld [vmem:[%s11424_s1 + $0x1124] ss:$16 sps:$4 sm:$0xff]  }
 0x113   :  { %5375 = vmatpush1.bf16.msra.mxu0 %v7761_v5  ;;  %v9723_v5 = vrot.slane %v950_v62, %v8777_v49  ;;  %v7854_v62 = vld [vmem:[%s11424_s1 + $0x1680] ss:$16 sps:$4 sm:$0xff]  }
 0x114   :  { %5416 = vmatpush1.bf16.msra.mxu1 %v7764_v7  ;;  %5376 = vmatprep.subr.bf16.mxu0 %v7769_v8  ;;  %v7821_v7 = vld [vmem:[%s11424_s1 + $0x1120] ss:$16 sps:$4 sm:$0xff]  }
 0x115   :  { %5417 = vmatprep.subr.bf16.mxu1 %v7772_v9  ;;  %v7824_v8 = vld [vmem:[%s11424_s1 + $0x1320] ss:$16 sps:$4 sm:$0xff]   ;;  %v7829_v9 = vld [vmem:[%s11424_s1 + $0x1104] ss:$16 sps:$4 sm:$0xff]  }
 0x117   :  { %5377 = vmatpush1.bf16.msra.mxu0 %v7767_v10  ;;  %v7832_v10 = vld [vmem:[%s11424_s1 + $0x1304] ss:$16 sps:$4 sm:$0xff]  }
 0x118   :  { %5418 = vmatpush1.bf16.msra.mxu1 %v7770_v11  ;;  %5378 = vmatprep.subr.bf16.mxu0 %v7775_v12  ;;  %v966_v11 = vcombine.high %v9723_v5, %v9723_v5  ;;  %v9741_v12 = vrot.slane %v9496_v4, %v8777_v49  ;;  %v7838_v4 = vld [vmem:[%s11424_s1 + $0x16e4] ss:$16 sps:$4 sm:$0xff]  }
 0x119   :  { %5419 = vmatprep.subr.bf16.mxu1 %v7778_v14  ;;  %v7827_v14 = vld [vmem:[%s11424_s1 + $0x1100] ss:$16 sps:$4 sm:$0xff]  }
 0x11b   :  { %5379 = vmatpush1.bf16.msra.mxu0 %v7773_v16  ;;  %v7830_v16 = vld [vmem:[%s11424_s1 + $0x1300] ss:$16 sps:$4 sm:$0xff]  }
 0x11c   :  { %5420 = vmatpush1.bf16.msra.mxu1 %v7776_v19  ;;  %5380 = vmatprep.subr.bf16.mxu0 %v7781_v20  ;;  %v7835_v19 = vld [vmem:[%s11424_s1 + $0x14e4] ss:$16 sps:$4 sm:$0xff]   ;;  %v7833_v20 = vld [vmem:[%s11424_s1 + $0x14e0] ss:$16 sps:$4 sm:$0xff]  }
 0x11d   :  { %5421 = vmatprep.subr.bf16.mxu1 %v7784_v21  ;;  %v7836_v21 = vld [vmem:[%s11424_s1 + $0x16e0] ss:$16 sps:$4 sm:$0xff]  }
 0x11f   :  { %5381 = vmatpush1.bf16.msra.mxu0 %v7779_v24  ;;  %v9762_v24 = vrot.slane %v966_v11, %v8777_v49  ;;  %v7871_v11 = vld [vmem:[%s11424_s1 + $0x1424] ss:$16 sps:$4 sm:$0xff]  }
 0x120   :  { %5422 = vmatpush1.bf16.msra.mxu1 %v7782_v25  ;;  %5382 = vmatprep.subr.bf16.mxu0 %v7787_v27  ;;  %v9766_v25 = vcombine.high %v9741_v12, %v9741_v12  ;;  %v7841_v27 = vld [vmem:[%s11424_s1 + $0x14c4] ss:$16 sps:$4 sm:$0xff]  }
 0x121   :  { %5423 = vmatprep.subr.bf16.mxu1 %v7790_v28  ;;  %v7844_v28 = vld [vmem:[%s11424_s1 + $0x16c4] ss:$16 sps:$4 sm:$0xff]  }
 0x123   :  { %5383 = vmatpush2.bf16.msra.mxu0 %v7785_v29  ;;  %v7839_v29 = vld [vmem:[%s11424_s1 + $0x14c0] ss:$16 sps:$4 sm:$0xff]  }
 0x124   :  { %5424 = vmatpush2.bf16.msra.mxu1 %v7788_v30  ;;  %5384 = vmatprep.subr.bf16.mxu0 %v7793_v33  ;;  %v7842_v30 = vld [vmem:[%s11424_s1 + $0x16c0] ss:$16 sps:$4 sm:$0xff]   ;;  %v9782_v33 = vcombine.high %v9762_v24, %v9762_v24 }
 0x125   :  { %5425 = vmatprep.subr.bf16.mxu1 %v7796_v34 }
 0x127   :  { %5385 = vmatpush2.bf16.msra.mxu0 %v7791_v36 }
 0x128   :  { %5426 = vmatpush2.bf16.msra.mxu1 %v7794_v37  ;;  %5386 = vmatprep.subr.bf16.mxu0 %v7799_v38 }
 0x129   :  { %5427 = vmatprep.subr.bf16.mxu1 %v7802_v32 }
 0x12b   :  { %5387 = vmatpush2.bf16.msra.mxu0 %v7797_v40  ;;  %v7847_v40 = vld [vmem:[%s11424_s1 + $0x14a4] ss:$16 sps:$4 sm:$0xff]  }
 0x12c   :  { %5428 = vmatpush2.bf16.msra.mxu1 %v7800_v44  ;;  %5388 = vmatprep.subr.bf16.mxu0 %v7805_v45  ;;  %v7850_v44 = vld [vmem:[%s11424_s1 + $0x16a4] ss:$16 sps:$4 sm:$0xff]  }
 0x12d   :  { %5429 = vmatprep.subr.bf16.mxu1 %v7808_v47 }
 0x12f   :  { %5389 = vmatpush2.bf16.msra.mxu0 %v7803_v48  ;;  %v7848_v48 = vld [vmem:[%s11424_s1 + $0x16a0] ss:$16 sps:$4 sm:$0xff]  }
 0x130   :  { %5430 = vmatpush2.bf16.msra.mxu1 %v7806_v51  ;;  %5390 = vmatprep.subr.bf16.mxu0 %v7811_v52 }
 0x131   :  { %5431 = vmatprep.subr.bf16.mxu1 %v7814_v53 }
 0x133   :  { %5391 = vmatpush2.bf16.msra.mxu0 %v7809_v56 }
 0x134   :  { %5432 = vmatpush2.bf16.msra.mxu1 %v7812_v57  ;;  %5392 = vmatprep.subr.bf16.mxu0 %v7817_v58  ;;  %v7853_v57 = vld [vmem:[%s11424_s1 + $0x1484] ss:$16 sps:$4 sm:$0xff]  }
 0x135   :  { %5433 = vmatprep.subr.bf16.mxu1 %v7820_v61  ;;  %v7856_v58 = vld [vmem:[%s11424_s1 + $0x1684] ss:$16 sps:$4 sm:$0xff]   ;;  %v7851_v61 = vld [vmem:[%s11424_s1 + $0x1480] ss:$16 sps:$4 sm:$0xff]  }
 0x137   :  { %5393 = vmatpush2.bf16.msra.mxu0 %v7815_v63  ;;  %v7859_v63 = vld [vmem:[%s11424_s1 + $0x1464] ss:$16 sps:$4 sm:$0xff]  }
 0x138   :  { %5434 = vmatpush2.bf16.msra.mxu1 %v7818_v2  ;;  %5394 = vmatprep.subr.bf16.mxu0 %v7823_v3  ;;  %v7862_v2 = vld [vmem:[%s11424_s1 + $0x1664] ss:$16 sps:$4 sm:$0xff]   ;;  %v7857_v3 = vld [vmem:[%s11424_s1 + $0x1460] ss:$16 sps:$4 sm:$0xff]  }
 0x139   :  { %5435 = vmatprep.subr.bf16.mxu1 %v7826_v1  ;;  %v7860_v1 = vld [vmem:[%s11424_s1 + $0x1660] ss:$16 sps:$4 sm:$0xff]  }
 0x13b   :  { %5395 = vmatpush2.bf16.msra.mxu0 %v7821_v7  ;;  %v7865_v7 = vld [vmem:[%s11424_s1 + $0x1444] ss:$16 sps:$4 sm:$0xff]  }
 0x13c   :  { %5436 = vmatpush2.bf16.msra.mxu1 %v7824_v8  ;;  %5396 = vmatprep.subr.bf16.mxu0 %v7829_v9  ;;  %v7868_v8 = vld [vmem:[%s11424_s1 + $0x1644] ss:$16 sps:$4 sm:$0xff]   ;;  %v7863_v9 = vld [vmem:[%s11424_s1 + $0x1440] ss:$16 sps:$4 sm:$0xff]  }
 0x13d   :  { %5437 = vmatprep.subr.bf16.mxu1 %v7832_v10  ;;  %v7866_v10 = vld [vmem:[%s11424_s1 + $0x1640] ss:$16 sps:$4 sm:$0xff]  }
 0x13f   :  { %5397 = vmatpush2.bf16.msra.mxu0 %v7827_v14  ;;  %v7874_v14 = vld [vmem:[%s11424_s1 + $0x1624] ss:$16 sps:$4 sm:$0xff]  }
 0x140   :  { %5438 = vmatpush2.bf16.msra.mxu1 %v7830_v16  ;;  %5448 = vmatprep.subr.bf16.mxu0 %v7835_v19  ;;  %v7869_v16 = vld [vmem:[%s11424_s1 + $0x1420] ss:$16 sps:$4 sm:$0xff]  }
 0x141   :  { %5489 = vmatprep.subr.bf16.mxu1 %v7838_v4  ;;  %v7872_v19 = vld [vmem:[%s11424_s1 + $0x1620] ss:$16 sps:$4 sm:$0xff]   ;;  %v7877_v4 = vld [vmem:[%s11424_s1 + $0x1404] ss:$16 sps:$4 sm:$0xff]  }
 0x142   :  { %v5154_v34 = vpop.f32.mrf.mxu0  ;;  %5399 = vmatmul.mubr.bf16.vlgmr.msra.gmra.mxu0 %v9741_v12 }
 0x143   :  { %v5195_v36 = vpop.f32.mrf.mxu1  ;;  %5440 = vmatmul.mubr.bf16.vlgmr.msra.gmra.mxu1 %v9766_v25  ;;  %v5155_v37 = vadd.f32 %v5154_v34, %v9570_v46  ;;  %5449 = vmatpush1.bf16.msra.mxu0 %v7833_v20  ;;  %v7845_v46 = vld [vmem:[%s11424_s1 + $0x14a0] ss:$16 sps:$4 sm:$0xff]   ;;  %v7880_v20 = vld [vmem:[%s11424_s1 + $0x1604] ss:$16 sps:$4 sm:$0xff]  }
 0x144   :  { %5490 = vmatpush1.bf16.msra.mxu1 %v7836_v21  ;;  %v5156_v38 = vpop.f32.mrf.mxu0  ;;  %5450 = vmatprep.subr.bf16.mxu0 %v7841_v27  ;;  %v7875_v21 = vld [vmem:[%s11424_s1 + $0x1400] ss:$16 sps:$4 sm:$0xff]  }
 0x145   :  { %v5197_v32 = vpop.f32.mrf.mxu1  ;;  %5491 = vmatprep.subr.bf16.mxu1 %v7844_v28  ;;  %v9793_v45 = vadd.f32 %v5195_v36, %v5155_v37  ;;  %v5157_v47 = vadd.f32 %v5156_v38, %v9580_v55  ;;  %5480 = vmatprep.mubr.bf16.mxu0 %v9762_v24  ;;  %v7878_v27 = vld [vmem:[%s11424_s1 + $0x1600] ss:$16 sps:$4 sm:$0xff]   ;;  %v7883_v28 = vld [vmem:[%s11424_s1 + $0x15e4] ss:$16 sps:$4 sm:$0xff]  }
 0x146   :  { %5521 = vmatprep.mubr.bf16.mxu1 %v9782_v33  ;;  %v5158_v51 = vpop.f32.mrf.mxu0  ;;  %v7884_v34 = vld [vmem:[%s11424_s1 + $0x17e0] ss:$16 sps:$4 sm:$0xff]   ;;  %v7889_v36 = vld [vmem:[%s11424_s1 + $0x15c4] ss:$16 sps:$4 sm:$0xff]  }
 0x147   :  { %v5199_v52 = vpop.f32.mrf.mxu1  ;;  %v9804_v53 = vadd.f32 %v5197_v32, %v5157_v47  ;;  %5451 = vmatpush1.bf16.msra.mxu0 %v7839_v29  ;;  %v7886_v29 = vld [vmem:[%s11424_s1 + $0x17e4] ss:$16 sps:$4 sm:$0xff]   ;;  %v7887_v38 = vld [vmem:[%s11424_s1 + $0x15c0] ss:$16 sps:$4 sm:$0xff]  }
 0x148   :  { %5492 = vmatpush1.bf16.msra.mxu1 %v7842_v30  ;;  %v5159_v56 = vpop.f32.mrf.mxu0  ;;  %5452 = vmatprep.subr.bf16.mxu0 %v7847_v40  ;;  %v7881_v30 = vld [vmem:[%s11424_s1 + $0x15e0] ss:$16 sps:$4 sm:$0xff]   ;;  %v7892_v37 = vld [vmem:[%s11424_s1 + $0x17c4] ss:$16 sps:$4 sm:$0xff]  }
 0x149   :  { %v5200_v55 = vpop.f32.mrf.mxu1  ;;  %5493 = vmatprep.subr.bf16.mxu1 %v7850_v44  ;;  %v7890_v32 = vld [vmem:[%s11424_s1 + $0x17c0] ss:$16 sps:$4 sm:$0xff]   ;;  %v7895_v40 = vld [vmem:[%s11424_s1 + $0x15a4] ss:$16 sps:$4 sm:$0xff]  }
 0x14a   :  { %v7898_v44 = vld [vmem:[%s11424_s1 + $0x17a4] ss:$16 sps:$4 sm:$0xff]   ;;  %v7893_v47 = vld [vmem:[%s11424_s1 + $0x15a0] ss:$16 sps:$4 sm:$0xff]  }
 0x14b   :  { %5453 = vmatpush1.bf16.msra.mxu0 %v7845_v46  ;;  %v7896_v46 = vld [vmem:[%s11424_s1 + $0x17a0] ss:$16 sps:$4 sm:$0xff]   ;;  %v7904_v51 = vld [vmem:[%s11424_s1 + $0x1784] ss:$16 sps:$4 sm:$0xff]  }
 0x14c   :  { %5494 = vmatpush1.bf16.msra.mxu1 %v7848_v48  ;;  %5454 = vmatprep.subr.bf16.mxu0 %v7853_v57  ;;  %v7901_v48 = vld [vmem:[%s11424_s1 + $0x1584] ss:$16 sps:$4 sm:$0xff]   ;;  %v7899_v52 = vld [vmem:[%s11424_s1 + $0x1580] ss:$16 sps:$4 sm:$0xff]  }
 0x14d   :  { %5495 = vmatprep.subr.bf16.mxu1 %v7856_v58  ;;  %v7902_v56 = vld [vmem:[%s11424_s1 + $0x1780] ss:$16 sps:$4 sm:$0xff]   ;;  %v7907_v55 = vld [vmem:[%s11424_s1 + $0x1564] ss:$16 sps:$4 sm:$0xff]  }
 0x14e   :  { %v7910_v57 = vld [vmem:[%s11424_s1 + $0x1764] ss:$16 sps:$4 sm:$0xff]   ;;  %v7905_v58 = vld [vmem:[%s11424_s1 + $0x1560] ss:$16 sps:$4 sm:$0xff]  }
 0x14f   :  { %5455 = vmatpush1.bf16.msra.mxu0 %v7851_v61  ;;  %v7908_v61 = vld [vmem:[%s11424_s1 + $0x1760] ss:$16 sps:$4 sm:$0xff]  }
 0x150   :  { %5496 = vmatpush1.bf16.msra.mxu1 %v7854_v62  ;;  %5456 = vmatprep.subr.bf16.mxu0 %v7859_v63  ;;  %v7913_v62 = vld [vmem:[%s11424_s1 + $0x1544] ss:$16 sps:$4 sm:$0xff]  }
 0x151   :  { %5497 = vmatprep.subr.bf16.mxu1 %v7862_v2  ;;  %v7916_v63 = vld [vmem:[%s11424_s1 + $0x1744] ss:$16 sps:$4 sm:$0xff]   ;;  %v7911_v2 = vld [vmem:[%s11424_s1 + $0x1540] ss:$16 sps:$4 sm:$0xff]  }
 0x153   :  { %5457 = vmatpush1.bf16.msra.mxu0 %v7857_v3  ;;  %v7914_v3 = vld [vmem:[%s11424_s1 + $0x1740] ss:$16 sps:$4 sm:$0xff]  }
 0x154   :  { %5498 = vmatpush1.bf16.msra.mxu1 %v7860_v1  ;;  %5458 = vmatprep.subr.bf16.mxu0 %v7865_v7  ;;  %v7919_v1 = vld [vmem:[%s11424_s1 + $0x1524] ss:$16 sps:$4 sm:$0xff]  }
 0x155   :  { %5499 = vmatprep.subr.bf16.mxu1 %v7868_v8  ;;  %v7922_v7 = vld [vmem:[%s11424_s1 + $0x1724] ss:$16 sps:$4 sm:$0xff]   ;;  %v7917_v8 = vld [vmem:[%s11424_s1 + $0x1520] ss:$16 sps:$4 sm:$0xff]  }
 0x157   :  { %5459 = vmatpush1.bf16.msra.mxu0 %v7863_v9  ;;  %v7920_v9 = vld [vmem:[%s11424_s1 + $0x1720] ss:$16 sps:$4 sm:$0xff]  }
 0x158   :  { %5500 = vmatpush1.bf16.msra.mxu1 %v7866_v10  ;;  %5460 = vmatprep.subr.bf16.mxu0 %v7871_v11  ;;  %v7925_v10 = vld [vmem:[%s11424_s1 + $0x1504] ss:$16 sps:$4 sm:$0xff]  }
 0x159   :  { %5501 = vmatprep.subr.bf16.mxu1 %v7874_v14  ;;  %v7928_v11 = vld [vmem:[%s11424_s1 + $0x1704] ss:$16 sps:$4 sm:$0xff]   ;;  %v9958_v14 = vrot.slane %v9723_v5, %v8777_v49  ;;  %v7935_v5 = vld [vmem:[%s11424_s1 + $0xec] ss:$16 sps:$4 sm:$0xff]  }
 0x15b   :  { %5461 = vmatpush1.bf16.msra.mxu0 %v7869_v16  ;;  %v7923_v16 = vld [vmem:[%s11424_s1 + $0x1500] ss:$16 sps:$4 sm:$0xff]  }
 0x15c   :  { %5502 = vmatpush1.bf16.msra.mxu1 %v7872_v19  ;;  %5462 = vmatprep.subr.bf16.mxu0 %v7877_v4  ;;  %v7926_v19 = vld [vmem:[%s11424_s1 + $0x1700] ss:$16 sps:$4 sm:$0xff]   ;;  %v7932_v4 = vld [vmem:[%s11424_s1 + $0x18e4] ss:$16 sps:$4 sm:$0xff]  }
 0x15d   :  { %5503 = vmatprep.subr.bf16.mxu1 %v7880_v20  ;;  %v7930_v20 = vld [vmem:[%s11424_s1 + $0x18e0] ss:$16 sps:$4 sm:$0xff]  }
 0x15f   :  { %5463 = vmatpush1.bf16.msra.mxu0 %v7875_v21  ;;  %v7933_v21 = vld [vmem:[%s11424_s1 + $0xe8] ss:$16 sps:$4 sm:$0xff]  }
 0x160   :  { %5504 = vmatpush1.bf16.msra.mxu1 %v7878_v27  ;;  %5464 = vmatprep.subr.bf16.mxu0 %v7883_v28  ;;  %v9980_v27 = vcombine.high %v9958_v14, %v9958_v14  ;;  %v7938_v28 = vld [vmem:[%s11424_s1 + $0x18c4] ss:$16 sps:$4 sm:$0xff]  }
 0x161   :  { %5505 = vmatprep.subr.bf16.mxu1 %v7886_v29  ;;  %v7941_v29 = vld [vmem:[%s11424_s1 + $0xcc] ss:$16 sps:$4 sm:$0xff]  }
 0x163   :  { %5465 = vmatpush2.bf16.msra.mxu0 %v7881_v30  ;;  %v7936_v30 = vld [vmem:[%s11424_s1 + $0x18c0] ss:$16 sps:$4 sm:$0xff]  }
 0x164   :  { %5506 = vmatpush2.bf16.msra.mxu1 %v7884_v34  ;;  %5466 = vmatprep.subr.bf16.mxu0 %v7889_v36  ;;  %v7939_v34 = vld [vmem:[%s11424_s1 + $0xc8] ss:$16 sps:$4 sm:$0xff]  }
 0x165   :  { %5507 = vmatprep.subr.bf16.mxu1 %v7892_v37 }
 0x167   :  { %5467 = vmatpush2.bf16.msra.mxu0 %v7887_v38 }
 0x168   :  { %5508 = vmatpush2.bf16.msra.mxu1 %v7890_v32  ;;  %5468 = vmatprep.subr.bf16.mxu0 %v7895_v40 }
 0x169   :  { %5509 = vmatprep.subr.bf16.mxu1 %v7898_v44  ;;  %v7944_v44 = vld [vmem:[%s11424_s1 + $0x18a4] ss:$16 sps:$4 sm:$0xff]  }
 0x16b   :  { %5469 = vmatpush2.bf16.msra.mxu0 %v7893_v47  ;;  %v7947_v47 = vld [vmem:[%s11424_s1 + $0xac] ss:$16 sps:$4 sm:$0xff]  }
 0x16c   :  { %5510 = vmatpush2.bf16.msra.mxu1 %v7896_v46  ;;  %5470 = vmatprep.subr.bf16.mxu0 %v7901_v48 }
 0x16d   :  { %5511 = vmatprep.subr.bf16.mxu1 %v7904_v51  ;;  %v7945_v51 = vld [vmem:[%s11424_s1 + $0xa8] ss:$16 sps:$4 sm:$0xff]  }
 0x16f   :  { %5471 = vmatpush2.bf16.msra.mxu0 %v7899_v52  ;;  %v8610_v52 = vmov 0  }
 0x170   :  { %5512 = vmatpush2.bf16.msra.mxu1 %v7902_v56  ;;  %5472 = vmatprep.subr.bf16.mxu0 %v7907_v55 }
 0x171   :  { %5513 = vmatprep.subr.bf16.mxu1 %v7910_v57 }
 0x173   :  { %5473 = vmatpush2.bf16.msra.mxu0 %v7905_v58 }
 0x174   :  { %5514 = vmatpush2.bf16.msra.mxu1 %v7908_v61  ;;  %5474 = vmatprep.subr.bf16.mxu0 %v7913_v62  ;;  %v7950_v61 = vld [vmem:[%s11424_s1 + $0x1884] ss:$16 sps:$4 sm:$0xff]   ;;  %v7953_v62 = vld [vmem:[%s11424_s1 + $0x8c] ss:$16 sps:$4 sm:$0xff]  }
 0x175   :  { %5515 = vmatprep.subr.bf16.mxu1 %v7916_v63  ;;  %v7951_v63 = vld [vmem:[%s11424_s1 + $0x88] ss:$16 sps:$4 sm:$0xff]  }
 0x177   :  { %5475 = vmatpush2.bf16.msra.mxu0 %v7911_v2  ;;  %v7956_v2 = vld [vmem:[%s11424_s1 + $0x1864] ss:$16 sps:$4 sm:$0xff]  }
 0x178   :  { %5516 = vmatpush2.bf16.msra.mxu1 %v7914_v3  ;;  %5476 = vmatprep.subr.bf16.mxu0 %v7919_v1  ;;  %v7959_v3 = vld [vmem:[%s11424_s1 + $0x6c] ss:$16 sps:$4 sm:$0xff]   ;;  %v7954_v1 = vld [vmem:[%s11424_s1 + $0x1860] ss:$16 sps:$4 sm:$0xff]  }
 0x179   :  { %5517 = vmatprep.subr.bf16.mxu1 %v7922_v7  ;;  %v7957_v7 = vld [vmem:[%s11424_s1 + $0x68] ss:$16 sps:$4 sm:$0xff]  }
 0x17b   :  { %5477 = vmatpush2.bf16.msra.mxu0 %v7917_v8  ;;  %v7962_v8 = vld [vmem:[%s11424_s1 + $0x1844] ss:$16 sps:$4 sm:$0xff]  }
 0x17c   :  { %5518 = vmatpush2.bf16.msra.mxu1 %v7920_v9  ;;  %5478 = vmatprep.subr.bf16.mxu0 %v7925_v10  ;;  %v7965_v9 = vld [vmem:[%s11424_s1 + $0x4c] ss:$16 sps:$4 sm:$0xff]   ;;  %v7960_v10 = vld [vmem:[%s11424_s1 + $0x1840] ss:$16 sps:$4 sm:$0xff]  }
 0x17d   :  { %5519 = vmatprep.subr.bf16.mxu1 %v7928_v11  ;;  %v7963_v11 = vld [vmem:[%s11424_s1 + $0x48] ss:$16 sps:$4 sm:$0xff]  }
 0x17f   :  { %5479 = vmatpush2.bf16.msra.mxu0 %v7923_v16  ;;  %v7968_v16 = vld [vmem:[%s11424_s1 + $0x1824] ss:$16 sps:$4 sm:$0xff]  }
 0x180   :  { %5520 = vmatpush2.bf16.msra.mxu1 %v7926_v19  ;;  %5530 = vmatprep.subr.bf16.mxu0 %v7932_v4  ;;  %v7971_v19 = vld [vmem:[%s11424_s1 + $0x2c] ss:$16 sps:$4 sm:$0xff]   ;;  %v7966_v4 = vld [vmem:[%s11424_s1 + $0x1820] ss:$16 sps:$4 sm:$0xff]  }
 0x181   :  { %5571 = vmatprep.subr.bf16.mxu1 %v7935_v5  ;;  %v7969_v5 = vld [vmem:[%s11424_s1 + $0x28] ss:$16 sps:$4 sm:$0xff]  }
 0x182   :  { %v5236_v36 = vpop.f32.mrf.mxu0  ;;  %5481 = vmatmul.mubr.bf16.vlgmr.msra.gmra.mxu0 %v9958_v14 }
 0x183   :  { %v5277_v37 = vpop.f32.mrf.mxu1  ;;  %5522 = vmatmul.mubr.bf16.vlgmr.msra.gmra.mxu1 %v9980_v27  ;;  %v5237_v38 = vadd.f32 %v5236_v36, %v9793_v45  ;;  %5531 = vmatpush1.bf16.msra.mxu0 %v7930_v20  ;;  %v7942_v45 = vld [vmem:[%s11424_s1 + $0x18a0] ss:$16 sps:$4 sm:$0xff]   ;;  %v7974_v20 = vld [vmem:[%s11424_s1 + $0x1804] ss:$16 sps:$4 sm:$0xff]   ;;  %v7983_v36 = vld [vmem:[%s11424_s1 + $0x2ec] ss:$16 sps:$4 sm:$0xff]  }
 0x184   :  { %5572 = vmatpush1.bf16.msra.mxu1 %v7933_v21  ;;  %v5238_v32 = vpop.f32.mrf.mxu0  ;;  %5532 = vmatprep.subr.bf16.mxu0 %v7938_v28  ;;  %v7977_v21 = vld [vmem:[%s11424_s1 + $0xc] ss:$16 sps:$4 sm:$0xff]   ;;  %v7972_v28 = vld [vmem:[%s11424_s1 + $0x1800] ss:$16 sps:$4 sm:$0xff]  }
 0x185   :  { %v5279_v40 = vpop.f32.mrf.mxu1  ;;  %5573 = vmatprep.subr.bf16.mxu1 %v7941_v29  ;;  %v10003_v46 = vadd.f32 %v5277_v37, %v5237_v38  ;;  %v5239_v48 = vadd.f32 %v5238_v32, %v9804_v53  ;;  %5562 = vmatprep.mubr.bf16.mxu0 %v8610_v52  ;;  %v7975_v29 = vld [vmem:[%s11424_s1 + $0x8] ss:$16 sps:$4 sm:$0xff]  }
 0x186   :  { %5603 = vmatprep.mubr.bf16.mxu1 %v8805_v60  ;;  %v5240_v56 = vpop.f32.mrf.mxu0  ;;  %v7948_v60 = vld [vmem:[%s11424_s1 + $0x1880] ss:$16 sps:$4 sm:$0xff]   ;;  %v7978_v37 = vld [vmem:[%s11424_s1 + $0x1e8] ss:$16 sps:$4 sm:$0xff]  }
 0x187   :  { %v5281_v55 = vpop.f32.mrf.mxu1  ;;  %v10014_v57 = vadd.f32 %v5279_v40, %v5239_v48  ;;  %5533 = vmatpush1.bf16.msra.mxu0 %v7936_v30  ;;  %v6470_v30 = vld.sshfl [vmem:[%s11423_s0 + $0x18] sm:$0x1 pattern:$0x75316420]  ;;  %v7986_v40 = vld [vmem:[%s11424_s1 + $0x1cc] ss:$16 sps:$4 sm:$0xff]  }
 0x188   :  { %5574 = vmatpush1.bf16.msra.mxu1 %v7939_v34  ;;  %v5241_v53 = vpop.f32.mrf.mxu0  ;;  %5534 = vmatprep.subr.bf16.mxu0 %v7944_v44  ;;  %v7980_v34 = vld [vmem:[%s11424_s1 + $0x1ec] ss:$16 sps:$4 sm:$0xff]   ;;  %v7981_v38 = vld [vmem:[%s11424_s1 + $0x2e8] ss:$16 sps:$4 sm:$0xff]   ;;  %v10092_v32 = vrot.slane %v6470_v30, %v8777_v49 }
 0x189   :  { %v5282_v58 = vpop.f32.mrf.mxu1  ;;  %5575 = vmatprep.subr.bf16.mxu1 %v7947_v47  ;;  %v7989_v44 = vld [vmem:[%s11424_s1 + $0x2cc] ss:$16 sps:$4 sm:$0xff]   ;;  %v7984_v49 = vld [vmem:[%s11424_s1 + $0x1c8] ss:$16 sps:$4 sm:$0xff]  }
 0x18a   :  { %v7987_v47 = vld [vmem:[%s11424_s1 + $0x2c8] ss:$16 sps:$4 sm:$0xff]   ;;  %v7992_v48 = vld [vmem:[%s11424_s1 + $0x1ac] ss:$16 sps:$4 sm:$0xff]  }
 0x18b   :  { %5535 = vmatpush1.bf16.msra.mxu0 %v7942_v45  ;;  %v7995_v45 = vld [vmem:[%s11424_s1 + $0x2ac] ss:$16 sps:$4 sm:$0xff]   ;;  %v7993_v56 = vld [vmem:[%s11424_s1 + $0x2a8] ss:$16 sps:$4 sm:$0xff]  }
 0x18c   :  { %5576 = vmatpush1.bf16.msra.mxu1 %v7945_v51  ;;  %5536 = vmatprep.subr.bf16.mxu0 %v7950_v61  ;;  %v7990_v51 = vld [vmem:[%s11424_s1 + $0x1a8] ss:$16 sps:$4 sm:$0xff]   ;;  %v7998_v55 = vld [vmem:[%s11424_s1 + $0x18c] ss:$16 sps:$4 sm:$0xff]  }
 0x18d   :  { %5577 = vmatprep.subr.bf16.mxu1 %v7953_v62  ;;  %v7996_v53 = vld [vmem:[%s11424_s1 + $0x188] ss:$16 sps:$4 sm:$0xff]   ;;  %v8004_v61 = vld [vmem:[%s11424_s1 + $0x16c] ss:$16 sps:$4 sm:$0xff]  }
 0x18e   :  { %v7999_v58 = vld [vmem:[%s11424_s1 + $0x288] ss:$16 sps:$4 sm:$0xff]   ;;  %v8007_v62 = vld [vmem:[%s11424_s1 + $0x26c] ss:$16 sps:$4 sm:$0xff]  }
 0x18f   :  { %5537 = vmatpush1.bf16.msra.mxu0 %v7948_v60  ;;  %v8002_v60 = vld [vmem:[%s11424_s1 + $0x168] ss:$16 sps:$4 sm:$0xff]   ;;  %v8034_v30 = vld [vmem:[%s11424_s1 + $0x3cc] ss:$16 sps:$4 sm:$0xff]  }
 0x190   :  { %5578 = vmatpush1.bf16.msra.mxu1 %v7951_v63  ;;  %5538 = vmatprep.subr.bf16.mxu0 %v7956_v2  ;;  %v8005_v63 = vld [vmem:[%s11424_s1 + $0x268] ss:$16 sps:$4 sm:$0xff]   ;;  %v8010_v2 = vld [vmem:[%s11424_s1 + $0x14c] ss:$16 sps:$4 sm:$0xff]  }
 0x191   :  { %5579 = vmatprep.subr.bf16.mxu1 %v7959_v3  ;;  %v8013_v3 = vld [vmem:[%s11424_s1 + $0x24c] ss:$16 sps:$4 sm:$0xff]  }
 0x193   :  { %5539 = vmatpush1.bf16.msra.mxu0 %v7954_v1  ;;  %v8008_v1 = vld [vmem:[%s11424_s1 + $0x148] ss:$16 sps:$4 sm:$0xff]  }
 0x194   :  { %5580 = vmatpush1.bf16.msra.mxu1 %v7957_v7  ;;  %5540 = vmatprep.subr.bf16.mxu0 %v7962_v8  ;;  %v8011_v7 = vld [vmem:[%s11424_s1 + $0x248] ss:$16 sps:$4 sm:$0xff]   ;;  %v8016_v8 = vld [vmem:[%s11424_s1 + $0x12c] ss:$16 sps:$4 sm:$0xff]  }
 0x195   :  { %5581 = vmatprep.subr.bf16.mxu1 %v7965_v9  ;;  %v8019_v9 = vld [vmem:[%s11424_s1 + $0x22c] ss:$16 sps:$4 sm:$0xff]  }
 0x197   :  { %5541 = vmatpush1.bf16.msra.mxu0 %v7960_v10  ;;  %v8014_v10 = vld [vmem:[%s11424_s1 + $0x128] ss:$16 sps:$4 sm:$0xff]  }
 0x198   :  { %5582 = vmatpush1.bf16.msra.mxu1 %v7963_v11  ;;  %5542 = vmatprep.subr.bf16.mxu0 %v7968_v16  ;;  %v8017_v11 = vld [vmem:[%s11424_s1 + $0x228] ss:$16 sps:$4 sm:$0xff]   ;;  %v8022_v16 = vld [vmem:[%s11424_s1 + $0x10c] ss:$16 sps:$4 sm:$0xff]  }
 0x199   :  { %5583 = vmatprep.subr.bf16.mxu1 %v7971_v19  ;;  %v8025_v19 = vld [vmem:[%s11424_s1 + $0x20c] ss:$16 sps:$4 sm:$0xff]  }
 0x19b   :  { %5543 = vmatpush1.bf16.msra.mxu0 %v7966_v4  ;;  %v8020_v4 = vld [vmem:[%s11424_s1 + $0x108] ss:$16 sps:$4 sm:$0xff]  }
 0x19c   :  { %5584 = vmatpush1.bf16.msra.mxu1 %v7969_v5  ;;  %5544 = vmatprep.subr.bf16.mxu0 %v7974_v20  ;;  %v8023_v5 = vld [vmem:[%s11424_s1 + $0x208] ss:$16 sps:$4 sm:$0xff]   ;;  %v8028_v20 = vld [vmem:[%s11424_s1 + $0x3ec] ss:$16 sps:$4 sm:$0xff]  }
 0x19d   :  { %5585 = vmatprep.subr.bf16.mxu1 %v7977_v21  ;;  %v8031_v21 = vld [vmem:[%s11424_s1 + $0x4ec] ss:$16 sps:$4 sm:$0xff]  }
 0x19f   :  { %5545 = vmatpush1.bf16.msra.mxu0 %v7972_v28  ;;  %v8026_v28 = vld [vmem:[%s11424_s1 + $0x3e8] ss:$16 sps:$4 sm:$0xff]  }
 0x1a0   :  { %5586 = vmatpush1.bf16.msra.mxu1 %v7975_v29  ;;  %5612 = vmatprep.subr.bf16.mxu0 %v7983_v36  ;;  %v8029_v29 = vld [vmem:[%s11424_s1 + $0x4e8] ss:$16 sps:$4 sm:$0xff]  }
 0x1a1   :  { %5587 = vmatprep.subr.bf16.mxu1 %v7980_v34  ;;  %v8037_v34 = vld [vmem:[%s11424_s1 + $0x4cc] ss:$16 sps:$4 sm:$0xff]   ;;  %v8032_v36 = vld [vmem:[%s11424_s1 + $0x3c8] ss:$16 sps:$4 sm:$0xff]  }
 0x1a2   :  { %5563 = vmatmul.mubr.bf16.vlgmr.msra.gmra.mxu0 %v10092_v32 }
 0x1a3   :  { %5613 = vmatpush1.bf16.msra.mxu0 %v7981_v38  ;;  %5644 = vmatprep.mubr.bf16.mxu0 %v8818_v0  ;;  %v8001_v0 = vld [vmem:[%s11424_s1 + $0x28c] ss:$16 sps:$4 sm:$0xff]  }
 0x1a4   :  { %5588 = vmatpush2.bf16.msra.mxu1 %v7978_v37  ;;  %5614 = vmatprep.subr.bf16.mxu0 %v7989_v44  ;;  %v8035_v37 = vld [vmem:[%s11424_s1 + $0x4c8] ss:$16 sps:$4 sm:$0xff]  }
 0x1a5   :  { %5589 = vmatprep.subr.bf16.mxu1 %v7986_v40 }
 0x1a7   :  { %5615 = vmatpush1.bf16.msra.mxu0 %v7987_v47 }
 0x1a8   :  { %5590 = vmatpush2.bf16.msra.mxu1 %v7984_v49  ;;  %5616 = vmatprep.subr.bf16.mxu0 %v7995_v45  ;;  %v8043_v45 = vld [vmem:[%s11424_s1 + $0x4ac] ss:$16 sps:$4 sm:$0xff]  }
 0x1a9   :  { %5591 = vmatprep.subr.bf16.mxu1 %v7992_v48  ;;  %v8040_v48 = vld [vmem:[%s11424_s1 + $0x3ac] ss:$16 sps:$4 sm:$0xff]  }
 0x1ab   :  { %5617 = vmatpush1.bf16.msra.mxu0 %v7993_v56  ;;  %v8041_v56 = vld [vmem:[%s11424_s1 + $0x4a8] ss:$16 sps:$4 sm:$0xff]  }
 0x1ac   :  { %5592 = vmatpush2.bf16.msra.mxu1 %v7990_v51  ;;  %5618 = vmatprep.subr.bf16.mxu0 %v8001_v0 }
 0x1ad   :  { %5593 = vmatprep.subr.bf16.mxu1 %v7998_v55 }
 0x1af   :  { %5619 = vmatpush1.bf16.msra.mxu0 %v7999_v58 }
 0x1b0   :  { %5594 = vmatpush2.bf16.msra.mxu1 %v7996_v53  ;;  %5620 = vmatprep.subr.bf16.mxu0 %v8007_v62  ;;  %v8049_v62 = vld [vmem:[%s11424_s1 + $0x48c] ss:$16 sps:$4 sm:$0xff]  }
 0x1b1   :  { %5595 = vmatprep.subr.bf16.mxu1 %v8004_v61 }
 0x1b3   :  { %5621 = vmatpush1.bf16.msra.mxu0 %v8005_v63  ;;  %v8052_v63 = vld [vmem:[%s11424_s1 + $0x36c] ss:$16 sps:$4 sm:$0xff]  }
 0x1b4   :  { %5596 = vmatpush2.bf16.msra.mxu1 %v8002_v60  ;;  %5622 = vmatprep.subr.bf16.mxu0 %v8013_v3  ;;  %v8047_v60 = vld [vmem:[%s11424_s1 + $0x488] ss:$16 sps:$4 sm:$0xff]  }
 0x1b5   :  { %5597 = vmatprep.subr.bf16.mxu1 %v8010_v2  ;;  %v8055_v2 = vld [vmem:[%s11424_s1 + $0x46c] ss:$16 sps:$4 sm:$0xff]   ;;  %v8050_v3 = vld [vmem:[%s11424_s1 + $0x368] ss:$16 sps:$4 sm:$0xff]  }
 0x1b7   :  { %5623 = vmatpush1.bf16.msra.mxu0 %v8011_v7  ;;  %v8058_v7 = vld [vmem:[%s11424_s1 + $0x34c] ss:$16 sps:$4 sm:$0xff]  }
 0x1b8   :  { %5598 = vmatpush2.bf16.msra.mxu1 %v8008_v1  ;;  %5624 = vmatprep.subr.bf16.mxu0 %v8019_v9  ;;  %v8053_v1 = vld [vmem:[%s11424_s1 + $0x468] ss:$16 sps:$4 sm:$0xff]  }
 0x1b9   :  { %5599 = vmatprep.subr.bf16.mxu1 %v8016_v8  ;;  %v8061_v8 = vld [vmem:[%s11424_s1 + $0x44c] ss:$16 sps:$4 sm:$0xff]   ;;  %v8056_v9 = vld [vmem:[%s11424_s1 + $0x348] ss:$16 sps:$4 sm:$0xff]  }
 0x1bb   :  { %5625 = vmatpush1.bf16.msra.mxu0 %v8017_v11  ;;  %v8064_v11 = vld [vmem:[%s11424_s1 + $0x32c] ss:$16 sps:$4 sm:$0xff]  }
 0x1bc   :  { %5600 = vmatpush2.bf16.msra.mxu1 %v8014_v10  ;;  %5626 = vmatprep.subr.bf16.mxu0 %v8025_v19  ;;  %v8059_v10 = vld [vmem:[%s11424_s1 + $0x448] ss:$16 sps:$4 sm:$0xff]  }
 0x1bd   :  { %5601 = vmatprep.subr.bf16.mxu1 %v8022_v16  ;;  %v8067_v16 = vld [vmem:[%s11424_s1 + $0x42c] ss:$16 sps:$4 sm:$0xff]   ;;  %v8062_v19 = vld [vmem:[%s11424_s1 + $0x328] ss:$16 sps:$4 sm:$0xff]  }
 0x1bf   :  { %5627 = vmatpush1.bf16.msra.mxu0 %v8023_v5  ;;  %v8070_v5 = vld [vmem:[%s11424_s1 + $0x30c] ss:$16 sps:$4 sm:$0xff]  }
 0x1c0   :  { %5602 = vmatpush2.bf16.msra.mxu1 %v8020_v4  ;;  %5628 = vmatprep.subr.bf16.mxu0 %v8028_v20  ;;  %v8065_v4 = vld [vmem:[%s11424_s1 + $0x428] ss:$16 sps:$4 sm:$0xff]   ;;  %v8073_v20 = vld [vmem:[%s11424_s1 + $0x40c] ss:$16 sps:$4 sm:$0xff]  }
 0x1c1   :  { %5653 = vmatprep.subr.bf16.mxu1 %v8031_v21  ;;  %v8068_v21 = vld [vmem:[%s11424_s1 + $0x308] ss:$16 sps:$4 sm:$0xff]  }
 0x1c2   :  { %v5318_v38 = vpop.f32.mrf.mxu0 }
 0x1c3   :  { %v5359_v40 = vpop.f32.mrf.mxu1  ;;  %5604 = vmatmul.mubr.bf16.vlgmr.msra.gmra.mxu1 %v8855_v13  ;;  %v5319_v44 = vadd.f32 %v5318_v38, %v10003_v46  ;;  %5629 = vmatpush2.bf16.msra.mxu0 %v8026_v28  ;;  %v8038_v46 = vld [vmem:[%s11424_s1 + $0x3a8] ss:$16 sps:$4 sm:$0xff]   ;;  %v8085_v38 = vld [vmem:[%s11424_s1 + $0x6cc] ss:$16 sps:$4 sm:$0xff]  }
 0x1c4   :  { %5654 = vmatpush1.bf16.msra.mxu1 %v8029_v29  ;;  %v5320_v49 = vpop.f32.mrf.mxu0  ;;  %5630 = vmatprep.subr.bf16.mxu0 %v8034_v30  ;;  %v8071_v28 = vld [vmem:[%s11424_s1 + $0x408] ss:$16 sps:$4 sm:$0xff]   ;;  %v8076_v29 = vld [vmem:[%s11424_s1 + $0x5ec] ss:$16 sps:$4 sm:$0xff]  }
 0x1c5   :  { %v5361_v47 = vpop.f32.mrf.mxu1  ;;  %5655 = vmatprep.subr.bf16.mxu1 %v8037_v34  ;;  %v10212_v51 = vadd.f32 %v5359_v40, %v5319_v44  ;;  %v5321_v13 = vadd.f32 %v5320_v49, %v10014_v57  ;;  %5685 = vmatprep.mubr.bf16.mxu1 %v8867_v17  ;;  %v8046_v57 = vld [vmem:[%s11424_s1 + $0x38c] ss:$16 sps:$4 sm:$0xff]   ;;  %v8044_v17 = vld [vmem:[%s11424_s1 + $0x388] ss:$16 sps:$4 sm:$0xff]  }
 0x1c6   :  { %v5322_v55 = vpop.f32.mrf.mxu0  ;;  %v8079_v30 = vld [vmem:[%s11424_s1 + $0x6ec] ss:$16 sps:$4 sm:$0xff]   ;;  %v8074_v34 = vld [vmem:[%s11424_s1 + $0x5e8] ss:$16 sps:$4 sm:$0xff]  }
 0x1c7   :  { %v5363_v0 = vpop.f32.mrf.mxu1  ;;  %v10222_v53 = vadd.f32 %v5361_v47, %v5321_v13  ;;  %5631 = vmatpush2.bf16.msra.mxu0 %v8032_v36  ;;  %v8077_v36 = vld [vmem:[%s11424_s1 + $0x6e8] ss:$16 sps:$4 sm:$0xff]   ;;  %v8088_v49 = vld [vmem:[%s11424_s1 + $0x5ac] ss:$16 sps:$4 sm:$0xff]  }
 0x1c8   :  { %5656 = vmatpush1.bf16.msra.mxu1 %v8035_v37  ;;  %v5323_v58 = vpop.f32.mrf.mxu0  ;;  %5632 = vmatprep.subr.bf16.mxu0 %v8040_v48  ;;  %v8082_v37 = vld [vmem:[%s11424_s1 + $0x5cc] ss:$16 sps:$4 sm:$0xff]   ;;  %v8080_v40 = vld [vmem:[%s11424_s1 + $0x5c8] ss:$16 sps:$4 sm:$0xff]  }
 0x1c9   :  { %v5364_v61 = vpop.f32.mrf.mxu1  ;;  %5657 = vmatprep.subr.bf16.mxu1 %v8043_v45  ;;  %v8083_v44 = vld [vmem:[%s11424_s1 + $0x6c8] ss:$16 sps:$4 sm:$0xff]   ;;  %v8091_v47 = vld [vmem:[%s11424_s1 + $0x6ac] ss:$16 sps:$4 sm:$0xff]  }
 0x1ca   :  { %v8086_v48 = vld [vmem:[%s11424_s1 + $0x5a8] ss:$16 sps:$4 sm:$0xff]   ;;  %v8094_v45 = vld [vmem:[%s11424_s1 + $0x58c] ss:$16 sps:$4 sm:$0xff]  }
 0x1cb   :  { %5633 = vmatpush2.bf16.msra.mxu0 %v8038_v46  ;;  %v8097_v13 = vld [vmem:[%s11424_s1 + $0x68c] ss:$16 sps:$4 sm:$0xff]   ;;  %v8092_v46 = vld [vmem:[%s11424_s1 + $0x588] ss:$16 sps:$4 sm:$0xff]  }
 0x1cc   :  { %5658 = vmatpush1.bf16.msra.mxu1 %v8041_v56  ;;  %5634 = vmatprep.subr.bf16.mxu0 %v8046_v57  ;;  %v8100_v56 = vld [vmem:[%s11424_s1 + $0x56c] ss:$16 sps:$4 sm:$0xff]   ;;  %v8098_v0 = vld [vmem:[%s11424_s1 + $0x568] ss:$16 sps:$4 sm:$0xff]  }
 0x1cd   :  { %5659 = vmatprep.subr.bf16.mxu1 %v8049_v62  ;;  %v8103_v55 = vld [vmem:[%s11424_s1 + $0x66c] ss:$16 sps:$4 sm:$0xff]   ;;  %v8101_v58 = vld [vmem:[%s11424_s1 + $0x668] ss:$16 sps:$4 sm:$0xff]  }
 0x1ce   :  { %v8106_v61 = vld [vmem:[%s11424_s1 + $0x54c] ss:$16 sps:$4 sm:$0xff]  }
 0x1cf   :  { %5635 = vmatpush2.bf16.msra.mxu0 %v8044_v17  ;;  %v8109_v57 = vld [vmem:[%s11424_s1 + $0x64c] ss:$16 sps:$4 sm:$0xff]  }
 0x1d0   :  { %5660 = vmatpush1.bf16.msra.mxu1 %v8047_v60  ;;  %5636 = vmatprep.subr.bf16.mxu0 %v8052_v63 }
 0x1d1   :  { %5661 = vmatprep.subr.bf16.mxu1 %v8055_v2 }
 0x1d3   :  { %5637 = vmatpush2.bf16.msra.mxu0 %v8050_v3 }
 0x1d4   :  { %5662 = vmatpush1.bf16.msra.mxu1 %v8053_v1  ;;  %5638 = vmatprep.subr.bf16.mxu0 %v8058_v7 }
 0x1d5   :  { %5663 = vmatprep.subr.bf16.mxu1 %v8061_v8 }
 0x1d7   :  { %5639 = vmatpush2.bf16.msra.mxu0 %v8056_v9 }
 0x1d8   :  { %5664 = vmatpush1.bf16.msra.mxu1 %v8059_v10  ;;  %5640 = vmatprep.subr.bf16.mxu0 %v8064_v11 }
 0x1d9   :  { %5665 = vmatprep.subr.bf16.mxu1 %v8067_v16 }
 0x1db   :  { %5641 = vmatpush2.bf16.msra.mxu0 %v8062_v19 }
 0x1dc   :  { %5666 = vmatpush1.bf16.msra.mxu1 %v8065_v4  ;;  %5642 = vmatprep.subr.bf16.mxu0 %v8070_v5 }
 0x1dd   :  { %5667 = vmatprep.subr.bf16.mxu1 %v8073_v20 }
 0x1df   :  { %5643 = vmatpush2.bf16.msra.mxu0 %v8068_v21 }
 0x1e0   :  { %5668 = vmatpush1.bf16.msra.mxu1 %v8071_v28  ;;  %5694 = vmatprep.subr.bf16.mxu0 %v8079_v30 }
 0x1e1   :  { %5669 = vmatprep.subr.bf16.mxu1 %v8076_v29 }
 0x1e2   :  { %5645 = vmatmul.mubr.bf16.vlgmr.msra.gmra.mxu0 %v8871_v18  ;;  %v8089_v18 = vld [vmem:[%s11424_s1 + $0x6a8] ss:$16 sps:$4 sm:$0xff]  }
 0x1e3   :  { %5695 = vmatpush1.bf16.msra.mxu0 %v8077_v36  ;;  %5726 = vmatprep.mubr.bf16.mxu0 %v8887_v23  ;;  %v8095_v23 = vld [vmem:[%s11424_s1 + $0x688] ss:$16 sps:$4 sm:$0xff]  }
 0x1e4   :  { %5670 = vmatpush2.bf16.msra.mxu1 %v8074_v34  ;;  %5696 = vmatprep.subr.bf16.mxu0 %v8085_v38 }
 0x1e5   :  { %5671 = vmatprep.subr.bf16.mxu1 %v8082_v37 }
 0x1e7   :  { %5697 = vmatpush1.bf16.msra.mxu0 %v8083_v44 }
 0x1e8   :  { %5672 = vmatpush2.bf16.msra.mxu1 %v8080_v40  ;;  %5698 = vmatprep.subr.bf16.mxu0 %v8091_v47 }
 0x1e9   :  { %5673 = vmatprep.subr.bf16.mxu1 %v8088_v49 }
 0x1eb   :  { %5699 = vmatpush1.bf16.msra.mxu0 %v8089_v18 }
 0x1ec   :  { %5674 = vmatpush2.bf16.msra.mxu1 %v8086_v48  ;;  %5700 = vmatprep.subr.bf16.mxu0 %v8097_v13 }
 0x1ed   :  { %5675 = vmatprep.subr.bf16.mxu1 %v8094_v45 }
 0x1ef   :  { %5701 = vmatpush1.bf16.msra.mxu0 %v8095_v23 }
 0x1f0   :  { %5676 = vmatpush2.bf16.msra.mxu1 %v8092_v46  ;;  %5702 = vmatprep.subr.bf16.mxu0 %v8103_v55 }
 0x1f1   :  { %5677 = vmatprep.subr.bf16.mxu1 %v8100_v56 }
 0x1f2   :  { %10 = vsyncpa [#allocation3], 0  ;;  %v8104_v62 = vld [vmem:[%s11424_s1 + $0x548] ss:$16 sps:$4 sm:$0xff]   ;;  %v8112_v60 = vld [vmem:[%s11424_s1 + $0x52c] ss:$16 sps:$4 sm:$0xff]  }
 0x1f3   :  { %5703 = vmatpush1.bf16.msra.mxu0 %v8101_v58  ;;  %v8107_v17 = vld [vmem:[%s11424_s1 + $0x648] ss:$16 sps:$4 sm:$0xff]   ;;  %v8115_v63 = vld [vmem:[%s11424_s1 + $0x62c] ss:$16 sps:$4 sm:$0xff]   ;;  %s8611_s23 = smov [#allocation2]  }
 0x1f4   :  { %5678 = vmatpush2.bf16.msra.mxu1 %v8098_v0  ;;  %5704 = vmatprep.subr.bf16.mxu0 %v8109_v57  ;;  %v8110_v2 = vld [vmem:[%s11424_s1 + $0x528] ss:$16 sps:$4 sm:$0xff]   ;;  %v8118_v1 = vld [vmem:[%s11424_s1 + $0x50c] ss:$16 sps:$4 sm:$0xff]   ;;  %s6462_s24 = sshll.u32 %s8611_s23, 4  ;;  %s6463_s24 = int_to_ptr.vmem [resolvable:$true] %s6462_s24 }
 0x1f5   :  { %5679 = vmatprep.subr.bf16.mxu1 %v8106_v61  ;;  %v8113_v3 = vld [vmem:[%s11424_s1 + $0x628] ss:$16 sps:$4 sm:$0xff]   ;;  %v8121_v7 = vld [vmem:[%s11424_s1 + $0x60c] ss:$16 sps:$4 sm:$0xff]   ;;  %s8587_s25 = scalar_lea.vmem %s6463_s24, 32  ;;  %p8592_p1 = scmp.lt.s32.totalorder %s6463_s24, %s6463_s24 }
 0x1f6   :  { %v8116_v8 = vld [vmem:[%s11424_s1 + $0x508] ss:$16 sps:$4 sm:$0xff]   ;;  %v8124_v10 = vld [vmem:[%s11424_s1 + $0x7ec] ss:$16 sps:$4 sm:$0xff]   ;;  %p8588_p0 = scmp.ne.s32.totalorder %s6463_s24, %s8587_s25  ;;  %p8593_p2 = scmp.lt.s32.totalorder %s8587_s25, %s8587_s25 }
 0x1f7   :  { %5705 = vmatpush1.bf16.msra.mxu0 %v8107_v17  ;;  %v8119_v9 = vld [vmem:[%s11424_s1 + $0x608] ss:$16 sps:$4 sm:$0xff]   ;;  %v8127_v11 = vld [vmem:[%s11424_s1 + $0x8ec] ss:$16 sps:$4 sm:$0xff]  }
 0x1f8   :  { %5680 = vmatpush2.bf16.msra.mxu1 %v8104_v62  ;;  %5706 = vmatprep.subr.bf16.mxu0 %v8115_v63  ;;  %v8122_v16 = vld [vmem:[%s11424_s1 + $0x7e8] ss:$16 sps:$4 sm:$0xff]   ;;  %v8130_v4 = vld [vmem:[%s11424_s1 + $0x7cc] ss:$16 sps:$4 sm:$0xff]   ;;  %p8594_p3 = por %p8593_p2, %p8592_p1 }
 0x1f9   :  { %5681 = vmatprep.subr.bf16.mxu1 %v8112_v60  ;;  %v8125_v19 = vld [vmem:[%s11424_s1 + $0x8e8] ss:$16 sps:$4 sm:$0xff]   ;;  %v8133_v5 = vld [vmem:[%s11424_s1 + $0x8cc] ss:$16 sps:$4 sm:$0xff]  }
 0x1fa   :  { %v8128_v29 = vld [vmem:[%s11424_s1 + $0x7c8] ss:$16 sps:$4 sm:$0xff]   ;;  %v8148_v23 = vld [vmem:[%s11424_s1 + $0x76c] ss:$16 sps:$4 sm:$0xff]   ;;  %p8595_p4 = pnand %p8594_p3, %p8588_p0 }
 0x1fb   :  { %5707 = vmatpush1.bf16.msra.mxu0 %v8113_v3  ;;  %v8131_v30 = vld [vmem:[%s11424_s1 + $0x8c8] ss:$16 sps:$4 sm:$0xff]   ;;  %v8151_v56 = vld [vmem:[%s11424_s1 + $0x86c] ss:$16 sps:$4 sm:$0xff]  }
 0x1fc   :  { %5682 = vmatpush2.bf16.msra.mxu1 %v8110_v2  ;;  %5708 = vmatprep.subr.bf16.mxu0 %v8121_v7  ;;  %v8134_v47 = vld [vmem:[%s11424_s1 + $0x7a8] ss:$16 sps:$4 sm:$0xff]   ;;  %v8154_v58 = vld [vmem:[%s11424_s1 + $0x74c] ss:$16 sps:$4 sm:$0xff]  }
 0x1fd   :  { %5683 = vmatprep.subr.bf16.mxu1 %v8118_v1  ;;  %v8137_v48 = vld [vmem:[%s11424_s1 + $0x8a8] ss:$16 sps:$4 sm:$0xff]   ;;  %v8157_v61 = vld [vmem:[%s11424_s1 + $0x84c] ss:$16 sps:$4 sm:$0xff]  }
 0x1fe   :  { %v8140_v13 = vld [vmem:[%s11424_s1 + $0x788] ss:$16 sps:$4 sm:$0xff]   ;;  %v8160_v17 = vld [vmem:[%s11424_s1 + $0x72c] ss:$16 sps:$4 sm:$0xff]  }
 0x1ff   :  { %5709 = vmatpush1.bf16.msra.mxu0 %v8119_v9  ;;  %v8143_v46 = vld [vmem:[%s11424_s1 + $0x888] ss:$16 sps:$4 sm:$0xff]   ;;  %v8163_v60 = vld [vmem:[%s11424_s1 + $0x82c] ss:$16 sps:$4 sm:$0xff]  }
 0x200   :  { %5684 = vmatpush2.bf16.msra.mxu1 %v8116_v8  ;;  %5710 = vmatprep.subr.bf16.mxu0 %v8124_v10  ;;  %v8146_v55 = vld [vmem:[%s11424_s1 + $0x768] ss:$16 sps:$4 sm:$0xff]   ;;  %v8166_v3 = vld [vmem:[%s11424_s1 + $0x70c] ss:$16 sps:$4 sm:$0xff]  }
 0x201   :  { %5735 = vmatprep.subr.bf16.mxu1 %v8127_v11  ;;  %v8149_v0 = vld [vmem:[%s11424_s1 + $0x868] ss:$16 sps:$4 sm:$0xff]   ;;  %v8169_v1 = vld [vmem:[%s11424_s1 + $0x80c] ss:$16 sps:$4 sm:$0xff]  }
 0x202   :  { %v5400_v20 = vpop.f32.mrf.mxu0  ;;  %v8152_v57 = vld [vmem:[%s11424_s1 + $0x748] ss:$16 sps:$4 sm:$0xff]   ;;  %v8172_v9 = vld [vmem:[%s11424_s1 + $0x9ec] ss:$16 sps:$4 sm:$0xff]  }
 0x203   :  { %v5441_v21 = vpop.f32.mrf.mxu1  ;;  %5686 = vmatmul.mubr.bf16.vlgmr.msra.gmra.mxu1 %v9066_v26  ;;  %v5401_v28 = vadd.f32 %v5400_v20, %v10212_v51  ;;  %5711 = vmatpush2.bf16.msra.mxu0 %v8122_v16  ;;  %v8136_v26 = vld [vmem:[%s11424_s1 + $0x7ac] ss:$16 sps:$4 sm:$0xff]   ;;  %v8155_v62 = vld [vmem:[%s11424_s1 + $0x848] ss:$16 sps:$4 sm:$0xff]  }
 0x204   :  { %5736 = vmatpush1.bf16.msra.mxu1 %v8125_v19  ;;  %v5402_v34 = vpop.f32.mrf.mxu0  ;;  %5712 = vmatprep.subr.bf16.mxu0 %v8130_v4  ;;  %v8139_v51 = vld [vmem:[%s11424_s1 + $0x8ac] ss:$16 sps:$4 sm:$0xff]   ;;  %v8158_v63 = vld [vmem:[%s11424_s1 + $0x728] ss:$16 sps:$4 sm:$0xff]  }
 0x205   :  { %v5443_v36 = vpop.f32.mrf.mxu1  ;;  %5737 = vmatprep.subr.bf16.mxu1 %v8133_v5  ;;  %v10414_v37 = vadd.f32 %v5441_v21, %v5401_v28  ;;  %v5403_v38 = vadd.f32 %v5402_v34, %v10222_v53  ;;  %5767 = vmatprep.mubr.bf16.mxu1 %v9119_v41  ;;  %v8142_v41 = vld [vmem:[%s11424_s1 + $0x78c] ss:$16 sps:$4 sm:$0xff]   ;;  %v8161_v2 = vld [vmem:[%s11424_s1 + $0x828] ss:$16 sps:$4 sm:$0xff]  }
 0x206   :  { %v5404_v40 = vpop.f32.mrf.mxu0  ;;  %v8145_v53 = vld [vmem:[%s11424_s1 + $0x88c] ss:$16 sps:$4 sm:$0xff]   ;;  %v8164_v7 = vld [vmem:[%s11424_s1 + $0x708] ss:$16 sps:$4 sm:$0xff]  }
 0x207   :  { %v5445_v44 = vpop.f32.mrf.mxu1  ;;  %v10418_v49 = vadd.f32 %v5443_v36, %v5403_v38  ;;  %5713 = vmatpush2.bf16.msra.mxu0 %v8128_v29  ;;  %v8167_v8 = vld [vmem:[%s11424_s1 + $0x808] ss:$16 sps:$4 sm:$0xff]   ;;  %v8175_v10 = vld [vmem:[%s11424_s1 + $0xaec] ss:$16 sps:$4 sm:$0xff]  }
 0x208   :  { %5738 = vmatpush1.bf16.msra.mxu1 %v8131_v30  ;;  %v5405_v18 = vpop.f32.mrf.mxu0  ;;  %5714 = vmatprep.subr.bf16.mxu0 %v8136_v26  ;;  %v8170_v11 = vld [vmem:[%s11424_s1 + $0x9e8] ss:$16 sps:$4 sm:$0xff]   ;;  %v8178_v19 = vld [vmem:[%s11424_s1 + $0x9cc] ss:$16 sps:$4 sm:$0xff]  }
 0x209   :  { %v5446_v45 = vpop.f32.mrf.mxu1  ;;  %5739 = vmatprep.subr.bf16.mxu1 %v8139_v51  ;;  %v8173_v16 = vld [vmem:[%s11424_s1 + $0xae8] ss:$16 sps:$4 sm:$0xff]   ;;  %v8181_v4 = vld [vmem:[%s11424_s1 + $0xacc] ss:$16 sps:$4 sm:$0xff]  }
 0x20a   :  { %v8176_v5 = vld [vmem:[%s11424_s1 + $0x9c8] ss:$16 sps:$4 sm:$0xff]   ;;  %v8184_v21 = vld [vmem:[%s11424_s1 + $0x9ac] ss:$16 sps:$4 sm:$0xff]  }
 0x20b   :  { %5715 = vmatpush2.bf16.msra.mxu0 %v8134_v47  ;;  %v8179_v20 = vld [vmem:[%s11424_s1 + $0xac8] ss:$16 sps:$4 sm:$0xff]   ;;  %v8190_v30 = vld [vmem:[%s11424_s1 + $0x98c] ss:$16 sps:$4 sm:$0xff]  }
 0x20c   :  { %5740 = vmatpush1.bf16.msra.mxu1 %v8137_v48  ;;  %5716 = vmatprep.subr.bf16.mxu0 %v8142_v41  ;;  %v8182_v28 = vld [vmem:[%s11424_s1 + $0x9a8] ss:$16 sps:$4 sm:$0xff]   ;;  %v8196_v26 = vld [vmem:[%s11424_s1 + $0x96c] ss:$16 sps:$4 sm:$0xff]  }
 0x20d   :  { %5741 = vmatprep.subr.bf16.mxu1 %v8145_v53  ;;  %v8185_v29 = vld [vmem:[%s11424_s1 + $0xaa8] ss:$16 sps:$4 sm:$0xff]   ;;  %v8199_v51 = vld [vmem:[%s11424_s1 + $0xa6c] ss:$16 sps:$4 sm:$0xff]  }
 0x20e   :  { %v8188_v34 = vld [vmem:[%s11424_s1 + $0x988] ss:$16 sps:$4 sm:$0xff]   ;;  %v8202_v44 = vld [vmem:[%s11424_s1 + $0x94c] ss:$16 sps:$4 sm:$0xff]  }
 0x20f   :  { %5717 = vmatpush2.bf16.msra.mxu0 %v8140_v13  ;;  %v8191_v36 = vld [vmem:[%s11424_s1 + $0xa88] ss:$16 sps:$4 sm:$0xff]   ;;  %v8205_v47 = vld [vmem:[%s11424_s1 + $0xa4c] ss:$16 sps:$4 sm:$0xff]  }
 0x210   :  { %5742 = vmatpush1.bf16.msra.mxu1 %v8143_v46  ;;  %5718 = vmatprep.subr.bf16.mxu0 %v8148_v23  ;;  %v8194_v38 = vld [vmem:[%s11424_s1 + $0x968] ss:$16 sps:$4 sm:$0xff]   ;;  %v8208_v45 = vld [vmem:[%s11424_s1 + $0x92c] ss:$16 sps:$4 sm:$0xff]  }
 0x211   :  { %5743 = vmatprep.subr.bf16.mxu1 %v8151_v56  ;;  %v8197_v40 = vld [vmem:[%s11424_s1 + $0xa68] ss:$16 sps:$4 sm:$0xff]   ;;  %v8211_v41 = vld [vmem:[%s11424_s1 + $0xa2c] ss:$16 sps:$4 sm:$0xff]  }
 0x212   :  { %v8200_v48 = vld [vmem:[%s11424_s1 + $0x948] ss:$16 sps:$4 sm:$0xff]   ;;  %v8214_v46 = vld [vmem:[%s11424_s1 + $0x90c] ss:$16 sps:$4 sm:$0xff]  }
 0x213   :  { %5719 = vmatpush2.bf16.msra.mxu0 %v8146_v55  ;;  %v8203_v18 = vld [vmem:[%s11424_s1 + $0xa48] ss:$16 sps:$4 sm:$0xff]   ;;  %v8217_v23 = vld [vmem:[%s11424_s1 + $0xa0c] ss:$16 sps:$4 sm:$0xff]  }
 0x214   :  { %5744 = vmatpush1.bf16.msra.mxu1 %v8149_v0  ;;  %5720 = vmatprep.subr.bf16.mxu0 %v8154_v58  ;;  %v8206_v53 = vld [vmem:[%s11424_s1 + $0x928] ss:$16 sps:$4 sm:$0xff]   ;;  %v8220_v0 = vld [vmem:[%s11424_s1 + $0xbec] ss:$16 sps:$4 sm:$0xff]  }
 0x215   :  { %5745 = vmatprep.subr.bf16.mxu1 %v8157_v61  ;;  %v8209_v13 = vld [vmem:[%s11424_s1 + $0xa28] ss:$16 sps:$4 sm:$0xff]   ;;  %v8223_v58 = vld [vmem:[%s11424_s1 + $0xcec] ss:$16 sps:$4 sm:$0xff]  }
 0x216   :  { %v8212_v56 = vld [vmem:[%s11424_s1 + $0x908] ss:$16 sps:$4 sm:$0xff]  }
 0x217   :  { %5721 = vmatpush2.bf16.msra.mxu0 %v8152_v57  ;;  %v8215_v55 = vld [vmem:[%s11424_s1 + $0xa08] ss:$16 sps:$4 sm:$0xff]  }
 0x218   :  { %5746 = vmatpush1.bf16.msra.mxu1 %v8155_v62  ;;  %5722 = vmatprep.subr.bf16.mxu0 %v8160_v17  ;;  %v8218_v61 = vld [vmem:[%s11424_s1 + $0xbe8] ss:$16 sps:$4 sm:$0xff]   ;;  %v8226_v62 = vld [vmem:[%s11424_s1 + $0xbcc] ss:$16 sps:$4 sm:$0xff]  }
 0x219   :  { %5747 = vmatprep.subr.bf16.mxu1 %v8163_v60  ;;  %v8221_v57 = vld [vmem:[%s11424_s1 + $0xce8] ss:$16 sps:$4 sm:$0xff]   ;;  %v8229_v17 = vld [vmem:[%s11424_s1 + $0xccc] ss:$16 sps:$4 sm:$0xff]  }
 0x21b   :  { %5723 = vmatpush2.bf16.msra.mxu0 %v8158_v63 }
 0x21c   :  { %5748 = vmatpush1.bf16.msra.mxu1 %v8161_v2  ;;  %5724 = vmatprep.subr.bf16.mxu0 %v8166_v3  ;;  %v8224_v3 = vld [vmem:[%s11424_s1 + $0xbc8] ss:$16 sps:$4 sm:$0xff]  }
 0x21d   :  { %5749 = vmatprep.subr.bf16.mxu1 %v8169_v1  ;;  %v8227_v1 = vld [vmem:[%s11424_s1 + $0xcc8] ss:$16 sps:$4 sm:$0xff]  }
 0x21f   :  { %5725 = vmatpush2.bf16.msra.mxu0 %v8164_v7 }
 0x220   :  { %5750 = vmatpush1.bf16.msra.mxu1 %v8167_v8  ;;  %5776 = vmatprep.subr.bf16.mxu0 %v8175_v10 }
 0x221   :  { %5751 = vmatprep.subr.bf16.mxu1 %v8172_v9 }
 0x222   :  { %5727 = vmatmul.mubr.bf16.vlgmr.msra.gmra.mxu0 %v9079_v6  ;;  %v8187_v6 = vld [vmem:[%s11424_s1 + $0xaac] ss:$16 sps:$4 sm:$0xff]  }
 0x223   :  { %5777 = vmatpush1.bf16.msra.mxu0 %v8173_v16  ;;  %5808 = vmatprep.mubr.bf16.mxu0 %v9124_v43  ;;  %v8193_v43 = vld [vmem:[%s11424_s1 + $0xa8c] ss:$16 sps:$4 sm:$0xff]  }
 0x224   :  { %5752 = vmatpush2.bf16.msra.mxu1 %v8170_v11  ;;  %5778 = vmatprep.subr.bf16.mxu0 %v8181_v4  ;;  %v8230_v4 = vld [vmem:[%s11424_s1 + $0xba8] ss:$16 sps:$4 sm:$0xff]  }
 0x225   :  { %5753 = vmatprep.subr.bf16.mxu1 %v8178_v19 }
 0x227   :  { %5779 = vmatpush1.bf16.msra.mxu0 %v8179_v20 }
 0x228   :  { %5754 = vmatpush2.bf16.msra.mxu1 %v8176_v5  ;;  %5780 = vmatprep.subr.bf16.mxu0 %v8187_v6  ;;  %v8233_v5 = vld [vmem:[%s11424_s1 + $0xca8] ss:$16 sps:$4 sm:$0xff]  }
 0x229   :  { %5755 = vmatprep.subr.bf16.mxu1 %v8184_v21  ;;  %v8236_v6 = vld [vmem:[%s11424_s1 + $0xb88] ss:$16 sps:$4 sm:$0xff]  }
 0x22b   :  { %5781 = vmatpush1.bf16.msra.mxu0 %v8185_v29  ;;  %v8244_v29 = vld [vmem:[%s11424_s1 + $0xb6c] ss:$16 sps:$4 sm:$0xff]  }
 0x22c   :  { %5756 = vmatpush2.bf16.msra.mxu1 %v8182_v28  ;;  %5782 = vmatprep.subr.bf16.mxu0 %v8193_v43  ;;  %v8239_v28 = vld [vmem:[%s11424_s1 + $0xc88] ss:$16 sps:$4 sm:$0xff]  }
 0x22d   :  { %5757 = vmatprep.subr.bf16.mxu1 %v8190_v30  ;;  %v8247_v30 = vld [vmem:[%s11424_s1 + $0xc6c] ss:$16 sps:$4 sm:$0xff]   ;;  %v8242_v43 = vld [vmem:[%s11424_s1 + $0xb68] ss:$16 sps:$4 sm:$0xff]  }
 0x22f   :  { %5783 = vmatpush1.bf16.msra.mxu0 %v8191_v36  ;;  %v8250_v36 = vld [vmem:[%s11424_s1 + $0xb4c] ss:$16 sps:$4 sm:$0xff]  }
 0x230   :  { %5758 = vmatpush2.bf16.msra.mxu1 %v8188_v34  ;;  %5784 = vmatprep.subr.bf16.mxu0 %v8199_v51  ;;  %v8245_v34 = vld [vmem:[%s11424_s1 + $0xc68] ss:$16 sps:$4 sm:$0xff]  }
 0x231   :  { %5759 = vmatprep.subr.bf16.mxu1 %v8196_v26  ;;  %v8253_v26 = vld [vmem:[%s11424_s1 + $0xc4c] ss:$16 sps:$4 sm:$0xff]   ;;  %v8248_v51 = vld [vmem:[%s11424_s1 + $0xb48] ss:$16 sps:$4 sm:$0xff]  }
 0x233   :  { %5785 = vmatpush1.bf16.msra.mxu0 %v8197_v40  ;;  %v8256_v40 = vld [vmem:[%s11424_s1 + $0xb2c] ss:$16 sps:$4 sm:$0xff]  }
 0x234   :  { %5760 = vmatpush2.bf16.msra.mxu1 %v8194_v38  ;;  %5786 = vmatprep.subr.bf16.mxu0 %v8205_v47  ;;  %v8251_v38 = vld [vmem:[%s11424_s1 + $0xc48] ss:$16 sps:$4 sm:$0xff]  }
 0x235   :  { %5761 = vmatprep.subr.bf16.mxu1 %v8202_v44  ;;  %v8259_v44 = vld [vmem:[%s11424_s1 + $0xc2c] ss:$16 sps:$4 sm:$0xff]   ;;  %v8254_v47 = vld [vmem:[%s11424_s1 + $0xb28] ss:$16 sps:$4 sm:$0xff]  }
 0x237   :  { %5787 = vmatpush1.bf16.msra.mxu0 %v8203_v18  ;;  %v8262_v18 = vld [vmem:[%s11424_s1 + $0xb0c] ss:$16 sps:$4 sm:$0xff]  }
 0x238   :  { %5762 = vmatpush2.bf16.msra.mxu1 %v8200_v48  ;;  %5788 = vmatprep.subr.bf16.mxu0 %v8211_v41  ;;  %v8257_v48 = vld [vmem:[%s11424_s1 + $0xc28] ss:$16 sps:$4 sm:$0xff]  }
 0x239   :  { %5763 = vmatprep.subr.bf16.mxu1 %v8208_v45  ;;  %v8265_v45 = vld [vmem:[%s11424_s1 + $0xc0c] ss:$16 sps:$4 sm:$0xff]   ;;  %v8260_v41 = vld [vmem:[%s11424_s1 + $0xb08] ss:$16 sps:$4 sm:$0xff]  }
 0x23b   :  { %5789 = vmatpush1.bf16.msra.mxu0 %v8209_v13  ;;  %v8268_v13 = vld [vmem:[%s11424_s1 + $0xdec] ss:$16 sps:$4 sm:$0xff]  }
 0x23c   :  { %5764 = vmatpush2.bf16.msra.mxu1 %v8206_v53  ;;  %5790 = vmatprep.subr.bf16.mxu0 %v8217_v23  ;;  %v8263_v53 = vld [vmem:[%s11424_s1 + $0xc08] ss:$16 sps:$4 sm:$0xff]  }
 0x23d   :  { %5765 = vmatprep.subr.bf16.mxu1 %v8214_v46  ;;  %v8271_v46 = vld [vmem:[%s11424_s1 + $0xeec] ss:$16 sps:$4 sm:$0xff]   ;;  %v8266_v23 = vld [vmem:[%s11424_s1 + $0xde8] ss:$16 sps:$4 sm:$0xff]  }
 0x23f   :  { %5791 = vmatpush1.bf16.msra.mxu0 %v8215_v55  ;;  %v8274_v55 = vld [vmem:[%s11424_s1 + $0xdcc] ss:$16 sps:$4 sm:$0xff]  }
 0x240   :  { %5766 = vmatpush2.bf16.msra.mxu1 %v8212_v56  ;;  %5792 = vmatprep.subr.bf16.mxu0 %v8220_v0  ;;  %v8269_v56 = vld [vmem:[%s11424_s1 + $0xee8] ss:$16 sps:$4 sm:$0xff]   ;;  %v8277_v0 = vld [vmem:[%s11424_s1 + $0xecc] ss:$16 sps:$4 sm:$0xff]  }
 0x241   :  { %5817 = vmatprep.subr.bf16.mxu1 %v8223_v58 }
 0x242   :  { %v5482_v60 = vpop.f32.mrf.mxu0 }
 0x243   :  { %v5523_v63 = vpop.f32.mrf.mxu1  ;;  %5768 = vmatmul.mubr.bf16.vlgmr.msra.gmra.mxu1 %v9295_v50  ;;  %v5483_v2 = vadd.f32 %v5482_v60, %v10414_v37  ;;  %5793 = vmatpush2.bf16.msra.mxu0 %v8218_v61  ;;  %v8232_v50 = vld [vmem:[%s11424_s1 + $0xbac] ss:$16 sps:$4 sm:$0xff]  }
 0x244   :  { %5818 = vmatpush1.bf16.msra.mxu1 %v8221_v57  ;;  %v5484_v7 = vpop.f32.mrf.mxu0  ;;  %5794 = vmatprep.subr.bf16.mxu0 %v8226_v62  ;;  %v8235_v37 = vld [vmem:[%s11424_s1 + $0xcac] ss:$16 sps:$4 sm:$0xff]   ;;  %v8272_v57 = vld [vmem:[%s11424_s1 + $0xdc8] ss:$16 sps:$4 sm:$0xff]  }
 0x245   :  { %v5525_v8 = vpop.f32.mrf.mxu1  ;;  %5819 = vmatprep.subr.bf16.mxu1 %v8229_v17  ;;  %v10616_v9 = vadd.f32 %v5523_v63, %v5483_v2  ;;  %v5485_v10 = vadd.f32 %v5484_v7, %v10418_v49  ;;  %5849 = vmatprep.mubr.bf16.mxu1 %v9307_v54  ;;  %v8238_v54 = vld [vmem:[%s11424_s1 + $0xb8c] ss:$16 sps:$4 sm:$0xff]   ;;  %v8275_v62 = vld [vmem:[%s11424_s1 + $0xec8] ss:$16 sps:$4 sm:$0xff]  }
 0x246   :  { %v5486_v11 = vpop.f32.mrf.mxu0  ;;  %v8241_v49 = vld [vmem:[%s11424_s1 + $0xc8c] ss:$16 sps:$4 sm:$0xff]  }
 0x247   :  { %v5527_v16 = vpop.f32.mrf.mxu1  ;;  %v10620_v19 = vadd.f32 %v5525_v8, %v5485_v10  ;;  %5795 = vmatpush2.bf16.msra.mxu0 %v8224_v3  ;;  %v8283_v60 = vld [vmem:[%s11424_s1 + $0xeac] ss:$16 sps:$4 sm:$0xff]   ;;  %v8278_v3 = vld [vmem:[%s11424_s1 + $0xda8] ss:$16 sps:$4 sm:$0xff]  }
 0x248   :  { %5820 = vmatpush1.bf16.msra.mxu1 %v8227_v1  ;;  %v5487_v20 = vpop.f32.mrf.mxu0  ;;  %5796 = vmatprep.subr.bf16.mxu0 %v8232_v50  ;;  %v8281_v1 = vld [vmem:[%s11424_s1 + $0xea8] ss:$16 sps:$4 sm:$0xff]   ;;  %v8286_v8 = vld [vmem:[%s11424_s1 + $0xd8c] ss:$16 sps:$4 sm:$0xff]  }
 0x249   :  { %v5528_v21 = vpop.f32.mrf.mxu1  ;;  %5821 = vmatprep.subr.bf16.mxu1 %v8235_v37  ;;  %v8284_v50 = vld [vmem:[%s11424_s1 + $0xd88] ss:$16 sps:$4 sm:$0xff]   ;;  %v8295_v10 = vld [vmem:[%s11424_s1 + $0xe6c] ss:$16 sps:$4 sm:$0xff]  }
 0x24a   :  { %v8287_v37 = vld [vmem:[%s11424_s1 + $0xe88] ss:$16 sps:$4 sm:$0xff]   ;;  %v8304_v21 = vld [vmem:[%s11424_s1 + $0xd2c] ss:$16 sps:$4 sm:$0xff]  }
 0x24b   :  { %5797 = vmatpush2.bf16.msra.mxu0 %v8230_v4  ;;  %v8290_v11 = vld [vmem:[%s11424_s1 + $0xd68] ss:$16 sps:$4 sm:$0xff]   ;;  %v8301_v4 = vld [vmem:[%s11424_s1 + $0xe4c] ss:$16 sps:$4 sm:$0xff]  }
 0x24c   :  { %5822 = vmatpush1.bf16.msra.mxu1 %v8233_v5  ;;  %5798 = vmatprep.subr.bf16.mxu0 %v8238_v54  ;;  %v8293_v16 = vld [vmem:[%s11424_s1 + $0xe68] ss:$16 sps:$4 sm:$0xff]   ;;  %v8307_v54 = vld [vmem:[%s11424_s1 + $0xe2c] ss:$16 sps:$4 sm:$0xff]  }
 0x24d   :  { %5823 = vmatprep.subr.bf16.mxu1 %v8241_v49  ;;  %v8296_v5 = vld [vmem:[%s11424_s1 + $0xd48] ss:$16 sps:$4 sm:$0xff]  }
 0x24e   :  { %v8299_v20 = vld [vmem:[%s11424_s1 + $0xe48] ss:$16 sps:$4 sm:$0xff]  }
 0x24f   :  { %5799 = vmatpush2.bf16.msra.mxu0 %v8236_v6  ;;  %v8302_v49 = vld [vmem:[%s11424_s1 + $0xd28] ss:$16 sps:$4 sm:$0xff]  }
 0x250   :  { %5824 = vmatpush1.bf16.msra.mxu1 %v8239_v28  ;;  %5800 = vmatprep.subr.bf16.mxu0 %v8244_v29  ;;  %v8305_v6 = vld [vmem:[%s11424_s1 + $0xe28] ss:$16 sps:$4 sm:$0xff]   ;;  %v8310_v28 = vld [vmem:[%s11424_s1 + $0xd0c] ss:$16 sps:$4 sm:$0xff]  }
 0x251   :  { %5825 = vmatprep.subr.bf16.mxu1 %v8247_v30  ;;  %v8313_v29 = vld [vmem:[%s11424_s1 + $0xe0c] ss:$16 sps:$4 sm:$0xff]   ;;  %v8308_v30 = vld [vmem:[%s11424_s1 + $0xd08] ss:$16 sps:$4 sm:$0xff]  }
 0x253   :  { %5801 = vmatpush2.bf16.msra.mxu0 %v8242_v43  ;;  %v8311_v43 = vld [vmem:[%s11424_s1 + $0xe08] ss:$16 sps:$4 sm:$0xff]  }
 0x254   :  { %5826 = vmatpush1.bf16.msra.mxu1 %v8245_v34  ;;  %5802 = vmatprep.subr.bf16.mxu0 %v8250_v36  ;;  %v8316_v34 = vld [vmem:[%s11424_s1 + $0xfec] ss:$16 sps:$4 sm:$0xff]  }
 0x255   :  { %5827 = vmatprep.subr.bf16.mxu1 %v8253_v26  ;;  %v8319_v36 = vld [vmem:[%s11424_s1 + $0x10ec] ss:$16 sps:$4 sm:$0xff]   ;;  %v8314_v26 = vld [vmem:[%s11424_s1 + $0xfe8] ss:$16 sps:$4 sm:$0xff]  }
 0x257   :  { %5803 = vmatpush2.bf16.msra.mxu0 %v8248_v51  ;;  %v8317_v51 = vld [vmem:[%s11424_s1 + $0x10e8] ss:$16 sps:$4 sm:$0xff]  }
 0x258   :  { %5828 = vmatpush1.bf16.msra.mxu1 %v8251_v38  ;;  %5804 = vmatprep.subr.bf16.mxu0 %v8256_v40  ;;  %v8322_v38 = vld [vmem:[%s11424_s1 + $0xfcc] ss:$16 sps:$4 sm:$0xff]  }
 0x259   :  { %5829 = vmatprep.subr.bf16.mxu1 %v8259_v44  ;;  %v8325_v40 = vld [vmem:[%s11424_s1 + $0x10cc] ss:$16 sps:$4 sm:$0xff]  }
 0x25b   :  { %5805 = vmatpush2.bf16.msra.mxu0 %v8254_v47  ;;  %v8320_v47 = vld [vmem:[%s11424_s1 + $0xfc8] ss:$16 sps:$4 sm:$0xff]  }
 0x25c   :  { %5830 = vmatpush1.bf16.msra.mxu1 %v8257_v48  ;;  %5806 = vmatprep.subr.bf16.mxu0 %v8262_v18  ;;  %v8323_v48 = vld [vmem:[%s11424_s1 + $0x10c8] ss:$16 sps:$4 sm:$0xff]  }
 0x25d   :  { %5831 = vmatprep.subr.bf16.mxu1 %v8265_v45  ;;  %v8328_v45 = vld [vmem:[%s11424_s1 + $0xfac] ss:$16 sps:$4 sm:$0xff]  }
 0x25f   :  { %5807 = vmatpush2.bf16.msra.mxu0 %v8260_v41 }
 0x260   :  { %5832 = vmatpush1.bf16.msra.mxu1 %v8263_v53  ;;  %5858 = vmatprep.subr.bf16.mxu0 %v8271_v46  ;;  %v8326_v53 = vld [vmem:[%s11424_s1 + $0xfa8] ss:$16 sps:$4 sm:$0xff]  }
 0x261   :  { %5833 = vmatprep.subr.bf16.mxu1 %v8268_v13  ;;  %v8329_v13 = vld [vmem:[%s11424_s1 + $0x10a8] ss:$16 sps:$4 sm:$0xff]  }
 0x262   :  { %v5564_v58 = vpop.f32.mrf.mxu0  ;;  %5809 = vmatmul.mubr.bf16.vlgmr.msra.gmra.mxu0 %v9311_v35  ;;  %v8280_v35 = vld [vmem:[%s11424_s1 + $0xdac] ss:$16 sps:$4 sm:$0xff]  }
 0x263   :  { %v10708_v61 = vadd.f32 %v5564_v58, %v10616_v9  ;;  %5859 = vmatpush1.bf16.msra.mxu0 %v8269_v56  ;;  %5890 = vmatprep.mubr.bf16.mxu0 %v9327_v59  ;;  %v8289_v59 = vld [vmem:[%s11424_s1 + $0xe8c] ss:$16 sps:$4 sm:$0xff]   ;;  %v8332_v56 = vld [vmem:[%s11424_s1 + $0xf88] ss:$16 sps:$4 sm:$0xff]  }
 0x264   :  { %5834 = vmatpush2.bf16.msra.mxu1 %v8266_v23  ;;  %v5566_v17 = vpop.f32.mrf.mxu0  ;;  %5860 = vmatprep.subr.bf16.mxu0 %v8277_v0  ;;  %v8292_v9 = vld [vmem:[%s11424_s1 + $0xd6c] ss:$16 sps:$4 sm:$0xff]  }
 0x265   :  { %5835 = vmatprep.subr.bf16.mxu1 %v8274_v55  ;;  %v10723_v63 = vadd.f32 %v5566_v17, %v10620_v19  ;;  %v8298_v19 = vld [vmem:[%s11424_s1 + $0xd4c] ss:$16 sps:$4 sm:$0xff]   ;;  %v8335_v55 = vld [vmem:[%s11424_s1 + $0x1088] ss:$16 sps:$4 sm:$0xff]  }
 0x266   :  { %v5568_v2 = vpop.f32.mrf.mxu0  ;;  %v8334_v23 = vld [vmem:[%s11424_s1 + $0xf8c] ss:$16 sps:$4 sm:$0xff]  }
 0x267   :  { %5861 = vmatpush1.bf16.msra.mxu0 %v8275_v62  ;;  %v8340_v0 = vld [vmem:[%s11424_s1 + $0xf6c] ss:$16 sps:$4 sm:$0xff]   ;;  %v8341_v62 = vld [vmem:[%s11424_s1 + $0x1068] ss:$16 sps:$4 sm:$0xff]  }
 0x268   :  { %5836 = vmatpush2.bf16.msra.mxu1 %v8272_v57  ;;  %v5569_v7 = vpop.f32.mrf.mxu0  ;;  %5862 = vmatprep.subr.bf16.mxu0 %v8283_v60  ;;  %v8343_v58 = vld [vmem:[%s11424_s1 + $0x106c] ss:$16 sps:$4 sm:$0xff]   ;;  %v8338_v57 = vld [vmem:[%s11424_s1 + $0xf68] ss:$16 sps:$4 sm:$0xff]  }
 0x269   :  { %5837 = vmatprep.subr.bf16.mxu1 %v8280_v35  ;;  %v8346_v17 = vld [vmem:[%s11424_s1 + $0xf4c] ss:$16 sps:$4 sm:$0xff]   ;;  %v8344_v60 = vld [vmem:[%s11424_s1 + $0xf48] ss:$16 sps:$4 sm:$0xff]  }
 0x26a   :  { %v8349_v35 = vld [vmem:[%s11424_s1 + $0x104c] ss:$16 sps:$4 sm:$0xff]   ;;  %v8347_v2 = vld [vmem:[%s11424_s1 + $0x1048] ss:$16 sps:$4 sm:$0xff]  }
 0x26b   :  { %5863 = vmatpush1.bf16.msra.mxu0 %v8281_v1  ;;  %v8355_v1 = vld [vmem:[%s11424_s1 + $0x102c] ss:$16 sps:$4 sm:$0xff]   ;;  %v8350_v7 = vld [vmem:[%s11424_s1 + $0xf28] ss:$16 sps:$4 sm:$0xff]  }
 0x26c   :  { %5838 = vmatpush2.bf16.msra.mxu1 %v8278_v3  ;;  %5864 = vmatprep.subr.bf16.mxu0 %v8289_v59  ;;  %v8352_v3 = vld [vmem:[%s11424_s1 + $0xf2c] ss:$16 sps:$4 sm:$0xff]  }
 0x26d   :  { %5839 = vmatprep.subr.bf16.mxu1 %v8286_v8  ;;  %v8353_v8 = vld [vmem:[%s11424_s1 + $0x1028] ss:$16 sps:$4 sm:$0xff]   ;;  %v8358_v59 = vld [vmem:[%s11424_s1 + $0xf0c] ss:$16 sps:$4 sm:$0xff]  }
 0x26f   :  { %5865 = vmatpush1.bf16.msra.mxu0 %v8287_v37  ;;  %v838_v37 = vsub.s32 2, %v8759_v42 }
 0x270   :  { %5840 = vmatpush2.bf16.msra.mxu1 %v8284_v50  ;;  %5866 = vmatprep.subr.bf16.mxu0 %v8295_v10  ;;  %v8361_v50 = vld [vmem:[%s11424_s1 + $0x100c] ss:$16 sps:$4 sm:$0xff]   ;;  %v8356_v10 = vld [vmem:[%s11424_s1 + $0xf08] ss:$16 sps:$4 sm:$0xff]  }
 0x271   :  { %5841 = vmatprep.subr.bf16.mxu1 %v8292_v9  ;;  %v842_v9 = vsub.s32 3, %v8759_v42  ;;  %v8367_v42 = vld [vmem:[%s11424_s1 + $0x12ec] ss:$16 sps:$4 sm:$0xff]  }
 0x273   :  { %5867 = vmatpush1.bf16.msra.mxu0 %v8293_v16  ;;  %v8364_v16 = vld [vmem:[%s11424_s1 + $0x11ec] ss:$16 sps:$4 sm:$0xff]  }
 0x274   :  { %5842 = vmatpush2.bf16.msra.mxu1 %v8290_v11  ;;  %5868 = vmatprep.subr.bf16.mxu0 %v8301_v4  ;;  %v8359_v11 = vld [vmem:[%s11424_s1 + $0x1008] ss:$16 sps:$4 sm:$0xff]  }
 0x275   :  { %5843 = vmatprep.subr.bf16.mxu1 %v8298_v19  ;;  %v8586_v19 = vld [vmem:[%s11425_s2] sm:$0xf] }
 0x276   :  { %v839_v4 = vrot.slane %v8586_v19, %v838_v37 }
 0x277   :  { %5869 = vmatpush1.bf16.msra.mxu0 %v8299_v20  ;;  %v8362_v20 = vld [vmem:[%s11424_s1 + $0x11e8] ss:$16 sps:$4 sm:$0xff]  }
 0x278   :  { %5844 = vmatpush2.bf16.msra.mxu1 %v8296_v5  ;;  %5870 = vmatprep.subr.bf16.mxu0 %v8307_v54  ;;  %v843_v5 = vrot.slane %v8586_v19, %v842_v9  ;;  %v8370_v54 = vld [vmem:[%s11424_s1 + $0x11cc] ss:$16 sps:$4 sm:$0xff]   ;;  %v8416_v9 = vld [vmem:[%s11424_s1 + $0x13c8] ss:$16 sps:$4 sm:$0xff]  }
 0x279   :  { %5845 = vmatprep.subr.bf16.mxu1 %v8304_v21  ;;  %v8365_v21 = vld [vmem:[%s11424_s1 + $0x12e8] ss:$16 sps:$4 sm:$0xff]  }
 0x27b   :  { %5871 = vmatpush1.bf16.msra.mxu0 %v8305_v6 }
 0x27c   :  { %5846 = vmatpush2.bf16.msra.mxu1 %v8302_v49  ;;  %5872 = vmatprep.subr.bf16.mxu0 %v8313_v29  ;;  %v8373_v49 = vld [vmem:[%s11424_s1 + $0x12cc] ss:$16 sps:$4 sm:$0xff]  }
 0x27d   :  { %5847 = vmatprep.subr.bf16.mxu1 %v8310_v28 }
 0x27f   :  { %5873 = vmatpush1.bf16.msra.mxu0 %v8311_v43  ;;  %v8368_v43 = vld [vmem:[%s11424_s1 + $0x11c8] ss:$16 sps:$4 sm:$0xff]  }
 0x280   :  { %5848 = vmatpush2.bf16.msra.mxu1 %v8308_v30  ;;  %5874 = vmatprep.subr.bf16.mxu0 %v8316_v34  ;;  %v8371_v34 = vld [vmem:[%s11424_s1 + $0x12c8] ss:$16 sps:$4 sm:$0xff]  }
 0x281   :  { %5899 = vmatprep.subr.bf16.mxu1 %v8319_v36 }
 0x283   :  { %v10810_v44 = vpop.f32.mrf.mxu1  ;;  %5850 = vmatmul.mubr.bf16.vlgmr.msra.gmra.mxu1 %v9523_v15  ;;  %5875 = vmatpush2.bf16.msra.mxu0 %v8314_v26  ;;  %v8331_v15 = vld [vmem:[%s11424_s1 + $0x10ac] ss:$16 sps:$4 sm:$0xff]  }
 0x284   :  { %5900 = vmatpush1.bf16.msra.mxu1 %v8317_v51  ;;  %5876 = vmatprep.subr.bf16.mxu0 %v8322_v38  ;;  %v5606_v6 = vadd.f32 %v10810_v44, %v839_v4  ;;  %v8379_v26 = vld [vmem:[%s11424_s1 + $0x12ac] ss:$16 sps:$4 sm:$0xff]   ;;  %v8377_v44 = vld [vmem:[%s11424_s1 + $0x12a8] ss:$16 sps:$4 sm:$0xff]  }
 0x285   :  { %v10819_v18 = vpop.f32.mrf.mxu1  ;;  %5901 = vmatprep.subr.bf16.mxu1 %v8325_v40  ;;  %5931 = vmatprep.mubr.bf16.mxu1 %v9534_v22  ;;  %v8337_v22 = vld [vmem:[%s11424_s1 + $0x108c] ss:$16 sps:$4 sm:$0xff]   ;;  %v8374_v40 = vld [vmem:[%s11424_s1 + $0x11a8] ss:$16 sps:$4 sm:$0xff]  }
 0x286   :  { %v5608_v29 = vadd.f32 %v10819_v18, %v843_v5  ;;  %v8380_v18 = vld [vmem:[%s11424_s1 + $0x1188] ss:$16 sps:$4 sm:$0xff]  }
 0x287   :  { %v5609_v41 = vpop.f32.mrf.mxu1  ;;  %5877 = vmatpush2.bf16.msra.mxu0 %v8320_v47  ;;  %v8422_v4 = vld [vmem:[%s11424_s1 + $0x13a8] ss:$16 sps:$4 sm:$0xff]  }
 0x288   :  { %5902 = vmatpush1.bf16.msra.mxu1 %v8323_v48  ;;  %5878 = vmatprep.subr.bf16.mxu0 %v8328_v45  ;;  %v8382_v48 = vld [vmem:[%s11424_s1 + $0x118c] ss:$16 sps:$4 sm:$0xff]   ;;  %v8383_v45 = vld [vmem:[%s11424_s1 + $0x1288] ss:$16 sps:$4 sm:$0xff]  }
 0x289   :  { %v5610_v46 = vpop.f32.mrf.mxu1  ;;  %5903 = vmatprep.subr.bf16.mxu1 %v8331_v15  ;;  %v8388_v15 = vld [vmem:[%s11424_s1 + $0x116c] ss:$16 sps:$4 sm:$0xff]   ;;  %v8425_v5 = vld [vmem:[%s11424_s1 + $0x14a8] ss:$16 sps:$4 sm:$0xff]  }
 0x28a   :  { %v8391_v41 = vld [vmem:[%s11424_s1 + $0x126c] ss:$16 sps:$4 sm:$0xff]  }
 0x28b   :  { %5879 = vmatpush2.bf16.msra.mxu0 %v8326_v53  ;;  %v8386_v53 = vld [vmem:[%s11424_s1 + $0x1168] ss:$16 sps:$4 sm:$0xff]   ;;  %v8394_v46 = vld [vmem:[%s11424_s1 + $0x114c] ss:$16 sps:$4 sm:$0xff]  }
 0x28c   :  { %5904 = vmatpush1.bf16.msra.mxu1 %v8329_v13  ;;  %5880 = vmatprep.subr.bf16.mxu0 %v8334_v23  ;;  %v8389_v13 = vld [vmem:[%s11424_s1 + $0x1268] ss:$16 sps:$4 sm:$0xff]   ;;  %v8397_v23 = vld [vmem:[%s11424_s1 + $0x124c] ss:$16 sps:$4 sm:$0xff]  }
 0x28d   :  { %5905 = vmatprep.subr.bf16.mxu1 %v8337_v22  ;;  %v8392_v22 = vld [vmem:[%s11424_s1 + $0x1148] ss:$16 sps:$4 sm:$0xff]  }
 0x28f   :  { %5881 = vmatpush2.bf16.msra.mxu0 %v8332_v56  ;;  %v8395_v56 = vld [vmem:[%s11424_s1 + $0x1248] ss:$16 sps:$4 sm:$0xff]  }
 0x290   :  { %5906 = vmatpush1.bf16.msra.mxu1 %v8335_v55  ;;  %5882 = vmatprep.subr.bf16.mxu0 %v8340_v0  ;;  %v8400_v55 = vld [vmem:[%s11424_s1 + $0x112c] ss:$16 sps:$4 sm:$0xff]  }
 0x291   :  { %5907 = vmatprep.subr.bf16.mxu1 %v8343_v58  ;;  %v8403_v0 = vld [vmem:[%s11424_s1 + $0x122c] ss:$16 sps:$4 sm:$0xff]   ;;  %v8398_v58 = vld [vmem:[%s11424_s1 + $0x1128] ss:$16 sps:$4 sm:$0xff]  }
 0x293   :  { %5883 = vmatpush2.bf16.msra.mxu0 %v8338_v57  ;;  %v8401_v57 = vld [vmem:[%s11424_s1 + $0x1228] ss:$16 sps:$4 sm:$0xff]  }
 0x294   :  { %5908 = vmatpush1.bf16.msra.mxu1 %v8341_v62  ;;  %5884 = vmatprep.subr.bf16.mxu0 %v8346_v17  ;;  %v8406_v62 = vld [vmem:[%s11424_s1 + $0x110c] ss:$16 sps:$4 sm:$0xff]  }
 0x295   :  { %5909 = vmatprep.subr.bf16.mxu1 %v8349_v35  ;;  %v8409_v17 = vld [vmem:[%s11424_s1 + $0x120c] ss:$16 sps:$4 sm:$0xff]   ;;  %v8404_v35 = vld [vmem:[%s11424_s1 + $0x1108] ss:$16 sps:$4 sm:$0xff]  }
 0x297   :  { %5885 = vmatpush2.bf16.msra.mxu0 %v8344_v60  ;;  %v8407_v60 = vld [vmem:[%s11424_s1 + $0x1208] ss:$16 sps:$4 sm:$0xff]  }
 0x298   :  { %5910 = vmatpush1.bf16.msra.mxu1 %v8347_v2  ;;  %5886 = vmatprep.subr.bf16.mxu0 %v8352_v3  ;;  %v8412_v2 = vld [vmem:[%s11424_s1 + $0x13ec] ss:$16 sps:$4 sm:$0xff]  }
 0x299   :  { %5911 = vmatprep.subr.bf16.mxu1 %v8355_v1  ;;  %v8415_v3 = vld [vmem:[%s11424_s1 + $0x14ec] ss:$16 sps:$4 sm:$0xff]   ;;  %v8410_v1 = vld [vmem:[%s11424_s1 + $0x13e8] ss:$16 sps:$4 sm:$0xff]  }
 0x29b   :  { %5887 = vmatpush2.bf16.msra.mxu0 %v8350_v7  ;;  %v8413_v7 = vld [vmem:[%s11424_s1 + $0x14e8] ss:$16 sps:$4 sm:$0xff]  }
 0x29c   :  { %5912 = vmatpush1.bf16.msra.mxu1 %v8353_v8  ;;  %5888 = vmatprep.subr.bf16.mxu0 %v8358_v59  ;;  %v8418_v8 = vld [vmem:[%s11424_s1 + $0x13cc] ss:$16 sps:$4 sm:$0xff]  }
 0x29d   :  { %5913 = vmatprep.subr.bf16.mxu1 %v8361_v50  ;;  %v8421_v59 = vld [vmem:[%s11424_s1 + $0x14cc] ss:$16 sps:$4 sm:$0xff]  }
 0x29f   :  { %5889 = vmatpush2.bf16.msra.mxu0 %v8356_v10  ;;  %v8419_v10 = vld [vmem:[%s11424_s1 + $0x14c8] ss:$16 sps:$4 sm:$0xff]  }
 0x2a0   :  { %5914 = vmatpush1.bf16.msra.mxu1 %v8359_v11  ;;  %5940 = vmatprep.subr.bf16.mxu0 %v8367_v42 }
 0x2a1   :  { %5915 = vmatprep.subr.bf16.mxu1 %v8364_v16  ;;  %v8427_v16 = vld [vmem:[%s11424_s1 + $0x14ac] ss:$16 sps:$4 sm:$0xff]  }
 0x2a2   :  { %v5646_v28 = vpop.f32.mrf.mxu0  ;;  %5891 = vmatmul.mubr.bf16.vlgmr.msra.gmra.mxu0 %v9538_v39  ;;  %v8376_v39 = vld [vmem:[%s11424_s1 + $0x11ac] ss:$16 sps:$4 sm:$0xff]  }
 0x2a3   :  { %v10920_v30 = vadd.f32 %v5646_v28, %v5606_v6  ;;  %5941 = vmatpush1.bf16.msra.mxu0 %v8365_v21  ;;  %5972 = vmatprep.mubr.bf16.mxu0 %v9554_v31  ;;  %v8385_v31 = vld [vmem:[%s11424_s1 + $0x128c] ss:$16 sps:$4 sm:$0xff]  }
 0x2a4   :  { %5916 = vmatpush2.bf16.msra.mxu1 %v8362_v20  ;;  %v5648_v36 = vpop.f32.mrf.mxu0  ;;  %5942 = vmatprep.subr.bf16.mxu0 %v8373_v49  ;;  %v8430_v21 = vld [vmem:[%s11424_s1 + $0x138c] ss:$16 sps:$4 sm:$0xff]   ;;  %v8431_v49 = vld [vmem:[%s11424_s1 + $0x1488] ss:$16 sps:$4 sm:$0xff]  }
 0x2a5   :  { %5917 = vmatprep.subr.bf16.mxu1 %v8370_v54  ;;  %v10934_v51 = vadd.f32 %v5648_v36, %v5608_v29  ;;  %v8428_v54 = vld [vmem:[%s11424_s1 + $0x1388] ss:$16 sps:$4 sm:$0xff]   ;;  %v8436_v6 = vld [vmem:[%s11424_s1 + $0x136c] ss:$16 sps:$4 sm:$0xff]  }
 0x2a6   :  { %v5650_v38 = vpop.f32.mrf.mxu0  ;;  %v8439_v28 = vld [vmem:[%s11424_s1 + $0x146c] ss:$16 sps:$4 sm:$0xff]   ;;  %v8434_v29 = vld [vmem:[%s11424_s1 + $0x1368] ss:$16 sps:$4 sm:$0xff]  }
 0x2a7   :  { %5943 = vmatpush1.bf16.msra.mxu0 %v8371_v34  ;;  %v8445_v34 = vld [vmem:[%s11424_s1 + $0x144c] ss:$16 sps:$4 sm:$0xff]   ;;  %v8440_v36 = vld [vmem:[%s11424_s1 + $0x1348] ss:$16 sps:$4 sm:$0xff]  }
 0x2a8   :  { %5918 = vmatpush2.bf16.msra.mxu1 %v8368_v43  ;;  %v5651_v47 = vpop.f32.mrf.mxu0  ;;  %5944 = vmatprep.subr.bf16.mxu0 %v8379_v26  ;;  %v8442_v43 = vld [vmem:[%s11424_s1 + $0x134c] ss:$16 sps:$4 sm:$0xff]   ;;  %v8446_v38 = vld [vmem:[%s11424_s1 + $0x1328] ss:$16 sps:$4 sm:$0xff]  }
 0x2a9   :  { %5919 = vmatprep.subr.bf16.mxu1 %v8376_v39  ;;  %v8443_v39 = vld [vmem:[%s11424_s1 + $0x1448] ss:$16 sps:$4 sm:$0xff]   ;;  %v8448_v26 = vld [vmem:[%s11424_s1 + $0x132c] ss:$16 sps:$4 sm:$0xff]  }
 0x2aa   :  { %v8457_v47 = vld [vmem:[%s11424_s1 + $0x140c] ss:$16 sps:$4 sm:$0xff]  }
 0x2ab   :  { %5945 = vmatpush1.bf16.msra.mxu0 %v8377_v44  ;;  %v8454_v44 = vld [vmem:[%s11424_s1 + $0x130c] ss:$16 sps:$4 sm:$0xff]  }
 0x2ac   :  { %5920 = vmatpush2.bf16.msra.mxu1 %v8374_v40  ;;  %5946 = vmatprep.subr.bf16.mxu0 %v8385_v31  ;;  %v8449_v40 = vld [vmem:[%s11424_s1 + $0x1428] ss:$16 sps:$4 sm:$0xff]  }
 0x2ad   :  { %5921 = vmatprep.subr.bf16.mxu1 %v8382_v48  ;;  %v8452_v48 = vld [vmem:[%s11424_s1 + $0x1308] ss:$16 sps:$4 sm:$0xff]  }
 0x2ae   :  { %v8455_v31 = vld [vmem:[%s11424_s1 + $0x1408] ss:$16 sps:$4 sm:$0xff]  }
 0x2af   :  { %5947 = vmatpush1.bf16.msra.mxu0 %v8383_v45  ;;  %v8463_v45 = vld [vmem:[%s11424_s1 + $0x16ec] ss:$16 sps:$4 sm:$0xff]  }
 0x2b0   :  { %5922 = vmatpush2.bf16.msra.mxu1 %v8380_v18  ;;  %5948 = vmatprep.subr.bf16.mxu0 %v8391_v41  ;;  %v8460_v18 = vld [vmem:[%s11424_s1 + $0x15ec] ss:$16 sps:$4 sm:$0xff]   ;;  %v8461_v41 = vld [vmem:[%s11424_s1 + $0x16e8] ss:$16 sps:$4 sm:$0xff]  }
 0x2b1   :  { %5923 = vmatprep.subr.bf16.mxu1 %v8388_v15  ;;  %v8458_v15 = vld [vmem:[%s11424_s1 + $0x15e8] ss:$16 sps:$4 sm:$0xff]  }
 0x2b3   :  { %5949 = vmatpush1.bf16.msra.mxu0 %v8389_v13  ;;  %v8469_v13 = vld [vmem:[%s11424_s1 + $0x16cc] ss:$16 sps:$4 sm:$0xff]  }
 0x2b4   :  { %5924 = vmatpush2.bf16.msra.mxu1 %v8386_v53  ;;  %5950 = vmatprep.subr.bf16.mxu0 %v8397_v23  ;;  %v8466_v53 = vld [vmem:[%s11424_s1 + $0x15cc] ss:$16 sps:$4 sm:$0xff]  }
 0x2b5   :  { %5925 = vmatprep.subr.bf16.mxu1 %v8394_v46 }
 0x2b7   :  { %5951 = vmatpush1.bf16.msra.mxu0 %v8395_v56  ;;  %v8467_v56 = vld [vmem:[%s11424_s1 + $0x16c8] ss:$16 sps:$4 sm:$0xff]  }
 0x2b8   :  { %5926 = vmatpush2.bf16.msra.mxu1 %v8392_v22  ;;  %5952 = vmatprep.subr.bf16.mxu0 %v8403_v0  ;;  %v8464_v22 = vld [vmem:[%s11424_s1 + $0x15c8] ss:$16 sps:$4 sm:$0xff]   ;;  %v8475_v0 = vld [vmem:[%s11424_s1 + $0x16ac] ss:$16 sps:$4 sm:$0xff]  }
 0x2b9   :  { %5927 = vmatprep.subr.bf16.mxu1 %v8400_v55 }
 0x2bb   :  { %5953 = vmatpush1.bf16.msra.mxu0 %v8401_v57 }
 0x2bc   :  { %5928 = vmatpush2.bf16.msra.mxu1 %v8398_v58  ;;  %5954 = vmatprep.subr.bf16.mxu0 %v8409_v17  ;;  %v8473_v17 = vld [vmem:[%s11424_s1 + $0x16a8] ss:$16 sps:$4 sm:$0xff]  }
 0x2bd   :  { %5929 = vmatprep.subr.bf16.mxu1 %v8406_v62  ;;  %v8470_v62 = vld [vmem:[%s11424_s1 + $0x15a8] ss:$16 sps:$4 sm:$0xff]  }
 0x2bf   :  { %5955 = vmatpush1.bf16.msra.mxu0 %v8407_v60  ;;  %v8478_v60 = vld [vmem:[%s11424_s1 + $0x158c] ss:$16 sps:$4 sm:$0xff]  }
 0x2c0   :  { %5930 = vmatpush2.bf16.msra.mxu1 %v8404_v35  ;;  %5956 = vmatprep.subr.bf16.mxu0 %v8412_v2  ;;  %v8476_v2 = vld [vmem:[%s11424_s1 + $0x1588] ss:$16 sps:$4 sm:$0xff]  }
 0x2c1   :  { %5981 = vmatprep.subr.bf16.mxu1 %v8415_v3  ;;  %v8479_v3 = vld [vmem:[%s11424_s1 + $0x1688] ss:$16 sps:$4 sm:$0xff]  }
 0x2c3   :  { %v5687_v50 = vpop.f32.mrf.mxu1  ;;  %5932 = vmatmul.mubr.bf16.vlgmr.msra.gmra.mxu1 %v9741_v12  ;;  %5957 = vmatpush2.bf16.msra.mxu0 %v8410_v1  ;;  %v8424_v12 = vld [vmem:[%s11424_s1 + $0x13ac] ss:$16 sps:$4 sm:$0xff]  }
 0x2c4   :  { %v11023_v37 = vadd.f32 %v5687_v50, %v10920_v30  ;;  %5982 = vmatpush1.bf16.msra.mxu1 %v8413_v7  ;;  %5958 = vmatprep.subr.bf16.mxu0 %v8418_v8  ;;  %v8437_v30 = vld [vmem:[%s11424_s1 + $0x1468] ss:$16 sps:$4 sm:$0xff]   ;;  %v8484_v1 = vld [vmem:[%s11424_s1 + $0x156c] ss:$16 sps:$4 sm:$0xff]  }
 0x2c5   :  { %v5689_v11 = vpop.f32.mrf.mxu1  ;;  %5983 = vmatprep.subr.bf16.mxu1 %v8421_v59  ;;  %6013 = vmatprep.mubr.bf16.mxu1 %v9762_v24  ;;  %v8433_v24 = vld [vmem:[%s11424_s1 + $0x148c] ss:$16 sps:$4 sm:$0xff]   ;;  %v8482_v8 = vld [vmem:[%s11424_s1 + $0x1568] ss:$16 sps:$4 sm:$0xff]  }
 0x2c6   :  { %v11038_v42 = vadd.f32 %v5689_v11, %v10934_v51  ;;  %v8451_v51 = vld [vmem:[%s11424_s1 + $0x142c] ss:$16 sps:$4 sm:$0xff]   ;;  %v8485_v59 = vld [vmem:[%s11424_s1 + $0x1668] ss:$16 sps:$4 sm:$0xff]  }
 0x2c7   :  { %v5691_v19 = vpop.f32.mrf.mxu1  ;;  %5959 = vmatpush2.bf16.msra.mxu0 %v8416_v9  ;;  %v8487_v7 = vld [vmem:[%s11424_s1 + $0x166c] ss:$16 sps:$4 sm:$0xff]   ;;  %v8488_v9 = vld [vmem:[%s11424_s1 + $0x1548] ss:$16 sps:$4 sm:$0xff]  }
 0x2c8   :  { %5984 = vmatpush1.bf16.msra.mxu1 %v8419_v10  ;;  %5960 = vmatprep.subr.bf16.mxu0 %v8424_v12  ;;  %v8490_v50 = vld [vmem:[%s11424_s1 + $0x154c] ss:$16 sps:$4 sm:$0xff]   ;;  %v8491_v10 = vld [vmem:[%s11424_s1 + $0x1648] ss:$16 sps:$4 sm:$0xff]  }
 0x2c9   :  { %v5692_v20 = vpop.f32.mrf.mxu1  ;;  %5985 = vmatprep.subr.bf16.mxu1 %v8427_v16  ;;  %v8496_v11 = vld [vmem:[%s11424_s1 + $0x152c] ss:$16 sps:$4 sm:$0xff]   ;;  %v8494_v16 = vld [vmem:[%s11424_s1 + $0x1528] ss:$16 sps:$4 sm:$0xff]  }
 0x2ca   :  { %v8499_v12 = vld [vmem:[%s11424_s1 + $0x162c] ss:$16 sps:$4 sm:$0xff]   ;;  %v8503_v20 = vld [vmem:[%s11424_s1 + $0x1608] ss:$16 sps:$4 sm:$0xff]  }
 0x2cb   :  { %5961 = vmatpush2.bf16.msra.mxu0 %v8422_v4  ;;  %v8502_v19 = vld [vmem:[%s11424_s1 + $0x150c] ss:$16 sps:$4 sm:$0xff]  }
 0x2cc   :  { %5986 = vmatpush1.bf16.msra.mxu1 %v8425_v5  ;;  %5962 = vmatprep.subr.bf16.mxu0 %v8430_v21  ;;  %v8505_v4 = vld [vmem:[%s11424_s1 + $0x160c] ss:$16 sps:$4 sm:$0xff]   ;;  %v8500_v5 = vld [vmem:[%s11424_s1 + $0x1508] ss:$16 sps:$4 sm:$0xff]  }
 0x2cd   :  { %5987 = vmatprep.subr.bf16.mxu1 %v8433_v24  ;;  %v8508_v21 = vld [vmem:[%s11424_s1 + $0x17ec] ss:$16 sps:$4 sm:$0xff]  }
 0x2ce   :  { %v8511_v24 = vld [vmem:[%s11424_s1 + $0x18ec] ss:$16 sps:$4 sm:$0xff]  }
 0x2cf   :  { %5963 = vmatpush2.bf16.msra.mxu0 %v8428_v54  ;;  %v8506_v54 = vld [vmem:[%s11424_s1 + $0x17e8] ss:$16 sps:$4 sm:$0xff]  }
 0x2d0   :  { %5988 = vmatpush1.bf16.msra.mxu1 %v8431_v49  ;;  %5964 = vmatprep.subr.bf16.mxu0 %v8436_v6  ;;  %v8509_v49 = vld [vmem:[%s11424_s1 + $0x18e8] ss:$16 sps:$4 sm:$0xff]   ;;  %v8514_v6 = vld [vmem:[%s11424_s1 + $0x17cc] ss:$16 sps:$4 sm:$0xff]  }
 0x2d1   :  { %5989 = vmatprep.subr.bf16.mxu1 %v8439_v28  ;;  %v8517_v28 = vld [vmem:[%s11424_s1 + $0x18cc] ss:$16 sps:$4 sm:$0xff]  }
 0x2d3   :  { %5965 = vmatpush2.bf16.msra.mxu0 %v8434_v29 }
 0x2d4   :  { %5990 = vmatpush1.bf16.msra.mxu1 %v8437_v30  ;;  %5966 = vmatprep.subr.bf16.mxu0 %v8442_v43  ;;  %v8512_v43 = vld [vmem:[%s11424_s1 + $0x17c8] ss:$16 sps:$4 sm:$0xff]  }
 0x2d5   :  { %5991 = vmatprep.subr.bf16.mxu1 %v8445_v34  ;;  %v8515_v34 = vld [vmem:[%s11424_s1 + $0x18c8] ss:$16 sps:$4 sm:$0xff]  }
 0x2d7   :  { %5967 = vmatpush2.bf16.msra.mxu0 %v8440_v36 }
 0x2d8   :  { %5992 = vmatpush1.bf16.msra.mxu1 %v8443_v39  ;;  %5968 = vmatprep.subr.bf16.mxu0 %v8448_v26  ;;  %v8523_v39 = vld [vmem:[%s11424_s1 + $0x18ac] ss:$16 sps:$4 sm:$0xff]  }
 0x2d9   :  { %5993 = vmatprep.subr.bf16.mxu1 %v8451_v51 }
 0x2db   :  { %5969 = vmatpush2.bf16.msra.mxu0 %v8446_v38  ;;  %v8518_v38 = vld [vmem:[%s11424_s1 + $0x17a8] ss:$16 sps:$4 sm:$0xff]  }
 0x2dc   :  { %5994 = vmatpush1.bf16.msra.mxu1 %v8449_v40  ;;  %5970 = vmatprep.subr.bf16.mxu0 %v8454_v44  ;;  %v8521_v40 = vld [vmem:[%s11424_s1 + $0x18a8] ss:$16 sps:$4 sm:$0xff]  }
 0x2dd   :  { %5995 = vmatprep.subr.bf16.mxu1 %v8457_v47  ;;  %v8526_v47 = vld [vmem:[%s11424_s1 + $0x178c] ss:$16 sps:$4 sm:$0xff]  }
 0x2df   :  { %5971 = vmatpush2.bf16.msra.mxu0 %v8452_v48  ;;  %v8524_v48 = vld [vmem:[%s11424_s1 + $0x1788] ss:$16 sps:$4 sm:$0xff]  }
 0x2e0   :  { %5996 = vmatpush1.bf16.msra.mxu1 %v8455_v31  ;;  %6022 = vmatprep.subr.bf16.mxu0 %v8463_v45  ;;  %v8527_v31 = vld [vmem:[%s11424_s1 + $0x1888] ss:$16 sps:$4 sm:$0xff]   ;;  %v8535_v45 = vld [vmem:[%s11424_s1 + $0x186c] ss:$16 sps:$4 sm:$0xff]  }
 0x2e1   :  { %5997 = vmatprep.subr.bf16.mxu1 %v8460_v18  ;;  %v8532_v18 = vld [vmem:[%s11424_s1 + $0x176c] ss:$16 sps:$4 sm:$0xff]  }
 0x2e2   :  { %v5728_v46 = vpop.f32.mrf.mxu0  ;;  %5973 = vmatmul.mubr.bf16.vlgmr.msra.gmra.mxu0 %v9766_v25  ;;  %v8472_v25 = vld [vmem:[%s11424_s1 + $0x15ac] ss:$16 sps:$4 sm:$0xff]  }
 0x2e3   :  { %v11127_v23 = vadd.f32 %v5728_v46, %v11023_v37  ;;  %6023 = vmatpush1.bf16.msra.mxu0 %v8461_v41  ;;  %6054 = vmatprep.mubr.bf16.mxu0 %v9782_v33  ;;  %v8481_v33 = vld [vmem:[%s11424_s1 + $0x168c] ss:$16 sps:$4 sm:$0xff]   ;;  %v8533_v41 = vld [vmem:[%s11424_s1 + $0x1868] ss:$16 sps:$4 sm:$0xff]  }
 0x2e4   :  { %5998 = vmatpush2.bf16.msra.mxu1 %v8458_v15  ;;  %v5730_v55 = vpop.f32.mrf.mxu0  ;;  %6024 = vmatprep.subr.bf16.mxu0 %v8469_v13  ;;  %v8493_v37 = vld [vmem:[%s11424_s1 + $0x164c] ss:$16 sps:$4 sm:$0xff]   ;;  %v8530_v15 = vld [vmem:[%s11424_s1 + $0x1768] ss:$16 sps:$4 sm:$0xff]  }
 0x2e5   :  { %5999 = vmatprep.subr.bf16.mxu1 %v8466_v53  ;;  %v11142_v58 = vadd.f32 %v5730_v55, %v11038_v42  ;;  %v8497_v42 = vld [vmem:[%s11424_s1 + $0x1628] ss:$16 sps:$4 sm:$0xff]   ;;  %v8538_v53 = vld [vmem:[%s11424_s1 + $0x174c] ss:$16 sps:$4 sm:$0xff]  }
 0x2e6   :  { %v5732_v57 = vpop.f32.mrf.mxu0  ;;  %v8541_v13 = vld [vmem:[%s11424_s1 + $0x184c] ss:$16 sps:$4 sm:$0xff]   ;;  %v8536_v46 = vld [vmem:[%s11424_s1 + $0x1748] ss:$16 sps:$4 sm:$0xff]  }
 0x2e7   :  { %6025 = vmatpush1.bf16.msra.mxu0 %v8467_v56  ;;  %v8547_v56 = vld [vmem:[%s11424_s1 + $0x182c] ss:$16 sps:$4 sm:$0xff]   ;;  %v8542_v55 = vld [vmem:[%s11424_s1 + $0x1728] ss:$16 sps:$4 sm:$0xff]  }
 0x2e8   :  { %6000 = vmatpush2.bf16.msra.mxu1 %v8464_v22  ;;  %v5733_v35 = vpop.f32.mrf.mxu0  ;;  %6026 = vmatprep.subr.bf16.mxu0 %v8475_v0  ;;  %v8544_v22 = vld [vmem:[%s11424_s1 + $0x172c] ss:$16 sps:$4 sm:$0xff]   ;;  %v8548_v57 = vld [vmem:[%s11424_s1 + $0x1708] ss:$16 sps:$4 sm:$0xff]  }
 0x2e9   :  { %6001 = vmatprep.subr.bf16.mxu1 %v8472_v25  ;;  %v8545_v25 = vld [vmem:[%s11424_s1 + $0x1828] ss:$16 sps:$4 sm:$0xff]   ;;  %v8550_v0 = vld [vmem:[%s11424_s1 + $0x170c] ss:$16 sps:$4 sm:$0xff]   ;;  %v6105_v35 = vmax.f32 %v10723_v63, 0.0  ;;  %v8557_v63 = vld [vmem:[%s11426_s3 + $0x30] sm:$0xff]  }
 0x2eb   :  { %6027 = vmatpush1.bf16.msra.mxu0 %v8473_v17  ;;  %v8554_v17 = vld [vmem:[%s11426_s3 + $0x78] sm:$0xff]  }
 0x2ec   :  { %6002 = vmatpush2.bf16.msra.mxu1 %v8470_v62  ;;  %6028 = vmatprep.subr.bf16.mxu0 %v8481_v33  ;;  %v8551_v62 = vld [vmem:[%s11424_s1 + $0x1808] ss:$16 sps:$4 sm:$0xff]   ;;  %v8556_v33 = vld [vmem:[%s11426_s3 + $0x70] sm:$0xff]  }
 0x2ed   :  { %6003 = vmatprep.subr.bf16.mxu1 %v8478_v60  ;;  %v8555_v60 = vld [vmem:[%s11426_s3 + $0x38] sm:$0xff]  }
 0x2ef   :  { %6029 = vmatpush1.bf16.msra.mxu0 %v8479_v3 }
 0x2f0   :  { %6004 = vmatpush2.bf16.msra.mxu1 %v8476_v2  ;;  %6030 = vmatprep.subr.bf16.mxu0 %v8487_v7  ;;  %v6109_v2 = vpack.c.bf16 %v6105_v35, %v6105_v35 }
 0x2f1   :  { %6005 = vmatprep.subr.bf16.mxu1 %v8484_v1 }
 0x2f3   :  { %6031 = vmatpush1.bf16.msra.mxu0 %v8485_v59 }
 0x2f4   :  { %6006 = vmatpush2.bf16.msra.mxu1 %v8482_v8  ;;  %6032 = vmatprep.subr.bf16.mxu0 %v8493_v37  ;;  %v8558_v8 = vld [vmem:[%s11426_s3 + $0x68] sm:$0xff]   ;;  %v8560_v37 = vld [vmem:[%s11426_s3 + $0x60] sm:$0xff]  }
 0x2f5   :  { %6007 = vmatprep.subr.bf16.mxu1 %v8490_v50 }
 0x2f7   :  { %6033 = vmatpush1.bf16.msra.mxu0 %v8491_v10  ;;  %v8562_v10 = vld [vmem:[%s11426_s3 + $0x58] sm:$0xff]  }
 0x2f8   :  { %6008 = vmatpush2.bf16.msra.mxu1 %v8488_v9  ;;  %6034 = vmatprep.subr.bf16.mxu0 %v8499_v12  ;;  %v8561_v9 = vld [vmem:[%s11426_s3 + $0x20] sm:$0xff]   ;;  %v8564_v12 = vld [vmem:[%s11426_s3 + $0x50] sm:$0xff]  }
 0x2f9   :  { %6009 = vmatprep.subr.bf16.mxu1 %v8496_v11  ;;  %v8563_v11 = vld [vmem:[%s11426_s3 + $0x18] sm:$0xff]  }
 0x2fb   :  { %6035 = vmatpush1.bf16.msra.mxu0 %v8497_v42  ;;  %v8566_v42 = vld [vmem:[%s11426_s3 + $0x48] sm:$0xff]  }
 0x2fc   :  { %6010 = vmatpush2.bf16.msra.mxu1 %v8494_v16  ;;  %6036 = vmatprep.subr.bf16.mxu0 %v8505_v4  ;;  %v8565_v16 = vld [vmem:[%s11426_s3 + $0x10] sm:$0xff]   ;;  %v8568_v4 = vld [vmem:[%s11426_s3 + $0x40] sm:$0xff]  }
 0x2fd   :  { %6011 = vmatprep.subr.bf16.mxu1 %v8502_v19  ;;  %v8567_v19 = vld [vmem:[%s11426_s3 + $0x8] sm:$0xff]  }
 0x2ff   :  { %6037 = vmatpush1.bf16.msra.mxu0 %v8503_v20  ;;  %v6104_v20 = vmax.f32 %v10708_v61, 0.0  ;;  %v8572_v61 = vld [vmem:[%s11426_s3 + $0xf0] sm:$0xff]  }
 0x300   :  { %6012 = vmatpush2.bf16.msra.mxu1 %v8500_v5  ;;  %6038 = vmatprep.subr.bf16.mxu0 %v8508_v21  ;;  %v8569_v5 = vld [vmem:[%s11426_s3] sm:$0xff]  }
 0x301   :  { %6063 = vmatprep.subr.bf16.mxu1 %v8511_v24  ;;  %v6108_v21 = vpack.c.bf16 %v6104_v20, %v6104_v20 }
 0x303   :  { %v5769_v29 = vpop.f32.mrf.mxu1  ;;  %6014 = vmatmul.mubr.bf16.vlgmr.msra.gmra.mxu1 %v9958_v14  ;;  %6039 = vmatpush2.bf16.msra.mxu0 %v8506_v54  ;;  %v8520_v14 = vld [vmem:[%s11424_s1 + $0x17ac] ss:$16 sps:$4 sm:$0xff]  }
 0x304   :  { %v11231_v30 = vadd.f32 %v5769_v29, %v11127_v23  ;;  %6064 = vmatpush1.bf16.msra.mxu1 %v8509_v49  ;;  %6040 = vmatprep.subr.bf16.mxu0 %v8514_v6  ;;  %v8539_v23 = vld [vmem:[%s11424_s1 + $0x1848] ss:$16 sps:$4 sm:$0xff]  }
 0x305   :  { %v5771_v36 = vpop.f32.mrf.mxu1  ;;  %6065 = vmatprep.subr.bf16.mxu1 %v8517_v28  ;;  %6095 = vmatprep.mubr.bf16.mxu1 %v8610_v52  ;;  %v8529_v52 = vld [vmem:[%s11424_s1 + $0x188c] ss:$16 sps:$4 sm:$0xff]  }
 0x306   :  { %v11246_v26 = vadd.f32 %v5771_v36, %v11142_v58  ;;  %v8553_v58 = vld [vmem:[%s11424_s1 + $0x180c] ss:$16 sps:$4 sm:$0xff]  }
 0x307   :  { %v5773_v51 = vpop.f32.mrf.mxu1  ;;  %6041 = vmatpush2.bf16.msra.mxu0 %v8512_v43  ;;  %v8571_v43 = vld [vmem:[%s11426_s3 + $0xb8] sm:$0xff]   ;;  %v8574_v36 = vld [vmem:[%s11426_s3 + $0xe8] sm:$0xff]  }
 0x308   :  { %6066 = vmatpush1.bf16.msra.mxu1 %v8515_v34  ;;  %6042 = vmatprep.subr.bf16.mxu0 %v8520_v14  ;;  %v8573_v34 = vld [vmem:[%s11426_s3 + $0xb0] sm:$0xff]   ;;  %v8575_v14 = vld [vmem:[%s11426_s3 + $0xa8] sm:$0xff]   ;;  %v8578_v51 = vld [vmem:[%s11426_s3 + $0xd8] sm:$0xff]  }
 0x309   :  { %v5774_v44 = vpop.f32.mrf.mxu1  ;;  %6067 = vmatprep.subr.bf16.mxu1 %v8523_v39  ;;  %v8576_v39 = vld [vmem:[%s11426_s3 + $0xe0] sm:$0xff]  }
 0x30a   :  { %v8581_v44 = vld [vmem:[%s11426_s3 + $0x90] sm:$0xff]  }
 0x30b   :  { %6043 = vmatpush2.bf16.msra.mxu0 %v8518_v38  ;;  %v8579_v38 = vld [vmem:[%s11426_s3 + $0x98] sm:$0xff]  }
 0x30c   :  { %6068 = vmatpush1.bf16.msra.mxu1 %v8521_v40  ;;  %6044 = vmatprep.subr.bf16.mxu0 %v8526_v47  ;;  %v8580_v40 = vld [vmem:[%s11426_s3 + $0xd0] sm:$0xff]  }
 0x30d   :  { %6069 = vmatprep.subr.bf16.mxu1 %v8529_v52 }
 0x30f   :  { %6045 = vmatpush2.bf16.msra.mxu0 %v8524_v48 }
 0x310   :  { %6070 = vmatpush1.bf16.msra.mxu1 %v8527_v31  ;;  %6046 = vmatprep.subr.bf16.mxu0 %v8532_v18  ;;  %v8582_v31 = vld [vmem:[%s11426_s3 + $0xc8] sm:$0xff]  }
 0x311   :  { %6071 = vmatprep.subr.bf16.mxu1 %v8535_v45  ;;  %v8583_v45 = vld [vmem:[%s11426_s3 + $0x88] sm:$0xff]  }
 0x313   :  { %6047 = vmatpush2.bf16.msra.mxu0 %v8530_v15 }
 0x314   :  { %6072 = vmatpush1.bf16.msra.mxu1 %v8533_v41  ;;  %6048 = vmatprep.subr.bf16.mxu0 %v8538_v53  ;;  %v8584_v53 = vld [vmem:[%s11426_s3 + $0xc0] sm:$0xff]  }
 0x315   :  { %6073 = vmatprep.subr.bf16.mxu1 %v8541_v13  ;;  %v8585_v13 = vld [vmem:[%s11426_s3 + $0x80] sm:$0xff]  }
 0x317   :  { %6049 = vmatpush2.bf16.msra.mxu0 %v8536_v46 }
 0x318   :  { %6074 = vmatpush1.bf16.msra.mxu1 %v8539_v23  ;;  %6050 = vmatprep.subr.bf16.mxu0 %v8544_v22 }
 0x319   :  { %6075 = vmatprep.subr.bf16.mxu1 %v8547_v56 }
 0x31b   :  { %6051 = vmatpush2.bf16.msra.mxu0 %v8542_v55 }
 0x31c   :  { %6076 = vmatpush1.bf16.msra.mxu1 %v8545_v25  ;;  %6052 = vmatprep.subr.bf16.mxu0 %v8550_v0 }
 0x31d   :  { %6077 = vmatprep.subr.bf16.mxu1 %v8553_v58 }
 0x31f   :  { %6053 = vmatpush2.bf16.msra.mxu0 %v8548_v57 }
 0x320   :  { %6078 = vmatpush1.bf16.msra.mxu1 %v8551_v62  ;;  %7304 = vmatprep.subr.bf16.mxu0 %v8554_v17 }
 0x322   :  { %v5810_v3 = vpop.f32.mrf.mxu0  ;;  %6055 = vmatmul.mubr.bf16.vlgmr.msra.gmra.mxu0 %v9980_v27  ;;  %v8559_v27 = vld [vmem:[%s11426_s3 + $0x28] sm:$0xff]  }
 0x323   :  { %6096 = vmatmul.mubr.bf16.vlgmr.msra.gmra.mxu1 %v10092_v32  ;;  %v5811_v1 = vadd.f32 %v5810_v3, %v11231_v30  ;;  %7305 = vmatpush3.bf16.msra.mxu0 %v8555_v60  ;;  %v8570_v30 = vld [vmem:[%s11426_s3 + $0xf8] sm:$0xff]  }
 0x324   :  { %6407 = vmatprep.mubr.bf16.mxu0 %v6109_v2  ;;  %v5812_v7 = vpop.f32.mrf.mxu0  ;;  %7306 = vmatprep.subr.bf16.mxu0 %v8556_v33 }
 0x325   :  { %v5813_v59 = vadd.f32 %v5812_v7, %v11246_v26  ;;  %7326 = vmatprep.subr.bf16.mxu1 %v8570_v30  ;;  %v8577_v26 = vld [vmem:[%s11426_s3 + $0xa0] sm:$0xff]  }
 0x326   :  { %v5814_v50 = vpop.f32.mrf.mxu0  ;;  %7327 = vmatpush3.bf16.msra.mxu1 %v8571_v43 }
 0x327   :  { %7307 = vmatpush3.bf16.msra.mxu0 %v8557_v63  ;;  %7328 = vmatprep.subr.bf16.mxu1 %v8572_v61 }
 0x328   :  { %v5815_v32 = vpop.f32.mrf.mxu0  ;;  %7308 = vmatprep.subr.bf16.mxu0 %v8558_v8 }
 0x32a   :  { %7329 = vmatpush3.bf16.msra.mxu1 %v8573_v34 }
 0x32b   :  { %7309 = vmatpush3.bf16.msra.mxu0 %v8559_v27  ;;  %7330 = vmatprep.subr.bf16.mxu1 %v8574_v36 }
 0x32c   :  { %7310 = vmatprep.subr.bf16.mxu0 %v8560_v37 }
 0x32e   :  { %7331 = vmatpush3.bf16.msra.mxu1 %v8575_v14 }
 0x32f   :  { %7311 = vmatpush3.bf16.msra.mxu0 %v8561_v9  ;;  %7332 = vmatprep.subr.bf16.mxu1 %v8576_v39 }
 0x330   :  { %7312 = vmatprep.subr.bf16.mxu0 %v8562_v10 }
 0x332   :  { %7333 = vmatpush3.bf16.msra.mxu1 %v8577_v26 }
 0x333   :  { %7313 = vmatpush3.bf16.msra.mxu0 %v8563_v11  ;;  %7334 = vmatprep.subr.bf16.mxu1 %v8578_v51 }
 0x334   :  { %7314 = vmatprep.subr.bf16.mxu0 %v8564_v12 }
 0x336   :  { %7335 = vmatpush3.bf16.msra.mxu1 %v8579_v38 }
 0x337   :  { %7315 = vmatpush3.bf16.msra.mxu0 %v8565_v16  ;;  %7336 = vmatprep.subr.bf16.mxu1 %v8580_v40 }
 0x338   :  { %7316 = vmatprep.subr.bf16.mxu0 %v8566_v42 }
 0x33a   :  { %7337 = vmatpush3.bf16.msra.mxu1 %v8581_v44 }
 0x33b   :  { %7317 = vmatpush3.bf16.msra.mxu0 %v8567_v19  ;;  %7338 = vmatprep.subr.bf16.mxu1 %v8582_v31 }
 0x33c   :  { %7318 = vmatprep.subr.bf16.mxu0 %v8568_v4 }
 0x33e   :  { %7339 = vmatpush3.bf16.msra.mxu1 %v8583_v45 }
 0x33f   :  { %7319 = vmatpush3.bf16.msra.mxu0 %v8569_v5  ;;  %7340 = vmatprep.subr.bf16.mxu1 %v8584_v53 }
 0x342   :  { %6408 = vmatmul.mubr.bf16.vlgmr.msra.gmra.mxu0 %v6108_v21  ;;  %7341 = vmatpush3.bf16.msra.mxu1 %v8585_v13 }
 0x343   :  { %v5851_v24 = vpop.f32.mrf.mxu1 }
 0x344   :  { %v5852_v54 = vadd.f32 %v5851_v24, %v5811_v1 }
 0x345   :  { %v5853_v49 = vpop.f32.mrf.mxu1 }
 0x346   :  { %v5854_v6 = vadd.f32 %v5853_v49, %v5813_v59 }
 0x347   :  { %v5855_v28 = vpop.f32.mrf.mxu1 }
 0x349   :  { %v5856_v29 = vpop.f32.mrf.mxu1 }
 0x362   :  { %v5892_v47 = vpop.f32.mrf.mxu0 }
 0x363   :  { %v5893_v52 = vadd.f32 %v5892_v47, %v5852_v54 }
 0x364   :  { %v5894_v48 = vpop.f32.mrf.mxu0 }
 0x365   :  { %v5895_v18 = vadd.f32 %v5894_v48, %v5854_v6  ;;  %v7271_v6 = vld [vmem:[%s11427_s4] ss:$0 sm:$0xff] }
 0x366   :  { %v5896_v15 = vpop.f32.mrf.mxu0 }
 0x368   :  { %v5897_v41 = vpop.f32.mrf.mxu0 }
 0x383   :  { %v5933_v46 = vpop.f32.mrf.mxu1 }
 0x384   :  { %v5934_v23 = vadd.f32 %v5933_v46, %v5893_v52 }
 0x385   :  { %v5935_v22 = vpop.f32.mrf.mxu1 }
 0x386   :  { %v5936_v56 = vadd.f32 %v5935_v22, %v5895_v18 }
 0x387   :  { %v5937_v55 = vpop.f32.mrf.mxu1 }
 0x389   :  { %v5938_v25 = vpop.f32.mrf.mxu1 }
 0x3a2   :  { %v5974_v0 = vpop.f32.mrf.mxu0 }
 0x3a3   :  { %v5975_v2 = vadd.f32 %v5974_v0, %v5934_v23 }
 0x3a4   :  { %v5976_v58 = vpop.f32.mrf.mxu0 }
 0x3a5   :  { %v5977_v3 = vadd.f32 %v5976_v58, %v5936_v56 }
 0x3a6   :  { %v5978_v57 = vpop.f32.mrf.mxu0 }
 0x3a8   :  { %v5979_v62 = vpop.f32.mrf.mxu0 }
 0x3c3   :  { %v6015_v17 = vpop.f32.mrf.mxu1 }
 0x3c4   :  { %v6016_v1 = vadd.f32 %v6015_v17, %v5975_v2 }
 0x3c5   :  { %v6017_v35 = vpop.f32.mrf.mxu1 }
 0x3c6   :  { %v6018_v8 = vadd.f32 %v6017_v35, %v5977_v3 }
 0x3c7   :  { %v6019_v60 = vpop.f32.mrf.mxu1 }
 0x3c9   :  { %v6020_v33 = vpop.f32.mrf.mxu1 }
 0x3e2   :  { %v6056_v63 = vpop.f32.mrf.mxu0 }
 0x3e3   :  { %v6097_v7 = vpop.f32.mrf.mxu1  ;;  %v6057_v59 = vadd.f32 %v6056_v63, %v6016_v1 }
 0x3e4   :  { %v6058_v50 = vpop.f32.mrf.mxu0 }
 0x3e5   :  { %v6099_v27 = vpop.f32.mrf.mxu1  ;;  %v6098_v32 = vadd.f32 %v6097_v7, %v6057_v59  ;;  %v6059_v37 = vadd.f32 %v6058_v50, %v6018_v8 }
 0x3e6   :  { %v6060_v9 = vpop.f32.mrf.mxu0 }
 0x3e7   :  { %v6101_v10 = vpop.f32.mrf.mxu1  ;;  %v6100_v11 = vadd.f32 %v6099_v27, %v6059_v37  ;;  %v6106_v12 = vmax.f32 %v6098_v32, 0.0 }
 0x3e8   :  { %v6061_v16 = vpop.f32.mrf.mxu0 }
 0x3e9   :  { %v6102_v42 = vpop.f32.mrf.mxu1  ;;  %v6107_v19 = vmax.f32 %v6100_v11, 0.0  ;;  %v6110_v5 = vpack.c.bf16 %v6106_v12, %v6106_v12 }
 0x3eb   :  { %v6111_v4 = vpack.c.bf16 %v6107_v19, %v6107_v19 }
 0x3ed   :  { %6447 = vmatprep.mubr.bf16.mxu1 %v6111_v4 }
 0x3ee   :  { %6448 = vmatmul.mubr.bf16.vlgmr.msra.gmra.mxu1 %v6110_v5 }
 0x402   :  { %v7320_v20 = vpop.f32.mrf.mxu0 }
 0x404   :  { %v7321_v21 = vpop.f32.mrf.mxu0 }
 0x405   :  { %v7322_v24 = vadd.f32 %v7321_v21, %v7320_v20 }
 0x406   :  { %v7323_v54 = vpop.f32.mrf.mxu0 }
 0x407   :  { %v6410_v30 = vadd.f32 %v7322_v24, %v7271_v6 }
 0x408   :  { %v7324_v49 = vpop.f32.mrf.mxu0 }
 0x4ae   :  { %v7342_v28 = vpop.f32.mrf.mxu1 }
 0x4b0   :  { %v7343_v29 = vpop.f32.mrf.mxu1 }
 0x4b1   :  { %v7344_v43 = vadd.f32 %v7343_v29, %v7342_v28 }
 0x4b2   :  { %v7345_v61 = vpop.f32.mrf.mxu1 }
 0x4b3   :  { %v6450_v34 = vadd.f32 %v7344_v43, %v6410_v30 }
 0x4b4   :  { %v7346_v36 = vpop.f32.mrf.mxu1 }
 0x4b5   :  { %6455 = vst [vmem:[#allocation2] sm:$0x3] %v6450_v34 }
 0x4b6   :  { %8598 = shalt.err (!%p8595_p4)
}
 0x4b7   :  { %6465 = dma.vmem_to_hbm [thread:$0]  %s6463_s24, 32, %s11428_s5, [#allocation3]  }
 0x4b8   :  { %8607 = dma.done.wait [#allocation3], 32  }
 0x4b9   :  { %8608 = vsyncadd [#allocation3], 4294967264 }
 0x4ba   :  { %6469 = vsyncpa [#allocation3], 1 }

</bundles_post_ra>
